<compile_context>
chip_gen: v7x
topology: tpu7x:2x2x1
jax: 0.10.0
libtpu: 0.0.40
codegen_flags: <defaults>
</compile_context>

<pallas_src>
import functools

import jax
import jax.numpy as jnp
from jax.experimental import pallas as pl
from jax.experimental.pallas import tpu as pltpu

FILTERS = [[1, 4], [2, 8], [3, 16], [4, 32], [5, 64], [6, 128]]  # (width, num)


def _round_up(x, m):
    return ((x + m - 1) // m) * m


def _token_embedder_kernel(im2col_ref, convw_ref, maskb_ref,
                           hw_w_ref, hw_b_ref, pjw_ref, pjb_ref, o_ref,
                           *, T, F_pad, highway_layers):
    # ---- all conv widths as ONE lane-dense bf16 matmul (K = 128) ----
    acc = jnp.dot(im2col_ref[...], convw_ref[...],
                  preferred_element_type=jnp.float32)            # (tile_n*T, F_pad) f32
    tn = acc.shape[0] // T
    # per-filter validity mask (-1e30 on invalid time positions) with the conv
    # bias already folded in; max-over-time; relu.
    acc = acc.reshape(tn, T, F_pad) + maskb_ref[...][None, :, :]
    tok = jnp.maximum(jnp.max(acc, axis=1), 0.0)                 # (tile_n, F_pad) f32

    # ---- highway layers: one fused (F_pad, 2*F_pad) matmul per layer ----
    for l in range(highway_layers):
        both = jnp.dot(tok.astype(jnp.bfloat16), hw_w_ref[l],
                       preferred_element_type=jnp.float32) + hw_b_ref[l]
        nonlin = jnp.maximum(both[:, :F_pad], 0.0)
        gate = jax.nn.sigmoid(both[:, F_pad:])
        # == gate * tok + (1 - gate) * nonlin
        tok = nonlin + gate * (tok - nonlin)

    # ---- final projection ----
    out = jnp.dot(tok.astype(jnp.bfloat16), pjw_ref[...],
                  preferred_element_type=jnp.float32) + pjb_ref[...]
    o_ref[...] = out.astype(o_ref.dtype)


def init_params(key, vocab_size=264, char_embedding_size=16,
                filters=FILTERS, highway_layers=1, projection_size=256):
    E = char_embedding_size
    F = sum(num for _, num in filters)            # 252 logical channels
    Wmax = max(w for w, _ in filters)             # 6
    F_pad = _round_up(F, 128)                     # 256 -> lane-dense channel dim
    K_pad = _round_up(Wmax * E, 128)              # 128 -> do NOT pad further (v6e)
    keys = jax.random.split(key, 8)

    embedding = 0.1 * jax.random.normal(keys[0], (vocab_size, E), jnp.float32)

    # Pack all conv filters into one (K_pad, F_pad) im2col weight; row = w*E + e.
    # Columns beyond a filter's width (and channels >= F) stay zero.
    conv_w = jnp.zeros((K_pad, F_pad), jnp.float32)
    conv_b = jnp.zeros((F_pad,), jnp.float32)
    fkeys = jax.random.split(keys[1], 2 * len(filters))
    off = 0
    for fi, (width, num) in enumerate(filters):
        wf = 0.1 * jax.random.normal(fkeys[2 * fi], (width, E, num), jnp.float32)
        bf = 0.1 * jax.random.normal(fkeys[2 * fi + 1], (num,), jnp.float32)
        conv_w = conv_w.at[:width * E, off:off + num].set(wf.reshape(width * E, num))
        conv_b = conv_b.at[off:off + num].set(bf)
        off += num

    # Fused highway weights: columns [0:F_pad] = nonlinear branch, [F_pad:] = gate.
    hw_w = jnp.zeros((highway_layers, F_pad, 2 * F_pad), jnp.float32)
    hw_b = jnp.zeros((highway_layers, 1, 2 * F_pad), jnp.float32)
    hkeys = jax.random.split(keys[2], 3 * highway_layers)
    for l in range(highway_layers):
        wn = 0.05 * jax.random.normal(hkeys[3 * l + 0], (F, F), jnp.float32)
        wg = 0.05 * jax.random.normal(hkeys[3 * l + 1], (F, F), jnp.float32)
        bn = 0.05 * jax.random.normal(hkeys[3 * l + 2], (F,), jnp.float32)
        hw_w = hw_w.at[l, :F, :F].set(wn)
        hw_w = hw_w.at[l, :F, F_pad:F_pad + F].set(wg)
        hw_b = hw_b.at[l, 0, :F].set(bn)
        hw_b = hw_b.at[l, 0, F_pad:F_pad + F].set(1.0)   # gate bias init (carry input)

    proj_w = jnp.zeros((F_pad, projection_size), jnp.float32).at[:F, :].set(
        0.05 * jax.random.normal(keys[5], (F, projection_size), jnp.float32))
    proj_b = 0.05 * jax.random.normal(keys[6], (1, projection_size), jnp.float32)

    # MXU operands stored in bf16 (kernel accumulates in f32); biases stay f32.
    return dict(embedding=embedding,
                conv_w=conv_w.astype(jnp.bfloat16), conv_b=conv_b,
                hw_w=hw_w.astype(jnp.bfloat16), hw_b=hw_b,
                proj_w=proj_w.astype(jnp.bfloat16), proj_b=proj_b)


def _choose_tile_n(N, tile_n):
    # >=128 floor (MXU row utilization + lane-dense vregs); keep ~>=4 grid
    # steps when N is large enough so v7x's two TensorCores each get >=2 steps
    # to double-buffer behind.  Default 256 is VMEM-safe on v7x's 64 MiB; go
    # to 512 on v5e/v6e (128 MiB) for longer weight-stationary runs.
    tile_n = max(128, _round_up(tile_n, 128))
    if N >= 4 * 128:
        tile_n = min(tile_n, _round_up(pl.cdiv(N, 4), 128))
    else:
        tile_n = 128
    return tile_n


def token_embedder_forward(ids, params, *, filters=FILTERS, tile_n=256,
                           out_dtype=jnp.float32):
    B, S, T = ids.shape
    N = B * S
    E = params["embedding"].shape[1]
    K_pad, F_pad = params["conv_w"].shape
    P = params["proj_w"].shape[1]
    HL = params["hw_w"].shape[0]
    Wmax = max(w for w, _ in filters)
    KE = Wmax * E
    assert T >= Wmax, "token length must be >= widest conv filter"

    tile_n = _choose_tile_n(N, tile_n)
    N_pad = _round_up(N, tile_n)
    grid_n = N_pad // tile_n

    # ---- JAX glue: bf16 gather + im2col precompute (lane-dense K = 128) ----
    emb_tbl = params["embedding"].astype(jnp.bfloat16)
    emb = jnp.take(emb_tbl, ids.reshape(N, T), axis=0)              # (N, T, E) bf16
    emb = jnp.pad(emb, ((0, N_pad - N), (0, Wmax - 1), (0, 0)))     # row + time pad
    widx = jnp.arange(T)[:, None] + jnp.arange(Wmax)[None, :]       # (T, Wmax)
    im2col = emb[:, widx, :].reshape(N_pad, T, KE)                  # (N_pad, T, Wmax*E)
    im2col = jnp.pad(im2col, ((0, 0), (0, 0), (0, K_pad - KE)))
    im2col = im2col.reshape(N_pad * T, K_pad)                       # bf16, lane-dense

    # additive mask (T, F_pad): -1e30 for pooling positions past T - width,
    # with the conv bias folded in (bias commutes with max-over-time).
    maskb = jnp.zeros((T, F_pad), jnp.float32)
    off = 0
    for width, num in filters:
        invalid = jnp.where(jnp.arange(T) > (T - width),
                            jnp.float32(-1e30), jnp.float32(0.0))
        maskb = maskb.at[:, off:off + num].set(
            jnp.broadcast_to(invalid[:, None], (T, num)))
        off += num
    maskb = maskb + params["conv_b"][None, :]

    def whole(arr):
        return pl.BlockSpec(arr.shape, lambda i, _nd=arr.ndim: (0,) * _nd)

    kernel = functools.partial(_token_embedder_kernel,
                               T=T, F_pad=F_pad, highway_layers=HL)

    operands = (im2col, params["conv_w"], maskb,
                params["hw_w"], params["hw_b"], params["proj_w"], params["proj_b"])
    bytes_accessed = int(sum(a.size * a.dtype.itemsize for a in operands)
                         + N_pad * P * jnp.dtype(out_dtype).itemsize)
    flops = int(N_pad * (2 * T * K_pad * F_pad
                         + HL * 2 * F_pad * (2 * F_pad)
                         + 2 * F_pad * P))
    transcendentals = int(N_pad * F_pad * HL)

    out = pl.pallas_call(
        kernel,
        out_shape=jax.ShapeDtypeStruct((N_pad, P), out_dtype),
        grid=(grid_n,),
        in_specs=[
            pl.BlockSpec((tile_n * T, K_pad), lambda i: (i, 0)),
            whole(params["conv_w"]),
            whole(maskb),
            whole(params["hw_w"]),
            whole(params["hw_b"]),
            whole(params["proj_w"]),
            whole(params["proj_b"]),
        ],
        out_specs=pl.BlockSpec((tile_n, P), lambda i: (i, 0)),
        compiler_params=pltpu.CompilerParams(
            dimension_semantics=("parallel",),
            vmem_limit_bytes=32 * 1024 * 1024),
        cost_estimate=pl.CostEstimate(flops=flops,
                                      transcendentals=transcendentals,
                                      bytes_accessed=bytes_accessed),
    )(*operands)

    return out[:N].reshape(B, S, P)


if __name__ == "__main__":
    key = jax.random.PRNGKey(0)
    k_ids, k_params = jax.random.split(key)

    B, S, T = 2, 8, 8
    vocab_size = 264
    params = init_params(k_params, vocab_size=vocab_size,
                         char_embedding_size=16, filters=FILTERS,
                         highway_layers=1, projection_size=256)

    ids = jax.random.randint(k_ids, (B, S, T), 0, vocab_size, dtype=jnp.int32)

    out = token_embedder_forward(ids, params)
    out = jax.block_until_ready(out)
    assert out.shape == (B, S, 256)
    assert bool(jnp.all(jnp.isfinite(out)))
    print("KERNEL_OK")
</pallas_src>

<mosaic_0001>
module attributes {stable_mosaic.version = 11 : i64} {
  func.func @_token_embedder_kernel(%arg0: i32, %arg1: memref<1024x128xbf16, #tpu.memory_space<vmem>>, %arg2: memref<128x256xbf16, #tpu.memory_space<vmem>>, %arg3: memref<8x256xf32, #tpu.memory_space<vmem>>, %arg4: memref<1x256x512xbf16, #tpu.memory_space<vmem>>, %arg5: memref<1x1x512xf32, #tpu.memory_space<vmem>>, %arg6: memref<256x256xbf16, #tpu.memory_space<vmem>>, %arg7: memref<1x256xf32, #tpu.memory_space<vmem>>, %arg8: memref<128x256xf32, #tpu.memory_space<vmem>>) attributes {dimension_semantics = [#tpu.dimension_semantics<parallel>], iteration_bounds = array<i64: 1>, scalar_prefetch = 0 : i64, scratch_operands = 0 : i64, tpu.core_type = #tpu.core_type<tc>, window_params = [{transform_indices = @transform_0, window_bounds = array<i64: 1024, 128>}, {pipeline_mode = #tpu.pipeline_mode<synchronous>, transform_indices = @transform_1, window_bounds = array<i64: 128, 256>}, {pipeline_mode = #tpu.pipeline_mode<synchronous>, transform_indices = @transform_2, window_bounds = array<i64: 8, 256>}, {pipeline_mode = #tpu.pipeline_mode<synchronous>, transform_indices = @transform_3, window_bounds = array<i64: 1, 256, 512>}, {pipeline_mode = #tpu.pipeline_mode<synchronous>, transform_indices = @transform_4, window_bounds = array<i64: 1, 1, 512>}, {pipeline_mode = #tpu.pipeline_mode<synchronous>, transform_indices = @transform_5, window_bounds = array<i64: 256, 256>}, {pipeline_mode = #tpu.pipeline_mode<synchronous>, transform_indices = @transform_6, window_bounds = array<i64: 1, 256>}, {transform_indices = @transform_7, window_bounds = array<i64: 128, 256>}]} {
    %c0 = arith.constant 0 : index
    %c0_0 = arith.constant 0 : index
    %0 = vector.load %arg1[%c0, %c0_0] : memref<1024x128xbf16, #tpu.memory_space<vmem>>, vector<1024x128xbf16>
    %c0_1 = arith.constant 0 : index
    %c0_2 = arith.constant 0 : index
    %1 = vector.load %arg2[%c0_1, %c0_2] : memref<128x256xbf16, #tpu.memory_space<vmem>>, vector<128x256xbf16>
    %cst = arith.constant dense<0.000000e+00> : vector<1024x256xf32>
    %2 = tpu.matmul %0, %1, %cst {dimension_numbers = #tpu.dot_dimension_numbers<[1], [0], [0], [1], [0, 0, 1, 1], [], []>} : vector<1024x128xbf16>, vector<128x256xbf16>, vector<1024x256xf32> -> vector<1024x256xf32>
    %3 = vector.shape_cast %2 : vector<1024x256xf32> to vector<128x8x256xf32>
    %c0_3 = arith.constant 0 : index
    %c0_4 = arith.constant 0 : index
    %4 = vector.load %arg3[%c0_3, %c0_4] : memref<8x256xf32, #tpu.memory_space<vmem>>, vector<8x256xf32>
    %5 = vector.shape_cast %4 : vector<8x256xf32> to vector<1x8x256xf32>
    %6 = vector.broadcast %5 : vector<1x8x256xf32> to vector<128x8x256xf32>
    %7 = arith.addf %3, %6 : vector<128x8x256xf32>
    %cst_5 = arith.constant dense<0xFF800000> : vector<128x256xf32>
    %8 = vector.multi_reduction <maximumf>, %7, %cst_5 [1] : vector<128x8x256xf32> to vector<128x256xf32>
    %cst_6 = arith.constant 0.000000e+00 : f32
    %9 = vector.broadcast %cst_6 : f32 to vector<128x256xf32>
    %10 = arith.maximumf %8, %9 : vector<128x256xf32>
    %11 = arith.truncf %10 : vector<128x256xf32> to vector<128x256xbf16>
    %c0_7 = arith.constant 0 : index
    %c0_8 = arith.constant 0 : index
    %c0_9 = arith.constant 0 : index
    %12 = vector.load %arg4[%c0_7, %c0_8, %c0_9] : memref<1x256x512xbf16, #tpu.memory_space<vmem>>, vector<1x256x512xbf16>
    %13 = vector.shape_cast %12 : vector<1x256x512xbf16> to vector<256x512xbf16>
    %cst_10 = arith.constant dense<0.000000e+00> : vector<128x512xf32>
    %14 = tpu.matmul %11, %13, %cst_10 {dimension_numbers = #tpu.dot_dimension_numbers<[1], [0], [0], [1], [0, 0, 1, 1], [], []>} : vector<128x256xbf16>, vector<256x512xbf16>, vector<128x512xf32> -> vector<128x512xf32>
    %c0_11 = arith.constant 0 : index
    %c0_12 = arith.constant 0 : index
    %c0_13 = arith.constant 0 : index
    %15 = vector.load %arg5[%c0_11, %c0_12, %c0_13] : memref<1x1x512xf32, #tpu.memory_space<vmem>>, vector<1x1x512xf32>
    %16 = vector.shape_cast %15 : vector<1x1x512xf32> to vector<1x512xf32>
    %17 = vector.broadcast %16 : vector<1x512xf32> to vector<128x512xf32>
    %18 = arith.addf %14, %17 : vector<128x512xf32>
    %19 = vector.extract_strided_slice %18 {offsets = [0, 0], sizes = [128, 256], strides = [1, 1]} : vector<128x512xf32> to vector<128x256xf32>
    %cst_14 = arith.constant 0.000000e+00 : f32
    %20 = vector.broadcast %cst_14 : f32 to vector<128x256xf32>
    %21 = arith.maximumf %19, %20 : vector<128x256xf32>
    %22 = vector.extract_strided_slice %18 {offsets = [0, 256], sizes = [128, 256], strides = [1, 1]} : vector<128x512xf32> to vector<128x256xf32>
    %23 = arith.negf %22 : vector<128x256xf32>
    %24 = math.exp %23 : vector<128x256xf32>
    %cst_15 = arith.constant 1.000000e+00 : f32
    %25 = vector.broadcast %cst_15 : f32 to vector<128x256xf32>
    %26 = arith.addf %25, %24 : vector<128x256xf32>
    %27 = arith.divf %25, %26 : vector<128x256xf32>
    %28 = arith.subf %10, %21 : vector<128x256xf32>
    %29 = arith.mulf %27, %28 : vector<128x256xf32>
    %30 = arith.addf %21, %29 : vector<128x256xf32>
    %31 = arith.truncf %30 : vector<128x256xf32> to vector<128x256xbf16>
    %c0_16 = arith.constant 0 : index
    %c0_17 = arith.constant 0 : index
    %32 = vector.load %arg6[%c0_16, %c0_17] : memref<256x256xbf16, #tpu.memory_space<vmem>>, vector<256x256xbf16>
    %cst_18 = arith.constant dense<0.000000e+00> : vector<128x256xf32>
    %33 = tpu.matmul %31, %32, %cst_18 {dimension_numbers = #tpu.dot_dimension_numbers<[1], [0], [0], [1], [0, 0, 1, 1], [], []>} : vector<128x256xbf16>, vector<256x256xbf16>, vector<128x256xf32> -> vector<128x256xf32>
    %c0_19 = arith.constant 0 : index
    %c0_20 = arith.constant 0 : index
    %34 = vector.load %arg7[%c0_19, %c0_20] : memref<1x256xf32, #tpu.memory_space<vmem>>, vector<1x256xf32>
    %35 = vector.broadcast %34 : vector<1x256xf32> to vector<128x256xf32>
    %36 = arith.addf %33, %35 : vector<128x256xf32>
    %c0_21 = arith.constant 0 : index
    %c0_22 = arith.constant 0 : index
    %37 = vector.load %arg8[%c0_21, %c0_22] : memref<128x256xf32, #tpu.memory_space<vmem>>, vector<128x256xf32>
    tpu.vector_store %arg8[%c0_21, %c0_22], %36 {strides = array<i32>} : memref<128x256xf32, #tpu.memory_space<vmem>>, vector<128x256xf32>,
    return
  }
  func.func @transform_0(%arg0: i32) -> (i32, i32) {
    %c0_i32 = arith.constant 0 : i32
    %c0_i32_0 = arith.constant 0 : i32
    return %arg0, %c0_i32 : i32, i32
  }
  func.func @transform_1(%arg0: i32) -> (i32, i32) {
    %c0_i32 = arith.constant 0 : i32
    %c0_i32_0 = arith.constant 0 : i32
    %c0_i32_1 = arith.constant 0 : i32
    return %c0_i32, %c0_i32_0 : i32, i32
  }
  func.func @transform_2(%arg0: i32) -> (i32, i32) {
    %c0_i32 = arith.constant 0 : i32
    %c0_i32_0 = arith.constant 0 : i32
    %c0_i32_1 = arith.constant 0 : i32
    return %c0_i32, %c0_i32_0 : i32, i32
  }
  func.func @transform_3(%arg0: i32) -> (i32, i32, i32) {
    %c0_i32 = arith.constant 0 : i32
    %c0_i32_0 = arith.constant 0 : i32
    %c0_i32_1 = arith.constant 0 : i32
    %c0_i32_2 = arith.constant 0 : i32
    return %c0_i32, %c0_i32_0, %c0_i32_1 : i32, i32, i32
  }
  func.func @transform_4(%arg0: i32) -> (i32, i32, i32) {
    %c0_i32 = arith.constant 0 : i32
    %c0_i32_0 = arith.constant 0 : i32
    %c0_i32_1 = arith.constant 0 : i32
    %c0_i32_2 = arith.constant 0 : i32
    return %c0_i32, %c0_i32_0, %c0_i32_1 : i32, i32, i32
  }
  func.func @transform_5(%arg0: i32) -> (i32, i32) {
    %c0_i32 = arith.constant 0 : i32
    %c0_i32_0 = arith.constant 0 : i32
    %c0_i32_1 = arith.constant 0 : i32
    return %c0_i32, %c0_i32_0 : i32, i32
  }
  func.func @transform_6(%arg0: i32) -> (i32, i32) {
    %c0_i32 = arith.constant 0 : i32
    %c0_i32_0 = arith.constant 0 : i32
    %c0_i32_1 = arith.constant 0 : i32
    return %c0_i32, %c0_i32_0 : i32, i32
  }
  func.func @transform_7(%arg0: i32) -> (i32, i32) {
    %c0_i32 = arith.constant 0 : i32
    %c0_i32_0 = arith.constant 0 : i32
    return %arg0, %c0_i32 : i32, i32
  }
}

</mosaic_0001>

<bundles_post_ra>
// kernel: tpu_custom_call.1
= control target key start
LH: loop header
LB: loop body
LE: loop exit
PB: predicated region body
PF: predicated region fallthrough
CT: control target
= control target key end

     0   :  { %12 = vsyncpa [#allocation3], 0  ;;  %s12313_s0 = inlined_call_operand.hbm [shape: bf16[1024,128], index: 0, kind: input, shape index: {}]   ;;  %s12314_s1 = inlined_call_operand.hbm [shape: bf16[128,256], index: 1, kind: input, shape index: {}]   ;;  %s12315_s2 = inlined_call_operand.hbm [shape: f32[8,256], index: 2, kind: input, shape index: {}]   ;;  %s12316_s3 = inlined_call_operand.hbm [shape: bf16[1,256,512], index: 3, kind: input, shape index: {}]   ;;  %s12317_s4 = inlined_call_operand.vmem [shape: f32[1,1,512], index: 4, kind: input, shape index: {}]   ;;  %s12318_s5 = inlined_call_operand.hbm [shape: bf16[256,256], index: 5, kind: input, shape index: {}]   ;;  %s12319_s6 = inlined_call_operand.vmem [shape: f32[1,256], index: 6, kind: input, shape index: {}]   ;;  %s12320_s7 = inlined_call_operand.hbm [shape: f32[128,256], index: 7, kind: output, shape index: {}]  }
   0x1   :  { %13 = vsyncpa [#allocation6], 0 }
   0x2   :  { %14 = vsyncpa [#allocation9], 0 }
   0x3   :  { %15 = vsyncpa [#allocation4], 0  ;;  %s8012_s24 = smov [#allocation5]   ;;  %s7872_s28 = scalar_lea.hbm %s12314_s1, 2048 }
   0x4   :  { %s33_s25 = sshll.u32 %s8012_s24, 4  ;;  %p7873_p0 = scmp.ne.s32.totalorder %s12314_s1, %s7872_s28  ;;  %s34_s25 = int_to_ptr.vmem [resolvable:$true] %s33_s25 }
   0x5   :  { %p7876_p1 = scmp.lt.u32.totalorder %s7872_s28, %s12314_s1 }
   0x7   :  { %p7878_p2 = pnand %p7876_p1, %p7873_p0 }
   0x9   :  { %7881 = shalt.err (!%p7878_p2)
}
   0xa   :  { %s7882_s10 = scalar_lea.vmem %s34_s25, 2048  ;;  %p7887_p4 = scmp.lt.s32.totalorder %s34_s25, %s34_s25 }
   0xb   :  { %p7883_p3 = scmp.ne.s32.totalorder %s34_s25, %s7882_s10  ;;  %p7888_p5 = scmp.lt.s32.totalorder %s7882_s10, %s7882_s10 }
   0xd   :  { %p7889_p6 = por %p7888_p5, %p7887_p4 }
   0xf   :  { %p7890_p7 = pnand %p7889_p6, %p7883_p3 }
  0x11   :  { %7893 = shalt.err (!%p7890_p7)
}
  0x12   :  { %s8013_s11 = smov 128   ;;  %s8014_s12 = smov 8  }
  0x13   :  { %39 = dma.hbm_to_vmem [thread:$0]  %s12314_s1, 2048, %s34_s25, [#allocation6], %s8013_s11, %s8013_s11, %s8014_s12  }
  0x14   :  { %s8015_s15 = smov [#allocation8]   ;;  %s7894_s19 = scalar_lea.hbm %s12316_s3, 8192 }
  0x15   :  { %s55_s16 = sshll.u32 %s8015_s15, 4  ;;  %p7895_p8 = scmp.ne.s32.totalorder %s12316_s3, %s7894_s19  ;;  %s56_s16 = int_to_ptr.vmem [resolvable:$true] %s55_s16 }
  0x16   :  { %p7898_p9 = scmp.lt.u32.totalorder %s7894_s19, %s12316_s3 }
  0x18   :  { %p7900_p10 = pnand %p7898_p9, %p7895_p8 }
  0x1a   :  { %7903 = shalt.err (!%p7900_p10)
}
  0x1b   :  { %s7904_s24 = scalar_lea.vmem %s56_s16, 8192  ;;  %p7909_p12 = scmp.lt.s32.totalorder %s56_s16, %s56_s16 }
  0x1c   :  { %p7905_p11 = scmp.ne.s32.totalorder %s56_s16, %s7904_s24  ;;  %p7910_p13 = scmp.lt.s32.totalorder %s7904_s24, %s7904_s24 }
  0x1e   :  { %p7911_p0 = por %p7910_p13, %p7909_p12 }
  0x20   :  { %p7912_p1 = pnand %p7911_p0, %p7905_p11 }
  0x22   :  { %7915 = shalt.err (!%p7912_p1)
}
  0x23   :  { %s8016_s1 = smov 256   ;;  %s8017_s25 = smov 16  }
  0x24   :  { %61 = dma.hbm_to_vmem [thread:$0]  %s12316_s3, 8192, %s56_s16, [#allocation9], %s8016_s1, %s8016_s1, %s8017_s25  }
  0x25   :  { %s8018_s28 = smov [#allocation2]   ;;  %s7916_s9 = scalar_lea.hbm %s12313_s0, 8192 }
  0x26   :  { %s21_s29 = sshll.u32 %s8018_s28, 4  ;;  %p7917_p2 = scmp.ne.s32.totalorder %s12313_s0, %s7916_s9  ;;  %s22_s29 = int_to_ptr.vmem [resolvable:$true] %s21_s29 }
  0x27   :  { %p7920_p3 = scmp.lt.u32.totalorder %s7916_s9, %s12313_s0 }
  0x29   :  { %p7922_p4 = pnand %p7920_p3, %p7917_p2 }
  0x2b   :  { %7925 = shalt.err (!%p7922_p4)
}
  0x2c   :  { %s7926_s17 = scalar_lea.vmem %s22_s29, 8192  ;;  %p7931_p6 = scmp.lt.s32.totalorder %s22_s29, %s22_s29 }
  0x2d   :  { %p7927_p5 = scmp.ne.s32.totalorder %s22_s29, %s7926_s17  ;;  %p7932_p7 = scmp.lt.s32.totalorder %s7926_s17, %s7926_s17 }
  0x2f   :  { %p7933_p8 = por %p7932_p7, %p7931_p6 }
  0x31   :  { %p7934_p9 = pnand %p7933_p8, %p7927_p5 }
  0x33   :  { %7937 = shalt.err (!%p7934_p9)
}
  0x34   :  { %s8019_s3 = smov 64   ;;  %s8020_s16 = smov 4  }
  0x35   :  { %27 = dma.hbm_to_vmem [thread:$0]  %s12313_s0, 8192, %s22_s29, [#allocation3], %s8019_s3, %s8019_s3, %s8020_s16  }
  0x36   :  { %s8021_s20 = smov [#allocation7]   ;;  %s8022_s22 = smov [#allocation10]  }
  0x37   :  { %s46_s21 = sshll.u32 %s8021_s20, 4  ;;  %s69_s23 = sshll.u32 %s8022_s22, 4  ;;  %s47_s21 = int_to_ptr.vmem [resolvable:$true] %s46_s21  ;;  %s70_s23 = int_to_ptr.vmem [resolvable:$true] %s69_s23 }
  0x38   :  { %s7938_s27 = scalar_lea.hbm %s12315_s2, 256 }
  0x39   :  { %p7939_p10 = scmp.ne.s32.totalorder %s12315_s2, %s7938_s27  ;;  %p7942_p11 = scmp.lt.u32.totalorder %s7938_s27, %s12315_s2 }
  0x3b   :  { %p7944_p12 = pnand %p7942_p11, %p7939_p10 }
  0x3d   :  { %7947 = shalt.err (!%p7944_p12)
}
  0x3e   :  { %s7948_s0 = scalar_lea.vmem %s47_s21, 256  ;;  %p7953_p0 = scmp.lt.s32.totalorder %s47_s21, %s47_s21 }
  0x3f   :  { %p7949_p13 = scmp.ne.s32.totalorder %s47_s21, %s7948_s0  ;;  %p7954_p1 = scmp.lt.s32.totalorder %s7948_s0, %s7948_s0 }
  0x41   :  { %p7955_p2 = por %p7954_p1, %p7953_p0 }
  0x43   :  { %p7956_p3 = pnand %p7955_p2, %p7949_p13 }
  0x45   :  { %7959 = shalt.err (!%p7956_p3)
}
  0x46   :  { %49 = dma.hbm_to_vmem [thread:$0]  %s12315_s2, 256, %s47_s21, [#allocation6]  }
  0x47   :  { %s7960_s15 = scalar_lea.hbm %s12318_s5, 4096 }
  0x48   :  { %p7961_p4 = scmp.ne.s32.totalorder %s12318_s5, %s7960_s15  ;;  %p7964_p5 = scmp.lt.u32.totalorder %s7960_s15, %s12318_s5 }
  0x4a   :  { %p7966_p6 = pnand %p7964_p5, %p7961_p4 }
  0x4c   :  { %7969 = shalt.err (!%p7966_p6)
}
  0x4d   :  { %s7970_s19 = scalar_lea.vmem %s70_s23, 4096  ;;  %p7975_p8 = scmp.lt.s32.totalorder %s70_s23, %s70_s23 }
  0x4e   :  { %p7971_p7 = scmp.ne.s32.totalorder %s70_s23, %s7970_s19  ;;  %p7976_p9 = scmp.lt.s32.totalorder %s7970_s19, %s7970_s19 }
  0x50   :  { %p7977_p10 = por %p7976_p9, %p7975_p8 }
  0x52   :  { %p7978_p11 = pnand %p7977_p10, %p7971_p7 }
  0x54   :  { %7981 = shalt.err (!%p7978_p11)
}
  0x55   :  { %75 = dma.hbm_to_vmem [thread:$0]  %s12318_s5, 4096, %s70_s23, [#allocation9], %s8013_s11, %s8013_s11, %s8014_s12  }
  0x56   :  { %8004 = dma.done.wait [#allocation3], 8192  }
  0x57   :  { %8005 = vsyncadd [#allocation3], 4294959104 }
  0x58   :  { %8006 = dma.done.wait [#allocation6], 2304  }
  0x59   :  { %8007 = vsyncadd [#allocation6], 4294964992 }
  0x5a   :  { %8008 = dma.done.wait [#allocation9], 12288  }
  0x5b   :  { %8009 = vsyncadd [#allocation9], 4294955008  ;;  %v12321_v0 = vmov 0   ;;  %v7501_v1 = vld [vmem:[#allocation5 + $0x4] ss:$8 sps:$4 sm:$0xff]   ;;  %v7527_v21 = vld [vmem:[#allocation2 + $0x10] sm:$0xff]  }
  0x5c   :  { %734 = vmatprep.mubr.bf16.mxu0 %v12321_v0  ;;  %1174 = vmatprep.mubr.bf16.mxu1 %v12321_v0  ;;  %v7503_v2 = vld [vmem:[#allocation5] ss:$8 sps:$4 sm:$0xff]   ;;  %v7504_v3 = vld [vmem:[#allocation5 + $0x14] ss:$8 sps:$4 sm:$0xff]   ;;  %v7506_v4 = vld [vmem:[#allocation5 + $0x10] ss:$8 sps:$4 sm:$0xff]  }
  0x5d   :  { %702 = vmatprep.subr.bf16.mxu0 %v7501_v1  ;;  %7472 = vmatprep.subr.bf16.mxu1 %v7501_v1  ;;  %v7507_v5 = vld [vmem:[#allocation5 + $0x24] ss:$8 sps:$4 sm:$0xff]   ;;  %v7509_v6 = vld [vmem:[#allocation5 + $0x20] ss:$8 sps:$4 sm:$0xff]   ;;  %v7510_v7 = vld [vmem:[#allocation5 + $0x34] ss:$8 sps:$4 sm:$0xff]  }
  0x5e   :  { %703 = vmatpush1.bf16.msra.mxu0 %v7503_v2  ;;  %7480 = vmatpush1.bf16.msra.mxu1 %v7503_v2  ;;  %v7512_v8 = vld [vmem:[#allocation5 + $0x30] ss:$8 sps:$4 sm:$0xff]   ;;  %v7513_v9 = vld [vmem:[#allocation5 + $0x44] ss:$8 sps:$4 sm:$0xff]   ;;  %v7515_v10 = vld [vmem:[#allocation5 + $0x40] ss:$8 sps:$4 sm:$0xff]  }
  0x5f   :  { %704 = vmatprep.subr.bf16.mxu0 %v7504_v3  ;;  %7473 = vmatprep.subr.bf16.mxu1 %v7504_v3  ;;  %v7516_v11 = vld [vmem:[#allocation5 + $0x54] ss:$8 sps:$4 sm:$0xff]   ;;  %v7518_v12 = vld [vmem:[#allocation5 + $0x50] ss:$8 sps:$4 sm:$0xff]   ;;  %v7519_v13 = vld [vmem:[#allocation5 + $0x64] ss:$8 sps:$4 sm:$0xff]  }
  0x60   :  { %v7521_v14 = vld [vmem:[#allocation5 + $0x60] ss:$8 sps:$4 sm:$0xff]   ;;  %v7522_v15 = vld [vmem:[#allocation5 + $0x74] ss:$8 sps:$4 sm:$0xff]   ;;  %v7524_v16 = vld [vmem:[#allocation5 + $0x70] ss:$8 sps:$4 sm:$0xff]  }
  0x61   :  { %v7525_v17 = vld [vmem:[#allocation2] sm:$0xff]   ;;  %v7526_v19 = vld [vmem:[#allocation2 + $0x8] sm:$0xff]   ;;  %v7546_v22 = vld [vmem:[#allocation2 + $0x170] sm:$0xff]   ;;  %vm4279_vm0 = vcmask 1041409   ;;  %vm4281_vm1 = vcmask 1042434   ;;  %vm4283_vm2 = vcmask 1043459  }
  0x62   :  { %705 = vmatpush1.bf16.msra.mxu0 %v7506_v4  ;;  %7481 = vmatpush1.bf16.msra.mxu1 %v7506_v4  ;;  %v7542_v18 = vld [vmem:[#allocation2 + $0x160] sm:$0xff]   ;;  %v7544_v20 = vld [vmem:[#allocation2 + $0x168] sm:$0xff]   ;;  %v7528_v23 = vld [vmem:[#allocation2 + $0x18] sm:$0xff]   ;;  %vm4285_vm3 = vcmask 1044484   ;;  %vm4287_vm4 = vcmask 1045509   ;;  %vm4289_vm5 = vcmask 1046534  }
  0x63   :  { %706 = vmatprep.subr.bf16.mxu0 %v7507_v5  ;;  %7474 = vmatprep.subr.bf16.mxu1 %v7507_v5  ;;  %v7548_v24 = vld [vmem:[#allocation2 + $0x178] sm:$0xff]   ;;  %v7529_v25 = vld [vmem:[#allocation2 + $0x20] sm:$0xff]   ;;  %v7530_v27 = vld [vmem:[#allocation2 + $0x28] sm:$0xff]   ;;  %vm4291_vm6 = vcmask 1047559  }
  0x64   :  { %v7550_v26 = vld [vmem:[#allocation2 + $0x180] sm:$0xff]   ;;  %v7552_v28 = vld [vmem:[#allocation2 + $0x188] sm:$0xff]   ;;  %v7531_v29 = vld [vmem:[#allocation2 + $0x30] sm:$0xff]  }
  0x65   :  { %v7554_v30 = vld [vmem:[#allocation2 + $0x190] sm:$0xff]   ;;  %v7532_v31 = vld [vmem:[#allocation2 + $0x38] sm:$0xff]   ;;  %v7533_v33 = vld [vmem:[#allocation2 + $0x40] sm:$0xff]  }
  0x66   :  { %707 = vmatpush1.bf16.msra.mxu0 %v7509_v6  ;;  %7482 = vmatpush1.bf16.msra.mxu1 %v7509_v6  ;;  %v7556_v32 = vld [vmem:[#allocation2 + $0x198] sm:$0xff]   ;;  %v7558_v34 = vld [vmem:[#allocation2 + $0x1a0] sm:$0xff]   ;;  %v7534_v35 = vld [vmem:[#allocation2 + $0x48] sm:$0xff]  }
  0x67   :  { %708 = vmatprep.subr.bf16.mxu0 %v7510_v7  ;;  %7475 = vmatprep.subr.bf16.mxu1 %v7510_v7  ;;  %v7560_v36 = vld [vmem:[#allocation2 + $0x1a8] sm:$0xff]   ;;  %v7535_v37 = vld [vmem:[#allocation2 + $0x50] sm:$0xff]   ;;  %v7536_v38 = vld [vmem:[#allocation2 + $0x58] sm:$0xff]  }
  0x68   :  { %v7562_v39 = vld [vmem:[#allocation2 + $0x1b0] sm:$0xff]   ;;  %v7537_v40 = vld [vmem:[#allocation2 + $0x60] sm:$0xff]   ;;  %v7564_v41 = vld [vmem:[#allocation2 + $0x1b8] sm:$0xff]  }
  0x69   :  { %v7538_v42 = vld [vmem:[#allocation2 + $0x68] sm:$0xff]   ;;  %v7566_v43 = vld [vmem:[#allocation2 + $0x1c0] sm:$0xff]   ;;  %v7539_v45 = vld [vmem:[#allocation2 + $0x70] sm:$0xff]  }
  0x6a   :  { %709 = vmatpush1.bf16.msra.mxu0 %v7512_v8  ;;  %7483 = vmatpush1.bf16.msra.mxu1 %v7512_v8  ;;  %v7569_v44 = vld [vmem:[#allocation8 + $0x4] ss:$16 sps:$4 sm:$0xff]   ;;  %v7567_v46 = vld [vmem:[#allocation8] ss:$16 sps:$4 sm:$0xff]   ;;  %v7574_v49 = vld [vmem:[#allocation2 + $0x1c8] sm:$0xff]  }
  0x6b   :  { %710 = vmatprep.subr.bf16.mxu0 %v7513_v9  ;;  %7476 = vmatprep.subr.bf16.mxu1 %v7513_v9  ;;  %v7573_v47 = vld [vmem:[#allocation8 + $0x24] ss:$16 sps:$4 sm:$0xff]   ;;  %v7571_v48 = vld [vmem:[#allocation8 + $0x20] ss:$16 sps:$4 sm:$0xff]   ;;  %v7540_v51 = vld [vmem:[#allocation2 + $0x78] sm:$0xff]  }
  0x6c   :  { %v7577_v50 = vld [vmem:[#allocation8 + $0x44] ss:$16 sps:$4 sm:$0xff]   ;;  %v7575_v52 = vld [vmem:[#allocation8 + $0x40] ss:$16 sps:$4 sm:$0xff]   ;;  %v7543_v59 = vld [vmem:[#allocation2 + $0x88] sm:$0xff]  }
  0x6d   :  { %v7581_v53 = vld [vmem:[#allocation8 + $0x64] ss:$16 sps:$4 sm:$0xff]   ;;  %v7579_v54 = vld [vmem:[#allocation8 + $0x60] ss:$16 sps:$4 sm:$0xff]   ;;  %v7590_v62 = vld [vmem:[#allocation2 + $0x1d8] sm:$0xff]  }
  0x6e   :  { %711 = vmatpush1.bf16.msra.mxu0 %v7515_v10  ;;  %7484 = vmatpush1.bf16.msra.mxu1 %v7515_v10  ;;  %v7541_v55 = vld [vmem:[#allocation2 + $0x80] sm:$0xff]   ;;  %v7582_v56 = vld [vmem:[#allocation2 + $0x1d0] sm:$0xff]   ;;  %v7547_v5 = vld [vmem:[#allocation2 + $0x98] sm:$0xff]  }
  0x6f   :  { %712 = vmatprep.subr.bf16.mxu0 %v7516_v11  ;;  %7477 = vmatprep.subr.bf16.mxu1 %v7516_v11  ;;  %v7585_v57 = vld [vmem:[#allocation8 + $0x84] ss:$16 sps:$4 sm:$0xff]   ;;  %v7583_v58 = vld [vmem:[#allocation8 + $0x80] ss:$16 sps:$4 sm:$0xff]  }
  0x70   :  { %v7589_v60 = vld [vmem:[#allocation8 + $0xa4] ss:$16 sps:$4 sm:$0xff]   ;;  %v7587_v61 = vld [vmem:[#allocation8 + $0xa0] ss:$16 sps:$4 sm:$0xff]  }
  0x71   :  { %v7593_v63 = vld [vmem:[#allocation8 + $0xc4] ss:$16 sps:$4 sm:$0xff]   ;;  %v7591_v1 = vld [vmem:[#allocation8 + $0xc0] ss:$16 sps:$4 sm:$0xff]  }
  0x72   :  { %713 = vmatpush1.bf16.msra.mxu0 %v7518_v12  ;;  %7485 = vmatpush1.bf16.msra.mxu1 %v7518_v12  ;;  %v7545_v2 = vld [vmem:[#allocation2 + $0x90] sm:$0xff]   ;;  %v7598_v6 = vld [vmem:[#allocation2 + $0x1e0] sm:$0xff]   ;;  %v7606_v12 = vld [vmem:[#allocation2 + $0x1e8] sm:$0xff]  }
  0x73   :  { %714 = vmatprep.subr.bf16.mxu0 %v7519_v13  ;;  %7478 = vmatprep.subr.bf16.mxu1 %v7519_v13  ;;  %v7597_v3 = vld [vmem:[#allocation8 + $0xe4] ss:$16 sps:$4 sm:$0xff]   ;;  %v7595_v4 = vld [vmem:[#allocation8 + $0xe0] ss:$16 sps:$4 sm:$0xff]  }
  0x74   :  { %v7601_v7 = vld [vmem:[#allocation8 + $0x104] ss:$16 sps:$4 sm:$0xff]   ;;  %v7599_v8 = vld [vmem:[#allocation8 + $0x100] ss:$16 sps:$4 sm:$0xff]  }
  0x75   :  { %v7605_v9 = vld [vmem:[#allocation8 + $0x124] ss:$16 sps:$4 sm:$0xff]   ;;  %v7603_v10 = vld [vmem:[#allocation8 + $0x120] ss:$16 sps:$4 sm:$0xff]  }
  0x76   :  { %715 = vmatpush1.bf16.msra.mxu0 %v7521_v14  ;;  %7486 = vmatpush1.bf16.msra.mxu1 %v7521_v14  ;;  %v7549_v11 = vld [vmem:[#allocation2 + $0xa0] sm:$0xff]  }
  0x77   :  { %716 = vmatprep.subr.bf16.mxu0 %v7522_v15  ;;  %7479 = vmatprep.subr.bf16.mxu1 %v7522_v15  ;;  %v7609_v13 = vld [vmem:[#allocation8 + $0x144] ss:$16 sps:$4 sm:$0xff]   ;;  %v7607_v14 = vld [vmem:[#allocation8 + $0x140] ss:$16 sps:$4 sm:$0xff]  }
  0x78   :  { %v7613_v15 = vld [vmem:[#allocation8 + $0x164] ss:$16 sps:$4 sm:$0xff]  }
  0x7a   :  { %717 = vmatpush1.bf16.msra.mxu0 %v7524_v16  ;;  %7487 = vmatpush1.bf16.msra.mxu1 %v7524_v16  ;;  %v7551_v16 = vld [vmem:[#allocation2 + $0xa8] sm:$0xff]  }
  0x7b   :  { %4862 = vmatprep.subr.bf16.mxu1 %v7569_v44 }
  0x7d   :  { %735 = vmatmul.mubr.bf16.vlgmr.msra.gmra.mrb[0].mxu0 %v7525_v17  ;;  %1175 = vmatmul.mubr.bf16.vlgmr.msra.gmra.mrb[0].mxu1 %v7542_v18  ;;  %v7611_v17 = vld [vmem:[#allocation8 + $0x160] ss:$16 sps:$4 sm:$0xff]  }
  0x7e   :  { %744 = vmatprep.mubr.bf16.mxu0 %v12321_v0  ;;  %1184 = vmatprep.mubr.bf16.mxu1 %v12321_v0  ;;  %v7614_v18 = vld [vmem:[#allocation2 + $0x1f0] sm:$0xff]  }
  0x7f   :  { %4863 = vmatpush1.bf16.msra.mxu1 %v7567_v46 }
  0x80   :  { %4864 = vmatprep.subr.bf16.mxu1 %v7573_v47 }
  0x83   :  { %4865 = vmatpush1.bf16.msra.mxu1 %v7571_v48 }
  0x84   :  { %4866 = vmatprep.subr.bf16.mxu1 %v7577_v50 }
  0x85   :  { %745 = vmatmul.mubr.bf16.gmra.mrb[4].mxu0 %v7526_v19  ;;  %1185 = vmatmul.mubr.bf16.gmra.mrb[4].mxu1 %v7544_v20  ;;  %v7617_v19 = vld [vmem:[#allocation8 + $0x184] ss:$16 sps:$4 sm:$0xff]  }
  0x86   :  { %754 = vmatprep.mubr.bf16.mxu0 %v12321_v0  ;;  %1194 = vmatprep.mubr.bf16.mxu1 %v12321_v0  ;;  %v7553_v20 = vld [vmem:[#allocation2 + $0xb0] sm:$0xff]  }
  0x87   :  { %4867 = vmatpush1.bf16.msra.mxu1 %v7575_v52 }
  0x88   :  { %4868 = vmatprep.subr.bf16.mxu1 %v7581_v53 }
  0x8b   :  { %4869 = vmatpush1.bf16.msra.mxu1 %v7579_v54  ;;  %v7565_v54 = vld [vmem:[#allocation2 + $0xe0] sm:$0xff]  }
  0x8c   :  { %4870 = vmatprep.subr.bf16.mxu1 %v7585_v57 }
  0x8d   :  { %755 = vmatmul.mubr.bf16.gmra.mrb[8].mxu0 %v7527_v21  ;;  %1195 = vmatmul.mubr.bf16.gmra.mrb[8].mxu1 %v7546_v22  ;;  %v7615_v21 = vld [vmem:[#allocation8 + $0x180] ss:$16 sps:$4 sm:$0xff]   ;;  %v7621_v22 = vld [vmem:[#allocation8 + $0x1a4] ss:$16 sps:$4 sm:$0xff]  }
  0x8e   :  { %764 = vmatprep.mubr.bf16.mxu0 %v12321_v0  ;;  %1204 = vmatprep.mubr.bf16.mxu1 %v12321_v0 }
  0x8f   :  { %4871 = vmatpush1.bf16.msra.mxu1 %v7583_v58 }
  0x90   :  { %4872 = vmatprep.subr.bf16.mxu1 %v7589_v60 }
  0x93   :  { %4873 = vmatpush1.bf16.msra.mxu1 %v7587_v61 }
  0x94   :  { %4874 = vmatprep.subr.bf16.mxu1 %v7593_v63 }
  0x95   :  { %765 = vmatmul.mubr.bf16.gmra.mrb[12].mxu0 %v7528_v23  ;;  %1205 = vmatmul.mubr.bf16.gmra.mrb[12].mxu1 %v7548_v24  ;;  %v7619_v23 = vld [vmem:[#allocation8 + $0x1a0] ss:$16 sps:$4 sm:$0xff]   ;;  %v7622_v24 = vld [vmem:[#allocation2 + $0x1f8] sm:$0xff]  }
  0x96   :  { %774 = vmatprep.mubr.bf16.mxu0 %v12321_v0  ;;  %1214 = vmatprep.mubr.bf16.mxu1 %v12321_v0 }
  0x97   :  { %4875 = vmatpush1.bf16.msra.mxu1 %v7591_v1 }
  0x98   :  { %4876 = vmatprep.subr.bf16.mxu1 %v7597_v3 }
  0x9b   :  { %4877 = vmatpush1.bf16.msra.mxu1 %v7595_v4 }
  0x9c   :  { %4878 = vmatprep.subr.bf16.mxu1 %v7601_v7 }
  0x9d   :  { %775 = vmatmul.mubr.bf16.gmra.mrb[16].mxu0 %v7529_v25  ;;  %1215 = vmatmul.mubr.bf16.gmra.mrb[16].mxu1 %v7550_v26  ;;  %v7625_v25 = vld [vmem:[#allocation8 + $0x1c4] ss:$16 sps:$4 sm:$0xff]   ;;  %v7555_v26 = vld [vmem:[#allocation2 + $0xb8] sm:$0xff]  }
  0x9e   :  { %784 = vmatprep.mubr.bf16.mxu0 %v12321_v0  ;;  %1224 = vmatprep.mubr.bf16.mxu1 %v12321_v0 }
  0x9f   :  { %4879 = vmatpush1.bf16.msra.mxu1 %v7599_v8 }
  0xa0   :  { %4880 = vmatprep.subr.bf16.mxu1 %v7605_v9 }
  0xa3   :  { %4881 = vmatpush1.bf16.msra.mxu1 %v7603_v10 }
  0xa4   :  { %4882 = vmatprep.subr.bf16.mxu1 %v7609_v13 }
  0xa5   :  { %785 = vmatmul.mubr.bf16.gmra.mrb[20].mxu0 %v7530_v27  ;;  %1225 = vmatmul.mubr.bf16.gmra.mrb[20].mxu1 %v7552_v28  ;;  %v7623_v27 = vld [vmem:[#allocation8 + $0x1c0] ss:$16 sps:$4 sm:$0xff]   ;;  %v7629_v28 = vld [vmem:[#allocation8 + $0x1e4] ss:$16 sps:$4 sm:$0xff]  }
  0xa6   :  { %794 = vmatprep.mubr.bf16.mxu0 %v12321_v0  ;;  %1234 = vmatprep.mubr.bf16.mxu1 %v12321_v0 }
  0xa7   :  { %4883 = vmatpush1.bf16.msra.mxu1 %v7607_v14 }
  0xa8   :  { %4884 = vmatprep.subr.bf16.mxu1 %v7613_v15 }
  0xab   :  { %4885 = vmatpush1.bf16.msra.mxu1 %v7611_v17 }
  0xac   :  { %4886 = vmatprep.subr.bf16.mxu1 %v7617_v19 }
  0xad   :  { %795 = vmatmul.mubr.bf16.gmra.mrb[24].mxu0 %v7531_v29  ;;  %1235 = vmatmul.mubr.bf16.gmra.mrb[24].mxu1 %v7554_v30  ;;  %v7627_v29 = vld [vmem:[#allocation8 + $0x1e0] ss:$16 sps:$4 sm:$0xff]  }
  0xae   :  { %804 = vmatprep.mubr.bf16.mxu0 %v12321_v0  ;;  %1244 = vmatprep.mubr.bf16.mxu1 %v12321_v0  ;;  %v7557_v30 = vld [vmem:[#allocation2 + $0xc0] sm:$0xff]  }
  0xaf   :  { %4887 = vmatpush1.bf16.msra.mxu1 %v7615_v21 }
  0xb0   :  { %4888 = vmatprep.subr.bf16.mxu1 %v7621_v22 }
  0xb3   :  { %4889 = vmatpush1.bf16.msra.mxu1 %v7619_v23 }
  0xb4   :  { %4890 = vmatprep.subr.bf16.mxu1 %v7625_v25 }
  0xb5   :  { %805 = vmatmul.mubr.bf16.gmra.mrb[28].mxu0 %v7532_v31  ;;  %1245 = vmatmul.mubr.bf16.gmra.mrb[28].mxu1 %v7556_v32  ;;  %v7559_v31 = vld [vmem:[#allocation2 + $0xc8] sm:$0xff]   ;;  %v7561_v32 = vld [vmem:[#allocation2 + $0xd0] sm:$0xff]  }
  0xb6   :  { %814 = vmatprep.mubr.bf16.mxu0 %v12321_v0  ;;  %1254 = vmatprep.mubr.bf16.mxu1 %v12321_v0 }
  0xb7   :  { %4891 = vmatpush1.bf16.msra.mxu1 %v7623_v27 }
  0xb8   :  { %4892 = vmatprep.subr.bf16.mxu1 %v7629_v28 }
  0xbb   :  { %4893 = vmatpush1.bf16.msra.mxu1 %v7627_v29 }
  0xbd   :  { %815 = vmatmul.mubr.bf16.gmra.mrb[32].mxu0 %v7533_v33  ;;  %1255 = vmatmul.mubr.bf16.gmra.mrb[32].mxu1 %v7558_v34  ;;  %v8181_v33 = vld [vmem:[#allocation7] sm:$0xff]  ;;  %v8184_v34 = vld [vmem:[#allocation7 + $0x8] sm:$0xff] }
  0xbe   :  { %824 = vmatprep.mubr.bf16.mxu0 %v12321_v0  ;;  %1264 = vmatprep.mubr.bf16.mxu1 %v12321_v0 }
  0xc5   :  { %825 = vmatmul.mubr.bf16.gmra.mrb[36].mxu0 %v7534_v35  ;;  %1265 = vmatmul.mubr.bf16.gmra.mrb[36].mxu1 %v7560_v36 }
  0xc6   :  { %834 = vmatprep.mubr.bf16.mxu0 %v12321_v0  ;;  %1274 = vmatprep.mubr.bf16.mxu1 %v12321_v0 }
  0xcd   :  { %835 = vmatmul.mubr.bf16.gmra.mrb[40].mxu0 %v7535_v37  ;;  %1275 = vmatmul.mubr.bf16.gmra.mrb[40].mxu1 %v7562_v39 }
  0xce   :  { %844 = vmatprep.mubr.bf16.mxu0 %v12321_v0  ;;  %1284 = vmatprep.mubr.bf16.mxu1 %v12321_v0 }
  0xd5   :  { %845 = vmatmul.mubr.bf16.gmra.mrb[44].mxu0 %v7536_v38  ;;  %1285 = vmatmul.mubr.bf16.gmra.mrb[44].mxu1 %v7564_v41  ;;  %v7563_v38 = vld [vmem:[#allocation2 + $0xd8] sm:$0xff]  }
  0xd6   :  { %854 = vmatprep.mubr.bf16.mxu0 %v12321_v0  ;;  %1294 = vmatprep.mubr.bf16.mxu1 %v12321_v0 }
  0xdd   :  { %855 = vmatmul.mubr.bf16.gmra.mrb[48].mxu0 %v7537_v40  ;;  %1295 = vmatmul.mubr.bf16.gmra.mrb[48].mxu1 %v7566_v43 }
  0xde   :  { %864 = vmatprep.mubr.bf16.mxu0 %v12321_v0  ;;  %1304 = vmatprep.mubr.bf16.mxu1 %v12321_v0 }
  0xe5   :  { %865 = vmatmul.mubr.bf16.gmra.mrb[52].mxu0 %v7538_v42  ;;  %1305 = vmatmul.mubr.bf16.gmra.mrb[52].mxu1 %v7574_v49 }
  0xe6   :  { %874 = vmatprep.mubr.bf16.mxu0 %v12321_v0  ;;  %1314 = vmatprep.mubr.bf16.mxu1 %v12321_v0 }
  0xed   :  { %875 = vmatmul.mubr.bf16.gmra.mrb[56].mxu0 %v7539_v45  ;;  %1315 = vmatmul.mubr.bf16.gmra.mrb[56].mxu1 %v7582_v56 }
  0xee   :  { %884 = vmatprep.mubr.bf16.mxu0 %v12321_v0  ;;  %1324 = vmatprep.mubr.bf16.mxu1 %v12321_v0 }
  0xf5   :  { %885 = vmatmul.mubr.bf16.gmra.mrb[60].mxu0 %v7540_v51  ;;  %1325 = vmatmul.mubr.bf16.gmra.mrb[60].mxu1 %v7590_v62 }
  0xf6   :  { %894 = vmatprep.mubr.bf16.mxu0 %v12321_v0  ;;  %1334 = vmatprep.mubr.bf16.mxu1 %v12321_v0 }
  0xfd   :  { %895 = vmatmul.mubr.bf16.gmra.mrb[64].mxu0 %v7541_v55  ;;  %1335 = vmatmul.mubr.bf16.gmra.mrb[64].mxu1 %v7598_v6 }
  0xfe   :  { %904 = vmatprep.mubr.bf16.mxu0 %v12321_v0  ;;  %1344 = vmatprep.mubr.bf16.mxu1 %v12321_v0 }
 0x105   :  { %905 = vmatmul.mubr.bf16.gmra.mrb[68].mxu0 %v7543_v59  ;;  %1345 = vmatmul.mubr.bf16.gmra.mrb[68].mxu1 %v7606_v12 }
 0x106   :  { %914 = vmatprep.mubr.bf16.mxu0 %v12321_v0  ;;  %1354 = vmatprep.mubr.bf16.mxu1 %v12321_v0 }
 0x10d   :  { %915 = vmatmul.mubr.bf16.gmra.mrb[72].mxu0 %v7545_v2  ;;  %1355 = vmatmul.mubr.bf16.gmra.mrb[72].mxu1 %v7614_v18 }
 0x10e   :  { %924 = vmatprep.mubr.bf16.mxu0 %v12321_v0  ;;  %1364 = vmatprep.mubr.bf16.mxu1 %v12321_v0 }
 0x115   :  { %925 = vmatmul.mubr.bf16.gmra.mrb[76].mxu0 %v7547_v5  ;;  %1365 = vmatmul.mubr.bf16.gmra.mrb[76].mxu1 %v7622_v24 }
 0x116   :  { %934 = vmatprep.mubr.bf16.mxu0 %v12321_v0 }
 0x11d   :  { %935 = vmatmul.mubr.bf16.gmra.mrb[80].mxu0 %v7549_v11 }
 0x11e   :  { %944 = vmatprep.mubr.bf16.mxu0 %v12321_v0 }
 0x125   :  { %945 = vmatmul.mubr.bf16.gmra.mrb[84].mxu0 %v7551_v16  ;;  %v7570_v16 = vld [vmem:[#allocation2 + $0xe8] sm:$0xff]  }
 0x126   :  { %954 = vmatprep.mubr.bf16.mxu0 %v12321_v0 }
 0x12d   :  { %955 = vmatmul.mubr.bf16.gmra.mrb[88].mxu0 %v7553_v20 }
 0x12e   :  { %964 = vmatprep.mubr.bf16.mxu0 %v12321_v0 }
 0x135   :  { %965 = vmatmul.mubr.bf16.gmra.mrb[92].mxu0 %v7555_v26 }
 0x136   :  { %974 = vmatprep.mubr.bf16.mxu0 %v12321_v0 }
 0x13d   :  { %975 = vmatmul.mubr.bf16.gmra.mrb[96].mxu0 %v7557_v30 }
 0x13e   :  { %984 = vmatprep.mubr.bf16.mxu0 %v12321_v0 }
 0x145   :  { %985 = vmatmul.mubr.bf16.gmra.mrb[100].mxu0 %v7559_v31 }
 0x146   :  { %994 = vmatprep.mubr.bf16.mxu0 %v12321_v0 }
 0x14d   :  { %995 = vmatmul.mubr.bf16.gmra.mrb[104].mxu0 %v7561_v32 }
 0x14e   :  { %1004 = vmatprep.mubr.bf16.mxu0 %v12321_v0 }
 0x150   :  { %v736_v35 = vpop.f32.mrb[0].mxu0 }
 0x151   :  { %v1377_v36 = vadd.f32 %v8181_v33, %v736_v35  ;;  %v738_v37 = vpop.f32.mrb[1].mxu0 }
 0x152   :  { %v1378_v39 = vadd.f32 %v8184_v34, %v738_v37  ;;  %v740_v40 = vpop.f32.mrb[2].mxu0 }
 0x153   :  { %v1379_v41 = vadd.f32 %v8181_v33, %v740_v40  ;;  %v742_v42 = vpop.f32.mrb[3].mxu0  ;;  %v1633_v43 = vrot.slane %v1377_v36, 4 }
 0x154   :  { %v1380_v44 = vadd.f32 %v8184_v34, %v742_v42  ;;  %v1639_v45 = vrot.slane %v1378_v39, 4 }
 0x155   :  { %v1645_v46 = vrot.slane %v1379_v41, 4  ;;  %1005 = vmatmul.mubr.bf16.gmra.mrb[108].mxu0 %v7563_v38  ;;  %v1634_v49 = vmax.f32 %v1377_v36, %v1633_v43 }
 0x156   :  { %v1651_v47 = vrot.slane %v1380_v44, 4  ;;  %1014 = vmatprep.mubr.bf16.mxu0 %v12321_v0  ;;  %v1640_v51 = vmax.f32 %v1378_v39, %v1639_v45  ;;  %v7578_v45 = vld [vmem:[#allocation2 + $0xf0] sm:$0xff]  }
 0x157   :  { %v1646_v48 = vmax.f32 %v1379_v41, %v1645_v46  ;;  %v1635_v62 = vrot.slane %v1634_v49, 2 }
 0x158   :  { %v746_v50 = vpop.f32.mrb[4].mxu0  ;;  %v1652_v56 = vmax.f32 %v1380_v44, %v1651_v47  ;;  %v1641_v2 = vrot.slane %v1640_v51, 2 }
 0x159   :  { %v1381_v52 = vadd.f32 %v8181_v33, %v746_v50  ;;  %v748_v53 = vpop.f32.mrb[5].mxu0  ;;  %v1647_v55 = vrot.slane %v1646_v48, 2  ;;  %v1636_v10 = vmax.f32 %v1634_v49, %v1635_v62 }
 0x15a   :  { %v1382_v57 = vadd.f32 %v8184_v34, %v748_v53  ;;  %v750_v58 = vpop.f32.mrb[6].mxu0  ;;  %v1653_v6 = vrot.slane %v1652_v56, 2  ;;  %v1642_v13 = vmax.f32 %v1640_v51, %v1641_v2 }
 0x15b   :  { %v1657_v59 = vrot.slane %v1381_v52, 4  ;;  %v1383_v60 = vadd.f32 %v8181_v33, %v750_v58  ;;  %v752_v61 = vpop.f32.mrb[7].mxu0  ;;  %v1648_v5 = vmax.f32 %v1646_v48, %v1647_v55  ;;  %v1637_v23 = vrot.slane %v1636_v10, 1 }
 0x15c   :  { %v1663_v63 = vrot.slane %v1382_v57, 4  ;;  %v1384_v1 = vadd.f32 %v8184_v34, %v752_v61  ;;  %v1654_v18 = vmax.f32 %v1652_v56, %v1653_v6  ;;  %v1643_v25 = vrot.slane %v1642_v13, 1 }
 0x15d   :  { %v1658_v3 = vmax.f32 %v1381_v52, %v1657_v59  ;;  %v1669_v4 = vrot.slane %v1383_v60, 4  ;;  %1015 = vmatmul.mubr.bf16.gmra.mrb[112].mxu0 %v7565_v54  ;;  %v1649_v17 = vrot.slane %v1648_v5, 1  ;;  %v1638_v36 = vmax.f32 %v1636_v10, %v1637_v23 }
 0x15e   :  { %v1664_v7 = vmax.f32 %v1382_v57, %v1663_v63  ;;  %1024 = vmatprep.mubr.bf16.mxu0 %v12321_v0  ;;  %v1675_v9 = vrot.slane %v1384_v1, 4  ;;  %v1655_v29 = vrot.slane %v1654_v18, 1  ;;  %v1644_v40 = vmax.f32 %v1642_v13, %v1643_v25 }
 0x15f   :  { %v1659_v8 = vrot.slane %v1658_v3, 2  ;;  %v1670_v11 = vmax.f32 %v1383_v60, %v1669_v4  ;;  %v1650_v28 = vmax.f32 %v1648_v5, %v1649_v17  ;;  %v8203_v56 = vmax.f32 %v1638_v36, 0.0 }
 0x160   :  { %v756_v12 = vpop.f32.mrb[8].mxu0  ;;  %v1665_v14 = vrot.slane %v1664_v7, 2  ;;  %v1676_v21 = vmax.f32 %v1384_v1, %v1675_v9  ;;  %v1656_v47 = vmax.f32 %v1654_v18, %v1655_v29  ;;  %v8205_v63 = vmax.f32 %v1644_v40, 0.0  ;;  %v7586_v18 = vld [vmem:[#allocation2 + $0xf8] sm:$0xff]  }
 0x161   :  { %v758_v15 = vpop.f32.mrb[9].mxu0  ;;  %v1660_v20 = vmax.f32 %v1658_v3, %v1659_v8  ;;  %v1671_v24 = vrot.slane %v1670_v11, 2  ;;  %v1385_v27 = vadd.f32 %v8181_v33, %v756_v12  ;;  %v8200_v46 = vmax.f32 %v1650_v28, 0.0  ;;  %12628 = vst [vmem:[#allocation17_spill] sm:$0xff] %v8203_v56 }
 0x162   :  { %v760_v19 = vpop.f32.mrb[10].mxu0  ;;  %v1666_v26 = vmax.f32 %v1664_v7, %v1665_v14  ;;  %v1386_v30 = vadd.f32 %v8184_v34, %v758_v15  ;;  %v1677_v32 = vrot.slane %v1676_v21, 2  ;;  %12629 = vst [vmem:[#allocation18_spill] sm:$0xff] %v8205_v63  ;;  %v8209_v2 = vmax.f32 %v1656_v47, 0.0 }
 0x163   :  { %v762_v22 = vpop.f32.mrb[11].mxu0  ;;  %v1661_v31 = vrot.slane %v1660_v20, 1  ;;  %v1681_v35 = vrot.slane %v1385_v27, 4  ;;  %v1672_v37 = vmax.f32 %v1670_v11, %v1671_v24  ;;  %v1387_v43 = vadd.f32 %v8181_v33, %v760_v19  ;;  %12627 = vst [vmem:[#allocation16_spill] sm:$0xff] %v8200_v46 }
 0x164   :  { %v1687_v38 = vrot.slane %v1386_v30, 4  ;;  %v1667_v41 = vrot.slane %v1666_v26, 1  ;;  %v1388_v49 = vadd.f32 %v8184_v34, %v762_v22  ;;  %v1678_v52 = vmax.f32 %v1676_v21, %v1677_v32  ;;  %12630 = vst [vmem:[#allocation19_spill] sm:$0xff] %v8209_v2 }
 0x165   :  { %1025 = vmatmul.mubr.bf16.gmra.mrb[116].mxu0 %v7570_v16  ;;  %v1682_v42 = vmax.f32 %v1385_v27, %v1681_v35  ;;  %v1662_v51 = vmax.f32 %v1660_v20, %v1661_v31  ;;  %v1693_v54 = vrot.slane %v1387_v43, 4  ;;  %v1673_v57 = vrot.slane %v1672_v37, 1 }
 0x166   :  { %1034 = vmatprep.mubr.bf16.mxu0 %v12321_v0  ;;  %v1688_v48 = vmax.f32 %v1386_v30, %v1687_v38  ;;  %v1699_v58 = vrot.slane %v1388_v49, 4  ;;  %v1668_v59 = vmax.f32 %v1666_v26, %v1667_v41  ;;  %v3427_v1 = vpack.c.bf16 %v8200_v46, %v8200_v46 }
 0x167   :  { %v1683_v53 = vrot.slane %v1682_v42, 2  ;;  %v1694_v62 = vmax.f32 %v1387_v43, %v1693_v54  ;;  %v8212_v4 = vmax.f32 %v1662_v51, 0.0  ;;  %v1679_v5 = vrot.slane %v1678_v52, 1 }
 0x168   :  { %v766_v39 = vpop.f32.mrb[12].mxu0  ;;  %v1689_v61 = vrot.slane %v1688_v48, 2  ;;  %v1700_v3 = vmax.f32 %v1388_v49, %v1699_v58  ;;  %v1674_v8 = vmax.f32 %v1672_v37, %v1673_v57  ;;  %v8217_v13 = vmax.f32 %v1668_v59, 0.0  ;;  %v7594_v59 = vld [vmem:[#allocation2 + $0x100] sm:$0xff]  }
 0x169   :  { %v768_v44 = vpop.f32.mrb[13].mxu0  ;;  %v1684_v60 = vmax.f32 %v1682_v42, %v1683_v53  ;;  %12631 = vst [vmem:[#allocation20_spill] sm:$0xff] %v8212_v4  ;;  %v1695_v6 = vrot.slane %v1694_v62, 2  ;;  %v1389_v7 = vadd.f32 %v8181_v33, %v766_v39  ;;  %v3425_v19 = vpack.c.bf16 %v8203_v56, %v8203_v56 }
 0x16a   :  { %v770_v50 = vpop.f32.mrb[14].mxu0  ;;  %v1701_v9 = vrot.slane %v1700_v3, 2  ;;  %v1390_v10 = vadd.f32 %v8184_v34, %v768_v44  ;;  %12632 = vst [vmem:[#allocation21_spill] sm:$0xff] %v8217_v13  ;;  %v1690_v15 = vmax.f32 %v1688_v48, %v1689_v61  ;;  %v3426_v24 = vpack.c.bf16 %v8205_v63, %v8205_v63 }
 0x16b   :  { %v772_v55 = vpop.f32.mrb[15].mxu0  ;;  %v1391_v11 = vadd.f32 %v8181_v33, %v770_v50  ;;  %v1685_v14 = vrot.slane %v1684_v60, 1  ;;  %v1705_v16 = vrot.slane %v1389_v7, 4  ;;  %v1696_v20 = vmax.f32 %v1694_v62, %v1695_v6 }
 0x16c   :  { %v1702_v21 = vmax.f32 %v1700_v3, %v1701_v9  ;;  %v1392_v22 = vadd.f32 %v8184_v34, %v772_v55  ;;  %v3428_v25 = vpack.c.bf16 %v8209_v2, %v8209_v2  ;;  %v1680_v26 = vmax.f32 %v1678_v52, %v1679_v5 }
 0x16d   :  { %1035 = vmatmul.mubr.bf16.gmra.mrb[120].mxu0 %v7578_v45  ;;  %v1711_v27 = vrot.slane %v1390_v10, 4  ;;  %v4025_v29 = vunpack.c.l.b16 %v3427_v1  ;;  %v3429_v30 = vpack.c.bf16 %v8212_v4, %v8212_v4  ;;  %v8228_v31 = vmax.f32 %v1674_v8, 0.0 }
 0x16e   :  { %1044 = vmatprep.mubr.bf16.mxu0 %v12321_v0  ;;  %v1717_v32 = vrot.slane %v1391_v11, 4  ;;  %v3430_v35 = vpack.c.bf16 %v8217_v13, %v8217_v13  ;;  %v1686_v36 = vmax.f32 %v1684_v60, %v1685_v14  ;;  %v1691_v37 = vrot.slane %v1690_v15, 1 }
 0x16f   :  { %12633 = vst [vmem:[#allocation22_spill] sm:$0xff] %v8228_v31  ;;  %v1706_v38 = vmax.f32 %v1389_v7, %v1705_v16  ;;  %v4023_v39 = vunpack.c.l.b16 %v3425_v19  ;;  %v1697_v40 = vrot.slane %v1696_v20, 1  ;;  %v1703_v41 = vrot.slane %v1702_v21, 1 }
 0x170   :  { %v776_v12 = vpop.f32.mrb[16].mxu0  ;;  %v1723_v42 = vrot.slane %v1392_v22, 4  ;;  %v4024_v43 = vunpack.c.l.b16 %v3426_v24  ;;  %v4026_v44 = vunpack.c.l.b16 %v3428_v25  ;;  %v8233_v45 = vmax.f32 %v1680_v26, 0.0 }
 0x171   :  { %v778_v17 = vpop.f32.mrb[17].mxu0  ;;  %v1712_v47 = vmax.f32 %v1390_v10, %v1711_v27  ;;  %v4280_v48 = vsel %vm4279_vm0, %v4025_v29, %v4023_v39  ;;  %v4027_v49 = vunpack.c.l.b16 %v3429_v30  ;;  %v3431_v50 = vpack.c.bf16 %v8228_v31, %v8228_v31 }
 0x172   :  { %v780_v23 = vpop.f32.mrb[18].mxu0  ;;  %12634 = vst [vmem:[#allocation23_spill] sm:$0xff] %v8233_v45  ;;  %v1718_v51 = vmax.f32 %v1391_v11, %v1717_v32  ;;  %v4028_v53 = vunpack.c.l.b16 %v3430_v35  ;;  %v8238_v54 = vmax.f32 %v1686_v36, 0.0  ;;  %v1692_v55 = vmax.f32 %v1690_v15, %v1691_v37 }
 0x173   :  { %v782_v28 = vpop.f32.mrb[19].mxu0  ;;  %v1707_v57 = vrot.slane %v1706_v38, 2  ;;  %v1698_v60 = vmax.f32 %v1696_v20, %v1697_v40  ;;  %v1704_v61 = vmax.f32 %v1702_v21, %v1703_v41  ;;  %v1724_v62 = vmax.f32 %v1392_v22, %v1723_v42  ;;  %v7602_v41 = vld [vmem:[#allocation2 + $0x108] sm:$0xff]  }
 0x174   :  { %12635 = vst [vmem:[#allocation24_spill] sm:$0xff] %v8238_v54  ;;  %v1393_v1 = vadd.f32 %v8181_v33, %v776_v12  ;;  %v4293_v5 = vsel %vm4279_vm0, %v4026_v44, %v4024_v43  ;;  %v3432_v6 = vpack.c.bf16 %v8233_v45, %v8233_v45  ;;  %v1713_v7 = vrot.slane %v1712_v47, 2 }
 0x175   :  { %1045 = vmatmul.mubr.bf16.gmra.mrb[124].mxu0 %v7586_v18  ;;  %v1394_v8 = vadd.f32 %v8184_v34, %v778_v17  ;;  %v4282_v10 = vsel %vm4281_vm1, %v4027_v49, %v4280_v48  ;;  %v4029_v11 = vunpack.c.l.b16 %v3431_v50  ;;  %v1719_v14 = vrot.slane %v1718_v51, 2 }
 0x176   :  { %1054 = vmatprep.mubr.bf16.mxu0 %v12321_v0  ;;  %v1729_v15 = vrot.slane %v1393_v1, 4  ;;  %v8247_v16 = vsel %vm4281_vm1, %v4028_v53, %v4293_v5  ;;  %v3433_v12 = vpack.c.bf16 %v8238_v54, %v8238_v54  ;;  %v8251_v18 = vmax.f32 %v1692_v55, 0.0 }
 0x177   :  { %v1708_v19 = vmax.f32 %v1706_v38, %v1707_v57  ;;  %v8253_v20 = vmax.f32 %v1698_v60, 0.0  ;;  %v8255_v21 = vmax.f32 %v1704_v61, 0.0  ;;  %v1725_v17 = vrot.slane %v1724_v62, 2 }
 0x178   :  { %v786_v52 = vpop.f32.mrb[20].mxu0  ;;  %12636 = vst [vmem:[#allocation25_spill] sm:$0xff] %v8251_v18  ;;  %v1395_v22 = vadd.f32 %v8181_v33, %v780_v23  ;;  %v8259_v24 = vunpack.c.l.b16 %v3432_v6  ;;  %v1714_v25 = vmax.f32 %v1712_v47, %v1713_v7  ;;  %v1735_v26 = vrot.slane %v1394_v8, 4 }
 0x179   :  { %v788_v58 = vpop.f32.mrb[21].mxu0  ;;  %12637 = vst [vmem:[#allocation26_spill] sm:$0xff] %v8253_v20  ;;  %12638 = vst [vmem:[#allocation27_spill] sm:$0xff] %v8255_v21  ;;  %v1396_v27 = vadd.f32 %v8184_v34, %v782_v28  ;;  %v4284_v29 = vsel %vm4283_vm2, %v4029_v11, %v4282_v10  ;;  %v1720_v30 = vmax.f32 %v1718_v51, %v1719_v14  ;;  %v4031_v37 = vunpack.c.l.b16 %v3433_v12 }
 0x17a   :  { %v790_v3 = vpop.f32.mrb[22].mxu0  ;;  %v1730_v32 = vmax.f32 %v1393_v1, %v1729_v15  ;;  %v1741_v35 = vrot.slane %v1395_v22, 4  ;;  %v3434_v23 = vpack.c.bf16 %v8251_v18, %v8251_v18  ;;  %v1709_v38 = vrot.slane %v1708_v19, 1 }
 0x17b   :  { %v792_v9 = vpop.f32.mrb[23].mxu0  ;;  %v1747_v39 = vrot.slane %v1396_v27, 4  ;;  %v3435_v42 = vpack.c.bf16 %v8253_v20, %v8253_v20  ;;  %v3436_v28 = vpack.c.bf16 %v8255_v21, %v8255_v21  ;;  %v1726_v43 = vmax.f32 %v1724_v62, %v1725_v17 }
 0x17c   :  { %v1742_v44 = vmax.f32 %v1395_v22, %v1741_v35  ;;  %v1715_v48 = vrot.slane %v1714_v25, 1  ;;  %v1736_v49 = vmax.f32 %v1394_v8, %v1735_v26  ;;  %v1397_v51 = vadd.f32 %v8181_v33, %v786_v52 }
 0x17d   :  { %1055 = vmatmul.mubr.bf16.gmra.mrb[128].mxu0 %v7594_v59  ;;  %v1748_v50 = vmax.f32 %v1396_v27, %v1747_v39  ;;  %v1721_v55 = vrot.slane %v1720_v30, 1  ;;  %v1731_v57 = vrot.slane %v1730_v32, 2  ;;  %v1398_v59 = vadd.f32 %v8184_v34, %v788_v58 }
 0x17e   :  { %1064 = vmatprep.mubr.bf16.mxu0 %v12321_v0  ;;  %v1399_v60 = vadd.f32 %v8181_v33, %v790_v3  ;;  %v1710_v61 = vmax.f32 %v1708_v19, %v1709_v38  ;;  %v1743_v1 = vrot.slane %v1742_v44, 2  ;;  %v1753_v5 = vrot.slane %v1397_v51, 4  ;;  %v7610_v38 = vld [vmem:[#allocation2 + $0x110] sm:$0xff]  }
 0x17f   :  { %v1400_v62 = vadd.f32 %v8184_v34, %v792_v9  ;;  %v1727_v6 = vrot.slane %v1726_v43, 1  ;;  %v1749_v7 = vrot.slane %v1748_v50, 2  ;;  %v1759_v8 = vrot.slane %v1398_v59, 4 }
 0x180   :  { %v8263_v36 = vpop.f32.mrb[24].mxu0  ;;  %v1765_v10 = vrot.slane %v1399_v60, 4  ;;  %v1716_v52 = vmax.f32 %v1714_v25, %v1715_v48  ;;  %v1737_v11 = vrot.slane %v1736_v49, 2  ;;  %v1754_v14 = vmax.f32 %v1397_v51, %v1753_v5 }
 0x181   :  { %v8267_v40 = vpop.f32.mrb[25].mxu0  ;;  %v1771_v15 = vrot.slane %v1400_v62, 4  ;;  %v1722_v12 = vmax.f32 %v1720_v30, %v1721_v55  ;;  %v1732_v58 = vmax.f32 %v1730_v32, %v1731_v57  ;;  %v1760_v17 = vmax.f32 %v1398_v59, %v1759_v8 }
 0x182   :  { %v8273_v47 = vpop.f32.mrb[26].mxu0  ;;  %v1766_v3 = vmax.f32 %v1399_v60, %v1765_v10  ;;  %v4033_v22 = vunpack.c.l.b16 %v3435_v42  ;;  %v8284_v26 = vmax.f32 %v1710_v61, 0.0  ;;  %v1744_v9 = vmax.f32 %v1742_v44, %v1743_v1 }
 0x183   :  { %v8276_v53 = vpop.f32.mrb[27].mxu0  ;;  %v1755_v27 = vrot.slane %v1754_v14, 2  ;;  %v4286_v39 = vsel %vm4285_vm3, %v4031_v37, %v4284_v29  ;;  %v1728_v25 = vmax.f32 %v1726_v43, %v1727_v6  ;;  %v1772_v48 = vmax.f32 %v1400_v62, %v1771_v15 }
 0x184   :  { %12639 = vst [vmem:[#allocation28_spill] sm:$0xff] %v8284_v26  ;;  %v8291_v30 = vunpack.c.l.b16 %v3434_v23  ;;  %v8293_v32 = vmax.f32 %v1716_v52, 0.0  ;;  %v1738_v55 = vmax.f32 %v1736_v49, %v1737_v11  ;;  %v1761_v42 = vrot.slane %v1760_v17, 2 }
 0x185   :  { %1065 = vmatmul.mubr.bf16.gmra.mrb[132].mxu0 %v7602_v41  ;;  %v1750_v41 = vmax.f32 %v1748_v50, %v1749_v7  ;;  %v8297_v44 = vunpack.c.l.b16 %v3436_v28  ;;  %v8299_v59 = vmax.f32 %v1722_v12, 0.0  ;;  %v1733_v60 = vrot.slane %v1732_v58, 1 }
 0x186   :  { %1074 = vmatprep.mubr.bf16.mxu0 %v12321_v0  ;;  %12640 = vst [vmem:[#allocation29_spill] sm:$0xff] %v8293_v32  ;;  %v1767_v29 = vrot.slane %v1766_v3, 2  ;;  %v4288_v37 = vsel %vm4287_vm4, %v4033_v22, %v4286_v39  ;;  %v3437_v43 = vpack.c.bf16 %v8284_v26, %v8284_v26  ;;  %v1745_v23 = vrot.slane %v1744_v9, 1 }
 0x187   :  { %12641 = vst [vmem:[#allocation30_spill] sm:$0xff] %v8299_v59  ;;  %v1756_v50 = vmax.f32 %v1754_v14, %v1755_v27  ;;  %v8304_v61 = vmax.f32 %v1728_v25, 0.0  ;;  %v1751_v49 = vrot.slane %v1750_v41, 1  ;;  %v1773_v1 = vrot.slane %v1772_v48, 2 }
 0x188   :  { %v8282_v19 = vpop.f32.mrb[28].mxu0  ;;  %v1401_v28 = vadd.f32 %v8181_v33, %v8263_v36  ;;  %v3438_v5 = vpack.c.bf16 %v8293_v32, %v8293_v32  ;;  %v1739_v62 = vrot.slane %v1738_v55, 1  ;;  %v1762_v6 = vmax.f32 %v1760_v17, %v1761_v42 }
 0x189   :  { %v8286_v35 = vpop.f32.mrb[29].mxu0  ;;  %12642 = vst [vmem:[#allocation31_spill] sm:$0xff] %v8304_v61  ;;  %v1402_v7 = vadd.f32 %v8184_v34, %v8267_v40  ;;  %v3439_v8 = vpack.c.bf16 %v8299_v59, %v8299_v59  ;;  %v1734_v10 = vmax.f32 %v1732_v58, %v1733_v60  ;;  %v1768_v52 = vmax.f32 %v1766_v3, %v1767_v29 }
 0x18a   :  { %v8289_v51 = vpop.f32.mrb[30].mxu0  ;;  %v1777_v11 = vrot.slane %v1401_v28, 4  ;;  %v4035_v15 = vunpack.c.l.b16 %v3437_v43  ;;  %v1746_v36 = vmax.f32 %v1744_v9, %v1745_v23  ;;  %v1757_v12 = vrot.slane %v1756_v50, 1 }
 0x18b   :  { %v8295_v57 = vpop.f32.mrb[31].mxu0  ;;  %v1783_v22 = vrot.slane %v1402_v7, 4  ;;  %v1752_v39 = vmax.f32 %v1750_v41, %v1751_v49  ;;  %v1774_v40 = vmax.f32 %v1772_v48, %v1773_v1  ;;  %v8323_v58 = vunpack.c.l.b16 %v3438_v5 }
 0x18c   :  { %v1778_v25 = vmax.f32 %v1401_v28, %v1777_v11  ;;  %v1740_v3 = vmax.f32 %v1738_v55, %v1739_v62  ;;  %v1763_v60 = vrot.slane %v1762_v6, 1  ;;  %v8327_v9 = vmax.f32 %v1734_v10, 0.0 }
 0x18d   :  { %1075 = vmatmul.mubr.bf16.gmra.mrb[136].mxu0 %v7610_v38  ;;  %v7618_v38 = vld [vmem:[#allocation2 + $0x118] sm:$0xff]   ;;  %v1784_v29 = vmax.f32 %v1402_v7, %v1783_v22  ;;  %v1769_v23 = vrot.slane %v1768_v52, 1  ;;  %v1403_v32 = vadd.f32 %v8181_v33, %v8273_v47  ;;  %v8331_v17 = vunpack.c.l.b16 %v3439_v8 }
 0x18e   :  { %1084 = vmatprep.mubr.bf16.mxu0 %v12321_v0  ;;  %12643 = vst [vmem:[#allocation32_spill] sm:$0xff] %v8327_v9  ;;  %v1779_v0 = vrot.slane %v1778_v25, 2  ;;  %v8333_v41 = vmax.f32 %v1746_v36, 0.0  ;;  %v1758_v48 = vmax.f32 %v1756_v50, %v1757_v12  ;;  %v1404_v49 = vadd.f32 %v8184_v34, %v8276_v53 }
 0x18f   :  { %v8337_v55 = vmax.f32 %v1752_v39, 0.0  ;;  %v1775_v1 = vrot.slane %v1774_v40, 1  ;;  %v1785_v28 = vrot.slane %v1784_v29, 2  ;;  %v1789_v5 = vrot.slane %v1403_v32, 4  ;;  %v7626_v39 = vld [vmem:[#allocation2 + $0x120] sm:$0xff]  }
 0x190   :  { %v8315_v14 = vpop.f32.mrb[32].mxu0  ;;  %12644 = vst [vmem:[#allocation33_spill] sm:$0xff] %v8333_v41  ;;  %v12646_v62 = vmov 0   ;;  %v8341_v7 = vsel %vm4289_vm5, %v4035_v15, %v4288_v37  ;;  %v8343_v47 = vmax.f32 %v1740_v3, 0.0  ;;  %v1764_v8 = vmax.f32 %v1762_v6, %v1763_v60 }
 0x191   :  { %v8317_v27 = vpop.f32.mrb[33].mxu0  ;;  %12645 = vst [vmem:[#allocation34_spill] sm:$0xff] %v8337_v55  ;;  %v1795_v10 = vrot.slane %v1404_v49, 4  ;;  %v3441_v50 = vpack.c.bf16 %v8327_v9, %v8327_v9  ;;  %v1770_v11 = vmax.f32 %v1768_v52, %v1769_v23  ;;  %v1780_v53 = vmax.f32 %v1778_v25, %v1779_v0 }
 0x192   :  { %v8321_v42 = vpop.f32.mrb[34].mxu0  ;;  %12647 = vst [vmem:[#allocation35_spill] sm:$0xff] %v8343_v47  ;;  %v1790_v36 = vmax.f32 %v1403_v32, %v1789_v5  ;;  %v3443_v22 = vpack.c.bf16 %v8333_v41, %v8333_v41  ;;  %v1405_v37 = vadd.f32 %v8181_v33, %v8282_v19  ;;  %v1406_v6 = vadd.f32 %v8184_v34, %v8286_v35 }
 0x193   :  { %v8325_v43 = vpop.f32.mrb[35].mxu0  ;;  %v3444_v0 = vpack.c.bf16 %v8337_v55, %v8337_v55  ;;  %v1776_v32 = vmax.f32 %v1774_v40, %v1775_v1  ;;  %v1786_v52 = vmax.f32 %v1784_v29, %v1785_v28  ;;  %v1407_v25 = vadd.f32 %v8181_v33, %v8289_v51 }
 0x194   :  { %v8365_v60 = vmax.f32 %v1764_v8, 0.0  ;;  %v1791_v23 = vrot.slane %v1790_v36, 2  ;;  %v1796_v19 = vmax.f32 %v1404_v49, %v1795_v10  ;;  %v3442_v35 = vpack.c.bf16 %v8343_v47, %v8343_v47 }
 0x195   :  { %1085 = vmatmul.mubr.bf16.gmra.mrb[140].mxu0 %v7618_v38  ;;  %v8351_v38 = vmax.f32 %v1758_v48, 0.0  ;;  %v1801_v48 = vrot.slane %v1405_v37, 4  ;;  %v8371_v21 = vmax.f32 %v1770_v11, 0.0  ;;  %v1781_v18 = vrot.slane %v1780_v53, 1 }
 0x196   :  { %1094 = vmatprep.mubr.bf16.mxu0 %v12646_v62  ;;  %12649 = vst [vmem:[#allocation37_spill] sm:$0xff] %v8365_v60  ;;  %v1408_v40 = vadd.f32 %v8184_v34, %v8295_v57  ;;  %v4041_v29 = vunpack.c.l.b16 %v3443_v22  ;;  %v1807_v1 = vrot.slane %v1406_v6, 4  ;;  %v1813_v28 = vrot.slane %v1407_v25, 4 }
 0x197   :  { %12648 = vst [vmem:[#allocation36_spill] sm:$0xff] %v8351_v38  ;;  %12650 = vst [vmem:[#allocation38_spill] sm:$0xff] %v8371_v21  ;;  %v3445_v51 = vpack.c.bf16 %v8351_v38, %v8351_v38  ;;  %v4042_v49 = vunpack.c.l.b16 %v3444_v0  ;;  %v8377_v8 = vmax.f32 %v1776_v32, 0.0  ;;  %v1787_v10 = vrot.slane %v1786_v52, 1 }
 0x198   :  { %v8347_v12 = vpop.f32.mrb[36].mxu0  ;;  %v1802_v45 = vmax.f32 %v1405_v37, %v1801_v48  ;;  %v4039_v11 = vunpack.c.l.b16 %v3441_v50  ;;  %v3446_v47 = vpack.c.bf16 %v8365_v60, %v8365_v60  ;;  %v1792_v63 = vmax.f32 %v1790_v36, %v1791_v23  ;;  %v7630_v50 = vld [vmem:[#allocation2 + $0x128] sm:$0xff]  }
 0x199   :  { %v8357_v15 = vpop.f32.mrb[37].mxu0  ;;  %12651 = vst [vmem:[#allocation39_spill] sm:$0xff] %v8377_v8  ;;  %v1797_v57 = vrot.slane %v1796_v19, 2  ;;  %v4040_v22 = vunpack.c.l.b16 %v3442_v35  ;;  %v3447_v55 = vpack.c.bf16 %v8371_v21, %v8371_v21  ;;  %v1782_v13 = vmax.f32 %v1780_v53, %v1781_v18 }
 0x19a   :  { %v8363_v3 = vpop.f32.mrb[38].mxu0  ;;  %v1819_v9 = vrot.slane %v1408_v40, 4  ;;  %v4300_v0 = vsel %vm4279_vm0, %v4041_v29, %v4039_v11  ;;  %v4043_v32 = vunpack.c.l.b16 %v3445_v51  ;;  %v1808_v37 = vmax.f32 %v1406_v6, %v1807_v1 }
 0x19b   :  { %v8367_v5 = vpop.f32.mrb[39].mxu0  ;;  %v1814_v48 = vmax.f32 %v1407_v25, %v1813_v28  ;;  %v4307_v60 = vsel %vm4279_vm0, %v4042_v49, %v4040_v22  ;;  %v3448_v36 = vpack.c.bf16 %v8377_v8, %v8377_v8  ;;  %v1788_v23 = vmax.f32 %v1786_v52, %v1787_v10 }
 0x19c   :  { %v1803_v35 = vrot.slane %v1802_v45, 2  ;;  %v4044_v18 = vunpack.c.l.b16 %v3446_v47  ;;  %v1793_v53 = vrot.slane %v1792_v63, 1  ;;  %v1798_v2 = vmax.f32 %v1796_v19, %v1797_v57 }
 0x19d   :  { %1095 = vmatmul.mubr.bf16.gmra.mrb[144].mxu0 %v7626_v39  ;;  %v1409_v29 = vadd.f32 %v8181_v33, %v8315_v14  ;;  %v4045_v25 = vunpack.c.l.b16 %v3447_v55  ;;  %v8398_v51 = vmax.f32 %v1782_v13, 0.0  ;;  %v1820_v1 = vmax.f32 %v1408_v40, %v1819_v9 }
 0x19e   :  { %1104 = vmatprep.mubr.bf16.mxu0 %v12646_v62  ;;  %v1410_v28 = vadd.f32 %v8184_v34, %v8317_v27  ;;  %v4301_v52 = vsel %vm4281_vm1, %v4043_v32, %v4300_v0  ;;  %v1809_v49 = vrot.slane %v1808_v37, 2  ;;  %v1815_v10 = vrot.slane %v1814_v48, 2 }
 0x19f   :  { %12652 = vst [vmem:[#allocation40_spill] sm:$0xff] %v8398_v51  ;;  %v1825_v11 = vrot.slane %v1409_v29, 4  ;;  %v8403_v47 = vunpack.c.l.b16 %v3448_v36  ;;  %v8405_v19 = vmax.f32 %v1788_v23, 0.0  ;;  %v1804_v14 = vmax.f32 %v1802_v45, %v1803_v35 }
 0x1a0   :  { %v8384_v39 = vpop.f32.mrb[40].mxu0  ;;  %v1831_v57 = vrot.slane %v1410_v28, 4  ;;  %v8409_v13 = vsel %vm4281_vm1, %v4044_v18, %v4307_v60  ;;  %v1794_v9 = vmax.f32 %v1792_v63, %v1793_v53  ;;  %v1799_v55 = vrot.slane %v1798_v2, 1  ;;  %v7631_v63 = vld [vmem:[#allocation2 + $0x130] sm:$0xff]  }
 0x1a1   :  { %v8387_v59 = vpop.f32.mrb[41].mxu0  ;;  %12653 = vst [vmem:[#allocation41_spill] sm:$0xff] %v8405_v19  ;;  %v1826_v27 = vmax.f32 %v1409_v29, %v1825_v11  ;;  %v4302_v40 = vsel %vm4283_vm2, %v4045_v25, %v4301_v52  ;;  %v3449_v22 = vpack.c.bf16 %v8398_v51, %v8398_v51  ;;  %v1821_v0 = vrot.slane %v1820_v1, 2 }
 0x1a2   :  { %v8392_v21 = vpop.f32.mrb[42].mxu0  ;;  %v1832_v32 = vmax.f32 %v1410_v28, %v1831_v57  ;;  %v1810_v36 = vmax.f32 %v1808_v37, %v1809_v49  ;;  %v1816_v45 = vmax.f32 %v1814_v48, %v1815_v10  ;;  %v1411_v35 = vadd.f32 %v8181_v33, %v8321_v42 }
 0x1a3   :  { %v8396_v6 = vpop.f32.mrb[43].mxu0  ;;  %v1827_v23 = vrot.slane %v1826_v27, 2  ;;  %v3450_v18 = vpack.c.bf16 %v8405_v19, %v8405_v19  ;;  %v1805_v53 = vrot.slane %v1804_v14, 1  ;;  %v1412_v25 = vadd.f32 %v8184_v34, %v8325_v43 }
 0x1a4   :  { %v1833_v29 = vrot.slane %v1832_v32, 2  ;;  %v8426_v52 = vmax.f32 %v1794_v9, 0.0  ;;  %v1800_v37 = vmax.f32 %v1798_v2, %v1799_v55  ;;  %v1837_v49 = vrot.slane %v1411_v35, 4 }
 0x1a5   :  { %1105 = vmatmul.mubr.bf16.gmra.mrb[148].mxu0 %v7630_v50  ;;  %v1828_v48 = vmax.f32 %v1826_v27, %v1827_v23  ;;  %v1822_v42 = vmax.f32 %v1820_v1, %v1821_v0  ;;  %v1843_v57 = vrot.slane %v1412_v25, 4  ;;  %v1413_v19 = vadd.f32 %v8181_v33, %v8347_v12 }
 0x1a6   :  { %1114 = vmatprep.mubr.bf16.mxu0 %v12646_v62  ;;  %12654 = vst [vmem:[#allocation42_spill] sm:$0xff] %v8426_v52  ;;  %v1834_v11 = vmax.f32 %v1832_v32, %v1833_v29  ;;  %v1811_v8 = vrot.slane %v1810_v36, 1  ;;  %v1817_v51 = vrot.slane %v1816_v45, 1  ;;  %v1838_v38 = vmax.f32 %v1411_v35, %v1837_v49 }
 0x1a7   :  { %v1414_v43 = vadd.f32 %v8184_v34, %v8357_v15  ;;  %v1806_v9 = vmax.f32 %v1804_v14, %v1805_v53  ;;  %v1844_v26 = vmax.f32 %v1412_v25, %v1843_v57  ;;  %v1849_v2 = vrot.slane %v1413_v19, 4 }
 0x1a8   :  { %v8414_v50 = vpop.f32.mrb[44].mxu0  ;;  %v1415_v55 = vadd.f32 %v8181_v33, %v8363_v3  ;;  %v1829_v1 = vrot.slane %v1828_v48, 1  ;;  %v1835_v27 = vrot.slane %v1834_v11, 1  ;;  %v1839_v0 = vrot.slane %v1838_v38, 2  ;;  %v7632_v3 = vld [vmem:[#allocation2 + $0x138] sm:$0xff]  }
 0x1a9   :  { %v8418_v60 = vpop.f32.mrb[45].mxu0  ;;  %v1855_v32 = vrot.slane %v1414_v43, 4  ;;  %v4047_v12 = vunpack.c.l.b16 %v3449_v22  ;;  %v1845_v23 = vrot.slane %v1844_v26, 2  ;;  %v1850_v29 = vmax.f32 %v1413_v19, %v1849_v2 }
 0x1aa   :  { %v8424_v28 = vpop.f32.mrb[46].mxu0  ;;  %v1416_v35 = vadd.f32 %v8184_v34, %v8367_v5  ;;  %v1823_v14 = vrot.slane %v1822_v42, 1  ;;  %v1861_v25 = vrot.slane %v1415_v55, 4  ;;  %v3451_v57 = vpack.c.bf16 %v8426_v52, %v8426_v52 }
 0x1ab   :  { %v8428_v10 = vpop.f32.mrb[47].mxu0  ;;  %v1856_v53 = vmax.f32 %v1414_v43, %v1855_v32  ;;  %v8445_v20 = vmax.f32 %v1800_v37, 0.0  ;;  %v1812_v22 = vmax.f32 %v1810_v36, %v1811_v8  ;;  %v1818_v54 = vmax.f32 %v1816_v45, %v1817_v51 }
 0x1ac   :  { %v8449_v2 = vunpack.c.l.b16 %v3450_v18  ;;  %v8451_v5 = vmax.f32 %v1806_v9, 0.0  ;;  %v1830_v41 = vmax.f32 %v1828_v48, %v1829_v1  ;;  %v1846_v32 = vmax.f32 %v1844_v26, %v1845_v23 }
 0x1ad   :  { %1115 = vmatmul.mubr.bf16.gmra.mrb[152].mxu0 %v7631_v63  ;;  %v1840_v63 = vmax.f32 %v1838_v38, %v1839_v0  ;;  %12655 = vst [vmem:[#allocation43_spill] sm:$0xff] %v8445_v20  ;;  %v1836_v38 = vmax.f32 %v1834_v11, %v1835_v27  ;;  %v4303_v0 = vsel %vm4285_vm3, %v4047_v12, %v4302_v40  ;;  %v1851_v31 = vrot.slane %v1850_v29, 2 }
 0x1ae   :  { %1124 = vmatprep.mubr.bf16.mxu0 %v12646_v62  ;;  %12656 = vst [vmem:[#allocation44_spill] sm:$0xff] %v8451_v5  ;;  %v1867_v56 = vrot.slane %v1416_v35, 4  ;;  %v1824_v52 = vmax.f32 %v1822_v42, %v1823_v14  ;;  %v1857_v4 = vrot.slane %v1856_v53, 2  ;;  %v1862_v8 = vmax.f32 %v1415_v55, %v1861_v25  ;;  %v7633_v25 = vld [vmem:[#allocation2 + $0x140] sm:$0xff]  }
 0x1af   :  { %v1841_v37 = vrot.slane %v1840_v63, 1  ;;  %v4049_v51 = vunpack.c.l.b16 %v3451_v57  ;;  %v3452_v36 = vpack.c.bf16 %v8445_v20, %v8445_v20  ;;  %v8458_v45 = vmax.f32 %v1812_v22, 0.0 }
 0x1b0   :  { %v8439_v15 = vpop.f32.mrb[48].mxu0  ;;  %v8460_v18 = vmax.f32 %v1818_v54, 0.0  ;;  %v3453_v26 = vpack.c.bf16 %v8451_v5, %v8451_v5  ;;  %v8465_v40 = vmax.f32 %v1830_v41, 0.0  ;;  %v8467_v48 = vmax.f32 %v1836_v38, 0.0 }
 0x1b1   :  { %v8441_v49 = vpop.f32.mrb[49].mxu0  ;;  %12657 = vst [vmem:[#allocation45_spill] sm:$0xff] %v8458_v45  ;;  %v1417_v42 = vadd.f32 %v8181_v33, %v8384_v39  ;;  %v1847_v11 = vrot.slane %v1846_v32, 1  ;;  %v1852_v9 = vmax.f32 %v1850_v29, %v1851_v31  ;;  %v1868_v55 = vmax.f32 %v1416_v35, %v1867_v56 }
 0x1b2   :  { %v8447_v19 = vpop.f32.mrb[50].mxu0  ;;  %12658 = vst [vmem:[#allocation46_spill] sm:$0xff] %v8460_v18  ;;  %12659 = vst [vmem:[#allocation47_spill] sm:$0xff] %v8465_v40  ;;  %v1418_v1 = vadd.f32 %v8184_v34, %v8387_v59  ;;  %v8475_v27 = vmax.f32 %v1824_v52, 0.0  ;;  %v1842_v12 = vmax.f32 %v1840_v63, %v1841_v37  ;;  %v1858_v23 = vmax.f32 %v1856_v53, %v1857_v4 }
 0x1b3   :  { %v8453_v43 = vpop.f32.mrb[51].mxu0  ;;  %12660 = vst [vmem:[#allocation48_spill] sm:$0xff] %v8467_v48  ;;  %v1863_v14 = vrot.slane %v1862_v8, 2  ;;  %v3455_v31 = vpack.c.bf16 %v8460_v18, %v8460_v18  ;;  %v1873_v56 = vrot.slane %v1417_v42, 4  ;;  %v4050_v59 = vunpack.c.l.b16 %v3452_v36 }
 0x1b4   :  { %12661 = vst [vmem:[#allocation49_spill] sm:$0xff] %v8475_v27  ;;  %v1879_v39 = vrot.slane %v1418_v1, 4  ;;  %v4051_v35 = vunpack.c.l.b16 %v3453_v26  ;;  %v3457_v52 = vpack.c.bf16 %v8465_v40, %v8465_v40  ;;  %v3458_v4 = vpack.c.bf16 %v8467_v48, %v8467_v48 }
 0x1b5   :  { %1125 = vmatmul.mubr.bf16.gmra.mrb[156].mxu0 %v7632_v3  ;;  %v3454_v3 = vpack.c.bf16 %v8458_v45, %v8458_v45  ;;  %v4304_v53 = vsel %vm4287_vm4, %v4049_v51, %v4303_v0  ;;  %v1848_v57 = vmax.f32 %v1846_v32, %v1847_v11  ;;  %v1853_v22 = vrot.slane %v1852_v9, 1 }
 0x1b6   :  { %1134 = vmatprep.mubr.bf16.mxu0 %v12646_v62  ;;  %v1869_v38 = vrot.slane %v1868_v55, 2  ;;  %v3456_v37 = vpack.c.bf16 %v8475_v27, %v8475_v27  ;;  %v8494_v45 = vmax.f32 %v1842_v12, 0.0  ;;  %v1859_v36 = vrot.slane %v1858_v23, 1 }
 0x1b7   :  { %v1864_v26 = vmax.f32 %v1862_v8, %v1863_v14  ;;  %v4052_v40 = vunpack.c.l.b16 %v3454_v3  ;;  %v4053_v20 = vunpack.c.l.b16 %v3455_v31  ;;  %v1874_v18 = vmax.f32 %v1417_v42, %v1873_v56 }
 0x1b8   :  { %v8473_v54 = vpop.f32.mrb[52].mxu0  ;;  %12662 = vst [vmem:[#allocation50_spill] sm:$0xff] %v8494_v45  ;;  %v1880_v48 = vmax.f32 %v1418_v1, %v1879_v39  ;;  %v4305_v0 = vsel %vm4289_vm5, %v4051_v35, %v4304_v53  ;;  %v8498_v32 = vunpack.c.l.b16 %v3457_v52  ;;  %v8500_v51 = vunpack.c.l.b16 %v3458_v4  ;;  %v7634_v39 = vld [vmem:[#allocation2 + $0x148] sm:$0xff]  }
 0x1b9   :  { %v8477_v41 = vpop.f32.mrb[53].mxu0  ;;  %v1419_v11 = vadd.f32 %v8181_v33, %v8392_v21  ;;  %v8504_v12 = vmax.f32 %v1848_v57, 0.0  ;;  %v1854_v27 = vmax.f32 %v1852_v9, %v1853_v22  ;;  %v1870_v8 = vmax.f32 %v1868_v55, %v1869_v38 }
 0x1ba   :  { %v8483_v29 = vpop.f32.mrb[54].mxu0  ;;  %v1420_v14 = vadd.f32 %v8184_v34, %v8396_v6  ;;  %v3459_v1 = vpack.c.bf16 %v8494_v45, %v8494_v45  ;;  %v1865_v3 = vrot.slane %v1864_v26, 1  ;;  %v1875_v35 = vrot.slane %v1874_v18, 2 }
 0x1bb   :  { %v8489_v63 = vpop.f32.mrb[55].mxu0  ;;  %12663 = vst [vmem:[#allocation51_spill] sm:$0xff] %v8504_v12  ;;  %v1885_v31 = vrot.slane %v1419_v11, 4  ;;  %v1881_v33 = vrot.slane %v1880_v48, 2  ;;  %v12664_v9 = vpack.c.bf16 %v8304_v61, %v8304_v61  ;;  %v4054_v6 = vunpack.c.l.b16 %v3456_v37 }
 0x1bc   :  { %v1891_v21 = vrot.slane %v1420_v14, 4  ;;  %v4309_v4 = vsel %vm4283_vm2, %v8403_v47, %v8409_v13  ;;  %v1871_v57 = vrot.slane %v1870_v8, 1  ;;  %v3460_v37 = vpack.c.bf16 %v8504_v12, %v8504_v12 }
 0x1bd   :  { %1135 = vmatmul.mubr.bf16.gmra.mrb[160].mxu0 %v7633_v25  ;;  %v1860_v25 = vmax.f32 %v1858_v23, %v1859_v36  ;;  %v4038_v55 = vunpack.c.l.b16 %v12664_v9  ;;  %v1886_v34 = vmax.f32 %v1419_v11, %v1885_v31  ;;  %v4295_v23 = vsel %vm4283_vm2, %v8259_v24, %v8247_v16 }
 0x1be   :  { %1144 = vmatprep.mubr.bf16.mxu0 %v12646_v62  ;;  %v1892_v22 = vmax.f32 %v1420_v14, %v1891_v21  ;;  %v4296_v38 = vsel %vm4285_vm3, %v8291_v30, %v4295_v23  ;;  %v4310_v36 = vsel %vm4285_vm3, %v8449_v2, %v4309_v4  ;;  %v8533_v11 = vmax.f32 %v1854_v27, 0.0 }
 0x1bf   :  { %v4297_v16 = vsel %vm4287_vm4, %v8297_v44, %v4296_v38  ;;  %v4311_v24 = vsel %vm4287_vm4, %v4050_v59, %v4310_v36  ;;  %v1876_v47 = vmax.f32 %v1874_v18, %v1875_v35  ;;  %v1882_v13 = vmax.f32 %v1880_v48, %v1881_v33  ;;  %v8554_v35 = vld [vmem:[#allocation7] sm:$0xff] }
 0x1c0   :  { %v8508_v42 = vpop.f32.mrb[56].mxu0  ;;  %12665 = vst [vmem:[#allocation52_spill] sm:$0xff] %v8533_v11  ;;  %v4298_v14 = vsel %vm4289_vm5, %v8323_v58, %v4297_v16  ;;  %v4312_v30 = vsel %vm4289_vm5, %v4052_v40, %v4311_v24  ;;  %v1887_v2 = vrot.slane %v1886_v34, 2  ;;  %v1893_v31 = vrot.slane %v1892_v22, 2 }
 0x1c1   :  { %v8512_v56 = vpop.f32.mrb[57].mxu0  ;;  %v4299_v27 = vsel %vm4291_vm6, %v4038_v55, %v4298_v14  ;;  %v4313_v21 = vsel %vm4291_vm6, %v4054_v6, %v4312_v30  ;;  %v4057_v9 = vunpack.c.l.b16 %v3459_v1  ;;  %v8544_v44 = vmax.f32 %v1860_v25, 0.0  ;;  %v7635_v25 = vld [vmem:[#allocation2 + $0x150] sm:$0xff]  }
 0x1c2   :  { %v8517_v52 = vpop.f32.mrb[58].mxu0  ;;  %v1866_v59 = vmax.f32 %v1864_v26, %v1865_v3  ;;  %v1872_v48 = vmax.f32 %v1870_v8, %v1871_v57  ;;  %v4292_v58 = vsel %vm4291_vm6, %v8331_v17, %v8341_v7  ;;  %v4306_v40 = vsel %vm4291_vm6, %v4053_v20, %v4305_v0  ;;  %v8563_v8 = vld [vmem:[#allocation7 + $0x8] sm:$0xff] }
 0x1c3   :  { %v8525_v53 = vpop.f32.mrb[59].mxu0  ;;  %12666 = vst [vmem:[#allocation53_spill] sm:$0xff] %v8544_v44  ;;  %v1421_v33 = vadd.f32 %v8554_v35, %v8414_v50  ;;  %v1877_v26 = vrot.slane %v1876_v47, 1  ;;  %v1883_v3 = vrot.slane %v1882_v13, 1  ;;  %v8561_v55 = vpack.c.b16 %v4306_v40, %v4292_v58 }
 0x1c4   :  { %v1422_v17 = vadd.f32 %v8563_v8, %v8418_v60  ;;  %v1888_v7 = vmax.f32 %v1886_v34, %v1887_v2  ;;  %v1894_v0 = vmax.f32 %v1892_v22, %v1893_v31  ;;  %v1423_v50 = vadd.f32 %v8554_v35, %v8424_v28 }
 0x1c5   :  { %1145 = vmatmul.mubr.bf16.gmra.mrb[164].mxu0 %v7634_v39  ;;  %v8546_v39 = vpack.c.b16 %v4313_v21, %v4299_v27  ;;  %12668 = vst [vmem:[#allocation55_spill] sm:$0xff] %v8561_v55  ;;  %v1897_v6 = vrot.slane %v1421_v33, 4  ;;  %v1424_v57 = vadd.f32 %v8563_v8, %v8428_v10  ;;  %v1425_v38 = vadd.f32 %v8554_v35, %v8439_v15 }
 0x1c6   :  { %1154 = vmatprep.mubr.bf16.mxu0 %v12646_v62  ;;  %v1903_v4 = vrot.slane %v1422_v17, 4  ;;  %v1426_v60 = vadd.f32 %v8563_v8, %v8441_v49  ;;  %v4058_v34 = vunpack.c.l.b16 %v3460_v37  ;;  %v3461_v22 = vpack.c.bf16 %v8533_v11, %v8533_v11 }
 0x1c7   :  { %12667 = vst [vmem:[#allocation54_spill] sm:$0xff] %v8546_v39  ;;  %4894 = vmatprep.mubr.bf16.mxu1 %v8546_v39  ;;  %v8582_v36 = vmax.f32 %v1866_v59, 0.0  ;;  %v1898_v28 = vmax.f32 %v1421_v33, %v1897_v6  ;;  %v3462_v16 = vpack.c.bf16 %v8544_v44, %v8544_v44  ;;  %v1909_v24 = vrot.slane %v1423_v50, 4 }
 0x1c8   :  { %v8548_v18 = vpop.f32.mrb[60].mxu0  ;;  %4895 = vmatmul.mubr.bf16.vlgmr.msra.gmra.mrb[80].mxu1 %v8561_v55  ;;  %v1921_v14 = vrot.slane %v1425_v38, 4  ;;  %v1927_v10 = vrot.slane %v1426_v60, 4  ;;  %v4314_v15 = vsel %vm4279_vm0, %v4057_v9, %v8498_v32  ;;  %v1878_v49 = vmax.f32 %v1876_v47, %v1877_v26  ;;  %v7636_v32 = vld [vmem:[#allocation2 + $0x158] sm:$0xff]  }
 0x1c9   :  { %v8558_v1 = vpop.f32.mrb[61].mxu0  ;;  %12669 = vst [vmem:[#allocation56_spill] sm:$0xff] %v8582_v36  ;;  %v1884_v37 = vmax.f32 %v1882_v13, %v1883_v3  ;;  %v1889_v30 = vrot.slane %v1888_v7, 1  ;;  %v8589_v2 = vmax.f32 %v1872_v48, 0.0  ;;  %v1895_v31 = vrot.slane %v1894_v0, 1 }
 0x1ca   :  { %v8567_v20 = vpop.f32.mrb[62].mxu0  ;;  %v1904_v27 = vmax.f32 %v1422_v17, %v1903_v4  ;;  %v1915_v21 = vrot.slane %v1424_v57, 4  ;;  %v4321_v58 = vsel %vm4279_vm0, %v4058_v34, %v8500_v51  ;;  %v4059_v40 = vunpack.c.l.b16 %v3461_v22 }
 0x1cb   :  { %v8571_v23 = vpop.f32.mrb[63].mxu0  ;;  %12670 = vst [vmem:[#allocation57_spill] sm:$0xff] %v8589_v2  ;;  %v1899_v33 = vrot.slane %v1898_v28, 2  ;;  %v4060_v47 = vunpack.c.l.b16 %v3462_v16  ;;  %v1910_v13 = vmax.f32 %v1423_v50, %v1909_v24  ;;  %v1922_v9 = vmax.f32 %v1425_v38, %v1921_v14 }
 0x1cc   :  { %v1928_v48 = vmax.f32 %v1426_v60, %v1927_v10  ;;  %v8601_v3 = vmax.f32 %v1878_v49, 0.0  ;;  %v8603_v17 = vmax.f32 %v1884_v37, 0.0  ;;  %v1890_v6 = vmax.f32 %v1888_v7, %v1889_v30 }
 0x1cd   :  { %1155 = vmatmul.mubr.bf16.gmra.mrb[168].mxu0 %v7635_v25  ;;  %v1427_v51 = vadd.f32 %v8554_v35, %v8447_v19  ;;  %v1896_v34 = vmax.f32 %v1894_v0, %v1895_v31  ;;  %v1905_v22 = vrot.slane %v1904_v27, 2  ;;  %v1428_v50 = vadd.f32 %v8563_v8, %v8453_v43 }
 0x1ce   :  { %1164 = vmatprep.mubr.bf16.mxu0 %v12646_v62  ;;  %v3463_v62 = vpack.c.bf16 %v8582_v36, %v8582_v36  ;;  %12671 = vst [vmem:[#allocation58_spill] sm:$0xff] %v8601_v3  ;;  %12672 = vst [vmem:[#allocation59_spill] sm:$0xff] %v8603_v17  ;;  %v1916_v36 = vmax.f32 %v1424_v57, %v1915_v21  ;;  %v8612_v38 = vsel %vm4281_vm1, %v4059_v40, %v4314_v15 }
 0x1cf   :  { %v3464_v60 = vpack.c.bf16 %v8589_v2, %v8589_v2  ;;  %v1900_v16 = vmax.f32 %v1898_v28, %v1899_v33  ;;  %v1933_v24 = vrot.slane %v1427_v51, 4  ;;  %v1911_v7 = vrot.slane %v1910_v13, 2 }
 0x1d0   :  { %v8591_v59 = vpop.f32.mrb[64].mxu0  ;;  %v1923_v14 = vrot.slane %v1922_v9, 2  ;;  %v1929_v19 = vrot.slane %v1928_v48, 2  ;;  %v1939_v10 = vrot.slane %v1428_v50, 4  ;;  %v3465_v0 = vpack.c.bf16 %v8601_v3, %v8601_v3 }
 0x1d1   :  { %v8597_v25 = vpop.f32.mrb[65].mxu0  ;;  %v3466_v57 = vpack.c.bf16 %v8603_v17, %v8603_v17  ;;  %v8620_v43 = vmax.f32 %v1890_v6, 0.0  ;;  %v1934_v15 = vmax.f32 %v1427_v51, %v1933_v24  ;;  %v8622_v49 = vmax.f32 %v1896_v34, 0.0 }
 0x1d2   :  { %v8599_v26 = vpop.f32.mrb[66].mxu0  ;;  %v1906_v37 = vmax.f32 %v1904_v27, %v1905_v22  ;;  %v1917_v30 = vrot.slane %v1916_v36, 2  ;;  %v1940_v28 = vmax.f32 %v1428_v50, %v1939_v10  ;;  %v8627_v21 = vsel %vm4281_vm1, %v4060_v47, %v4321_v58 }
 0x1d3   :  { %v8607_v4 = vpop.f32.mrb[67].mxu0  ;;  %12673 = vst [vmem:[#allocation60_spill] sm:$0xff] %v8620_v43  ;;  %12674 = vst [vmem:[#allocation61_spill] sm:$0xff] %v8622_v49  ;;  %v8629_v40 = vunpack.c.l.b16 %v3463_v62  ;;  %v1901_v33 = vrot.slane %v1900_v16, 1  ;;  %v8633_v11 = vunpack.c.l.b16 %v3464_v60  ;;  %v1912_v6 = vmax.f32 %v1910_v13, %v1911_v7 }
 0x1d4   :  { %v1924_v51 = vmax.f32 %v1922_v9, %v1923_v14  ;;  %v1930_v34 = vmax.f32 %v1928_v48, %v1929_v19  ;;  %v8637_v27 = vunpack.c.l.b16 %v3465_v0  ;;  %v8639_v22 = vunpack.c.l.b16 %v3466_v57 }
 0x1d5   :  { %1165 = vmatmul.mubr.bf16.gmra.mrb[172].mxu0 %v7636_v32  ;;  %v1935_v32 = vrot.slane %v1934_v15, 2  ;;  %v3467_v58 = vpack.c.bf16 %v8620_v43, %v8620_v43  ;;  %v1941_v62 = vrot.slane %v1940_v28, 2  ;;  %v3468_v50 = vpack.c.bf16 %v8622_v49, %v8622_v49 }
 0x1d6   :  { %12675 = vst [vmem:[#allocation62_spill] sm:$0xff] %v8637_v27  ;;  %v1907_v60 = vrot.slane %v1906_v37, 1  ;;  %v1918_v10 = vmax.f32 %v1916_v36, %v1917_v30  ;;  %v1902_v9 = vmax.f32 %v1900_v16, %v1901_v33  ;;  %v1429_v48 = vadd.f32 %v8554_v35, %v8473_v54 }
 0x1d7   :  { %v1936_v13 = vmax.f32 %v1934_v15, %v1935_v32  ;;  %v1430_v7 = vadd.f32 %v8563_v8, %v8477_v41  ;;  %v1431_v14 = vadd.f32 %v8554_v35, %v8483_v29  ;;  %v1913_v19 = vrot.slane %v1912_v6, 1 }
 0x1d8   :  { %v8624_v31 = vpop.f32.mrb[68].mxu0  ;;  %v1925_v0 = vrot.slane %v1924_v51, 1  ;;  %v1931_v57 = vrot.slane %v1930_v34, 1  ;;  %v1432_v43 = vadd.f32 %v8563_v8, %v8489_v63  ;;  %v1942_v45 = vmax.f32 %v1940_v28, %v1941_v62  ;;  %v8663_v63 = vpop.f32.mrb[0].mxu1 }
 0x1d9   :  { %v8631_v3 = vpop.f32.mrb[69].mxu0  ;;  %v1945_v49 = vrot.slane %v1429_v48, 4  ;;  %v1951_v36 = vrot.slane %v1430_v7, 4  ;;  %v1957_v15 = vrot.slane %v1431_v14, 4  ;;  %v1937_v16 = vrot.slane %v1936_v13, 1  ;;  %12676 = vst [vmem:[#allocation63_spill] sm:$0xff] %v8663_v63 }
 0x1da   :  { %v8635_v24 = vpop.f32.mrb[70].mxu0  ;;  %v1963_v30 = vrot.slane %v1432_v43, 4  ;;  %v1433_v54 = vadd.f32 %v8554_v35, %v8508_v42  ;;  %v1434_v41 = vadd.f32 %v8563_v8, %v8512_v56  ;;  %v1919_v29 = vrot.slane %v1918_v10, 1  ;;  %v8675_v27 = vpop.f32.mrb[1].mxu1 }
 0x1db   :  { %v8643_v47 = vpop.f32.mrb[71].mxu0  ;;  %v1946_v32 = vmax.f32 %v1429_v48, %v1945_v49  ;;  %v1952_v17 = vmax.f32 %v1430_v7, %v1951_v36  ;;  %v1958_v2 = vmax.f32 %v1431_v14, %v1957_v15  ;;  %v1908_v28 = vmax.f32 %v1906_v37, %v1907_v60  ;;  %12678 = vst [vmem:[#allocation65_spill] sm:$0xff] %v8675_v27 }
 0x1dc   :  { %v1964_v62 = vmax.f32 %v1432_v43, %v1963_v30  ;;  %v1969_v61 = vrot.slane %v1433_v54, 4  ;;  %v1975_v12 = vrot.slane %v1434_v41, 4  ;;  %v8667_v42 = vmax.f32 %v1902_v9, 0.0 }
 0x1dd   :  { %v1926_v46 = vmax.f32 %v1924_v51, %v1925_v0  ;;  %v1947_v56 = vrot.slane %v1946_v32, 2  ;;  %v1953_v55 = vrot.slane %v1952_v17, 2  ;;  %v1914_v49 = vmax.f32 %v1912_v6, %v1913_v19 }
 0x1de   :  { %12677 = vst [vmem:[#allocation64_spill] sm:$0xff] %v8667_v42  ;;  %v1932_v48 = vmax.f32 %v1930_v34, %v1931_v57  ;;  %v1938_v7 = vmax.f32 %v1936_v13, %v1937_v16  ;;  %v1943_v14 = vrot.slane %v1942_v45, 1  ;;  %v8671_v36 = vunpack.c.l.b16 %v3467_v58 }
 0x1df   :  { %v1959_v15 = vrot.slane %v1958_v2, 2  ;;  %v1965_v37 = vrot.slane %v1964_v62, 2  ;;  %v1970_v43 = vmax.f32 %v1433_v54, %v1969_v61  ;;  %v8673_v60 = vunpack.c.l.b16 %v3468_v50 }
 0x1e0   :  { %v8659_v33 = vpop.f32.mrb[72].mxu0  ;;  %v1948_v30 = vmax.f32 %v1946_v32, %v1947_v56  ;;  %v1954_v63 = vmax.f32 %v1952_v17, %v1953_v55  ;;  %v1976_v9 = vmax.f32 %v1434_v41, %v1975_v12  ;;  %v3469_v51 = vpack.c.bf16 %v8667_v42, %v8667_v42 }
 0x1e1   :  { %v8661_v44 = vpop.f32.mrb[73].mxu0  ;;  %v8679_v0 = vmax.f32 %v1908_v28, 0.0  ;;  %v1920_v6 = vmax.f32 %v1918_v10, %v1919_v29  ;;  %v8681_v34 = vmax.f32 %v1926_v46, 0.0  ;;  %v8683_v58 = vmax.f32 %v1914_v49, 0.0 }
 0x1e2   :  { %v8665_v5 = vpop.f32.mrb[74].mxu0  ;;  %v8685_v13 = vmax.f32 %v1932_v48, 0.0  ;;  %v8687_v61 = vmax.f32 %v1938_v7, 0.0  ;;  %v1944_v50 = vmax.f32 %v1942_v45, %v1943_v14  ;;  %v1960_v12 = vmax.f32 %v1958_v2, %v1959_v15 }
 0x1e3   :  { %v8669_v39 = vpop.f32.mrb[75].mxu0  ;;  %12679 = vst [vmem:[#allocation66_spill] sm:$0xff] %v8679_v0  ;;  %12680 = vst [vmem:[#allocation67_spill] sm:$0xff] %v8681_v34  ;;  %v1966_v55 = vmax.f32 %v1964_v62, %v1965_v37  ;;  %v1971_v17 = vrot.slane %v1970_v43, 2  ;;  %v1435_v57 = vadd.f32 %v8554_v35, %v8517_v52  ;;  %v1949_v10 = vrot.slane %v1948_v30, 1 }
 0x1e4   :  { %12681 = vst [vmem:[#allocation68_spill] sm:$0xff] %v8683_v58  ;;  %12682 = vst [vmem:[#allocation69_spill] sm:$0xff] %v8685_v13  ;;  %v1955_v46 = vrot.slane %v1954_v63, 1  ;;  %v1977_v54 = vrot.slane %v1976_v9, 2  ;;  %v1436_v41 = vadd.f32 %v8563_v8, %v8525_v53  ;;  %v3470_v45 = vpack.c.bf16 %v8679_v0, %v8679_v0 }
 0x1e5   :  { %12683 = vst [vmem:[#allocation70_spill] sm:$0xff] %v8687_v61  ;;  %v8701_v32 = vmax.f32 %v1920_v6, 0.0  ;;  %v3473_v2 = vpack.c.bf16 %v8681_v34, %v8681_v34  ;;  %v1981_v28 = vrot.slane %v1435_v57, 4  ;;  %v3474_v62 = vpack.c.bf16 %v8685_v13, %v8685_v13 }
 0x1e6   :  { %v3475_v56 = vpack.c.bf16 %v8687_v61, %v8687_v61  ;;  %v8711_v53 = vmax.f32 %v1944_v50, 0.0  ;;  %v1987_v49 = vrot.slane %v1436_v41, 4  ;;  %v8713_v48 = vunpack.c.l.b16 %v3469_v51 }
 0x1e7   :  { %12685 = vst [vmem:[#allocation72_spill] sm:$0xff] %v8701_v32  ;;  %v1961_v7 = vrot.slane %v1960_v12, 1  ;;  %v1967_v14 = vrot.slane %v1966_v55, 1  ;;  %v1972_v15 = vmax.f32 %v1970_v43, %v1971_v17  ;;  %v1950_v6 = vmax.f32 %v1948_v30, %v1949_v10  ;;  %v8729_v10 = vpop.f32.mrb[2].mxu1 }
 0x1e8   :  { %v8689_v19 = vpop.f32.mrb[76].mxu0  ;;  %12687 = vst [vmem:[#allocation74_spill] sm:$0xff] %v8711_v53  ;;  %v1956_v42 = vmax.f32 %v1954_v63, %v1955_v46  ;;  %v1978_v34 = vmax.f32 %v1976_v9, %v1977_v54  ;;  %v8717_v0 = vunpack.c.l.b16 %v3470_v45  ;;  %v1982_v61 = vmax.f32 %v1435_v57, %v1981_v28  ;;  %12690 = vst [vmem:[#allocation77_spill] sm:$0xff] %v8729_v10 }
 0x1e9   :  { %v8693_v16 = vpop.f32.mrb[77].mxu0  ;;  %v1988_v50 = vmax.f32 %v1436_v41, %v1987_v49  ;;  %v4071_v27 = vunpack.c.l.b16 %v3473_v2  ;;  %v4073_v51 = vunpack.c.l.b16 %v3475_v56  ;;  %v1962_v17 = vmax.f32 %v1960_v12, %v1961_v7  ;;  %v8739_v12 = vpop.f32.mrb[3].mxu1 }
 0x1ea   :  { %v8697_v29 = vpop.f32.mrb[78].mxu0  ;;  %v1968_v37 = vmax.f32 %v1966_v55, %v1967_v14  ;;  %v1973_v30 = vrot.slane %v1972_v15, 1  ;;  %v1437_v63 = vadd.f32 %v8554_v35, %v8548_v18  ;;  %v8731_v57 = vmax.f32 %v1950_v6, 0.0  ;;  %12694 = vst [vmem:[#allocation81_spill] sm:$0xff] %v8739_v12  ;;  %v8745_v56 = vpop.f32.mrb[4].mxu1 }
 0x1eb   :  { %12684 = vst [vmem:[#allocation71_spill] sm:$0xff] %v8697_v29  ;;  %v8705_v52 = vpop.f32.mrb[79].mxu0  ;;  %v3476_v29 = vpack.c.bf16 %v8711_v53, %v8711_v53  ;;  %v8733_v46 = vmax.f32 %v1956_v42, 0.0  ;;  %v1979_v54 = vrot.slane %v1978_v34, 1  ;;  %v1438_v41 = vadd.f32 %v8563_v8, %v8558_v1  ;;  %12696 = vst [vmem:[#allocation83_spill] sm:$0xff] %v8745_v56 }
 0x1ec   :  { %12686 = vst [vmem:[#allocation73_spill] sm:$0xff] %v8705_v52  ;;  %v4072_v52 = vunpack.c.l.b16 %v3474_v62  ;;  %12691 = vst [vmem:[#allocation78_spill] sm:$0xff] %v8731_v57  ;;  %v1983_v55 = vrot.slane %v1982_v61, 2  ;;  %v1989_v2 = vrot.slane %v1988_v50, 2  ;;  %v1993_v28 = vrot.slane %v1437_v63, 4 }
 0x1ed   :  { %12692 = vst [vmem:[#allocation79_spill] sm:$0xff] %v8733_v46  ;;  %v1439_v18 = vadd.f32 %v8554_v35, %v8567_v20  ;;  %v1999_v42 = vrot.slane %v1438_v41, 4  ;;  %v1440_v49 = vadd.f32 %v8563_v8, %v8571_v23  ;;  %v1441_v1 = vadd.f32 %v8554_v35, %v8591_v59 }
 0x1ee   :  { %v1442_v7 = vadd.f32 %v8563_v8, %v8597_v25  ;;  %v8753_v14 = vmax.f32 %v1962_v17, 0.0  ;;  %v8755_v6 = vmax.f32 %v1968_v37, 0.0  ;;  %v1974_v13 = vmax.f32 %v1972_v15, %v1973_v30 }
 0x1ef   :  { %v1994_v20 = vmax.f32 %v1437_v63, %v1993_v28  ;;  %v4074_v53 = vunpack.c.l.b16 %v3476_v29  ;;  %v1980_v12 = vmax.f32 %v1978_v34, %v1979_v54  ;;  %v2017_v10 = vrot.slane %v1441_v1, 4 }
 0x1f0   :  { %v8723_v43 = vpop.f32.mrb[80].mxu0  ;;  %12697 = vst [vmem:[#allocation84_spill] sm:$0xff] %v8753_v14  ;;  %12698 = vst [vmem:[#allocation85_spill] sm:$0xff] %v8755_v6  ;;  %v2023_v56 = vrot.slane %v1442_v7, 4  ;;  %v3477_v23 = vpack.c.bf16 %v8731_v57, %v8731_v57  ;;  %v1990_v59 = vmax.f32 %v1988_v50, %v1989_v2  ;;  %v3478_v25 = vpack.c.bf16 %v8733_v46, %v8733_v46 }
 0x1f1   :  { %12688 = vst [vmem:[#allocation75_spill] sm:$0xff] %v8723_v43  ;;  %v8727_v9 = vpop.f32.mrb[81].mxu0  ;;  %v1995_v37 = vrot.slane %v1994_v20, 2  ;;  %v2000_v15 = vmax.f32 %v1438_v41, %v1999_v42  ;;  %v2011_v17 = vrot.slane %v1440_v49, 4  ;;  %v4328_v34 = vsel %vm4279_vm0, %v4073_v51, %v4071_v27 }
 0x1f2   :  { %12689 = vst [vmem:[#allocation76_spill] sm:$0xff] %v8727_v9  ;;  %v8737_v45 = vpop.f32.mrb[82].mxu0  ;;  %v2005_v9 = vrot.slane %v1439_v18, 4  ;;  %v3479_v30 = vpack.c.bf16 %v8753_v14, %v8753_v14  ;;  %v8772_v50 = vmax.f32 %v1974_v13, 0.0  ;;  %v4335_v54 = vsel %vm4279_vm0, %v4074_v53, %v4072_v52 }
 0x1f3   :  { %12693 = vst [vmem:[#allocation80_spill] sm:$0xff] %v8737_v45  ;;  %v8743_v62 = vpop.f32.mrb[83].mxu0  ;;  %v1984_v45 = vmax.f32 %v1982_v61, %v1983_v55  ;;  %v3480_v61 = vpack.c.bf16 %v8755_v6, %v8755_v6  ;;  %v8777_v55 = vmax.f32 %v1980_v12, 0.0  ;;  %v2018_v41 = vmax.f32 %v1441_v1, %v2017_v10 }
 0x1f4   :  { %12695 = vst [vmem:[#allocation82_spill] sm:$0xff] %v8743_v62  ;;  %v8757_v62 = vpop.f32.mrb[5].mxu1  ;;  %12701 = vst [vmem:[#allocation88_spill] sm:$0xff] %v8772_v50  ;;  %v2024_v2 = vmax.f32 %v1442_v7, %v2023_v56  ;;  %v4075_v42 = vunpack.c.l.b16 %v3477_v23  ;;  %v1991_v51 = vrot.slane %v1990_v59, 1  ;;  %v2006_v57 = vmax.f32 %v1439_v18, %v2005_v9 }
 0x1f5   :  { %12699 = vst [vmem:[#allocation86_spill] sm:$0xff] %v8757_v62  ;;  %v8761_v43 = vpop.f32.mrb[6].mxu1  ;;  %12703 = vst [vmem:[#allocation90_spill] sm:$0xff] %v8777_v55  ;;  %v1985_v27 = vrot.slane %v1984_v45, 1  ;;  %v4076_v46 = vunpack.c.l.b16 %v3478_v25  ;;  %v1996_v6 = vmax.f32 %v1994_v20, %v1995_v37  ;;  %v2001_v13 = vrot.slane %v2000_v15, 2 }
 0x1f6   :  { %12700 = vst [vmem:[#allocation87_spill] sm:$0xff] %v8761_v43  ;;  %v2012_v43 = vmax.f32 %v1440_v49, %v2011_v17  ;;  %v8783_v62 = vpop.f32.mrb[7].mxu1  ;;  %v8787_v52 = vunpack.c.l.b16 %v3480_v61  ;;  %v3481_v53 = vpack.c.bf16 %v8772_v50, %v8772_v50  ;;  %v1443_v10 = vadd.f32 %v8554_v35, %v8599_v26 }
 0x1f7   :  { %12706 = vst [vmem:[#allocation93_spill] sm:$0xff] %v8783_v62  ;;  %v3482_v9 = vpack.c.bf16 %v8777_v55, %v8777_v55  ;;  %v2019_v12 = vrot.slane %v2018_v41, 2  ;;  %v2025_v18 = vrot.slane %v2024_v2, 2  ;;  %v1444_v56 = vadd.f32 %v8563_v8, %v8607_v4 }
 0x1f8   :  { %v8765_v29 = vpop.f32.mrb[84].mxu0  ;;  %v1986_v49 = vmax.f32 %v1984_v45, %v1985_v27  ;;  %v1992_v1 = vmax.f32 %v1990_v59, %v1991_v51  ;;  %v2007_v7 = vrot.slane %v2006_v57, 2  ;;  %v2029_v20 = vrot.slane %v1443_v10, 4 }
 0x1f9   :  { %v8774_v63 = vpop.f32.mrb[85].mxu0  ;;  %v1997_v23 = vrot.slane %v1996_v6, 1  ;;  %v2002_v25 = vmax.f32 %v2000_v15, %v2001_v13  ;;  %v2013_v37 = vrot.slane %v2012_v43, 2  ;;  %v2035_v17 = vrot.slane %v1444_v56, 4 }
 0x1fa   :  { %12702 = vst [vmem:[#allocation89_spill] sm:$0xff] %v8774_v63  ;;  %v8779_v28 = vpop.f32.mrb[86].mxu0  ;;  %v8785_v63 = vunpack.c.l.b16 %v3479_v30  ;;  %v8800_v26 = vsel %vm4281_vm1, %v4075_v42, %v4328_v34  ;;  %v8803_v61 = vsel %vm4281_vm1, %v4076_v46, %v4335_v54  ;;  %v8805_v50 = vunpack.c.l.b16 %v3481_v53 }
 0x1fb   :  { %12704 = vst [vmem:[#allocation91_spill] sm:$0xff] %v8779_v28  ;;  %v8781_v14 = vpop.f32.mrb[87].mxu0  ;;  %v2030_v55 = vmax.f32 %v1443_v10, %v2029_v20  ;;  %v8809_v45 = vunpack.c.l.b16 %v3482_v9  ;;  %v2020_v59 = vmax.f32 %v2018_v41, %v2019_v12  ;;  %v2026_v27 = vmax.f32 %v2024_v2, %v2025_v18 }
 0x1fc   :  { %12705 = vst [vmem:[#allocation92_spill] sm:$0xff] %v8781_v14  ;;  %v2036_v15 = vmax.f32 %v1444_v56, %v2035_v17  ;;  %v8813_v13 = vmax.f32 %v1986_v49, 0.0  ;;  %v8815_v62 = vmax.f32 %v1992_v1, 0.0  ;;  %v2008_v34 = vmax.f32 %v2006_v57, %v2007_v7 }
 0x1fd   :  { %v2031_v42 = vrot.slane %v2030_v55, 2  ;;  %v1998_v54 = vmax.f32 %v1996_v6, %v1997_v23  ;;  %v2003_v53 = vrot.slane %v2002_v25, 1  ;;  %v2014_v10 = vmax.f32 %v2012_v43, %v2013_v37 }
 0x1fe   :  { %12710 = vst [vmem:[#allocation97_spill] sm:$0xff] %v8813_v13  ;;  %12711 = vst [vmem:[#allocation98_spill] sm:$0xff] %v8815_v62  ;;  %v2037_v20 = vrot.slane %v2036_v15, 2  ;;  %v1445_v41 = vadd.f32 %v8554_v35, %v8624_v31  ;;  %v1446_v2 = vadd.f32 %v8563_v8, %v8631_v3  ;;  %v1447_v9 = vadd.f32 %v8554_v35, %v8635_v24 }
 0x1ff   :  { %v2021_v12 = vrot.slane %v2020_v59, 1  ;;  %v2027_v18 = vrot.slane %v2026_v27, 1  ;;  %v1448_v56 = vadd.f32 %v8563_v8, %v8643_v47  ;;  %v1449_v3 = vadd.f32 %v8554_v35, %v8659_v33 }
 0x200   :  { %v8797_v30 = vpop.f32.mrb[88].mxu0  ;;  %v2038_v57 = vmax.f32 %v2036_v15, %v2037_v20  ;;  %v2041_v49 = vrot.slane %v1445_v41, 4  ;;  %v2047_v43 = vrot.slane %v1446_v2, 4  ;;  %v2053_v1 = vrot.slane %v1447_v9, 4 }
 0x201   :  { %12707 = vst [vmem:[#allocation94_spill] sm:$0xff] %v8797_v30  ;;  %v8807_v4 = vpop.f32.mrb[89].mxu0  ;;  %v2059_v31 = vrot.slane %v1448_v56, 4  ;;  %v1450_v24 = vadd.f32 %v8563_v8, %v8661_v44  ;;  %v2065_v14 = vrot.slane %v1449_v3, 4  ;;  %v3483_v44 = vpack.c.bf16 %v8813_v13, %v8813_v13 }
 0x202   :  { %12708 = vst [vmem:[#allocation95_spill] sm:$0xff] %v8807_v4  ;;  %v8811_v51 = vpop.f32.mrb[90].mxu0  ;;  %v2032_v4 = vmax.f32 %v2030_v55, %v2031_v42  ;;  %v8827_v55 = vpop.f32.mrb[8].mxu1  ;;  %v2039_v7 = vrot.slane %v2038_v57, 1  ;;  %v2042_v47 = vmax.f32 %v1445_v41, %v2041_v49  ;;  %v2048_v15 = vmax.f32 %v1446_v2, %v2047_v43 }
 0x203   :  { %12709 = vst [vmem:[#allocation96_spill] sm:$0xff] %v8811_v51  ;;  %v8817_v46 = vpop.f32.mrb[91].mxu0  ;;  %12713 = vst [vmem:[#allocation100_spill] sm:$0xff] %v8827_v55  ;;  %v8835_v37 = vpop.f32.mrb[9].mxu1  ;;  %v2054_v42 = vmax.f32 %v1447_v9, %v2053_v1  ;;  %v2009_v55 = vrot.slane %v2008_v34, 1  ;;  %v2060_v30 = vmax.f32 %v1448_v56, %v2059_v31  ;;  %v2028_v41 = vmax.f32 %v2026_v27, %v2027_v18 }
 0x204   :  { %12712 = vst [vmem:[#allocation99_spill] sm:$0xff] %v8817_v46  ;;  %v2033_v6 = vrot.slane %v2032_v4, 1  ;;  %12714 = vst [vmem:[#allocation101_spill] sm:$0xff] %v8835_v37  ;;  %v8839_v46 = vpop.f32.mrb[10].mxu1  ;;  %v2040_v51 = vmax.f32 %v2038_v57, %v2039_v7  ;;  %v2015_v37 = vrot.slane %v2014_v10, 1  ;;  %v2004_v57 = vmax.f32 %v2002_v25, %v2003_v53 }
 0x205   :  { %12715 = vst [vmem:[#allocation102_spill] sm:$0xff] %v8839_v46  ;;  %v8843_v28 = vpop.f32.mrb[11].mxu1  ;;  %v2043_v56 = vrot.slane %v2042_v47, 2  ;;  %v2071_v49 = vrot.slane %v1450_v24, 4  ;;  %v2049_v31 = vrot.slane %v2048_v15, 2  ;;  %v2055_v13 = vrot.slane %v2054_v42, 2 }
 0x206   :  { %v2034_v17 = vmax.f32 %v2032_v4, %v2033_v6  ;;  %12716 = vst [vmem:[#allocation103_spill] sm:$0xff] %v8843_v28  ;;  %v2022_v4 = vmax.f32 %v2020_v59, %v2021_v12  ;;  %v8849_v9 = vpop.f32.mrb[12].mxu1  ;;  %v3484_v6 = vpack.c.bf16 %v8815_v62, %v8815_v62  ;;  %v8857_v7 = vmax.f32 %v2040_v51, 0.0 }
 0x207   :  { %12717 = vst [vmem:[#allocation104_spill] sm:$0xff] %v8849_v9  ;;  %v8853_v43 = vpop.f32.mrb[13].mxu1  ;;  %v8861_v27 = vmax.f32 %v1998_v54, 0.0  ;;  %v2010_v12 = vmax.f32 %v2008_v34, %v2009_v55  ;;  %v2061_v18 = vrot.slane %v2060_v30, 2  ;;  %v2066_v9 = vmax.f32 %v1449_v3, %v2065_v14 }
 0x208   :  { %v8833_v23 = vpop.f32.mrb[92].mxu0  ;;  %12718 = vst [vmem:[#allocation105_spill] sm:$0xff] %v8853_v43  ;;  %v8855_v1 = vmax.f32 %v2034_v17, 0.0  ;;  %12720 = vst [vmem:[#allocation107_spill] sm:$0xff] %v8857_v7  ;;  %v8859_v59 = vpop.f32.mrb[14].mxu1  ;;  %v8865_v25 = vunpack.c.l.b16 %v3483_v44  ;;  %v2016_v53 = vmax.f32 %v2014_v10, %v2015_v37  ;;  %v8867_v62 = vmax.f32 %v2022_v4, 0.0 }
 0x209   :  { %v8837_v20 = vpop.f32.mrb[93].mxu0  ;;  %12721 = vst [vmem:[#allocation108_spill] sm:$0xff] %v8859_v59  ;;  %12722 = vst [vmem:[#allocation109_spill] sm:$0xff] %v8861_v27  ;;  %v8863_v28 = vpop.f32.mrb[15].mxu1  ;;  %v8869_v17 = vmax.f32 %v2028_v41, 0.0  ;;  %v8873_v43 = vunpack.c.l.b16 %v3484_v6  ;;  %v8875_v46 = vmax.f32 %v2004_v57, 0.0  ;;  %v2044_v54 = vmax.f32 %v2042_v47, %v2043_v56 }
 0x20a   :  { %v8841_v33 = vpop.f32.mrb[94].mxu0  ;;  %12719 = vst [vmem:[#allocation106_spill] sm:$0xff] %v8855_v1  ;;  %12723 = vst [vmem:[#allocation110_spill] sm:$0xff] %v8863_v28  ;;  %v8871_v51 = vpop.f32.mrb[16].mxu1  ;;  %v2072_v59 = vmax.f32 %v1450_v24, %v2071_v49  ;;  %v3491_v14 = vpack.c.bf16 %v8855_v1, %v8855_v1  ;;  %v3492_v10 = vpack.c.bf16 %v8857_v7, %v8857_v7  ;;  %v8889_v41 = vmax.f32 %v2010_v12, 0.0 }
 0x20b   :  { %v8847_v2 = vpop.f32.mrb[95].mxu0  ;;  %12724 = vst [vmem:[#allocation111_spill] sm:$0xff] %v8867_v62  ;;  %12725 = vst [vmem:[#allocation112_spill] sm:$0xff] %v8869_v17  ;;  %v2050_v55 = vmax.f32 %v2048_v15, %v2049_v31  ;;  %v2056_v3 = vmax.f32 %v2054_v42, %v2055_v13  ;;  %v8885_v44 = vpop.f32.mrb[17].mxu1  ;;  %v3485_v4 = vpack.c.bf16 %v8861_v27, %v8861_v27  ;;  %v2067_v47 = vrot.slane %v2066_v9, 2 }
 0x20c   :  { %12726 = vst [vmem:[#allocation113_spill] sm:$0xff] %v8871_v51  ;;  %12727 = vst [vmem:[#allocation114_spill] sm:$0xff] %v8875_v46  ;;  %v2062_v24 = vmax.f32 %v2060_v30, %v2061_v18  ;;  %v8893_v57 = vmax.f32 %v2016_v53, 0.0  ;;  %v3489_v56 = vpack.c.bf16 %v8867_v62, %v8867_v62  ;;  %v3490_v13 = vpack.c.bf16 %v8869_v17, %v8869_v17 }
 0x20d   :  { %12729 = vst [vmem:[#allocation116_spill] sm:$0xff] %v8885_v44  ;;  %12730 = vst [vmem:[#allocation117_spill] sm:$0xff] %v8889_v41  ;;  %v1451_v15 = vadd.f32 %v8554_v35, %v8665_v5  ;;  %v3486_v49 = vpack.c.bf16 %v8875_v46, %v8875_v46  ;;  %v2045_v30 = vrot.slane %v2044_v54, 1  ;;  %v2073_v31 = vrot.slane %v2072_v59, 2 }
 0x20e   :  { %12732 = vst [vmem:[#allocation119_spill] sm:$0xff] %v8893_v57  ;;  %v1452_v12 = vadd.f32 %v8563_v8, %v8669_v39  ;;  %v4089_v18 = vunpack.c.l.b16 %v3491_v14  ;;  %v4090_v53 = vunpack.c.l.b16 %v3492_v10  ;;  %v2051_v1 = vrot.slane %v2050_v55, 1 }
 0x20f   :  { %v2057_v62 = vrot.slane %v2056_v3, 1  ;;  %v2063_v7 = vrot.slane %v2062_v24, 1  ;;  %v8907_v27 = vmax.f32 %v2066_v9, %v2067_v47  ;;  %v2077_v17 = vrot.slane %v1451_v15, 4 }
 0x210   :  { %v8877_v34 = vpop.f32.mrb[96].mxu0  ;;  %v2083_v44 = vrot.slane %v1452_v12, 4  ;;  %v4083_v5 = vunpack.c.l.b16 %v3485_v4  ;;  %v3488_v51 = vpack.c.bf16 %v8893_v57, %v8893_v57  ;;  %v4087_v28 = vunpack.c.l.b16 %v3489_v56  ;;  %v8925_v56 = vpop.f32.mrb[18].mxu1 }
 0x211   :  { %v8883_v37 = vpop.f32.mrb[97].mxu0  ;;  %v4088_v46 = vunpack.c.l.b16 %v3490_v13  ;;  %v2046_v39 = vmax.f32 %v2044_v54, %v2045_v30  ;;  %v8913_v14 = vmax.f32 %v2072_v59, %v2073_v31  ;;  %v2052_v4 = vmax.f32 %v2050_v55, %v2051_v1 }
 0x212   :  { %12728 = vst [vmem:[#allocation115_spill] sm:$0xff] %v8883_v37  ;;  %v8891_v6 = vpop.f32.mrb[98].mxu0  ;;  %v8918_v9 = vsel %vm4279_vm0, %v4089_v18, %v4087_v28  ;;  %v2058_v37 = vmax.f32 %v2056_v3, %v2057_v62  ;;  %v2064_v13 = vmax.f32 %v2062_v24, %v2063_v7  ;;  %v2078_v54 = vmax.f32 %v1451_v15, %v2077_v17  ;;  %v12737_v24 = vld [vmem:[#allocation62_spill] sm:$0xff] }
 0x213   :  { %12731 = vst [vmem:[#allocation118_spill] sm:$0xff] %v8891_v6  ;;  %v8901_v42 = vpop.f32.mrb[99].mxu0  ;;  %v3487_v6 = vpack.c.bf16 %v8889_v41, %v8889_v41  ;;  %v8921_v47 = vsel %vm4279_vm0, %v4090_v53, %v4088_v46  ;;  %v2084_v59 = vmax.f32 %v1452_v12, %v2083_v44  ;;  %v12734_v28 = vpack.c.bf16 %v8701_v32, %v8701_v32 }
 0x214   :  { %12733 = vst [vmem:[#allocation120_spill] sm:$0xff] %v8901_v42  ;;  %v4084_v42 = vunpack.c.l.b16 %v3486_v49  ;;  %v2069_v49 = vrot.slane %v8907_v27, 1  ;;  %v4086_v18 = vunpack.c.l.b16 %v3488_v51  ;;  %v4323_v62 = vsel %vm4283_vm2, %v8633_v11, %v8627_v21 }
 0x215   :  { %v4070_v31 = vunpack.c.l.b16 %v12734_v28  ;;  %v4337_v46 = vsel %vm4283_vm2, %v8787_v52, %v8803_v61  ;;  %v8941_v7 = vmax.f32 %v2046_v39, 0.0  ;;  %v2075_v17 = vrot.slane %v8913_v14, 1 }
 0x216   :  { %v4324_v55 = vsel %vm4285_vm3, %v8639_v22, %v4323_v62  ;;  %v4338_v51 = vsel %vm4285_vm3, %v8809_v45, %v4337_v46  ;;  %v8948_v3 = vmax.f32 %v2052_v4, 0.0  ;;  %v4316_v52 = vsel %vm4283_vm2, %v8629_v40, %v8612_v38 }
 0x217   :  { %12735 = vst [vmem:[#allocation121_spill] sm:$0xff] %v8941_v7  ;;  %v4325_v11 = vsel %vm4287_vm4, %v8673_v60, %v4324_v55  ;;  %v4339_v21 = vsel %vm4287_vm4, %v8873_v43, %v4338_v51  ;;  %v2079_v61 = vrot.slane %v2078_v54, 2  ;;  %v4317_v45 = vsel %vm4285_vm3, %v12737_v24, %v4316_v52  ;;  %v12743_v55 = vld [vmem:[#allocation73_spill] sm:$0xff] }
 0x218   :  { %v8915_v10 = vpop.f32.mrb[100].mxu0  ;;  %12736 = vst [vmem:[#allocation122_spill] sm:$0xff] %v8948_v3  ;;  %v4326_v44 = vsel %vm4289_vm5, %v8717_v0, %v4325_v11  ;;  %v4340_v22 = vsel %vm4289_vm5, %v4084_v42, %v4339_v21  ;;  %v2085_v15 = vrot.slane %v2084_v59, 2  ;;  %v12738_v43 = vpack.c.bf16 %v8683_v58, %v8683_v58 }
 0x219   :  { %v8923_v57 = vpop.f32.mrb[101].mxu0  ;;  %v4327_v12 = vsel %vm4291_vm6, %v4070_v31, %v4326_v44  ;;  %v4341_v60 = vsel %vm4291_vm6, %v4086_v18, %v4340_v22  ;;  %v4085_v38 = vunpack.c.l.b16 %v3487_v6  ;;  %v4318_v40 = vsel %vm4287_vm4, %v8671_v36, %v4317_v45  ;;  %v12745_v45 = vld [vmem:[#allocation75_spill] sm:$0xff] }
 0x21a   :  { %v8928_v30 = vpop.f32.mrb[102].mxu0  ;;  %v4069_v53 = vunpack.c.l.b16 %v12738_v43  ;;  %v8967_v39 = vpack.c.b16 %v4341_v60, %v4327_v12  ;;  %v4330_v0 = vsel %vm4283_vm2, %v8785_v63, %v8800_v26  ;;  %v8976_v4 = vmax.f32 %v2058_v37, 0.0  ;;  %v12742_v37 = vld [vmem:[#allocation71_spill] sm:$0xff]  ;;  %v12747_v60 = vld [vmem:[#allocation80_spill] sm:$0xff] }
 0x21b   :  { %v8939_v1 = vpop.f32.mrb[103].mxu0  ;;  %v4319_v28 = vsel %vm4289_vm5, %v8713_v48, %v4318_v40  ;;  %v4331_v31 = vsel %vm4285_vm3, %v8805_v50, %v4330_v0  ;;  %v1453_v6 = vadd.f32 %v8554_v35, %v8689_v19  ;;  %v8986_v36 = vmax.f32 %v2064_v13, 0.0 }
 0x21c   :  { %12739 = vst [vmem:[#allocation62_spill] sm:$0xff] %v8967_v39  ;;  %12740 = vst [vmem:[#allocation123_spill] sm:$0xff] %v8976_v4  ;;  %4904 = vmatprep.mubr.bf16.mxu1 %v8967_v39  ;;  %v4332_v63 = vsel %vm4287_vm4, %v8865_v25, %v4331_v31  ;;  %v1454_v26 = vadd.f32 %v8563_v8, %v8693_v16  ;;  %v1455_v48 = vadd.f32 %v8554_v35, %v12742_v37 }
 0x21d   :  { %12741 = vst [vmem:[#allocation124_spill] sm:$0xff] %v8986_v36  ;;  %v2080_v50 = vmax.f32 %v2078_v54, %v2079_v61  ;;  %v4333_v19 = vsel %vm4289_vm5, %v4083_v5, %v4332_v63  ;;  %v2089_v46 = vrot.slane %v1453_v6, 4  ;;  %v1456_v13 = vadd.f32 %v8563_v8, %v12743_v55 }
 0x21e   :  { %v2086_v11 = vmax.f32 %v2084_v59, %v2085_v15  ;;  %v4320_v25 = vsel %vm4291_vm6, %v4069_v53, %v4319_v28  ;;  %v4334_v21 = vsel %vm4291_vm6, %v4085_v38, %v4333_v19  ;;  %v2095_v16 = vrot.slane %v1454_v26, 4 }
 0x21f   :  { %v2070_v52 = vmax.f32 %v8907_v27, %v2069_v49  ;;  %v9005_v44 = vpack.c.b16 %v4334_v21, %v4320_v25  ;;  %v2090_v22 = vmax.f32 %v1453_v6, %v2089_v46  ;;  %v2101_v54 = vrot.slane %v1455_v48, 4  ;;  %v12746_v27 = vld [vmem:[#allocation76_spill] sm:$0xff] }
 0x220   :  { %v8974_v42 = vpop.f32.mrb[104].mxu0  ;;  %v3493_v5 = vpack.c.bf16 %v8941_v7, %v8941_v7  ;;  %v2076_v61 = vmax.f32 %v8913_v14, %v2075_v17  ;;  %v2107_v24 = vrot.slane %v1456_v13, 4  ;;  %v1457_v59 = vadd.f32 %v8554_v35, %v12745_v45  ;;  %v12748_v14 = vld [vmem:[#allocation82_spill] sm:$0xff] }
 0x221   :  { %v8984_v18 = vpop.f32.mrb[105].mxu0  ;;  %12744 = vst [vmem:[#allocation71_spill] sm:$0xff] %v9005_v44  ;;  %v3494_v15 = vpack.c.bf16 %v8948_v3, %v8948_v3  ;;  %4905 = vmatmul.mubr.bf16.gmra.mrb[84].mxu1 %v9005_v44  ;;  %v2096_v12 = vmax.f32 %v1454_v26, %v2095_v16  ;;  %v1458_v49 = vadd.f32 %v8563_v8, %v12746_v27  ;;  %v2081_v53 = vrot.slane %v2080_v50, 1  ;;  %v9075_v3 = vld [vmem:[#allocation7] sm:$0xff] }
 0x222   :  { %v8995_v62 = vpop.f32.mrb[106].mxu0  ;;  %v1459_v43 = vadd.f32 %v8554_v35, %v12747_v60  ;;  %v2087_v38 = vrot.slane %v2086_v11, 1  ;;  %v2113_v40 = vrot.slane %v1457_v59, 4  ;;  %v1460_v17 = vadd.f32 %v8563_v8, %v12748_v14 }
 0x223   :  { %v9000_v51 = vpop.f32.mrb[107].mxu0  ;;  %v2091_v0 = vrot.slane %v2090_v22, 2  ;;  %v2102_v28 = vmax.f32 %v1455_v48, %v2101_v54  ;;  %v2119_v31 = vrot.slane %v1458_v49, 4  ;;  %v9021_v63 = vmax.f32 %v2070_v52, 0.0 }
 0x224   :  { %v2125_v6 = vrot.slane %v1459_v43, 4  ;;  %v2108_v37 = vmax.f32 %v1456_v13, %v2107_v24  ;;  %v2114_v26 = vmax.f32 %v1457_v59, %v2113_v40  ;;  %v2131_v19 = vrot.slane %v1460_v17, 4 }
 0x225   :  { %12749 = vst [vmem:[#allocation73_spill] sm:$0xff] %v9021_v63  ;;  %v9023_v46 = vmax.f32 %v2076_v61, 0.0  ;;  %v2097_v55 = vrot.slane %v2096_v12, 2  ;;  %v2120_v25 = vmax.f32 %v1458_v49, %v2119_v31  ;;  %v3495_v16 = vpack.c.bf16 %v8976_v4, %v8976_v4 }
 0x226   :  { %v2126_v21 = vmax.f32 %v1459_v43, %v2125_v6  ;;  %v2082_v45 = vmax.f32 %v2080_v50, %v2081_v53  ;;  %v2088_v27 = vmax.f32 %v2086_v11, %v2087_v38  ;;  %v2132_v60 = vmax.f32 %v1460_v17, %v2131_v19  ;;  %v9033_v11 = vpop.f32.mrb[19].mxu1 }
 0x227   :  { %12750 = vst [vmem:[#allocation75_spill] sm:$0xff] %v9023_v46  ;;  %v4091_v14 = vunpack.c.l.b16 %v3493_v5  ;;  %v3496_v48 = vpack.c.bf16 %v8986_v36, %v8986_v36  ;;  %v2092_v52 = vmax.f32 %v2090_v22, %v2091_v0  ;;  %v2103_v54 = vrot.slane %v2102_v28, 2 }
 0x228   :  { %v4092_v13 = vunpack.c.l.b16 %v3494_v15  ;;  %v3497_v61 = vpack.c.bf16 %v9021_v63, %v9021_v63  ;;  %v2109_v24 = vrot.slane %v2108_v37, 2  ;;  %v2115_v59 = vrot.slane %v2114_v26, 2 }
 0x229   :  { %v3498_v49 = vpack.c.bf16 %v9023_v46, %v9023_v46  ;;  %v2098_v43 = vmax.f32 %v2096_v12, %v2097_v55  ;;  %v2121_v40 = vrot.slane %v2120_v25, 2  ;;  %v2127_v50 = vrot.slane %v2126_v21, 2 }
 0x22a   :  { %v9035_v5 = vunpack.c.l.b16 %v3495_v16  ;;  %v9037_v53 = vmax.f32 %v2082_v45, 0.0  ;;  %v9039_v22 = vmax.f32 %v2088_v27, 0.0  ;;  %v2133_v15 = vrot.slane %v2132_v60, 2 }
 0x22b   :  { %v9043_v38 = vsel %vm4281_vm1, %v4091_v14, %v8918_v9  ;;  %v9045_v17 = vunpack.c.l.b16 %v3496_v48  ;;  %v2093_v0 = vrot.slane %v2092_v52, 1  ;;  %v2104_v31 = vmax.f32 %v2102_v28, %v2103_v54 }
 0x22c   :  { %12751 = vst [vmem:[#allocation76_spill] sm:$0xff] %v9037_v53  ;;  %12752 = vst [vmem:[#allocation80_spill] sm:$0xff] %v9039_v22  ;;  %v9049_v12 = vsel %vm4281_vm1, %v4092_v13, %v8921_v47  ;;  %v9051_v6 = vunpack.c.l.b16 %v3497_v61  ;;  %v2110_v19 = vmax.f32 %v2108_v37, %v2109_v24  ;;  %v2116_v55 = vmax.f32 %v2114_v26, %v2115_v59  ;;  %v12754_v13 = vld [vmem:[#allocation89_spill] sm:$0xff]  ;;  %v12755_v26 = vld [vmem:[#allocation91_spill] sm:$0xff] }
 0x22d   :  { %v9053_v16 = vunpack.c.l.b16 %v3498_v49  ;;  %v2099_v45 = vrot.slane %v2098_v43, 1  ;;  %v2122_v27 = vmax.f32 %v2120_v25, %v2121_v40  ;;  %v2128_v63 = vmax.f32 %v2126_v21, %v2127_v50  ;;  %v9065_v25 = vpop.f32.mrb[20].mxu1  ;;  %v12757_v49 = vld [vmem:[#allocation92_spill] sm:$0xff] }
 0x22e   :  { %12753 = vst [vmem:[#allocation82_spill] sm:$0xff] %v9051_v6  ;;  %v3499_v9 = vpack.c.bf16 %v9037_v53, %v9037_v53  ;;  %v3500_v14 = vpack.c.bf16 %v9039_v22, %v9039_v22  ;;  %v2134_v28 = vmax.f32 %v2132_v60, %v2133_v15  ;;  %v1461_v47 = vadd.f32 %v8554_v35, %v8765_v29 }
 0x22f   :  { %v2094_v48 = vmax.f32 %v2092_v52, %v2093_v0  ;;  %v2105_v54 = vrot.slane %v2104_v31, 1  ;;  %v1462_v37 = vadd.f32 %v8563_v8, %v12754_v13  ;;  %v1463_v61 = vadd.f32 %v8554_v35, %v12755_v26  ;;  %12756 = vst [vmem:[#allocation89_spill] sm:$0xff] %v9065_v25 }
 0x230   :  { %v2111_v21 = vrot.slane %v2110_v19, 1  ;;  %v2117_v24 = vrot.slane %v2116_v55, 1  ;;  %v2137_v59 = vrot.slane %v1461_v47, 4  ;;  %v1464_v40 = vadd.f32 %v8563_v8, %v12757_v49  ;;  %v12760_v8 = vld [vmem:[#allocation94_spill] sm:$0xff] }
 0x231   :  { %v2100_v60 = vmax.f32 %v2098_v43, %v2099_v45  ;;  %v2123_v50 = vrot.slane %v2122_v27, 1  ;;  %v2129_v15 = vrot.slane %v2128_v63, 1  ;;  %v2143_v29 = vrot.slane %v1462_v37, 4 }
 0x232   :  { %v9069_v52 = vunpack.c.l.b16 %v3499_v9  ;;  %v2135_v0 = vrot.slane %v2134_v28, 1  ;;  %v2138_v53 = vmax.f32 %v1461_v47, %v2137_v59  ;;  %v2149_v13 = vrot.slane %v1463_v61, 4  ;;  %v9081_v47 = vld [vmem:[#allocation7 + $0x8] sm:$0xff] }
 0x233   :  { %v9071_v4 = vunpack.c.l.b16 %v3500_v14  ;;  %v2106_v35 = vmax.f32 %v2104_v31, %v2105_v54  ;;  %v2144_v26 = vmax.f32 %v1462_v37, %v2143_v29  ;;  %v2155_v7 = vrot.slane %v1464_v40, 4  ;;  %v12762_v14 = vld [vmem:[#allocation95_spill] sm:$0xff] }
 0x234   :  { %12758 = vst [vmem:[#allocation91_spill] sm:$0xff] %v9069_v52  ;;  %v9073_v22 = vmax.f32 %v2094_v48, 0.0  ;;  %v2112_v46 = vmax.f32 %v2110_v19, %v2111_v21  ;;  %v2118_v36 = vmax.f32 %v2116_v55, %v2117_v24  ;;  %v1465_v43 = vadd.f32 %v9075_v3, %v12760_v8  ;;  %v12763_v24 = vld [vmem:[#allocation96_spill] sm:$0xff]  ;;  %v12810_v52 = vld [vmem:[#allocation86_spill] sm:$0xff] }
 0x235   :  { %v9079_v45 = vmax.f32 %v2100_v60, 0.0  ;;  %v2124_v9 = vmax.f32 %v2122_v27, %v2123_v50  ;;  %v2130_v49 = vmax.f32 %v2128_v63, %v2129_v15  ;;  %v1466_v31 = vadd.f32 %v9081_v47, %v12762_v14  ;;  %v12766_v27 = vld [vmem:[#allocation99_spill] sm:$0xff] }
 0x236   :  { %12759 = vst [vmem:[#allocation92_spill] sm:$0xff] %v9073_v22  ;;  %v2136_v54 = vmax.f32 %v2134_v28, %v2135_v0  ;;  %v2139_v37 = vrot.slane %v2138_v53, 2  ;;  %v2150_v48 = vmax.f32 %v1463_v61, %v2149_v13  ;;  %v2161_v59 = vrot.slane %v1465_v43, 4 }
 0x237   :  { %12761 = vst [vmem:[#allocation94_spill] sm:$0xff] %v9079_v45  ;;  %v2145_v19 = vrot.slane %v2144_v26, 2  ;;  %v2156_v55 = vmax.f32 %v1464_v40, %v2155_v7  ;;  %v2167_v21 = vrot.slane %v1466_v31, 4  ;;  %v1467_v29 = vadd.f32 %v9075_v3, %v12763_v24  ;;  %v9099_v24 = vpop.f32.mrb[21].mxu1 }
 0x238   :  { %v9087_v8 = vmax.f32 %v2106_v35, 0.0  ;;  %v9089_v60 = vmax.f32 %v2118_v36, 0.0  ;;  %v2162_v63 = vmax.f32 %v1465_v43, %v2161_v59  ;;  %v1468_v50 = vadd.f32 %v9081_v47, %v12766_v27  ;;  %12770 = vst [vmem:[#allocation127_spill] sm:$0xff] %v9099_v24  ;;  %v9101_v35 = vpop.f32.mrb[108].mxu0  ;;  %v9103_v27 = vpop.f32.mrb[22].mxu1 }
 0x239   :  { %v9093_v15 = vmax.f32 %v2124_v9, 0.0  ;;  %v9095_v28 = vmax.f32 %v2130_v49, 0.0  ;;  %v2168_v61 = vmax.f32 %v1466_v31, %v2167_v21  ;;  %v2173_v0 = vrot.slane %v1467_v29, 4  ;;  %12771 = vst [vmem:[#allocation128_spill] sm:$0xff] %v9101_v35  ;;  %12772 = vst [vmem:[#allocation129_spill] sm:$0xff] %v9103_v27  ;;  %v9105_v9 = vpop.f32.mrb[109].mxu0 }
 0x23a   :  { %12764 = vst [vmem:[#allocation95_spill] sm:$0xff] %v9087_v8  ;;  %12765 = vst [vmem:[#allocation96_spill] sm:$0xff] %v9089_v60  ;;  %v9097_v13 = vmax.f32 %v2136_v54, 0.0  ;;  %v2140_v7 = vmax.f32 %v2138_v53, %v2139_v37  ;;  %v2151_v40 = vrot.slane %v2150_v48, 2  ;;  %v2179_v14 = vrot.slane %v1468_v50, 4  ;;  %v9111_v37 = vpop.f32.mrb[23].mxu1 }
 0x23b   :  { %12767 = vst [vmem:[#allocation99_spill] sm:$0xff] %v9093_v15  ;;  %12768 = vst [vmem:[#allocation125_spill] sm:$0xff] %v9095_v28  ;;  %v2146_v36 = vmax.f32 %v2144_v26, %v2145_v19  ;;  %v2157_v43 = vrot.slane %v2156_v55, 2  ;;  %v2163_v59 = vrot.slane %v2162_v63, 2  ;;  %v2174_v41 = vmax.f32 %v1467_v29, %v2173_v0  ;;  %v9119_v0 = vpop.f32.mrb[24].mxu1  ;;  %v9121_v58 = vpop.f32.mrb[110].mxu0 }
 0x23c   :  { %12769 = vst [vmem:[#allocation126_spill] sm:$0xff] %v9097_v13  ;;  %12773 = vst [vmem:[#allocation130_spill] sm:$0xff] %v9105_v9  ;;  %v3501_v49 = vpack.c.bf16 %v9073_v22, %v9073_v22  ;;  %v9109_v31 = vmax.f32 %v2112_v46, 0.0  ;;  %v2169_v53 = vrot.slane %v2168_v61, 2  ;;  %v2180_v54 = vmax.f32 %v1468_v50, %v2179_v14  ;;  %v9135_v35 = vpop.f32.mrb[25].mxu1 }
 0x23d   :  { %12775 = vst [vmem:[#allocation132_spill] sm:$0xff] %v9111_v37  ;;  %v3502_v21 = vpack.c.bf16 %v9079_v45, %v9079_v45  ;;  %v3505_v26 = vpack.c.bf16 %v9089_v60, %v9089_v60  ;;  %v3507_v19 = vpack.c.bf16 %v9095_v28, %v9095_v28  ;;  %v2175_v29 = vrot.slane %v2174_v41, 2  ;;  %12776 = vst [vmem:[#allocation133_spill] sm:$0xff] %v9119_v0 }
 0x23e   :  { %12774 = vst [vmem:[#allocation131_spill] sm:$0xff] %v9109_v31  ;;  %12777 = vst [vmem:[#allocation134_spill] sm:$0xff] %v9121_v58  ;;  %v3506_v46 = vpack.c.bf16 %v9093_v15, %v9093_v15  ;;  %v3508_v50 = vpack.c.bf16 %v9097_v13, %v9097_v13  ;;  %v2141_v14 = vrot.slane %v2140_v7, 1  ;;  %v2152_v22 = vmax.f32 %v2150_v48, %v2151_v40 }
 0x23f   :  { %v2147_v60 = vrot.slane %v2146_v36, 1  ;;  %v2158_v32 = vmax.f32 %v2156_v55, %v2157_v43  ;;  %v2164_v44 = vmax.f32 %v2162_v63, %v2163_v59  ;;  %v9129_v28 = vunpack.c.l.b16 %v3501_v49  ;;  %12779 = vst [vmem:[#allocation136_spill] sm:$0xff] %v9135_v35 }
 0x240   :  { %v2170_v58 = vmax.f32 %v2168_v61, %v2169_v53  ;;  %v2181_v0 = vrot.slane %v2180_v54, 2  ;;  %v9133_v9 = vunpack.c.l.b16 %v3502_v21  ;;  %v4103_v15 = vunpack.c.l.b16 %v3505_v26 }
 0x241   :  { %12778 = vst [vmem:[#allocation135_spill] sm:$0xff] %v9129_v28  ;;  %v4105_v37 = vunpack.c.l.b16 %v3507_v19  ;;  %v2176_v13 = vmax.f32 %v2174_v41, %v2175_v29  ;;  %v4104_v48 = vunpack.c.l.b16 %v3506_v46  ;;  %v4106_v40 = vunpack.c.l.b16 %v3508_v50  ;;  %v12808_v28 = vld [vmem:[#allocation83_spill] sm:$0xff] }
 0x242   :  { %v2142_v45 = vmax.f32 %v2140_v7, %v2141_v14  ;;  %v2153_v27 = vrot.slane %v2152_v22, 1  ;;  %v2148_v55 = vmax.f32 %v2146_v36, %v2147_v60  ;;  %v2159_v63 = vrot.slane %v2158_v32, 1 }
 0x243   :  { %v2165_v43 = vrot.slane %v2164_v44, 1  ;;  %v1469_v59 = vadd.f32 %v9075_v3, %v8833_v23  ;;  %v2171_v49 = vrot.slane %v2170_v58, 1  ;;  %v2182_v61 = vmax.f32 %v2180_v54, %v2181_v0 }
 0x244   :  { %v1470_v53 = vadd.f32 %v9081_v47, %v8837_v20  ;;  %v1471_v41 = vadd.f32 %v9075_v3, %v8841_v33  ;;  %v9144_v21 = vsel %vm4279_vm0, %v4105_v37, %v4103_v15  ;;  %v2177_v26 = vrot.slane %v2176_v13, 1 }
 0x245   :  { %v2185_v7 = vrot.slane %v1469_v59, 4  ;;  %v1472_v60 = vadd.f32 %v9081_v47, %v8847_v2  ;;  %v9149_v36 = vsel %vm4279_vm0, %v4106_v40, %v4104_v48  ;;  %v2154_v23 = vmax.f32 %v2152_v22, %v2153_v27  ;;  %v12782_v48 = vld [vmem:[#allocation115_spill] sm:$0xff] }
 0x246   :  { %v2191_v19 = vrot.slane %v1470_v53, 4  ;;  %v2197_v54 = vrot.slane %v1471_v41, 4  ;;  %v9151_v29 = vmax.f32 %v2142_v45, 0.0  ;;  %v9153_v20 = vmax.f32 %v2148_v55, 0.0 }
 0x247   :  { %v2160_v0 = vmax.f32 %v2158_v32, %v2159_v63  ;;  %v2186_v33 = vmax.f32 %v1469_v59, %v2185_v7  ;;  %v2166_v46 = vmax.f32 %v2164_v44, %v2165_v43  ;;  %v2172_v15 = vmax.f32 %v2170_v58, %v2171_v49  ;;  %v12785_v63 = vld [vmem:[#allocation63_spill] sm:$0xff]  ;;  %v12787_v49 = vld [vmem:[#allocation118_spill] sm:$0xff] }
 0x248   :  { %12780 = vst [vmem:[#allocation137_spill] sm:$0xff] %v9151_v29  ;;  %12781 = vst [vmem:[#allocation138_spill] sm:$0xff] %v9153_v20  ;;  %v2183_v37 = vrot.slane %v2182_v61, 1  ;;  %v1473_v50 = vadd.f32 %v9075_v3, %v8877_v34  ;;  %v2178_v14 = vmax.f32 %v2176_v13, %v2177_v26  ;;  %v2192_v2 = vmax.f32 %v1470_v53, %v2191_v19  ;;  %v9177_v19 = vpop.f32.mrb[111].mxu0 }
 0x249   :  { %v2203_v39 = vrot.slane %v1472_v60, 4  ;;  %v1474_v22 = vadd.f32 %v9081_v47, %v12782_v48  ;;  %v9159_v27 = vmax.f32 %v2154_v23, 0.0  ;;  %v2187_v45 = vrot.slane %v2186_v33, 2  ;;  %12790 = vst [vmem:[#allocation141_spill] sm:$0xff] %v9177_v19 }
 0x24a   :  { %v2198_v40 = vmax.f32 %v1471_v41, %v2197_v54  ;;  %v2209_v55 = vrot.slane %v1473_v50, 4  ;;  %v3509_v32 = vpack.c.bf16 %v9151_v29, %v9151_v29  ;;  %v9163_v44 = vmax.f32 %v2160_v0, 0.0  ;;  %v9179_v54 = vpop.f32.mrb[26].mxu1 }
 0x24b   :  { %12783 = vst [vmem:[#allocation115_spill] sm:$0xff] %v9159_v27  ;;  %v2215_v58 = vrot.slane %v1474_v22, 4  ;;  %v1553_v34 = vadd.f32 %v9075_v3, %v12785_v63  ;;  %v3510_v13 = vpack.c.bf16 %v9153_v20, %v9153_v20  ;;  %v9169_v43 = vmax.f32 %v2166_v46, 0.0  ;;  %12791 = vst [vmem:[#allocation142_spill] sm:$0xff] %v9179_v54  ;;  %v12804_v54 = vld [vmem:[#allocation120_spill] sm:$0xff] }
 0x24c   :  { %12784 = vst [vmem:[#allocation139_spill] sm:$0xff] %v9163_v44  ;;  %v2184_v59 = vmax.f32 %v2182_v61, %v2183_v37  ;;  %v1475_v53 = vadd.f32 %v9075_v3, %v12787_v49  ;;  %v9173_v41 = vmax.f32 %v2172_v15, 0.0  ;;  %v9175_v26 = vmax.f32 %v2178_v14, 0.0  ;;  %v9183_v61 = vpop.f32.mrb[27].mxu1 }
 0x24d   :  { %12786 = vst [vmem:[#allocation63_spill] sm:$0xff] %v9169_v43  ;;  %v2193_v7 = vrot.slane %v2192_v2, 2  ;;  %v2204_v23 = vmax.f32 %v1472_v60, %v2203_v39  ;;  %v3511_v0 = vpack.c.bf16 %v9159_v27, %v9159_v27  ;;  %v2188_v48 = vmax.f32 %v2186_v33, %v2187_v45  ;;  %12792 = vst [vmem:[#allocation143_spill] sm:$0xff] %v9183_v61  ;;  %v9187_v29 = vpop.f32.mrb[28].mxu1  ;;  %v9189_v39 = vpop.f32.mrb[112].mxu0  ;;  %v12803_v61 = vld [vmem:[#allocation65_spill] sm:$0xff] }
 0x24e   :  { %12788 = vst [vmem:[#allocation118_spill] sm:$0xff] %v9173_v41  ;;  %12789 = vst [vmem:[#allocation140_spill] sm:$0xff] %v9175_v26  ;;  %v2199_v46 = vrot.slane %v2198_v40, 2  ;;  %v2210_v63 = vmax.f32 %v1473_v50, %v2209_v55  ;;  %v4107_v37 = vunpack.c.l.b16 %v3509_v32  ;;  %v3512_v15 = vpack.c.bf16 %v9163_v44, %v9163_v44  ;;  %v9195_v50 = vpop.f32.mrb[29].mxu1 }
 0x24f   :  { %v2216_v14 = vmax.f32 %v1474_v22, %v2215_v58  ;;  %v2689_v49 = vrot.slane %v1553_v34, 4  ;;  %12793 = vst [vmem:[#allocation144_spill] sm:$0xff] %v9187_v29  ;;  %12794 = vst [vmem:[#allocation145_spill] sm:$0xff] %v9189_v39  ;;  %v4108_v60 = vunpack.c.l.b16 %v3510_v13  ;;  %v3513_v20 = vpack.c.bf16 %v9169_v43, %v9169_v43  ;;  %v9201_v58 = vpop.f32.mrb[30].mxu1 }
 0x250   :  { %v9193_v27 = vmax.f32 %v2184_v59, 0.0  ;;  %v2221_v33 = vrot.slane %v1475_v53, 4  ;;  %12796 = vst [vmem:[#allocation147_spill] sm:$0xff] %v9195_v50  ;;  %v3514_v45 = vpack.c.bf16 %v9173_v41, %v9173_v41  ;;  %v3515_v22 = vpack.c.bf16 %v9175_v26, %v9175_v26  ;;  %12797 = vst [vmem:[#allocation148_spill] sm:$0xff] %v9201_v58 }
 0x251   :  { %v2194_v55 = vmax.f32 %v2192_v2, %v2193_v7  ;;  %v2205_v32 = vrot.slane %v2204_v23, 2  ;;  %v9203_v44 = vunpack.c.l.b16 %v3511_v0  ;;  %v2189_v13 = vrot.slane %v2188_v48, 1 }
 0x252   :  { %12795 = vst [vmem:[#allocation146_spill] sm:$0xff] %v9193_v27  ;;  %v2200_v39 = vmax.f32 %v2198_v40, %v2199_v46  ;;  %v2211_v43 = vrot.slane %v2210_v63, 2  ;;  %v9207_v59 = vsel %vm4281_vm1, %v4107_v37, %v9144_v21  ;;  %v9209_v50 = vunpack.c.l.b16 %v3512_v15  ;;  %v9223_v15 = vpop.f32.mrb[31].mxu1 }
 0x253   :  { %12798 = vst [vmem:[#allocation149_spill] sm:$0xff] %v9203_v44  ;;  %12799 = vst [vmem:[#allocation150_spill] sm:$0xff] %v9207_v59  ;;  %v2217_v29 = vrot.slane %v2216_v14, 2  ;;  %v2690_v41 = vmax.f32 %v1553_v34, %v2689_v49  ;;  %v9213_v26 = vsel %vm4281_vm1, %v4108_v60, %v9149_v36  ;;  %v9215_v2 = vunpack.c.l.b16 %v3513_v20  ;;  %v9243_v44 = vpop.f32.mrb[113].mxu0 }
 0x254   :  { %v3516_v7 = vpack.c.bf16 %v9193_v27, %v9193_v27  ;;  %v2222_v0 = vmax.f32 %v1475_v53, %v2221_v33  ;;  %v9219_v40 = vunpack.c.l.b16 %v3514_v45  ;;  %v9221_v46 = vunpack.c.l.b16 %v3515_v22  ;;  %12802 = vst [vmem:[#allocation153_spill] sm:$0xff] %v9223_v15  ;;  %v12805_v53 = vld [vmem:[#allocation77_spill] sm:$0xff] }
 0x255   :  { %12800 = vst [vmem:[#allocation151_spill] sm:$0xff] %v9215_v2  ;;  %v2195_v21 = vrot.slane %v2194_v55, 1  ;;  %v2206_v37 = vmax.f32 %v2204_v23, %v2205_v32  ;;  %v2190_v58 = vmax.f32 %v2188_v48, %v2189_v13  ;;  %v2201_v34 = vrot.slane %v2200_v39, 1  ;;  %v12806_v32 = vld [vmem:[#allocation81_spill] sm:$0xff]  ;;  %12811 = vst [vmem:[#allocation77_spill] sm:$0xff] %v9243_v44 }
 0x256   :  { %12801 = vst [vmem:[#allocation152_spill] sm:$0xff] %v9221_v46  ;;  %v2212_v49 = vmax.f32 %v2210_v63, %v2211_v43  ;;  %v1554_v36 = vadd.f32 %v9081_v47, %v12803_v61  ;;  %v2218_v20 = vmax.f32 %v2216_v14, %v2217_v29  ;;  %v2691_v60 = vrot.slane %v2690_v41, 2 }
 0x257   :  { %v1476_v27 = vadd.f32 %v9081_v47, %v12804_v54  ;;  %v1555_v33 = vadd.f32 %v9075_v3, %v12805_v53  ;;  %v9231_v45 = vunpack.c.l.b16 %v3516_v7  ;;  %v2223_v22 = vrot.slane %v2222_v0, 2 }
 0x258   :  { %v2695_v23 = vrot.slane %v1554_v36, 4  ;;  %v1556_v48 = vadd.f32 %v9081_v47, %v12806_v32  ;;  %v2196_v13 = vmax.f32 %v2194_v55, %v2195_v21  ;;  %v2207_v43 = vrot.slane %v2206_v37, 1 }
 0x259   :  { %v2227_v63 = vrot.slane %v1476_v27, 4  ;;  %v2701_v15 = vrot.slane %v1555_v33, 4  ;;  %v2202_v61 = vmax.f32 %v2200_v39, %v2201_v34  ;;  %v2213_v29 = vrot.slane %v2212_v49, 1 }
 0x25a   :  { %v2696_v14 = vmax.f32 %v1554_v36, %v2695_v23  ;;  %v2707_v19 = vrot.slane %v1556_v48, 4  ;;  %v9235_v35 = vmax.f32 %v2190_v58, 0.0  ;;  %v2219_v54 = vrot.slane %v2218_v20, 1 }
 0x25b   :  { %v2692_v24 = vmax.f32 %v2690_v41, %v2691_v60  ;;  %v2702_v53 = vmax.f32 %v1555_v33, %v2701_v15  ;;  %v2224_v7 = vmax.f32 %v2222_v0, %v2223_v22  ;;  %v2228_v25 = vmax.f32 %v1476_v27, %v2227_v63 }
 0x25c   :  { %12807 = vst [vmem:[#allocation65_spill] sm:$0xff] %v9235_v35  ;;  %v2708_v46 = vmax.f32 %v1556_v48, %v2707_v19  ;;  %v1557_v2 = vadd.f32 %v9075_v3, %v12808_v28  ;;  %v9239_v32 = vmax.f32 %v2196_v13, 0.0  ;;  %v2208_v55 = vmax.f32 %v2206_v37, %v2207_v43  ;;  %v12812_v19 = vld [vmem:[#allocation87_spill] sm:$0xff]  ;;  %v9251_v13 = vpop.f32.mrb[32].mxu1 }
 0x25d   :  { %v2697_v21 = vrot.slane %v2696_v14, 2  ;;  %v1558_v39 = vadd.f32 %v9081_v47, %v12810_v52  ;;  %v2214_v34 = vmax.f32 %v2212_v49, %v2213_v29  ;;  %v2703_v36 = vrot.slane %v2702_v53, 2  ;;  %12814 = vst [vmem:[#allocation83_spill] sm:$0xff] %v9251_v13 }
 0x25e   :  { %12809 = vst [vmem:[#allocation120_spill] sm:$0xff] %v9239_v32  ;;  %v2709_v58 = vrot.slane %v2708_v46, 2  ;;  %v2713_v23 = vrot.slane %v1557_v2, 4  ;;  %v2220_v41 = vmax.f32 %v2218_v20, %v2219_v54  ;;  %v2693_v0 = vrot.slane %v2692_v24, 1 }
 0x25f   :  { %v2719_v27 = vrot.slane %v1558_v39, 4  ;;  %v1559_v15 = vadd.f32 %v9075_v3, %v12812_v19  ;;  %v9247_v28 = vmax.f32 %v2202_v61, 0.0  ;;  %v2225_v60 = vrot.slane %v2224_v7, 1  ;;  %v9257_v61 = vpop.f32.mrb[114].mxu0 }
 0x260   :  { %v2229_v37 = vrot.slane %v2228_v25, 2  ;;  %v2714_v33 = vmax.f32 %v1557_v2, %v2713_v23  ;;  %v3517_v52 = vpack.c.bf16 %v9235_v35, %v9235_v35  ;;  %v2698_v49 = vmax.f32 %v2696_v14, %v2697_v21  ;;  %12816 = vst [vmem:[#allocation87_spill] sm:$0xff] %v9257_v61 }
 0x261   :  { %12813 = vst [vmem:[#allocation81_spill] sm:$0xff] %v9247_v28  ;;  %v2720_v22 = vmax.f32 %v1558_v39, %v2719_v27  ;;  %v2725_v48 = vrot.slane %v1559_v15, 4  ;;  %v9253_v43 = vmax.f32 %v2214_v34, 0.0  ;;  %v2704_v20 = vmax.f32 %v2702_v53, %v2703_v36  ;;  %v9261_v27 = vpop.f32.mrb[33].mxu1  ;;  %v9263_v34 = vpop.f32.mrb[115].mxu0 }
 0x262   :  { %v2710_v63 = vmax.f32 %v2708_v46, %v2709_v58  ;;  %v1477_v29 = vadd.f32 %v9075_v3, %v8915_v10  ;;  %v9259_v54 = vmax.f32 %v2220_v41, 0.0  ;;  %v2694_v2 = vmax.f32 %v2692_v24, %v2693_v0  ;;  %12818 = vst [vmem:[#allocation155_spill] sm:$0xff] %v9261_v27  ;;  %12819 = vst [vmem:[#allocation156_spill] sm:$0xff] %v9263_v34  ;;  %v9271_v24 = vpop.f32.mrb[34].mxu1 }
 0x263   :  { %12815 = vst [vmem:[#allocation86_spill] sm:$0xff] %v9253_v43  ;;  %v2715_v23 = vrot.slane %v2714_v33, 2  ;;  %v2721_v19 = vrot.slane %v2720_v22, 2  ;;  %v2226_v35 = vmax.f32 %v2224_v7, %v2225_v60  ;;  %v2230_v14 = vmax.f32 %v2228_v25, %v2229_v37  ;;  %12821 = vst [vmem:[#allocation158_spill] sm:$0xff] %v9271_v24  ;;  %v9275_v0 = vpop.f32.mrb[35].mxu1 }
 0x264   :  { %12817 = vst [vmem:[#allocation154_spill] sm:$0xff] %v9259_v54  ;;  %v2726_v21 = vmax.f32 %v1559_v15, %v2725_v48  ;;  %v2233_v39 = vrot.slane %v1477_v29, 4  ;;  %v3518_v46 = vpack.c.bf16 %v9239_v32, %v9239_v32  ;;  %v9269_v53 = vmax.f32 %v2208_v55, 0.0  ;;  %12822 = vst [vmem:[#allocation159_spill] sm:$0xff] %v9275_v0  ;;  %v9281_v55 = vpop.f32.mrb[36].mxu1 }
 0x265   :  { %v2699_v36 = vrot.slane %v2698_v49, 1  ;;  %v3521_v25 = vpack.c.bf16 %v9253_v43, %v9253_v43  ;;  %v2705_v7 = vrot.slane %v2704_v20, 1  ;;  %v2711_v58 = vrot.slane %v2710_v63, 1  ;;  %12824 = vst [vmem:[#allocation161_spill] sm:$0xff] %v9281_v55  ;;  %v9287_v34 = vpop.f32.mrb[37].mxu1 }
 0x266   :  { %12820 = vst [vmem:[#allocation157_spill] sm:$0xff] %v9269_v53  ;;  %v2234_v41 = vmax.f32 %v1477_v29, %v2233_v39  ;;  %v3522_v15 = vpack.c.bf16 %v9259_v54, %v9259_v54  ;;  %v9279_v60 = vmax.f32 %v2694_v2, 0.0  ;;  %v2716_v37 = vmax.f32 %v2714_v33, %v2715_v23  ;;  %12827 = vst [vmem:[#allocation164_spill] sm:$0xff] %v9287_v34  ;;  %v9293_v0 = vpop.f32.mrb[38].mxu1  ;;  %v12829_v23 = vld [vmem:[#allocation93_spill] sm:$0xff] }
 0x267   :  { %v2722_v48 = vmax.f32 %v2720_v22, %v2721_v19  ;;  %v9283_v10 = vunpack.c.l.b16 %v3517_v52  ;;  %v9285_v32 = vmax.f32 %v2226_v35, 0.0  ;;  %v2231_v24 = vrot.slane %v2230_v14, 1  ;;  %12828 = vst [vmem:[#allocation165_spill] sm:$0xff] %v9293_v0  ;;  %v9299_v19 = vpop.f32.mrb[116].mxu0  ;;  %v9301_v55 = vpop.f32.mrb[39].mxu1  ;;  %v12837_v0 = vld [vmem:[#allocation100_spill] sm:$0xff] }
 0x268   :  { %12823 = vst [vmem:[#allocation160_spill] sm:$0xff] %v9279_v60  ;;  %v2727_v43 = vrot.slane %v2726_v21, 2  ;;  %v9289_v29 = vunpack.c.l.b16 %v3518_v46  ;;  %v2700_v54 = vmax.f32 %v2698_v49, %v2699_v36  ;;  %v2235_v2 = vrot.slane %v2234_v41, 2  ;;  %12830 = vst [vmem:[#allocation93_spill] sm:$0xff] %v9299_v19  ;;  %v9307_v34 = vpop.f32.mrb[117].mxu0 }
 0x269   :  { %12825 = vst [vmem:[#allocation162_spill] sm:$0xff] %v9283_v10  ;;  %12826 = vst [vmem:[#allocation163_spill] sm:$0xff] %v9285_v32  ;;  %v9295_v33 = vunpack.c.l.b16 %v3521_v25  ;;  %v2706_v22 = vmax.f32 %v2704_v20, %v2705_v7  ;;  %v2712_v52 = vmax.f32 %v2710_v63, %v2711_v58  ;;  %v1560_v35 = vadd.f32 %v9081_v47, %v12829_v23  ;;  %v9309_v25 = vpop.f32.mrb[40].mxu1  ;;  %v9313_v23 = vpop.f32.mrb[118].mxu0 }
 0x26a   :  { %12831 = vst [vmem:[#allocation166_spill] sm:$0xff] %v9301_v55  ;;  %v9303_v46 = vunpack.c.l.b16 %v3522_v15  ;;  %v3601_v39 = vpack.c.bf16 %v9279_v60, %v9279_v60  ;;  %v2717_v49 = vrot.slane %v2716_v37, 1  ;;  %v2723_v36 = vrot.slane %v2722_v48, 1  ;;  %12832 = vst [vmem:[#allocation167_spill] sm:$0xff] %v9307_v34  ;;  %v9315_v55 = vpop.f32.mrb[41].mxu1 }
 0x26b   :  { %12833 = vst [vmem:[#allocation168_spill] sm:$0xff] %v9309_v25  ;;  %v3523_v20 = vpack.c.bf16 %v9285_v32, %v9285_v32  ;;  %v2232_v63 = vmax.f32 %v2230_v14, %v2231_v24  ;;  %v2728_v7 = vmax.f32 %v2726_v21, %v2727_v43  ;;  %v2731_v58 = vrot.slane %v1560_v35, 4  ;;  %12834 = vst [vmem:[#allocation169_spill] sm:$0xff] %v9313_v23 }
 0x26c   :  { %12835 = vst [vmem:[#allocation170_spill] sm:$0xff] %v9315_v55  ;;  %v9317_v15 = vmax.f32 %v2700_v54, 0.0  ;;  %v2236_v19 = vmax.f32 %v2234_v41, %v2235_v2  ;;  %v1478_v60 = vadd.f32 %v9081_v47, %v8923_v57  ;;  %v1561_v34 = vadd.f32 %v9075_v3, %v12837_v0 }
 0x26d   :  { %v9323_v25 = vmax.f32 %v2706_v22, 0.0  ;;  %v9325_v27 = vmax.f32 %v2712_v52, 0.0  ;;  %v2732_v14 = vmax.f32 %v1560_v35, %v2731_v58  ;;  %v1479_v43 = vadd.f32 %v9075_v3, %v8928_v30  ;;  %v9347_v58 = vpop.f32.mrb[119].mxu0 }
 0x26e   :  { %12836 = vst [vmem:[#allocation171_spill] sm:$0xff] %v9317_v15  ;;  %v4199_v21 = vunpack.c.l.b16 %v3601_v39  ;;  %v2718_v24 = vmax.f32 %v2716_v37, %v2717_v49  ;;  %v2724_v32 = vmax.f32 %v2722_v48, %v2723_v36  ;;  %v2239_v54 = vrot.slane %v1478_v60, 4  ;;  %v12841_v48 = vld [vmem:[#allocation101_spill] sm:$0xff] }
 0x26f   :  { %12838 = vst [vmem:[#allocation100_spill] sm:$0xff] %v9323_v25  ;;  %12839 = vst [vmem:[#allocation172_spill] sm:$0xff] %v9325_v27  ;;  %v4121_v55 = vunpack.c.l.b16 %v3523_v20  ;;  %v2729_v41 = vrot.slane %v2728_v7, 1  ;;  %v2737_v2 = vrot.slane %v1561_v34, 4  ;;  %v2245_v23 = vrot.slane %v1479_v43, 4 }
 0x270   :  { %v3602_v57 = vpack.c.bf16 %v9317_v15, %v9317_v15  ;;  %v9331_v0 = vmax.f32 %v2232_v63, 0.0  ;;  %v2237_v22 = vrot.slane %v2236_v19, 1  ;;  %v2240_v52 = vmax.f32 %v1478_v60, %v2239_v54  ;;  %v12844_v63 = vld [vmem:[#allocation102_spill] sm:$0xff] }
 0x271   :  { %v3603_v35 = vpack.c.bf16 %v9323_v25, %v9323_v25  ;;  %v3604_v30 = vpack.c.bf16 %v9325_v27, %v9325_v27  ;;  %v2733_v37 = vrot.slane %v2732_v14, 2  ;;  %v1562_v39 = vadd.f32 %v9081_v47, %v12841_v48  ;;  %12845 = vst [vmem:[#allocation102_spill] sm:$0xff] %v9347_v58 }
 0x272   :  { %12840 = vst [vmem:[#allocation173_spill] sm:$0xff] %v9331_v0  ;;  %v9339_v49 = vmax.f32 %v2718_v24, 0.0  ;;  %v9341_v36 = vmax.f32 %v2724_v32, 0.0  ;;  %v1480_v20 = vadd.f32 %v9081_v47, %v8939_v1  ;;  %v1563_v60 = vadd.f32 %v9075_v3, %v12844_v63 }
 0x273   :  { %v2730_v54 = vmax.f32 %v2728_v7, %v2729_v41  ;;  %v2738_v25 = vmax.f32 %v1561_v34, %v2737_v2  ;;  %v2246_v15 = vmax.f32 %v1479_v43, %v2245_v23  ;;  %v2743_v27 = vrot.slane %v1562_v39, 4  ;;  %v9355_v23 = vpop.f32.mrb[42].mxu1  ;;  %v12848_v2 = vld [vmem:[#allocation103_spill] sm:$0xff] }
 0x274   :  { %12842 = vst [vmem:[#allocation101_spill] sm:$0xff] %v9339_v49  ;;  %12843 = vst [vmem:[#allocation174_spill] sm:$0xff] %v9341_v36  ;;  %v3524_v61 = vpack.c.bf16 %v9331_v0, %v9331_v0  ;;  %v2238_v48 = vmax.f32 %v2236_v19, %v2237_v22  ;;  %v2241_v24 = vrot.slane %v2240_v52, 2  ;;  %v2251_v13 = vrot.slane %v1480_v20, 4  ;;  %v9361_v22 = vpop.f32.mrb[43].mxu1 }
 0x275   :  { %v4200_v32 = vunpack.c.l.b16 %v3602_v57  ;;  %v4201_v44 = vunpack.c.l.b16 %v3603_v35  ;;  %v2734_v10 = vmax.f32 %v2732_v14, %v2733_v37  ;;  %v2749_v59 = vrot.slane %v1563_v60, 4  ;;  %12846 = vst [vmem:[#allocation175_spill] sm:$0xff] %v9355_v23  ;;  %12849 = vst [vmem:[#allocation103_spill] sm:$0xff] %v9361_v22 }
 0x276   :  { %v4202_v1 = vunpack.c.l.b16 %v3604_v30  ;;  %v3605_v63 = vpack.c.bf16 %v9339_v49, %v9339_v49  ;;  %v3606_v7 = vpack.c.bf16 %v9341_v36, %v9341_v36  ;;  %v2744_v34 = vmax.f32 %v1562_v39, %v2743_v27  ;;  %v9365_v49 = vpop.f32.mrb[44].mxu1 }
 0x277   :  { %v9357_v43 = vmax.f32 %v2730_v54, 0.0  ;;  %v2739_v41 = vrot.slane %v2738_v25, 2  ;;  %v2247_v19 = vrot.slane %v2246_v15, 2  ;;  %v1564_v57 = vadd.f32 %v9081_v47, %v12848_v2  ;;  %v9368_v0 = vpop.f32.mrb[45].mxu1 }
 0x278   :  { %v4122_v14 = vunpack.c.l.b16 %v3524_v61  ;;  %v9363_v35 = vmax.f32 %v2238_v48, 0.0  ;;  %v2242_v30 = vmax.f32 %v2240_v52, %v2241_v24  ;;  %v2252_v37 = vmax.f32 %v1480_v20, %v2251_v13  ;;  %v9371_v22 = vpop.f32.mrb[46].mxu1  ;;  %v9375_v48 = vpop.f32.mrb[120].mxu0 }
 0x279   :  { %12847 = vst [vmem:[#allocation176_spill] sm:$0xff] %v9357_v43  ;;  %v4440_v27 = vsel %vm4279_vm0, %v4201_v44, %v4199_v21  ;;  %v2735_v39 = vrot.slane %v2734_v10, 1  ;;  %v2750_v36 = vmax.f32 %v1563_v60, %v2749_v59  ;;  %v2755_v54 = vrot.slane %v1564_v57, 4 }
 0x27a   :  { %12850 = vst [vmem:[#allocation177_spill] sm:$0xff] %v9363_v35  ;;  %v4447_v23 = vsel %vm4279_vm0, %v4202_v1, %v4200_v32  ;;  %v4203_v58 = vunpack.c.l.b16 %v3605_v63  ;;  %v4204_v2 = vunpack.c.l.b16 %v3606_v7  ;;  %v2745_v6 = vrot.slane %v2744_v34, 2  ;;  %v12851_v63 = vld [vmem:[#allocation104_spill] sm:$0xff] }
 0x27b   :  { %v3607_v61 = vpack.c.bf16 %v9357_v43, %v9357_v43  ;;  %v2740_v13 = vmax.f32 %v2738_v25, %v2739_v41  ;;  %v2248_v52 = vmax.f32 %v2246_v15, %v2247_v19  ;;  %v2756_v20 = vmax.f32 %v1564_v57, %v2755_v54  ;;  %v12856_v43 = vld [vmem:[#allocation105_spill] sm:$0xff] }
 0x27c   :  { %v4370_v44 = vsel %vm4279_vm0, %v4121_v55, %v9295_v33  ;;  %v3525_v59 = vpack.c.bf16 %v9363_v35, %v9363_v35  ;;  %v2243_v21 = vrot.slane %v2242_v30, 1  ;;  %v2253_v60 = vrot.slane %v2252_v37, 2 }
 0x27d   :  { %v9383_v24 = vsel %vm4279_vm0, %v4122_v14, %v9303_v46  ;;  %v2736_v32 = vmax.f32 %v2734_v10, %v2735_v39  ;;  %v2751_v1 = vrot.slane %v2750_v36, 2  ;;  %v1565_v25 = vadd.f32 %v9075_v3, %v12851_v63  ;;  %v9395_v46 = vpop.f32.mrb[47].mxu1 }
 0x27e   :  { %v9388_v15 = vsel %vm4281_vm1, %v4203_v58, %v4440_v27  ;;  %v9391_v7 = vsel %vm4281_vm1, %v4204_v2, %v4447_v23  ;;  %v2746_v55 = vmax.f32 %v2744_v34, %v2745_v6  ;;  %v2757_v33 = vrot.slane %v2756_v20, 2  ;;  %12855 = vst [vmem:[#allocation180_spill] sm:$0xff] %v9395_v46  ;;  %v12858_v2 = vld [vmem:[#allocation108_spill] sm:$0xff] }
 0x27f   :  { %12852 = vst [vmem:[#allocation104_spill] sm:$0xff] %v9388_v15  ;;  %12853 = vst [vmem:[#allocation178_spill] sm:$0xff] %v9391_v7  ;;  %v9393_v41 = vunpack.c.l.b16 %v3607_v61  ;;  %v2741_v19 = vrot.slane %v2740_v13, 1  ;;  %v2249_v57 = vrot.slane %v2248_v52, 1  ;;  %v2761_v54 = vrot.slane %v1565_v25, 4 }
 0x280   :  { %v4123_v10 = vunpack.c.l.b16 %v3525_v59  ;;  %v2244_v14 = vmax.f32 %v2242_v30, %v2243_v21  ;;  %v2254_v39 = vmax.f32 %v2252_v37, %v2253_v60  ;;  %v1566_v63 = vadd.f32 %v9081_v47, %v12856_v43 }
 0x281   :  { %12854 = vst [vmem:[#allocation179_spill] sm:$0xff] %v9393_v41  ;;  %v9399_v58 = vmax.f32 %v2736_v32, 0.0  ;;  %v2752_v27 = vmax.f32 %v2750_v36, %v2751_v1  ;;  %v2762_v23 = vmax.f32 %v1565_v25, %v2761_v54  ;;  %v1567_v6 = vadd.f32 %v9075_v3, %v12858_v2  ;;  %v12860_v54 = vld [vmem:[#allocation110_spill] sm:$0xff] }
 0x282   :  { %v2747_v34 = vrot.slane %v2746_v55, 1  ;;  %v2758_v61 = vmax.f32 %v2756_v20, %v2757_v33  ;;  %v2767_v35 = vrot.slane %v1566_v63, 4  ;;  %v1481_v41 = vadd.f32 %v9075_v3, %v8974_v42 }
 0x283   :  { %12857 = vst [vmem:[#allocation105_spill] sm:$0xff] %v9399_v58  ;;  %v2742_v15 = vmax.f32 %v2740_v13, %v2741_v19  ;;  %v2250_v59 = vmax.f32 %v2248_v52, %v2249_v57  ;;  %v2763_v30 = vrot.slane %v2762_v23, 2  ;;  %v2773_v37 = vrot.slane %v1567_v6, 4  ;;  %v12863_v19 = vld [vmem:[#allocation113_spill] sm:$0xff] }
 0x284   :  { %v9405_v21 = vmax.f32 %v2244_v14, 0.0  ;;  %v2255_v43 = vrot.slane %v2254_v39, 1  ;;  %v2768_v60 = vmax.f32 %v1566_v63, %v2767_v35  ;;  %v2257_v32 = vrot.slane %v1481_v41, 4 }
 0x285   :  { %v2753_v36 = vrot.slane %v2752_v27, 1  ;;  %v2764_v1 = vmax.f32 %v2762_v23, %v2763_v30  ;;  %v2774_v25 = vmax.f32 %v1567_v6, %v2773_v37  ;;  %v1568_v2 = vadd.f32 %v9081_v47, %v12860_v54 }
 0x286   :  { %12859 = vst [vmem:[#allocation108_spill] sm:$0xff] %v9405_v21  ;;  %v2748_v20 = vmax.f32 %v2746_v55, %v2747_v34  ;;  %v2759_v33 = vrot.slane %v2758_v61, 1  ;;  %v2769_v7 = vrot.slane %v2768_v60, 2  ;;  %v2258_v46 = vmax.f32 %v1481_v41, %v2257_v32  ;;  %v9421_v34 = vpop.f32.mrb[121].mxu0 }
 0x287   :  { %v9409_v42 = vmax.f32 %v2742_v15, 0.0  ;;  %v9411_v13 = vmax.f32 %v2250_v59, 0.0  ;;  %v1482_v52 = vadd.f32 %v9081_v47, %v8984_v18  ;;  %v1569_v35 = vadd.f32 %v9075_v3, %v12863_v19 }
 0x288   :  { %v3526_v57 = vpack.c.bf16 %v9405_v21, %v9405_v21  ;;  %v2256_v14 = vmax.f32 %v2254_v39, %v2255_v43  ;;  %v2765_v63 = vrot.slane %v2764_v1, 1  ;;  %v2775_v23 = vrot.slane %v2774_v25, 2 }
 0x289   :  { %12861 = vst [vmem:[#allocation110_spill] sm:$0xff] %v9409_v42  ;;  %12862 = vst [vmem:[#allocation181_spill] sm:$0xff] %v9411_v13  ;;  %v3608_v55 = vpack.c.bf16 %v9399_v58, %v9399_v58  ;;  %v2770_v41 = vmax.f32 %v2768_v60, %v2769_v7  ;;  %v2259_v15 = vrot.slane %v2258_v46, 2  ;;  %v2779_v6 = vrot.slane %v1568_v2, 4  ;;  %v9432_v7 = vpop.f32.mrb[122].mxu0 }
 0x28a   :  { %v9424_v59 = vsel %vm4281_vm1, %v4123_v10, %v4370_v44  ;;  %v9426_v18 = vmax.f32 %v2748_v20, 0.0  ;;  %v2754_v30 = vmax.f32 %v2752_v27, %v2753_v36  ;;  %v2760_v37 = vmax.f32 %v2758_v61, %v2759_v33  ;;  %v9436_v10 = vpop.f32.mrb[123].mxu0 }
 0x28b   :  { %12864 = vst [vmem:[#allocation113_spill] sm:$0xff] %v9424_v59  ;;  %v3609_v39 = vpack.c.bf16 %v9409_v42, %v9409_v42  ;;  %v3527_v43 = vpack.c.bf16 %v9411_v13, %v9411_v13  ;;  %v2263_v32 = vrot.slane %v1482_v52, 4  ;;  %v2785_v54 = vrot.slane %v1569_v35, 4 }
 0x28c   :  { %12865 = vst [vmem:[#allocation182_spill] sm:$0xff] %v9426_v18  ;;  %v4124_v60 = vunpack.c.l.b16 %v3526_v57  ;;  %v9434_v19 = vmax.f32 %v2256_v14, 0.0  ;;  %v2766_v58 = vmax.f32 %v2764_v1, %v2765_v63  ;;  %v2776_v44 = vmax.f32 %v2774_v25, %v2775_v23 }
 0x28d   :  { %v9438_v20 = vunpack.c.l.b16 %v3608_v55  ;;  %v2771_v27 = vrot.slane %v2770_v41, 1  ;;  %v2260_v61 = vmax.f32 %v2258_v46, %v2259_v15  ;;  %v2780_v36 = vmax.f32 %v1568_v2, %v2779_v6 }
 0x28e   :  { %12866 = vst [vmem:[#allocation183_spill] sm:$0xff] %v9434_v19  ;;  %v3610_v33 = vpack.c.bf16 %v9426_v18, %v9426_v18  ;;  %v9442_v42 = vmax.f32 %v2754_v30, 0.0  ;;  %v9444_v13 = vmax.f32 %v2760_v37, 0.0  ;;  %v1483_v57 = vadd.f32 %v9075_v3, %v8995_v62  ;;  %v12874_v62 = vld [vmem:[#allocation116_spill] sm:$0xff] }
 0x28f   :  { %12867 = vst [vmem:[#allocation184_spill] sm:$0xff] %v9438_v20  ;;  %v9448_v14 = vunpack.c.l.b16 %v3609_v39  ;;  %v9450_v1 = vunpack.c.l.b16 %v3527_v43  ;;  %v2264_v25 = vmax.f32 %v1482_v52, %v2263_v32  ;;  %v2786_v63 = vmax.f32 %v1569_v35, %v2785_v54  ;;  %v9462_v39 = vpop.f32.mrb[124].mxu0 }
 0x290   :  { %12868 = vst [vmem:[#allocation185_spill] sm:$0xff] %v9442_v42  ;;  %12869 = vst [vmem:[#allocation186_spill] sm:$0xff] %v9444_v13  ;;  %v9454_v46 = vsel %vm4281_vm1, %v4124_v60, %v9383_v24  ;;  %v3528_v2 = vpack.c.bf16 %v9434_v19, %v9434_v19  ;;  %v9458_v23 = vmax.f32 %v2766_v58, 0.0  ;;  %v2777_v55 = vrot.slane %v2776_v44, 1  ;;  %v9470_v58 = vpop.f32.mrb[125].mxu0 }
 0x291   :  { %12870 = vst [vmem:[#allocation187_spill] sm:$0xff] %v9448_v14  ;;  %12871 = vst [vmem:[#allocation188_spill] sm:$0xff] %v9450_v1  ;;  %v2772_v15 = vmax.f32 %v2770_v41, %v2771_v27  ;;  %v2261_v6 = vrot.slane %v2260_v61, 1  ;;  %v2781_v30 = vrot.slane %v2780_v36, 2  ;;  %v1570_v37 = vadd.f32 %v9081_v47, %v12874_v62  ;;  %v9474_v27 = vpop.f32.mrb[126].mxu0 }
 0x292   :  { %12872 = vst [vmem:[#allocation189_spill] sm:$0xff] %v9454_v46  ;;  %12873 = vst [vmem:[#allocation190_spill] sm:$0xff] %v9458_v23  ;;  %v9464_v52 = vunpack.c.l.b16 %v3610_v33  ;;  %v3611_v24 = vpack.c.bf16 %v9442_v42, %v9442_v42  ;;  %v3612_v35 = vpack.c.bf16 %v9444_v13, %v9444_v13  ;;  %v2269_v43 = vrot.slane %v1483_v57, 4  ;;  %v9482_v18 = vpop.f32.mrb[127].mxu0 }
 0x293   :  { %v2265_v32 = vrot.slane %v2264_v25, 2  ;;  %v2787_v41 = vrot.slane %v2786_v63, 2  ;;  %v2791_v54 = vrot.slane %v1570_v37, 4  ;;  %v1484_v60 = vadd.f32 %v9081_v47, %v9000_v51 }
 0x294   :  { %12875 = vst [vmem:[#allocation116_spill] sm:$0xff] %v9464_v52  ;;  %v9476_v62 = vunpack.c.l.b16 %v3528_v2  ;;  %v3613_v33 = vpack.c.bf16 %v9458_v23, %v9458_v23  ;;  %v2778_v42 = vmax.f32 %v2776_v44, %v2777_v55  ;;  %v1571_v13 = vadd.f32 %v9075_v3, %v8925_v56 }
 0x295   :  { %v9484_v19 = vmax.f32 %v2772_v15, 0.0  ;;  %v2262_v21 = vmax.f32 %v2260_v61, %v2261_v6  ;;  %v2782_v14 = vmax.f32 %v2780_v36, %v2781_v30  ;;  %v2792_v52 = vmax.f32 %v1570_v37, %v2791_v54 }
 0x296   :  { %12876 = vst [vmem:[#allocation191_spill] sm:$0xff] %v9476_v62  ;;  %v9486_v20 = vunpack.c.l.b16 %v3611_v24  ;;  %v2270_v51 = vmax.f32 %v1483_v57, %v2269_v43  ;;  %v2275_v1 = vrot.slane %v1484_v60, 4  ;;  %v2797_v2 = vrot.slane %v1571_v13, 4 }
 0x297   :  { %12877 = vst [vmem:[#allocation192_spill] sm:$0xff] %v9484_v19  ;;  %v9488_v59 = vunpack.c.l.b16 %v3612_v35  ;;  %v2266_v62 = vmax.f32 %v2264_v25, %v2265_v32  ;;  %v2788_v23 = vmax.f32 %v2786_v63, %v2787_v41  ;;  %v2793_v44 = vrot.slane %v2792_v52, 2  ;;  %v9503_v63 = vpop.f32.mrb[128].mxu0 }
 0x298   :  { %12878 = vst [vmem:[#allocation193_spill] sm:$0xff] %v9486_v20  ;;  %v9490_v55 = vunpack.c.l.b16 %v3613_v33  ;;  %v9492_v56 = vmax.f32 %v2778_v42, 0.0  ;;  %v2798_v46 = vmax.f32 %v1571_v13, %v2797_v2  ;;  %v4351_v61 = vsel %vm4283_vm2, %v9045_v17, %v9049_v12 }
 0x299   :  { %12879 = vst [vmem:[#allocation194_spill] sm:$0xff] %v9488_v59  ;;  %v9499_v57 = vmax.f32 %v2262_v21, 0.0  ;;  %v2783_v15 = vrot.slane %v2782_v14, 1  ;;  %v4352_v25 = vsel %vm4285_vm3, %v9053_v16, %v4351_v61  ;;  %v2271_v6 = vrot.slane %v2270_v51, 2 }
 0x29a   :  { %12880 = vst [vmem:[#allocation195_spill] sm:$0xff] %v9490_v55  ;;  %12881 = vst [vmem:[#allocation196_spill] sm:$0xff] %v9492_v56  ;;  %v2276_v30 = vmax.f32 %v1484_v60, %v2275_v1  ;;  %v12883_v42 = vpack.c.bf16 %v9109_v31, %v9109_v31  ;;  %v1572_v17 = vadd.f32 %v9081_v47, %v9033_v11  ;;  %v9518_v1 = vpop.f32.mrb[129].mxu0  ;;  %v2799_v35 = vrot.slane %v2798_v46, 2  ;;  %v12904_v31 = vld [vmem:[#allocation133_spill] sm:$0xff] }
 0x29b   :  { %12882 = vst [vmem:[#allocation197_spill] sm:$0xff] %v9499_v57  ;;  %v2794_v12 = vmax.f32 %v2792_v52, %v2793_v44  ;;  %v12884_v21 = vpack.c.bf16 %v9269_v53, %v9269_v53  ;;  %v4353_v24 = vsel %vm4287_vm4, %v9071_v4, %v4352_v25  ;;  %v4365_v16 = vsel %vm4283_vm2, %v9209_v50, %v9213_v26  ;;  %v9534_v61 = vpop.f32.mrb[130].mxu0 }
 0x29c   :  { %v4102_v13 = vunpack.c.l.b16 %v12883_v42  ;;  %v4354_v43 = vsel %vm4289_vm5, %v9133_v9, %v4353_v24  ;;  %v4366_v11 = vsel %vm4285_vm3, %v9219_v40, %v4365_v16  ;;  %v2803_v52 = vrot.slane %v1572_v17, 4 }
 0x29d   :  { %v4118_v37 = vunpack.c.l.b16 %v12884_v21  ;;  %v2267_v41 = vrot.slane %v2266_v62, 1  ;;  %v2789_v54 = vrot.slane %v2788_v23, 1  ;;  %v4367_v4 = vsel %vm4287_vm4, %v9231_v45, %v4366_v11 }
 0x29e   :  { %v9528_v60 = vmax.f32 %v2782_v14, %v2783_v15  ;;  %v2277_v26 = vrot.slane %v2276_v30, 2  ;;  %v4368_v50 = vsel %vm4289_vm5, %v9289_v29, %v4367_v4  ;;  %v2804_v33 = vmax.f32 %v1572_v17, %v2803_v52  ;;  %v9541_v14 = vpop.f32.mrb[131].mxu0  ;;  %v12889_v17 = vld [vmem:[#allocation150_spill] sm:$0xff] }
 0x29f   :  { %v2272_v9 = vmax.f32 %v2270_v51, %v2271_v6  ;;  %v2795_v2 = vrot.slane %v2794_v12, 1  ;;  %v4355_v40 = vsel %vm4291_vm6, %v4102_v13, %v4354_v43  ;;  %v4369_v44 = vsel %vm4291_vm6, %v4118_v37, %v4368_v50  ;;  %v12888_v13 = vld [vmem:[#allocation82_spill] sm:$0xff]  ;;  %v12890_v37 = vld [vmem:[#allocation149_spill] sm:$0xff]  ;;  %v12892_v43 = vld [vmem:[#allocation151_spill] sm:$0xff] }
 0x2a0   :  { %v2800_v25 = vmax.f32 %v2798_v46, %v2799_v35  ;;  %v9536_v42 = vpack.c.b16 %v4369_v44, %v4355_v40  ;;  %v2805_v21 = vrot.slane %v2804_v33, 2  ;;  %v4344_v45 = vsel %vm4283_vm2, %v9035_v5, %v9043_v38  ;;  %v12891_v38 = vld [vmem:[#allocation91_spill] sm:$0xff]  ;;  %v12894_v44 = vld [vmem:[#allocation152_spill] sm:$0xff] }
 0x2a1   :  { %v12886_v29 = vpack.c.bf16 %v9087_v8, %v9087_v8  ;;  %v12887_v15 = vpack.c.bf16 %v9247_v28, %v9247_v28  ;;  %v4345_v46 = vsel %vm4285_vm3, %v12888_v13, %v4344_v45  ;;  %v4358_v24 = vsel %vm4283_vm2, %v12890_v37, %v12889_v17  ;;  %v12893_v50 = vld [vmem:[#allocation135_spill] sm:$0xff]  ;;  %v9573_v17 = vpop.f32.mrb[132].mxu0 }
 0x2a2   :  { %12885 = vst [vmem:[#allocation198_spill] sm:$0xff] %v9536_v42  ;;  %v2278_v16 = vmax.f32 %v2276_v30, %v2277_v26  ;;  %4914 = vmatprep.mubr.bf16.mxu1 %v9536_v42  ;;  %v2806_v5 = vmax.f32 %v2804_v33, %v2805_v21  ;;  %v4346_v35 = vsel %vm4287_vm4, %v12891_v38, %v4345_v46  ;;  %v12895_v26 = vld [vmem:[#allocation162_spill] sm:$0xff]  ;;  %v9565_v21 = vpop.f32.mrb[48].mxu1 }
 0x2a3   :  { %v4101_v51 = vunpack.c.l.b16 %v12886_v29  ;;  %v4117_v6 = vunpack.c.l.b16 %v12887_v15  ;;  %v4359_v11 = vsel %vm4285_vm3, %v12892_v43, %v4358_v24  ;;  %v2268_v52 = vmax.f32 %v2266_v62, %v2267_v41  ;;  %v12896_v62 = vld [vmem:[#allocation89_spill] sm:$0xff]  ;;  %v12897_v41 = vld [vmem:[#allocation127_spill] sm:$0xff]  ;;  %v9575_v37 = vpop.f32.mrb[49].mxu1  ;;  %v9579_v43 = vld [vmem:[#allocation7] sm:$0xff] }
 0x2a4   :  { %v2790_v4 = vmax.f32 %v2788_v23, %v2789_v54  ;;  %v4347_v40 = vsel %vm4289_vm5, %v12893_v50, %v4346_v35  ;;  %v4360_v45 = vsel %vm4287_vm4, %v12894_v44, %v4359_v11  ;;  %v2273_v29 = vrot.slane %v2272_v9, 1  ;;  %v12899_v11 = vld [vmem:[#allocation129_spill] sm:$0xff]  ;;  %v9585_v50 = vpop.f32.mrb[50].mxu1 }
 0x2a5   :  { %v2801_v15 = vrot.slane %v2800_v25, 1  ;;  %v2807_v30 = vrot.slane %v2806_v5, 1  ;;  %v4361_v33 = vsel %vm4289_vm5, %v12895_v26, %v4360_v45  ;;  %v4348_v13 = vsel %vm4291_vm6, %v4101_v51, %v4347_v40  ;;  %v9589_v45 = vld [vmem:[#allocation7 + $0x8] sm:$0xff] }
 0x2a6   :  { %v4362_v46 = vsel %vm4291_vm6, %v4117_v6, %v4361_v33  ;;  %v1573_v23 = vadd.f32 %v9075_v3, %v12896_v62  ;;  %v1574_v54 = vadd.f32 %v9081_v47, %v12897_v41  ;;  %v2796_v24 = vmax.f32 %v2794_v12, %v2795_v2  ;;  %v9583_v6 = vpop.f32.mrb[133].mxu0  ;;  %v12900_v47 = vld [vmem:[#allocation128_spill] sm:$0xff]  ;;  %v12902_v62 = vld [vmem:[#allocation130_spill] sm:$0xff] }
 0x2a7   :  { %v2279_v38 = vrot.slane %v2278_v16, 1  ;;  %v9577_v35 = vpack.c.b16 %v4362_v46, %v4348_v13  ;;  %v1575_v51 = vadd.f32 %v9579_v43, %v12899_v11  ;;  %v1485_v44 = vadd.f32 %v9579_v43, %v12900_v47  ;;  %v12901_v12 = vld [vmem:[#allocation132_spill] sm:$0xff]  ;;  %v9593_v26 = vpop.f32.mrb[134].mxu0 }
 0x2a8   :  { %v2809_v3 = vrot.slane %v1573_v23, 4  ;;  %v2815_v40 = vrot.slane %v1574_v54, 4  ;;  %v1576_v2 = vadd.f32 %v9589_v45, %v12901_v12  ;;  %v2802_v33 = vmax.f32 %v2800_v25, %v2801_v15 }
 0x2a9   :  { %12898 = vst [vmem:[#allocation82_spill] sm:$0xff] %v9577_v35  ;;  %v2808_v13 = vmax.f32 %v2806_v5, %v2807_v30  ;;  %4915 = vmatmul.mubr.bf16.gmra.mrb[88].mxu1 %v9577_v35  ;;  %v2821_v46 = vrot.slane %v1575_v51, 4  ;;  %v1486_v41 = vadd.f32 %v9589_v45, %v12902_v62  ;;  %v2281_v36 = vrot.slane %v1485_v44, 4 }
 0x2aa   :  { %v2810_v11 = vmax.f32 %v1573_v23, %v2809_v3  ;;  %v2816_v32 = vmax.f32 %v1574_v54, %v2815_v40  ;;  %v2827_v28 = vrot.slane %v1576_v2, 4  ;;  %v9598_v47 = vmax.f32 %v2790_v4, 0.0 }
 0x2ab   :  { %v2822_v8 = vmax.f32 %v1575_v51, %v2821_v46  ;;  %v2287_v53 = vrot.slane %v1486_v41, 4  ;;  %v1577_v12 = vadd.f32 %v9579_v43, %v12904_v31  ;;  %v2274_v42 = vmax.f32 %v2272_v9, %v2273_v29 }
 0x2ac   :  { %12903 = vst [vmem:[#allocation150_spill] sm:$0xff] %v9598_v47  ;;  %v9602_v25 = vmax.f32 %v2796_v24, 0.0  ;;  %v2811_v5 = vrot.slane %v2810_v11, 2  ;;  %v2817_v15 = vrot.slane %v2816_v32, 2  ;;  %v3529_v30 = vpack.c.bf16 %v9499_v57, %v9499_v57 }
 0x2ad   :  { %v2280_v62 = vmax.f32 %v2278_v16, %v2279_v38  ;;  %v9606_v23 = vmax.f32 %v2802_v33, 0.0  ;;  %v2833_v54 = vrot.slane %v1577_v12, 4  ;;  %v9608_v3 = vmax.f32 %v2808_v13, 0.0 }
 0x2ae   :  { %12905 = vst [vmem:[#allocation149_spill] sm:$0xff] %v9602_v25  ;;  %v2823_v4 = vrot.slane %v2822_v8, 2  ;;  %v2282_v51 = vmax.f32 %v1485_v44, %v2281_v36  ;;  %v2828_v40 = vmax.f32 %v1576_v2, %v2827_v28  ;;  %v9611_v46 = vmax.f32 %v9528_v60, 0.0  ;;  %v12912_v60 = vld [vmem:[#allocation134_spill] sm:$0xff] }
 0x2af   :  { %12906 = vst [vmem:[#allocation91_spill] sm:$0xff] %v9606_v23  ;;  %12907 = vst [vmem:[#allocation151_spill] sm:$0xff] %v9608_v3  ;;  %v2812_v31 = vmax.f32 %v2810_v11, %v2811_v5  ;;  %v2818_v9 = vmax.f32 %v2816_v32, %v2817_v15  ;;  %v2288_v29 = vmax.f32 %v1486_v41, %v2287_v53  ;;  %v9613_v24 = vmax.f32 %v2268_v52, 0.0  ;;  %v9629_v5 = vpop.f32.mrb[51].mxu1 }
 0x2b0   :  { %12908 = vst [vmem:[#allocation135_spill] sm:$0xff] %v9611_v46  ;;  %v3617_v57 = vpack.c.bf16 %v9598_v47, %v9598_v47  ;;  %v9617_v16 = vmax.f32 %v2274_v42, 0.0  ;;  %v3618_v38 = vpack.c.bf16 %v9602_v25, %v9602_v25  ;;  %v9621_v33 = vmax.f32 %v2280_v62, 0.0  ;;  %12913 = vst [vmem:[#allocation127_spill] sm:$0xff] %v9629_v5  ;;  %v9639_v20 = vpop.f32.mrb[52].mxu1 }
 0x2b1   :  { %12909 = vst [vmem:[#allocation152_spill] sm:$0xff] %v9613_v24  ;;  %v3619_v28 = vpack.c.bf16 %v9606_v23, %v9606_v23  ;;  %v2834_v36 = vmax.f32 %v1577_v12, %v2833_v54  ;;  %v1487_v32 = vadd.f32 %v9579_v43, %v12912_v60  ;;  %v3620_v53 = vpack.c.bf16 %v9608_v3, %v9608_v3  ;;  %v9635_v60 = vpop.f32.mrb[135].mxu0  ;;  %v9646_v59 = vpop.f32.mrb[53].mxu1 }
 0x2b2   :  { %12910 = vst [vmem:[#allocation162_spill] sm:$0xff] %v9617_v16  ;;  %12911 = vst [vmem:[#allocation89_spill] sm:$0xff] %v9621_v33  ;;  %v2824_v52 = vmax.f32 %v2822_v8, %v2823_v4  ;;  %v2283_v44 = vrot.slane %v2282_v51, 2  ;;  %v2829_v2 = vrot.slane %v2828_v40, 2  ;;  %v2813_v42 = vrot.slane %v2812_v31, 1 }
 0x2b3   :  { %v2819_v13 = vrot.slane %v2818_v9, 1  ;;  %v2289_v41 = vrot.slane %v2288_v29, 2  ;;  %v2293_v11 = vrot.slane %v1487_v32, 4  ;;  %v3530_v15 = vpack.c.bf16 %v9613_v24, %v9613_v24  ;;  %12914 = vst [vmem:[#allocation129_spill] sm:$0xff] %v9635_v60  ;;  %12915 = vst [vmem:[#allocation128_spill] sm:$0xff] %v9639_v20 }
 0x2b4   :  { %v4215_v62 = vunpack.c.l.b16 %v3617_v57  ;;  %v3531_v12 = vpack.c.bf16 %v9617_v16, %v9617_v16  ;;  %v4216_v54 = vunpack.c.l.b16 %v3618_v38  ;;  %v3532_v8 = vpack.c.bf16 %v9621_v33, %v9621_v33  ;;  %12918 = vst [vmem:[#allocation130_spill] sm:$0xff] %v9646_v59 }
 0x2b5   :  { %v4217_v4 = vunpack.c.l.b16 %v3619_v28  ;;  %v2835_v47 = vrot.slane %v2834_v36, 2  ;;  %v2294_v23 = vmax.f32 %v1487_v32, %v2293_v11  ;;  %v4218_v25 = vunpack.c.l.b16 %v3620_v53 }
 0x2b6   :  { %v2825_v3 = vrot.slane %v2824_v52, 1  ;;  %v2284_v35 = vmax.f32 %v2282_v51, %v2283_v44  ;;  %v2830_v55 = vmax.f32 %v2828_v40, %v2829_v2  ;;  %v12916_v57 = vpack.c.bf16 %v9484_v19, %v9484_v19  ;;  %v9656_v40 = vpop.f32.mrb[54].mxu1 }
 0x2b7   :  { %v2814_v38 = vmax.f32 %v2812_v31, %v2813_v42  ;;  %v2820_v16 = vmax.f32 %v2818_v9, %v2819_v13  ;;  %v2290_v56 = vmax.f32 %v2288_v29, %v2289_v41  ;;  %v9648_v33 = vunpack.c.l.b16 %v3529_v30  ;;  %12922 = vst [vmem:[#allocation200_spill] sm:$0xff] %v9656_v40  ;;  %v9663_v29 = vpop.f32.mrb[55].mxu1 }
 0x2b8   :  { %v9644_v24 = vunpack.c.l.b16 %v12916_v57  ;;  %v9652_v32 = vunpack.c.l.b16 %v3530_v15  ;;  %v9654_v51 = vunpack.c.l.b16 %v3531_v12  ;;  %v9658_v53 = vunpack.c.l.b16 %v3532_v8  ;;  %12924 = vst [vmem:[#allocation202_spill] sm:$0xff] %v9663_v29  ;;  %v9668_v41 = vpop.f32.mrb[56].mxu1  ;;  %v12928_v8 = vld [vmem:[#allocation136_spill] sm:$0xff] }
 0x2b9   :  { %12919 = vst [vmem:[#allocation133_spill] sm:$0xff] %v9648_v33  ;;  %v9661_v44 = vsel %vm4279_vm0, %v4217_v4, %v4215_v62  ;;  %v2836_v31 = vmax.f32 %v2834_v36, %v2835_v47  ;;  %v2295_v9 = vrot.slane %v2294_v23, 2  ;;  %v9666_v30 = vsel %vm4279_vm0, %v4218_v25, %v4216_v54  ;;  %12925 = vst [vmem:[#allocation203_spill] sm:$0xff] %v9668_v41  ;;  %v9676_v47 = vpop.f32.mrb[136].mxu0  ;;  %v12930_v36 = vld [vmem:[#allocation141_spill] sm:$0xff]  ;;  %v12931_v25 = vld [vmem:[#allocation142_spill] sm:$0xff] }
 0x2ba   :  { %12917 = vst [vmem:[#allocation132_spill] sm:$0xff] %v9644_v24  ;;  %12920 = vst [vmem:[#allocation134_spill] sm:$0xff] %v9652_v32  ;;  %v2826_v2 = vmax.f32 %v2824_v52, %v2825_v3  ;;  %v2285_v42 = vrot.slane %v2284_v35, 1  ;;  %v2831_v13 = vrot.slane %v2830_v55, 1  ;;  %v9670_v11 = vmax.f32 %v2814_v38, 0.0  ;;  %v12932_v52 = vld [vmem:[#allocation143_spill] sm:$0xff] }
 0x2bb   :  { %12921 = vst [vmem:[#allocation199_spill] sm:$0xff] %v9654_v51  ;;  %12923 = vst [vmem:[#allocation201_spill] sm:$0xff] %v9658_v53  ;;  %v9672_v15 = vmax.f32 %v2820_v16, 0.0  ;;  %v2291_v12 = vrot.slane %v2290_v56, 1  ;;  %v1578_v62 = vadd.f32 %v9589_v45, %v12928_v8  ;;  %v1488_v4 = vadd.f32 %v9589_v45, %v12930_v36  ;;  %v12933_v57 = vld [vmem:[#allocation144_spill] sm:$0xff]  ;;  %v12934_v24 = vld [vmem:[#allocation147_spill] sm:$0xff] }
 0x2bc   :  { %12926 = vst [vmem:[#allocation204_spill] sm:$0xff] %v9670_v11  ;;  %12929 = vst [vmem:[#allocation136_spill] sm:$0xff] %v9676_v47  ;;  %v1579_v3 = vadd.f32 %v9579_v43, %v12931_v25  ;;  %v1580_v54 = vadd.f32 %v9589_v45, %v12932_v52  ;;  %v1581_v38 = vadd.f32 %v9579_v43, %v12933_v57  ;;  %v2837_v16 = vrot.slane %v2836_v31, 1  ;;  %v12935_v25 = vld [vmem:[#allocation148_spill] sm:$0xff] }
 0x2bd   :  { %12927 = vst [vmem:[#allocation205_spill] sm:$0xff] %v9672_v15  ;;  %v2296_v28 = vmax.f32 %v2294_v23, %v2295_v9  ;;  %v2839_v19 = vrot.slane %v1578_v62, 4  ;;  %v1582_v8 = vadd.f32 %v9589_v45, %v12934_v24  ;;  %v2299_v46 = vrot.slane %v1488_v4, 4 }
 0x2be   :  { %v2845_v51 = vrot.slane %v1579_v3, 4  ;;  %v2851_v33 = vrot.slane %v1580_v54, 4  ;;  %v2857_v53 = vrot.slane %v1581_v38, 4  ;;  %v2286_v36 = vmax.f32 %v2284_v35, %v2285_v42 }
 0x2bf   :  { %v2840_v32 = vmax.f32 %v1578_v62, %v2839_v19  ;;  %v2863_v47 = vrot.slane %v1582_v8, 4  ;;  %v1583_v41 = vadd.f32 %v9579_v43, %v12935_v25  ;;  %v9690_v52 = vmax.f32 %v2826_v2, 0.0  ;;  %v12937_v2 = vld [vmem:[#allocation145_spill] sm:$0xff] }
 0x2c0   :  { %v2832_v29 = vmax.f32 %v2830_v55, %v2831_v13  ;;  %v2300_v57 = vmax.f32 %v1488_v4, %v2299_v46  ;;  %v2846_v40 = vmax.f32 %v1579_v3, %v2845_v51  ;;  %v3621_v23 = vpack.c.bf16 %v9670_v11, %v9670_v11 }
 0x2c1   :  { %12936 = vst [vmem:[#allocation141_spill] sm:$0xff] %v9690_v52  ;;  %v2292_v9 = vmax.f32 %v2290_v56, %v2291_v12  ;;  %v2838_v24 = vmax.f32 %v2836_v31, %v2837_v16  ;;  %v2297_v59 = vrot.slane %v2296_v28, 1  ;;  %v3622_v20 = vpack.c.bf16 %v9672_v15, %v9672_v15 }
 0x2c2   :  { %v2841_v35 = vrot.slane %v2840_v32, 2  ;;  %v2852_v19 = vmax.f32 %v1580_v54, %v2851_v33  ;;  %v2858_v42 = vmax.f32 %v1581_v38, %v2857_v53  ;;  %v2301_v62 = vrot.slane %v2300_v57, 2 }
 0x2c3   :  { %v2864_v60 = vmax.f32 %v1582_v8, %v2863_v47  ;;  %v2869_v25 = vrot.slane %v1583_v41, 4  ;;  %v1489_v55 = vadd.f32 %v9579_v43, %v12937_v2  ;;  %v3623_v46 = vpack.c.bf16 %v9690_v52, %v9690_v52  ;;  %v9708_v52 = vpop.f32.mrb[57].mxu1 }
 0x2c4   :  { %v9700_v51 = vmax.f32 %v2286_v36, 0.0  ;;  %v9702_v56 = vmax.f32 %v2832_v29, 0.0  ;;  %v2847_v31 = vrot.slane %v2846_v40, 2  ;;  %v9704_v13 = vmax.f32 %v2292_v9, 0.0  ;;  %12942 = vst [vmem:[#allocation148_spill] sm:$0xff] %v9708_v52 }
 0x2c5   :  { %v9706_v12 = vmax.f32 %v2838_v24, 0.0  ;;  %v2298_v33 = vmax.f32 %v2296_v28, %v2297_v59  ;;  %v2305_v53 = vrot.slane %v1489_v55, 4  ;;  %v4219_v4 = vunpack.c.l.b16 %v3621_v23  ;;  %v9714_v59 = vpop.f32.mrb[137].mxu0 }
 0x2c6   :  { %12938 = vst [vmem:[#allocation142_spill] sm:$0xff] %v9700_v51  ;;  %12939 = vst [vmem:[#allocation143_spill] sm:$0xff] %v9702_v56  ;;  %v2842_v47 = vmax.f32 %v2840_v32, %v2841_v35  ;;  %v2853_v3 = vrot.slane %v2852_v19, 2  ;;  %v2859_v54 = vrot.slane %v2858_v42, 2  ;;  %v2302_v38 = vmax.f32 %v2300_v57, %v2301_v62 }
 0x2c7   :  { %12940 = vst [vmem:[#allocation144_spill] sm:$0xff] %v9704_v13  ;;  %12941 = vst [vmem:[#allocation147_spill] sm:$0xff] %v9706_v12  ;;  %v2865_v16 = vrot.slane %v2864_v60, 2  ;;  %v2870_v8 = vmax.f32 %v1583_v41, %v2869_v25  ;;  %v2306_v2 = vmax.f32 %v1489_v55, %v2305_v53  ;;  %v4220_v36 = vunpack.c.l.b16 %v3622_v20  ;;  %v9728_v53 = vpop.f32.mrb[58].mxu1 }
 0x2c8   :  { %v3533_v29 = vpack.c.bf16 %v9700_v51, %v9700_v51  ;;  %v3624_v9 = vpack.c.bf16 %v9702_v56, %v9702_v56  ;;  %v2848_v24 = vmax.f32 %v2846_v40, %v2847_v31  ;;  %12943 = vst [vmem:[#allocation145_spill] sm:$0xff] %v9714_v59  ;;  %v3534_v28 = vpack.c.bf16 %v9704_v13, %v9704_v13  ;;  %v12957_v13 = vld [vmem:[#allocation77_spill] sm:$0xff] }
 0x2c9   :  { %v3625_v32 = vpack.c.bf16 %v9706_v12, %v9706_v12  ;;  %v9720_v41 = vmax.f32 %v2298_v33, 0.0  ;;  %v2307_v57 = vrot.slane %v2306_v2, 2  ;;  %v9722_v23 = vunpack.c.l.b16 %v3623_v46  ;;  %12947 = vst [vmem:[#allocation209_spill] sm:$0xff] %v9728_v53 }
 0x2ca   :  { %v2843_v20 = vrot.slane %v2842_v47, 1  ;;  %v2854_v35 = vmax.f32 %v2852_v19, %v2853_v3  ;;  %v2860_v62 = vmax.f32 %v2858_v42, %v2859_v54  ;;  %v9726_v25 = vsel %vm4281_vm1, %v4219_v4, %v9661_v44  ;;  %v9738_v19 = vpop.f32.mrb[138].mxu0  ;;  %v9740_v42 = vpop.f32.mrb[59].mxu1 }
 0x2cb   :  { %12944 = vst [vmem:[#allocation206_spill] sm:$0xff] %v9720_v41  ;;  %12945 = vst [vmem:[#allocation207_spill] sm:$0xff] %v9722_v23  ;;  %v2303_v40 = vrot.slane %v2302_v38, 1  ;;  %v2866_v55 = vmax.f32 %v2864_v60, %v2865_v16  ;;  %v2871_v31 = vrot.slane %v2870_v8, 2  ;;  %v9732_v12 = vsel %vm4281_vm1, %v4220_v36, %v9666_v30  ;;  %v9748_v54 = vpop.f32.mrb[139].mxu0  ;;  %v12959_v60 = vld [vmem:[#allocation87_spill] sm:$0xff] }
 0x2cc   :  { %12946 = vst [vmem:[#allocation208_spill] sm:$0xff] %v9726_v25  ;;  %12948 = vst [vmem:[#allocation210_spill] sm:$0xff] %v9732_v12  ;;  %v9734_v33 = vunpack.c.l.b16 %v3533_v29  ;;  %v9736_v46 = vunpack.c.l.b16 %v3624_v9  ;;  %v2849_v11 = vrot.slane %v2848_v24, 1  ;;  %v9742_v44 = vunpack.c.l.b16 %v3534_v28  ;;  %v12956_v29 = vld [vmem:[#allocation153_spill] sm:$0xff] }
 0x2cd   :  { %12951 = vst [vmem:[#allocation213_spill] sm:$0xff] %v9738_v19  ;;  %12952 = vst [vmem:[#allocation214_spill] sm:$0xff] %v9740_v42  ;;  %v9744_v4 = vunpack.c.l.b16 %v3625_v32  ;;  %v2308_v3 = vmax.f32 %v2306_v2, %v2307_v57  ;;  %v2844_v30 = vmax.f32 %v2842_v47, %v2843_v20  ;;  %v2855_v16 = vrot.slane %v2854_v35, 1  ;;  %v12960_v57 = vld [vmem:[#allocation155_spill] sm:$0xff]  ;;  %v9760_v20 = vpop.f32.mrb[60].mxu1 }
 0x2ce   :  { %12949 = vst [vmem:[#allocation211_spill] sm:$0xff] %v9734_v33  ;;  %12950 = vst [vmem:[#allocation212_spill] sm:$0xff] %v9736_v46  ;;  %v2861_v36 = vrot.slane %v2860_v62, 1  ;;  %v1584_v9 = vadd.f32 %v9589_v45, %v12956_v29  ;;  %v2304_v56 = vmax.f32 %v2302_v38, %v2303_v40  ;;  %v2867_v15 = vrot.slane %v2866_v55, 1  ;;  %v12962_v38 = vld [vmem:[#allocation156_spill] sm:$0xff]  ;;  %v12963_v40 = vld [vmem:[#allocation158_spill] sm:$0xff] }
 0x2cf   :  { %12953 = vst [vmem:[#allocation215_spill] sm:$0xff] %v9742_v44  ;;  %12954 = vst [vmem:[#allocation216_spill] sm:$0xff] %v9744_v4  ;;  %v2872_v51 = vmax.f32 %v2870_v8, %v2871_v31  ;;  %v1490_v28 = vadd.f32 %v9589_v45, %v12957_v13  ;;  %v2850_v32 = vmax.f32 %v2848_v24, %v2849_v11  ;;  %v12958_v4 = vld [vmem:[#allocation83_spill] sm:$0xff]  ;;  %v2309_v25 = vrot.slane %v2308_v3, 1 }
 0x2d0   :  { %12955 = vst [vmem:[#allocation217_spill] sm:$0xff] %v9748_v54  ;;  %v1585_v23 = vadd.f32 %v9579_v43, %v12958_v4  ;;  %v1491_v2 = vadd.f32 %v9579_v43, %v12959_v60  ;;  %v1586_v47 = vadd.f32 %v9589_v45, %v12960_v57  ;;  %12961 = vst [vmem:[#allocation153_spill] sm:$0xff] %v9760_v20  ;;  %v2875_v11 = vrot.slane %v1584_v9, 4 }
 0x2d1   :  { %v2311_v29 = vrot.slane %v1490_v28, 4  ;;  %v1492_v8 = vadd.f32 %v9589_v45, %v12962_v38  ;;  %v1587_v13 = vadd.f32 %v9579_v43, %v12963_v40  ;;  %v2856_v46 = vmax.f32 %v2854_v35, %v2855_v16 }
 0x2d2   :  { %v2881_v24 = vrot.slane %v1585_v23, 4  ;;  %v2317_v31 = vrot.slane %v1491_v2, 4  ;;  %v2887_v4 = vrot.slane %v1586_v47, 4  ;;  %v2862_v41 = vmax.f32 %v2860_v62, %v2861_v36 }
 0x2d3   :  { %v2312_v12 = vmax.f32 %v1490_v28, %v2311_v29  ;;  %v2323_v60 = vrot.slane %v1492_v8, 4  ;;  %v2893_v33 = vrot.slane %v1587_v13, 4  ;;  %v2868_v57 = vmax.f32 %v2866_v55, %v2867_v15  ;;  %v12967_v28 = vld [vmem:[#allocation159_spill] sm:$0xff] }
 0x2d4   :  { %v2882_v44 = vmax.f32 %v1585_v23, %v2881_v24  ;;  %v2318_v20 = vmax.f32 %v1491_v2, %v2317_v31  ;;  %v9766_v54 = vmax.f32 %v2844_v30, 0.0  ;;  %v2888_v42 = vmax.f32 %v1586_v47, %v2887_v4 }
 0x2d5   :  { %v2324_v19 = vmax.f32 %v1492_v8, %v2323_v60  ;;  %v2894_v38 = vmax.f32 %v1587_v13, %v2893_v33  ;;  %v9768_v53 = vmax.f32 %v2304_v56, 0.0  ;;  %v2873_v40 = vrot.slane %v2872_v51, 1 }
 0x2d6   :  { %12964 = vst [vmem:[#allocation77_spill] sm:$0xff] %v9766_v54  ;;  %v2310_v59 = vmax.f32 %v2308_v3, %v2309_v25  ;;  %v2876_v52 = vmax.f32 %v1584_v9, %v2875_v11  ;;  %v9770_v5 = vmax.f32 %v2850_v32, 0.0  ;;  %v2313_v35 = vrot.slane %v2312_v12, 2 }
 0x2d7   :  { %12965 = vst [vmem:[#allocation83_spill] sm:$0xff] %v9768_v53  ;;  %v2883_v16 = vrot.slane %v2882_v44, 2  ;;  %v1588_v62 = vadd.f32 %v9589_v45, %v12967_v28  ;;  %v9774_v15 = vmax.f32 %v2856_v46, 0.0  ;;  %v9776_v23 = vmax.f32 %v2862_v41, 0.0 }
 0x2d8   :  { %12966 = vst [vmem:[#allocation87_spill] sm:$0xff] %v9770_v5  ;;  %v9778_v55 = vmax.f32 %v2868_v57, 0.0  ;;  %v2319_v30 = vrot.slane %v2318_v20, 2  ;;  %v2889_v33 = vrot.slane %v2888_v42, 2  ;;  %v2325_v56 = vrot.slane %v2324_v19, 2 }
 0x2d9   :  { %12968 = vst [vmem:[#allocation155_spill] sm:$0xff] %v9774_v15  ;;  %12969 = vst [vmem:[#allocation156_spill] sm:$0xff] %v9776_v23  ;;  %v2895_v36 = vrot.slane %v2894_v38, 2  ;;  %v2899_v2 = vrot.slane %v1588_v62, 4  ;;  %v3626_v25 = vpack.c.bf16 %v9766_v54, %v9766_v54  ;;  %v2874_v3 = vmax.f32 %v2872_v51, %v2873_v40 }
 0x2da   :  { %12970 = vst [vmem:[#allocation158_spill] sm:$0xff] %v9778_v55  ;;  %v9782_v9 = vmax.f32 %v2310_v59, 0.0  ;;  %v2877_v32 = vrot.slane %v2876_v52, 2  ;;  %v3627_v46 = vpack.c.bf16 %v9770_v5, %v9770_v5  ;;  %v2314_v47 = vmax.f32 %v2312_v12, %v2313_v35 }
 0x2db   :  { %v2884_v41 = vmax.f32 %v2882_v44, %v2883_v16  ;;  %v2900_v29 = vmax.f32 %v1588_v62, %v2899_v2  ;;  %v3628_v13 = vpack.c.bf16 %v9774_v15, %v9774_v15  ;;  %v3629_v11 = vpack.c.bf16 %v9776_v23, %v9776_v23 }
 0x2dc   :  { %12971 = vst [vmem:[#allocation159_spill] sm:$0xff] %v9782_v9  ;;  %v2320_v24 = vmax.f32 %v2318_v20, %v2319_v30  ;;  %v3630_v51 = vpack.c.bf16 %v9778_v55, %v9778_v55  ;;  %v2890_v59 = vmax.f32 %v2888_v42, %v2889_v33  ;;  %v2326_v31 = vmax.f32 %v2324_v19, %v2325_v56  ;;  %v12977_v19 = vld [vmem:[#allocation161_spill] sm:$0xff] }
 0x2dd   :  { %v2896_v4 = vmax.f32 %v2894_v38, %v2895_v36  ;;  %v9794_v60 = vunpack.c.l.b16 %v3626_v25  ;;  %v9796_v12 = vmax.f32 %v2874_v3, 0.0  ;;  %v3537_v44 = vpack.c.bf16 %v9782_v9, %v9782_v9  ;;  %v12981_v55 = vld [vmem:[#allocation93_spill] sm:$0xff] }
 0x2de   :  { %v2878_v57 = vmax.f32 %v2876_v52, %v2877_v32  ;;  %v9800_v40 = vunpack.c.l.b16 %v3627_v46  ;;  %v2315_v35 = vrot.slane %v2314_v47, 1  ;;  %v2885_v16 = vrot.slane %v2884_v41, 1 }
 0x2df   :  { %12972 = vst [vmem:[#allocation218_spill] sm:$0xff] %v9794_v60  ;;  %12973 = vst [vmem:[#allocation219_spill] sm:$0xff] %v9796_v12  ;;  %v2901_v28 = vrot.slane %v2900_v29, 2  ;;  %v9802_v20 = vunpack.c.l.b16 %v3628_v13  ;;  %v9804_v62 = vunpack.c.l.b16 %v3629_v11  ;;  %v2321_v42 = vrot.slane %v2320_v24, 1  ;;  %v12979_v11 = vld [vmem:[#allocation164_spill] sm:$0xff] }
 0x2e0   :  { %12974 = vst [vmem:[#allocation220_spill] sm:$0xff] %v9800_v40  ;;  %v1589_v38 = vadd.f32 %v9579_v43, %v12977_v19  ;;  %v9808_v30 = vunpack.c.l.b16 %v3630_v51  ;;  %v2891_v33 = vrot.slane %v2890_v59, 1  ;;  %v2327_v56 = vrot.slane %v2326_v31, 1  ;;  %v12980_v51 = vld [vmem:[#allocation165_spill] sm:$0xff] }
 0x2e1   :  { %12975 = vst [vmem:[#allocation221_spill] sm:$0xff] %v9802_v20  ;;  %12976 = vst [vmem:[#allocation222_spill] sm:$0xff] %v9804_v62  ;;  %v2897_v36 = vrot.slane %v2896_v4, 1  ;;  %v9812_v2 = vunpack.c.l.b16 %v3537_v44  ;;  %v2879_v25 = vrot.slane %v2878_v57, 1  ;;  %v2316_v32 = vmax.f32 %v2314_v47, %v2315_v35 }
 0x2e2   :  { %12978 = vst [vmem:[#allocation161_spill] sm:$0xff] %v9808_v30  ;;  %v2905_v3 = vrot.slane %v1589_v38, 4  ;;  %v2886_v46 = vmax.f32 %v2884_v41, %v2885_v16  ;;  %v2902_v13 = vmax.f32 %v2900_v29, %v2901_v28  ;;  %v1590_v8 = vadd.f32 %v9589_v45, %v12979_v11  ;;  %v12982_v41 = vld [vmem:[#allocation166_spill] sm:$0xff] }
 0x2e3   :  { %v2322_v23 = vmax.f32 %v2320_v24, %v2321_v42  ;;  %v1591_v5 = vadd.f32 %v9579_v43, %v12980_v51  ;;  %v1493_v15 = vadd.f32 %v9579_v43, %v12981_v55  ;;  %v2892_v54 = vmax.f32 %v2890_v59, %v2891_v33  ;;  %v12983_v24 = vld [vmem:[#allocation167_spill] sm:$0xff]  ;;  %v12984_v42 = vld [vmem:[#allocation168_spill] sm:$0xff] }
 0x2e4   :  { %v2906_v19 = vmax.f32 %v1589_v38, %v2905_v3  ;;  %v2328_v52 = vmax.f32 %v2326_v31, %v2327_v56  ;;  %v2898_v44 = vmax.f32 %v2896_v4, %v2897_v36  ;;  %v2911_v9 = vrot.slane %v1590_v8, 4 }
 0x2e5   :  { %v2917_v40 = vrot.slane %v1591_v5, 4  ;;  %v2329_v47 = vrot.slane %v1493_v15, 4  ;;  %v1592_v29 = vadd.f32 %v9589_v45, %v12982_v41  ;;  %v2903_v35 = vrot.slane %v2902_v13, 1 }
 0x2e6   :  { %v2907_v62 = vrot.slane %v2906_v19, 2  ;;  %v2912_v16 = vmax.f32 %v1590_v8, %v2911_v9  ;;  %v1494_v28 = vadd.f32 %v9589_v45, %v12983_v24  ;;  %v1593_v38 = vadd.f32 %v9579_v43, %v12984_v42 }
 0x2e7   :  { %v2918_v55 = vmax.f32 %v1591_v5, %v2917_v40  ;;  %v2330_v59 = vmax.f32 %v1493_v15, %v2329_v47  ;;  %v2923_v31 = vrot.slane %v1592_v29, 4  ;;  %v2880_v4 = vmax.f32 %v2878_v57, %v2879_v25  ;;  %v9838_v40 = vpop.f32.mrb[61].mxu1 }
 0x2e8   :  { %v2908_v3 = vmax.f32 %v2906_v19, %v2907_v62  ;;  %v2913_v33 = vrot.slane %v2912_v16, 2  ;;  %v2335_v56 = vrot.slane %v1494_v28, 4  ;;  %v2929_v36 = vrot.slane %v1593_v38, 4  ;;  %v12991_v19 = vld [vmem:[#allocation169_spill] sm:$0xff] }
 0x2e9   :  { %v9826_v11 = vmax.f32 %v2886_v46, 0.0  ;;  %v9828_v51 = vmax.f32 %v2322_v23, 0.0  ;;  %v9830_v41 = vmax.f32 %v2328_v52, 0.0  ;;  %v9832_v9 = vmax.f32 %v2898_v44, 0.0 }
 0x2ea   :  { %v2904_v8 = vmax.f32 %v2902_v13, %v2903_v35  ;;  %v2909_v24 = vrot.slane %v2908_v3, 1  ;;  %v2331_v12 = vrot.slane %v2330_v59, 2  ;;  %v2336_v42 = vmax.f32 %v1494_v28, %v2335_v56 }
 0x2eb   :  { %12985 = vst [vmem:[#allocation164_spill] sm:$0xff] %v9826_v11  ;;  %12986 = vst [vmem:[#allocation165_spill] sm:$0xff] %v9828_v51  ;;  %v9834_v62 = vmax.f32 %v2316_v32, 0.0  ;;  %v9836_v5 = vmax.f32 %v2892_v54, 0.0  ;;  %v2919_v15 = vrot.slane %v2918_v55, 2  ;;  %v2924_v57 = vmax.f32 %v1592_v29, %v2923_v31 }
 0x2ec   :  { %12987 = vst [vmem:[#allocation93_spill] sm:$0xff] %v9830_v41  ;;  %12988 = vst [vmem:[#allocation166_spill] sm:$0xff] %v9832_v9  ;;  %v2914_v25 = vmax.f32 %v2912_v16, %v2913_v33  ;;  %v2337_v46 = vrot.slane %v2336_v42, 2  ;;  %v2930_v23 = vmax.f32 %v1593_v38, %v2929_v36  ;;  %v1495_v52 = vadd.f32 %v9579_v43, %v12991_v19 }
 0x2ed   :  { %12989 = vst [vmem:[#allocation167_spill] sm:$0xff] %v9834_v62  ;;  %12990 = vst [vmem:[#allocation168_spill] sm:$0xff] %v9836_v5  ;;  %v3633_v13 = vpack.c.bf16 %v9826_v11, %v9826_v11  ;;  %v3539_v44 = vpack.c.bf16 %v9828_v51, %v9828_v51  ;;  %v3540_v54 = vpack.c.bf16 %v9830_v41, %v9830_v41  ;;  %v9850_v47 = vmax.f32 %v2904_v8, 0.0 }
 0x2ee   :  { %v3635_v32 = vpack.c.bf16 %v9832_v9, %v9832_v9  ;;  %v2910_v29 = vmax.f32 %v2908_v3, %v2909_v24  ;;  %v2332_v35 = vmax.f32 %v2330_v59, %v2331_v12  ;;  %v2341_v16 = vrot.slane %v1495_v52, 4  ;;  %v9858_v3 = vpop.f32.mrb[62].mxu1  ;;  %v12999_v24 = vld [vmem:[#allocation175_spill] sm:$0xff] }
 0x2ef   :  { %12992 = vst [vmem:[#allocation169_spill] sm:$0xff] %v9850_v47  ;;  %v9852_v28 = vmax.f32 %v2880_v4, 0.0  ;;  %v3538_v38 = vpack.c.bf16 %v9834_v62, %v9834_v62  ;;  %v2920_v31 = vmax.f32 %v2918_v55, %v2919_v15  ;;  %v2925_v33 = vrot.slane %v2924_v57, 2 }
 0x2f0   :  { %v3634_v56 = vpack.c.bf16 %v9836_v5, %v9836_v5  ;;  %v2915_v36 = vrot.slane %v2914_v25, 1  ;;  %v2338_v19 = vmax.f32 %v2336_v42, %v2337_v46  ;;  %v2931_v11 = vrot.slane %v2930_v23, 2 }
 0x2f1   :  { %12993 = vst [vmem:[#allocation223_spill] sm:$0xff] %v9852_v28  ;;  %v4231_v51 = vunpack.c.l.b16 %v3633_v13  ;;  %v4137_v9 = vunpack.c.l.b16 %v3539_v44  ;;  %v4138_v8 = vunpack.c.l.b16 %v3540_v54  ;;  %v4233_v41 = vunpack.c.l.b16 %v3635_v32  ;;  %v9866_v32 = vpop.f32.mrb[63].mxu1 }
 0x2f2   :  { %v3636_v12 = vpack.c.bf16 %v9850_v47, %v9850_v47  ;;  %v9862_v59 = vmax.f32 %v2910_v29, 0.0  ;;  %v2333_v4 = vrot.slane %v2332_v35, 1  ;;  %v2342_v55 = vmax.f32 %v1495_v52, %v2341_v16  ;;  %12995 = vst [vmem:[#allocation225_spill] sm:$0xff] %v9866_v32  ;;  %v12996_v16 = vld [vmem:[#allocation170_spill] sm:$0xff] }
 0x2f3   :  { %v4136_v15 = vunpack.c.l.b16 %v3538_v38  ;;  %v2921_v5 = vrot.slane %v2920_v31, 1  ;;  %v2926_v42 = vmax.f32 %v2924_v57, %v2925_v33  ;;  %v4232_v46 = vunpack.c.l.b16 %v3634_v56  ;;  %v9882_v33 = vpop.f32.mrb[64].mxu1 }
 0x2f4   :  { %12994 = vst [vmem:[#allocation224_spill] sm:$0xff] %v9862_v59  ;;  %v2916_v13 = vmax.f32 %v2914_v25, %v2915_v36  ;;  %v2339_v44 = vrot.slane %v2338_v19, 1  ;;  %v2932_v54 = vmax.f32 %v2930_v23, %v2931_v11  ;;  %v9870_v62 = vsel %vm4279_vm0, %v4137_v9, %v9812_v2  ;;  %v12997_v36 = vld [vmem:[#allocation102_spill] sm:$0xff] }
 0x2f5   :  { %v9873_v29 = vsel %vm4279_vm0, %v4138_v8, %v4136_v15  ;;  %v9876_v52 = vsel %vm4279_vm0, %v4233_v41, %v4231_v51  ;;  %v1594_v38 = vadd.f32 %v9589_v45, %v12996_v16  ;;  %v4234_v57 = vunpack.c.l.b16 %v3636_v12 }
 0x2f6   :  { %v3637_v25 = vpack.c.bf16 %v9862_v59, %v9862_v59  ;;  %v2334_v11 = vmax.f32 %v2332_v35, %v2333_v4  ;;  %v2343_v23 = vrot.slane %v2342_v55, 2  ;;  %v2922_v56 = vmax.f32 %v2920_v31, %v2921_v5  ;;  %v13000_v59 = vld [vmem:[#allocation103_spill] sm:$0xff] }
 0x2f7   :  { %v2927_v2 = vrot.slane %v2926_v42, 1  ;;  %v2935_v9 = vrot.slane %v1594_v38, 4  ;;  %v1496_v8 = vadd.f32 %v9589_v45, %v12997_v36  ;;  %v9886_v15 = vmax.f32 %v2916_v13, 0.0 }
 0x2f8   :  { %v2340_v51 = vmax.f32 %v2338_v19, %v2339_v44  ;;  %v2933_v41 = vrot.slane %v2932_v54, 1  ;;  %v1595_v12 = vadd.f32 %v9579_v43, %v12999_v24  ;;  %v1596_v35 = vadd.f32 %v9589_v45, %v13000_v59  ;;  %v9898_v19 = vpop.f32.mrb[140].mxu0 }
 0x2f9   :  { %12998 = vst [vmem:[#allocation170_spill] sm:$0xff] %v9886_v15  ;;  %v2936_v16 = vmax.f32 %v1594_v38, %v2935_v9  ;;  %v2347_v47 = vrot.slane %v1496_v8, 4  ;;  %v1597_v5 = vadd.f32 %v9579_v43, %v9365_v49  ;;  %v9894_v31 = vmax.f32 %v2334_v11, 0.0  ;;  %13002 = vst [vmem:[#allocation175_spill] sm:$0xff] %v9898_v19  ;;  %v9900_v9 = vpop.f32.mrb[65].mxu1 }
 0x2fa   :  { %v2344_v4 = vmax.f32 %v2342_v55, %v2343_v23  ;;  %v2941_v30 = vrot.slane %v1595_v12, 4  ;;  %v1598_v13 = vadd.f32 %v9589_v45, %v9368_v0  ;;  %v2947_v24 = vrot.slane %v1596_v35, 4  ;;  %13003 = vst [vmem:[#allocation103_spill] sm:$0xff] %v9900_v9  ;;  %v9905_v55 = vpop.f32.mrb[141].mxu0 }
 0x2fb   :  { %13001 = vst [vmem:[#allocation102_spill] sm:$0xff] %v9894_v31  ;;  %v2937_v44 = vrot.slane %v2936_v16, 2  ;;  %v2348_v36 = vmax.f32 %v1496_v8, %v2347_v47  ;;  %v2953_v38 = vrot.slane %v1597_v5, 4  ;;  %v4475_v59 = vsel %vm4279_vm0, %v4234_v57, %v4232_v46  ;;  %v9911_v47 = vpop.f32.mrb[66].mxu1 }
 0x2fc   :  { %v2942_v20 = vmax.f32 %v1595_v12, %v2941_v30  ;;  %v2959_v60 = vrot.slane %v1598_v13, 4  ;;  %v1599_v49 = vadd.f32 %v9579_v43, %v9371_v22  ;;  %v9907_v11 = vmax.f32 %v2922_v56, 0.0  ;;  %13006 = vst [vmem:[#allocation228_spill] sm:$0xff] %v9911_v47 }
 0x2fd   :  { %v2928_v0 = vmax.f32 %v2926_v42, %v2927_v2  ;;  %v9909_v23 = vmax.f32 %v2340_v51, 0.0  ;;  %v2934_v28 = vmax.f32 %v2932_v54, %v2933_v41  ;;  %v4235_v8 = vunpack.c.l.b16 %v3637_v25 }
 0x2fe   :  { %13004 = vst [vmem:[#allocation226_spill] sm:$0xff] %v9907_v11  ;;  %v2345_v32 = vrot.slane %v2344_v4, 1  ;;  %v2938_v9 = vmax.f32 %v2936_v16, %v2937_v44  ;;  %v2349_v19 = vrot.slane %v2348_v36, 2  ;;  %v3638_v30 = vpack.c.bf16 %v9886_v15, %v9886_v15  ;;  %v9927_v16 = vpop.f32.mrb[142].mxu0  ;;  %v9929_v15 = vpop.f32.mrb[67].mxu1 }
 0x2ff   :  { %13005 = vst [vmem:[#allocation227_spill] sm:$0xff] %v9909_v23  ;;  %v3541_v22 = vpack.c.bf16 %v9894_v31, %v9894_v31  ;;  %v2948_v46 = vmax.f32 %v1596_v35, %v2947_v24  ;;  %v2954_v57 = vmax.f32 %v1597_v5, %v2953_v38  ;;  %v2943_v56 = vrot.slane %v2942_v20, 2 }
 0x300   :  { %v2960_v12 = vmax.f32 %v1598_v13, %v2959_v60  ;;  %v2965_v42 = vrot.slane %v1599_v49, 4  ;;  %v1497_v54 = vadd.f32 %v9579_v43, %v9375_v48  ;;  %v3639_v25 = vpack.c.bf16 %v9907_v11, %v9907_v11 }
 0x301   :  { %v9921_v2 = vmax.f32 %v2928_v0, 0.0  ;;  %v3542_v51 = vpack.c.bf16 %v9909_v23, %v9909_v23  ;;  %v9925_v41 = vmax.f32 %v2934_v28, 0.0  ;;  %v2346_v35 = vmax.f32 %v2344_v4, %v2345_v32 }
 0x302   :  { %v2939_v5 = vrot.slane %v2938_v9, 1  ;;  %v2350_v44 = vmax.f32 %v2348_v36, %v2349_v19  ;;  %v2353_v60 = vrot.slane %v1497_v54, 4  ;;  %v4236_v13 = vunpack.c.l.b16 %v3638_v30 }
 0x303   :  { %13007 = vst [vmem:[#allocation229_spill] sm:$0xff] %v9921_v2  ;;  %13008 = vst [vmem:[#allocation230_spill] sm:$0xff] %v9925_v41  ;;  %v4139_v24 = vunpack.c.l.b16 %v3541_v22  ;;  %v2949_v38 = vrot.slane %v2948_v46, 2  ;;  %v2955_v48 = vrot.slane %v2954_v57, 2  ;;  %v2944_v11 = vmax.f32 %v2942_v20, %v2943_v56 }
 0x304   :  { %v2961_v0 = vrot.slane %v2960_v12, 2  ;;  %v2966_v31 = vmax.f32 %v1599_v49, %v2965_v42  ;;  %v2354_v47 = vmax.f32 %v1497_v54, %v2353_v60  ;;  %v9933_v28 = vsel %vm4281_vm1, %v4235_v8, %v9876_v52 }
 0x305   :  { %13009 = vst [vmem:[#allocation231_spill] sm:$0xff] %v9933_v28  ;;  %v3640_v32 = vpack.c.bf16 %v9921_v2, %v9921_v2  ;;  %v4140_v4 = vunpack.c.l.b16 %v3542_v51  ;;  %v3641_v19 = vpack.c.bf16 %v9925_v41, %v9925_v41  ;;  %v9939_v36 = vmax.f32 %v2346_v35, 0.0 }
 0x306   :  { %v2940_v30 = vmax.f32 %v2938_v9, %v2939_v5  ;;  %v2351_v22 = vrot.slane %v2350_v44, 1  ;;  %v2355_v23 = vrot.slane %v2354_v47, 2  ;;  %v9942_v20 = vsel %vm4281_vm1, %v4236_v13, %v4475_v59  ;;  %v13015_v5 = vld [vmem:[#allocation180_spill] sm:$0xff]  ;;  %v9966_v13 = vpop.f32.mrb[68].mxu1 }
 0x307   :  { %13010 = vst [vmem:[#allocation232_spill] sm:$0xff] %v9939_v36  ;;  %13011 = vst [vmem:[#allocation233_spill] sm:$0xff] %v9942_v20  ;;  %v9944_v49 = vunpack.c.l.b16 %v3639_v25  ;;  %v2950_v56 = vmax.f32 %v2948_v46, %v2949_v38  ;;  %v2956_v52 = vmax.f32 %v2954_v57, %v2955_v48  ;;  %v9948_v8 = vsel %vm4281_vm1, %v4139_v24, %v9870_v62 }
 0x308   :  { %v2945_v42 = vrot.slane %v2944_v11, 1  ;;  %v2962_v54 = vmax.f32 %v2960_v12, %v2961_v0  ;;  %v2967_v51 = vrot.slane %v2966_v31, 2  ;;  %v9950_v60 = vunpack.c.l.b16 %v3640_v32  ;;  %v9964_v12 = vpop.f32.mrb[143].mxu0 }
 0x309   :  { %13012 = vst [vmem:[#allocation234_spill] sm:$0xff] %v9944_v49  ;;  %v9952_v35 = vunpack.c.l.b16 %v3641_v19  ;;  %v2356_v9 = vmax.f32 %v2354_v47, %v2355_v23  ;;  %v1600_v59 = vadd.f32 %v9589_v45, %v13015_v5  ;;  %v9958_v25 = vsel %vm4281_vm1, %v4140_v4, %v9873_v29 }
 0x30a   :  { %13013 = vst [vmem:[#allocation235_spill] sm:$0xff] %v9950_v60  ;;  %v3543_v46 = vpack.c.bf16 %v9939_v36, %v9939_v36  ;;  %v9962_v62 = vmax.f32 %v2940_v30, 0.0  ;;  %v2352_v57 = vmax.f32 %v2350_v44, %v2351_v22  ;;  %v2951_v24 = vrot.slane %v2950_v56, 1 }
 0x30b   :  { %13014 = vst [vmem:[#allocation236_spill] sm:$0xff] %v9952_v35  ;;  %v2957_v38 = vrot.slane %v2956_v52, 1  ;;  %v2971_v23 = vrot.slane %v1600_v59, 4  ;;  %v1498_v47 = vadd.f32 %v9589_v45, %v9421_v34  ;;  %v2946_v48 = vmax.f32 %v2944_v11, %v2945_v42  ;;  %v9982_v35 = vpop.f32.mrb[69].mxu1 }
 0x30c   :  { %13016 = vst [vmem:[#allocation180_spill] sm:$0xff] %v9962_v62  ;;  %v2963_v0 = vrot.slane %v2962_v54, 1  ;;  %v2968_v29 = vmax.f32 %v2966_v31, %v2967_v51  ;;  %v1499_v32 = vadd.f32 %v9579_v43, %v9432_v7  ;;  %v2357_v4 = vrot.slane %v2356_v9, 1  ;;  %13017 = vst [vmem:[#allocation237_spill] sm:$0xff] %v9982_v35 }
 0x30d   :  { %v2359_v19 = vrot.slane %v1498_v47, 4  ;;  %v1500_v44 = vadd.f32 %v9589_v45, %v9436_v10  ;;  %v1501_v30 = vadd.f32 %v9579_v43, %v9462_v39  ;;  %v2972_v22 = vmax.f32 %v1600_v59, %v2971_v23 }
 0x30e   :  { %v2365_v5 = vrot.slane %v1499_v32, 4  ;;  %v1502_v41 = vadd.f32 %v9589_v45, %v9470_v58  ;;  %v1503_v34 = vadd.f32 %v9579_v43, %v9474_v27  ;;  %v2952_v31 = vmax.f32 %v2950_v56, %v2951_v24  ;;  %v9986_v58 = vpop.f32.mrb[70].mxu1 }
 0x30f   :  { %v2360_v11 = vmax.f32 %v1498_v47, %v2359_v19  ;;  %v2371_v42 = vrot.slane %v1500_v44, 4  ;;  %v2377_v7 = vrot.slane %v1501_v30, 4  ;;  %v9980_v51 = vunpack.c.l.b16 %v3543_v46  ;;  %13019 = vst [vmem:[#allocation239_spill] sm:$0xff] %v9986_v58  ;;  %v9990_v46 = vpop.f32.mrb[71].mxu1 }
 0x310   :  { %v2958_v2 = vmax.f32 %v2956_v52, %v2957_v38  ;;  %v2366_v36 = vmax.f32 %v1499_v32, %v2365_v5  ;;  %v2383_v10 = vrot.slane %v1502_v41, 4  ;;  %v9984_v39 = vmax.f32 %v2352_v57, 0.0  ;;  %13020 = vst [vmem:[#allocation240_spill] sm:$0xff] %v9990_v46  ;;  %v9996_v19 = vpop.f32.mrb[72].mxu1 }
 0x311   :  { %v2964_v59 = vmax.f32 %v2962_v54, %v2963_v0  ;;  %v2969_v23 = vrot.slane %v2968_v29, 1  ;;  %v2358_v49 = vmax.f32 %v2356_v9, %v2357_v4  ;;  %v3642_v27 = vpack.c.bf16 %v9962_v62, %v9962_v62  ;;  %13023 = vst [vmem:[#allocation243_spill] sm:$0xff] %v9996_v19 }
 0x312   :  { %13018 = vst [vmem:[#allocation238_spill] sm:$0xff] %v9984_v39  ;;  %v2973_v56 = vrot.slane %v2972_v22, 2  ;;  %v2361_v24 = vrot.slane %v2360_v11, 2  ;;  %v2389_v47 = vrot.slane %v1503_v34, 4  ;;  %v9992_v52 = vmax.f32 %v2946_v48, 0.0 }
 0x313   :  { %v9994_v38 = vmax.f32 %v2952_v31, 0.0  ;;  %v2372_v32 = vmax.f32 %v1500_v44, %v2371_v42  ;;  %v2378_v57 = vmax.f32 %v1501_v30, %v2377_v7  ;;  %v9998_v54 = vmax.f32 %v2958_v2, 0.0  ;;  %v10008_v31 = vpop.f32.mrb[144].mxu0 }
 0x314   :  { %13021 = vst [vmem:[#allocation241_spill] sm:$0xff] %v9992_v52  ;;  %v2367_v9 = vrot.slane %v2366_v36, 2  ;;  %v2384_v0 = vmax.f32 %v1502_v41, %v2383_v10  ;;  %v1504_v4 = vadd.f32 %v9589_v45, %v9482_v18  ;;  %v3544_v5 = vpack.c.bf16 %v9984_v39, %v9984_v39  ;;  %13027 = vst [vmem:[#allocation247_spill] sm:$0xff] %v10008_v31  ;;  %v10014_v10 = vpop.f32.mrb[73].mxu1 }
 0x315   :  { %13022 = vst [vmem:[#allocation242_spill] sm:$0xff] %v9994_v38  ;;  %13024 = vst [vmem:[#allocation244_spill] sm:$0xff] %v9998_v54  ;;  %v10004_v62 = vmax.f32 %v2964_v59, 0.0  ;;  %v2970_v48 = vmax.f32 %v2968_v29, %v2969_v23  ;;  %v10006_v28 = vmax.f32 %v2358_v49, 0.0  ;;  %v2974_v44 = vmax.f32 %v2972_v22, %v2973_v56 }
 0x316   :  { %v2362_v30 = vmax.f32 %v2360_v11, %v2361_v24  ;;  %v2390_v42 = vmax.f32 %v1503_v34, %v2389_v47  ;;  %v2395_v2 = vrot.slane %v1504_v4, 4  ;;  %v10010_v7 = vunpack.c.l.b16 %v3642_v27  ;;  %13029 = vst [vmem:[#allocation249_spill] sm:$0xff] %v10014_v10 }
 0x317   :  { %13025 = vst [vmem:[#allocation245_spill] sm:$0xff] %v10004_v62  ;;  %13026 = vst [vmem:[#allocation246_spill] sm:$0xff] %v10006_v28  ;;  %v3643_v41 = vpack.c.bf16 %v9992_v52, %v9992_v52  ;;  %v2373_v18 = vrot.slane %v2372_v32, 2  ;;  %v2379_v45 = vrot.slane %v2378_v57, 2  ;;  %v3644_v29 = vpack.c.bf16 %v9994_v38, %v9994_v38 }
 0x318   :  { %13028 = vst [vmem:[#allocation248_spill] sm:$0xff] %v10010_v7  ;;  %v3645_v49 = vpack.c.bf16 %v9998_v54, %v9998_v54  ;;  %v2368_v59 = vmax.f32 %v2366_v36, %v2367_v9  ;;  %v2385_v22 = vrot.slane %v2384_v0, 2  ;;  %v10020_v11 = vunpack.c.l.b16 %v3544_v5  ;;  %v10036_v7 = vpop.f32.mrb[145].mxu0 }
 0x319   :  { %v3646_v34 = vpack.c.bf16 %v10004_v62, %v10004_v62  ;;  %v10024_v23 = vmax.f32 %v2970_v48, 0.0  ;;  %v3545_v27 = vpack.c.bf16 %v10006_v28, %v10006_v28  ;;  %v2975_v56 = vrot.slane %v2974_v44, 1  ;;  %13034 = vst [vmem:[#allocation254_spill] sm:$0xff] %v10036_v7  ;;  %v10062_v60 = vpop.f32.mrb[146].mxu0 }
 0x31a   :  { %v2363_v24 = vrot.slane %v2362_v30, 1  ;;  %v2391_v47 = vrot.slane %v2390_v42, 2  ;;  %v2396_v52 = vmax.f32 %v1504_v4, %v2395_v2  ;;  %v10028_v38 = vunpack.c.l.b16 %v3643_v41  ;;  %v10050_v4 = vld [vmem:[#allocation7] sm:$0xff]  ;;  %13037 = vst [vmem:[#allocation257_spill] sm:$0xff] %v10062_v60 }
 0x31b   :  { %13030 = vst [vmem:[#allocation250_spill] sm:$0xff] %v10024_v23  ;;  %v2374_v39 = vmax.f32 %v2372_v32, %v2373_v18  ;;  %v2380_v54 = vmax.f32 %v2378_v57, %v2379_v45  ;;  %v1505_v36 = vadd.f32 %v9579_v43, %v9503_v63  ;;  %v10032_v9 = vunpack.c.l.b16 %v3644_v29  ;;  %v10044_v43 = vpop.f32.mrb[74].mxu1 }
 0x31c   :  { %13031 = vst [vmem:[#allocation251_spill] sm:$0xff] %v10028_v38  ;;  %v10034_v5 = vunpack.c.l.b16 %v3645_v49  ;;  %v2369_v48 = vrot.slane %v2368_v59, 1  ;;  %v2386_v62 = vmax.f32 %v2384_v0, %v2385_v22  ;;  %v10038_v28 = vunpack.c.l.b16 %v3646_v34  ;;  %13036 = vst [vmem:[#allocation256_spill] sm:$0xff] %v10044_v43  ;;  %v10046_v0 = vld [vmem:[#allocation7 + $0x8] sm:$0xff] }
 0x31d   :  { %13032 = vst [vmem:[#allocation252_spill] sm:$0xff] %v10032_v9  ;;  %v10042_v2 = vunpack.c.l.b16 %v3545_v27  ;;  %v2401_v32 = vrot.slane %v1505_v36, 4  ;;  %v2976_v57 = vmax.f32 %v2974_v44, %v2975_v56  ;;  %v2364_v41 = vmax.f32 %v2362_v30, %v2363_v24 }
 0x31e   :  { %13033 = vst [vmem:[#allocation253_spill] sm:$0xff] %v10034_v5  ;;  %13035 = vst [vmem:[#allocation255_spill] sm:$0xff] %v10038_v28  ;;  %v2392_v18 = vmax.f32 %v2390_v42, %v2391_v47  ;;  %v2397_v63 = vrot.slane %v2396_v52, 2  ;;  %v2375_v45 = vrot.slane %v2374_v39, 1  ;;  %v2381_v29 = vrot.slane %v2380_v54, 1 }
 0x31f   :  { %v2402_v49 = vmax.f32 %v1505_v36, %v2401_v32  ;;  %v1506_v22 = vadd.f32 %v10046_v0, %v9518_v1  ;;  %v2370_v34 = vmax.f32 %v2368_v59, %v2369_v48  ;;  %v2387_v5 = vrot.slane %v2386_v62, 1 }
 0x320   :  { %v1507_v44 = vadd.f32 %v10050_v4, %v9534_v61  ;;  %v1508_v30 = vadd.f32 %v10046_v0, %v9541_v14  ;;  %v1601_v56 = vadd.f32 %v10050_v4, %v9565_v21  ;;  %v1509_v24 = vadd.f32 %v10050_v4, %v9573_v17 }
 0x321   :  { %v2403_v42 = vrot.slane %v2402_v49, 2  ;;  %v2407_v27 = vrot.slane %v1506_v22, 4  ;;  %v2398_v47 = vmax.f32 %v2396_v52, %v2397_v63  ;;  %v1602_v36 = vadd.f32 %v10046_v0, %v9575_v37 }
 0x322   :  { %v2413_v1 = vrot.slane %v1507_v44, 4  ;;  %v2419_v59 = vrot.slane %v1508_v30, 4  ;;  %v2977_v61 = vrot.slane %v1601_v56, 4  ;;  %v2425_v38 = vrot.slane %v1509_v24, 4 }
 0x323   :  { %v2404_v48 = vmax.f32 %v2402_v49, %v2403_v42  ;;  %v2408_v32 = vmax.f32 %v1506_v22, %v2407_v27  ;;  %v2393_v23 = vrot.slane %v2392_v18, 1  ;;  %v2983_v9 = vrot.slane %v1602_v36, 4  ;;  %v10068_v49 = vpop.f32.mrb[75].mxu1  ;;  %v10070_v22 = vpop.f32.mrb[147].mxu0 }
 0x324   :  { %v2414_v14 = vmax.f32 %v1507_v44, %v2413_v1  ;;  %v2420_v28 = vmax.f32 %v1508_v30, %v2419_v59  ;;  %v10064_v21 = vmax.f32 %v2364_v41, 0.0  ;;  %v2376_v20 = vmax.f32 %v2374_v39, %v2375_v45  ;;  %13039 = vst [vmem:[#allocation259_spill] sm:$0xff] %v10068_v49  ;;  %13040 = vst [vmem:[#allocation260_spill] sm:$0xff] %v10070_v22  ;;  %v10076_v27 = vpop.f32.mrb[76].mxu1 }
 0x325   :  { %v2382_v17 = vmax.f32 %v2380_v54, %v2381_v29  ;;  %v2978_v52 = vmax.f32 %v1601_v56, %v2977_v61  ;;  %v2388_v63 = vmax.f32 %v2386_v62, %v2387_v5  ;;  %v2399_v43 = vrot.slane %v2398_v47, 1  ;;  %13043 = vst [vmem:[#allocation263_spill] sm:$0xff] %v10076_v27  ;;  %v13062_v27 = vld [vmem:[#allocation129_spill] sm:$0xff] }
 0x326   :  { %13038 = vst [vmem:[#allocation258_spill] sm:$0xff] %v10064_v21  ;;  %v2426_v7 = vmax.f32 %v1509_v24, %v2425_v38  ;;  %v1510_v37 = vadd.f32 %v10046_v0, %v9583_v6  ;;  %v10072_v44 = vmax.f32 %v2976_v57, 0.0  ;;  %v10074_v30 = vmax.f32 %v2370_v34, 0.0  ;;  %v10078_v38 = vpop.f32.mrb[77].mxu1 }
 0x327   :  { %v2405_v42 = vrot.slane %v2404_v48, 1  ;;  %v2409_v41 = vrot.slane %v2408_v32, 2  ;;  %v2415_v39 = vrot.slane %v2414_v14, 2  ;;  %v2421_v54 = vrot.slane %v2420_v28, 2  ;;  %13044 = vst [vmem:[#allocation264_spill] sm:$0xff] %v10078_v38  ;;  %v10084_v56 = vpop.f32.mrb[78].mxu1 }
 0x328   :  { %13041 = vst [vmem:[#allocation261_spill] sm:$0xff] %v10072_v44  ;;  %13042 = vst [vmem:[#allocation262_spill] sm:$0xff] %v10074_v30  ;;  %v2984_v62 = vmax.f32 %v1602_v36, %v2983_v9  ;;  %v2431_v5 = vrot.slane %v1510_v37, 4  ;;  %v3546_v6 = vpack.c.bf16 %v10064_v21, %v10064_v21  ;;  %v10082_v45 = vmax.f32 %v2376_v20, 0.0  ;;  %v10090_v61 = vpop.f32.mrb[79].mxu1 }
 0x329   :  { %v2394_v29 = vmax.f32 %v2392_v18, %v2393_v23  ;;  %v2979_v57 = vrot.slane %v2978_v52, 2  ;;  %13046 = vst [vmem:[#allocation266_spill] sm:$0xff] %v10084_v56  ;;  %v10086_v34 = vmax.f32 %v2382_v17, 0.0  ;;  %v10088_v24 = vmax.f32 %v2388_v63, 0.0  ;;  %13049 = vst [vmem:[#allocation269_spill] sm:$0xff] %v10090_v61  ;;  %v10102_v61 = vpop.f32.mrb[80].mxu1 }
 0x32a   :  { %13045 = vst [vmem:[#allocation265_spill] sm:$0xff] %v10082_v45  ;;  %v2400_v1 = vmax.f32 %v2398_v47, %v2399_v43  ;;  %v2427_v59 = vrot.slane %v2426_v7, 2  ;;  %v3547_v36 = vpack.c.bf16 %v10074_v30, %v10074_v30  ;;  %v2406_v20 = vmax.f32 %v2404_v48, %v2405_v42  ;;  %13051 = vst [vmem:[#allocation271_spill] sm:$0xff] %v10102_v61 }
 0x32b   :  { %13047 = vst [vmem:[#allocation267_spill] sm:$0xff] %v10086_v34  ;;  %13048 = vst [vmem:[#allocation268_spill] sm:$0xff] %v10088_v24  ;;  %v2432_v21 = vmax.f32 %v1510_v37, %v2431_v5  ;;  %v2410_v23 = vmax.f32 %v2408_v32, %v2409_v41  ;;  %v2416_v18 = vmax.f32 %v2414_v14, %v2415_v39  ;;  %v2985_v56 = vrot.slane %v2984_v62, 2  ;;  %v10110_v14 = vpop.f32.mrb[148].mxu0  ;;  %v10112_v37 = vpop.f32.mrb[81].mxu1 }
 0x32c   :  { %v2422_v38 = vmax.f32 %v2420_v28, %v2421_v54  ;;  %v10096_v17 = vunpack.c.l.b16 %v3546_v6  ;;  %v3548_v43 = vpack.c.bf16 %v10082_v45, %v10082_v45  ;;  %v10100_v47 = vmax.f32 %v2394_v29, 0.0  ;;  %13053 = vst [vmem:[#allocation273_spill] sm:$0xff] %v10110_v14  ;;  %13054 = vst [vmem:[#allocation274_spill] sm:$0xff] %v10112_v37  ;;  %v10120_v54 = vpop.f32.mrb[149].mxu0  ;;  %v10122_v5 = vpop.f32.mrb[82].mxu1 }
 0x32d   :  { %v2980_v63 = vmax.f32 %v2978_v52, %v2979_v57  ;;  %v3549_v9 = vpack.c.bf16 %v10086_v34, %v10086_v34  ;;  %v3550_v48 = vpack.c.bf16 %v10088_v24, %v10088_v24  ;;  %v10108_v32 = vmax.f32 %v2400_v1, 0.0  ;;  %13056 = vst [vmem:[#allocation276_spill] sm:$0xff] %v10120_v54  ;;  %13057 = vst [vmem:[#allocation277_spill] sm:$0xff] %v10122_v5  ;;  %v10124_v1 = vpop.f32.mrb[150].mxu0  ;;  %v13061_v54 = vld [vmem:[#allocation127_spill] sm:$0xff] }
 0x32e   :  { %13050 = vst [vmem:[#allocation270_spill] sm:$0xff] %v10100_v47  ;;  %v2428_v28 = vmax.f32 %v2426_v7, %v2427_v59  ;;  %v10114_v42 = vunpack.c.l.b16 %v3547_v36  ;;  %v10116_v41 = vmax.f32 %v2406_v20, 0.0  ;;  %v2433_v52 = vrot.slane %v2432_v21, 2  ;;  %13058 = vst [vmem:[#allocation278_spill] sm:$0xff] %v10124_v1  ;;  %v10126_v59 = vpop.f32.mrb[83].mxu1 }
 0x32f   :  { %13052 = vst [vmem:[#allocation272_spill] sm:$0xff] %v10108_v32  ;;  %v1603_v39 = vadd.f32 %v10050_v4, %v9585_v50  ;;  %v2411_v6 = vrot.slane %v2410_v23, 1  ;;  %v2417_v29 = vrot.slane %v2416_v18, 1  ;;  %v2423_v57 = vrot.slane %v2422_v38, 1  ;;  %13059 = vst [vmem:[#allocation279_spill] sm:$0xff] %v10126_v59  ;;  %v10132_v50 = vpop.f32.mrb[151].mxu0 }
 0x330   :  { %13055 = vst [vmem:[#allocation275_spill] sm:$0xff] %v10116_v41  ;;  %v2986_v7 = vmax.f32 %v2984_v62, %v2985_v56  ;;  %v10128_v36 = vunpack.c.l.b16 %v3548_v43  ;;  %v2981_v34 = vrot.slane %v2980_v63, 1  ;;  %13060 = vst [vmem:[#allocation280_spill] sm:$0xff] %v10132_v50  ;;  %v10134_v24 = vunpack.c.l.b16 %v3549_v9 }
 0x331   :  { %v2989_v30 = vrot.slane %v1603_v39, 4  ;;  %v10136_v45 = vunpack.c.l.b16 %v3550_v48  ;;  %v2429_v56 = vrot.slane %v2428_v28, 1  ;;  %v3553_v59 = vpack.c.bf16 %v10116_v41, %v10116_v41  ;;  %v13063_v41 = vld [vmem:[#allocation128_spill] sm:$0xff] }
 0x332   :  { %v2434_v43 = vmax.f32 %v2432_v21, %v2433_v52  ;;  %v1511_v20 = vadd.f32 %v10050_v4, %v9593_v26  ;;  %v2412_v5 = vmax.f32 %v2410_v23, %v2411_v6  ;;  %v2418_v61 = vmax.f32 %v2416_v18, %v2417_v29  ;;  %v10152_v23 = vpop.f32.mrb[152].mxu0 }
 0x333   :  { %v2990_v37 = vmax.f32 %v1603_v39, %v2989_v30  ;;  %v2424_v44 = vmax.f32 %v2422_v38, %v2423_v57  ;;  %v2987_v50 = vrot.slane %v2986_v7, 1  ;;  %v2982_v9 = vmax.f32 %v2980_v63, %v2981_v34  ;;  %v13064_v30 = vld [vmem:[#allocation130_spill] sm:$0xff]  ;;  %13065 = vst [vmem:[#allocation127_spill] sm:$0xff] %v10152_v23  ;;  %v13066_v63 = vld [vmem:[#allocation200_spill] sm:$0xff]  ;;  %v10156_v39 = vpop.f32.mrb[153].mxu0 }
 0x334   :  { %v2437_v48 = vrot.slane %v1511_v20, 4  ;;  %v1604_v14 = vadd.f32 %v10046_v0, %v13061_v54  ;;  %v2430_v62 = vmax.f32 %v2428_v28, %v2429_v56  ;;  %v1512_v22 = vadd.f32 %v10046_v0, %v13062_v27  ;;  %13067 = vst [vmem:[#allocation129_spill] sm:$0xff] %v10156_v39  ;;  %v10158_v29 = vpop.f32.mrb[154].mxu0 }
 0x335   :  { %v2991_v1 = vrot.slane %v2990_v37, 2  ;;  %v1605_v21 = vadd.f32 %v10050_v4, %v13063_v41  ;;  %v1606_v26 = vadd.f32 %v10046_v0, %v13064_v30  ;;  %v2435_v38 = vrot.slane %v2434_v43, 1  ;;  %13068 = vst [vmem:[#allocation128_spill] sm:$0xff] %v10158_v29  ;;  %v10164_v23 = vpop.f32.mrb[155].mxu0 }
 0x336   :  { %v2995_v34 = vrot.slane %v1604_v14, 4  ;;  %v1607_v52 = vadd.f32 %v10050_v4, %v13066_v63  ;;  %v2438_v28 = vmax.f32 %v1511_v20, %v2437_v48  ;;  %v2443_v54 = vrot.slane %v1512_v22, 4  ;;  %13071 = vst [vmem:[#allocation281_spill] sm:$0xff] %v10164_v23 }
 0x337   :  { %v2992_v18 = vmax.f32 %v2990_v37, %v2991_v1  ;;  %v3001_v6 = vrot.slane %v1605_v21, 4  ;;  %v3007_v27 = vrot.slane %v1606_v26, 4  ;;  %v10160_v41 = vmax.f32 %v2418_v61, 0.0 }
 0x338   :  { %v10162_v57 = vmax.f32 %v2424_v44, 0.0  ;;  %v2996_v56 = vmax.f32 %v1604_v14, %v2995_v34  ;;  %v3013_v30 = vrot.slane %v1607_v52, 4  ;;  %v10166_v37 = vmax.f32 %v2412_v5, 0.0  ;;  %v13075_v44 = vld [vmem:[#allocation202_spill] sm:$0xff] }
 0x339   :  { %13069 = vst [vmem:[#allocation130_spill] sm:$0xff] %v10160_v41  ;;  %v2444_v1 = vmax.f32 %v1512_v22, %v2443_v54  ;;  %v3002_v63 = vmax.f32 %v1605_v21, %v3001_v6  ;;  %v3008_v49 = vmax.f32 %v1606_v26, %v3007_v27  ;;  %v10168_v39 = vmax.f32 %v2982_v9, 0.0 }
 0x33a   :  { %13070 = vst [vmem:[#allocation200_spill] sm:$0xff] %v10162_v57  ;;  %13072 = vst [vmem:[#allocation282_spill] sm:$0xff] %v10166_v37  ;;  %v10170_v20 = vmax.f32 %v2430_v62, 0.0  ;;  %v2988_v48 = vmax.f32 %v2986_v7, %v2987_v50  ;;  %v2997_v60 = vrot.slane %v2996_v56, 2  ;;  %v2436_v29 = vmax.f32 %v2434_v43, %v2435_v38  ;;  %v10178_v7 = vpop.f32.mrb[156].mxu0 }
 0x33b   :  { %13073 = vst [vmem:[#allocation283_spill] sm:$0xff] %v10168_v39  ;;  %v2993_v61 = vrot.slane %v2992_v18, 1  ;;  %v2439_v10 = vrot.slane %v2438_v28, 2  ;;  %v1608_v14 = vadd.f32 %v10046_v0, %v13075_v44  ;;  %v3555_v34 = vpack.c.bf16 %v10160_v41, %v10160_v41  ;;  %13076 = vst [vmem:[#allocation202_spill] sm:$0xff] %v10178_v7  ;;  %v10188_v27 = vpop.f32.mrb[157].mxu0 }
 0x33c   :  { %13074 = vst [vmem:[#allocation284_spill] sm:$0xff] %v10170_v20  ;;  %v3556_v22 = vpack.c.bf16 %v10162_v57, %v10162_v57  ;;  %v2445_v5 = vrot.slane %v2444_v1, 2  ;;  %v3014_v21 = vmax.f32 %v1607_v52, %v3013_v30  ;;  %v2998_v9 = vmax.f32 %v2996_v56, %v2997_v60  ;;  %13078 = vst [vmem:[#allocation286_spill] sm:$0xff] %v10188_v27  ;;  %v10192_v44 = vpop.f32.mrb[158].mxu0 }
 0x33d   :  { %v3003_v26 = vrot.slane %v3002_v63, 2  ;;  %v3009_v62 = vrot.slane %v3008_v49, 2  ;;  %v3019_v54 = vrot.slane %v1608_v14, 4  ;;  %v3554_v50 = vpack.c.bf16 %v10166_v37, %v10166_v37  ;;  %13080 = vst [vmem:[#allocation288_spill] sm:$0xff] %v10192_v44  ;;  %v10194_v23 = vpop.f32.mrb[159].mxu0 }
 0x33e   :  { %v3649_v43 = vpack.c.bf16 %v10168_v39, %v10168_v39  ;;  %v3557_v38 = vpack.c.bf16 %v10170_v20, %v10170_v20  ;;  %v10186_v6 = vmax.f32 %v2988_v48, 0.0  ;;  %v10190_v52 = vmax.f32 %v2436_v29, 0.0  ;;  %13081 = vst [vmem:[#allocation289_spill] sm:$0xff] %v10194_v23 }
 0x33f   :  { %v2994_v60 = vmax.f32 %v2992_v18, %v2993_v61  ;;  %v2440_v56 = vmax.f32 %v2438_v28, %v2439_v10  ;;  %v3020_v30 = vmax.f32 %v1608_v14, %v3019_v54  ;;  %v4151_v41 = vunpack.c.l.b16 %v3553_v59 }
 0x340   :  { %13077 = vst [vmem:[#allocation285_spill] sm:$0xff] %v10186_v6  ;;  %13079 = vst [vmem:[#allocation287_spill] sm:$0xff] %v10190_v52  ;;  %v4153_v57 = vunpack.c.l.b16 %v3555_v34  ;;  %v2446_v37 = vmax.f32 %v2444_v1, %v2445_v5  ;;  %v3015_v7 = vrot.slane %v3014_v21, 2  ;;  %v4154_v39 = vunpack.c.l.b16 %v3556_v22 }
 0x341   :  { %v2999_v31 = vrot.slane %v2998_v9, 1  ;;  %v3004_v20 = vmax.f32 %v3002_v63, %v3003_v26  ;;  %v3010_v48 = vmax.f32 %v3008_v49, %v3009_v62  ;;  %v4152_v19 = vunpack.c.l.b16 %v3554_v50  ;;  %v13083_v63 = vld [vmem:[#allocation203_spill] sm:$0xff] }
 0x342   :  { %v10196_v46 = vunpack.c.l.b16 %v3649_v43  ;;  %v4155_v29 = vunpack.c.l.b16 %v3557_v38  ;;  %v3650_v10 = vpack.c.bf16 %v10186_v6, %v10186_v6  ;;  %v3558_v18 = vpack.c.bf16 %v10190_v52, %v10190_v52  ;;  %v13085_v38 = vld [vmem:[#allocation136_spill] sm:$0xff] }
 0x343   :  { %v10202_v59 = vmax.f32 %v2994_v60, 0.0  ;;  %v2441_v28 = vrot.slane %v2440_v56, 1  ;;  %v3021_v1 = vrot.slane %v3020_v30, 2  ;;  %v4398_v61 = vsel %vm4279_vm0, %v4153_v57, %v4151_v41 }
 0x344   :  { %v2447_v14 = vrot.slane %v2446_v37, 1  ;;  %v3016_v34 = vmax.f32 %v3014_v21, %v3015_v7  ;;  %v1609_v49 = vadd.f32 %v10050_v4, %v13083_v63  ;;  %v10208_v22 = vsel %vm4279_vm0, %v4154_v39, %v4152_v19  ;;  %v10221_v39 = vpop.f32.mrb[160].mxu0 }
 0x345   :  { %13082 = vst [vmem:[#allocation290_spill] sm:$0xff] %v10202_v59  ;;  %v3000_v5 = vmax.f32 %v2998_v9, %v2999_v31  ;;  %v3005_v26 = vrot.slane %v3004_v20, 1  ;;  %v3011_v62 = vrot.slane %v3010_v48, 1  ;;  %v10211_v54 = vsel %vm4281_vm1, %v4155_v29, %v4398_v61  ;;  %13086 = vst [vmem:[#allocation136_spill] sm:$0xff] %v10221_v39  ;;  %v10223_v61 = vpop.f32.mrb[161].mxu0 }
 0x346   :  { %13084 = vst [vmem:[#allocation203_spill] sm:$0xff] %v10211_v54  ;;  %v10213_v50 = vunpack.c.l.b16 %v3650_v10  ;;  %v3025_v43 = vrot.slane %v1609_v49, 4  ;;  %v1513_v41 = vadd.f32 %v10050_v4, %v13085_v38  ;;  %v10217_v57 = vunpack.c.l.b16 %v3558_v18  ;;  %13087 = vst [vmem:[#allocation291_spill] sm:$0xff] %v10223_v61  ;;  %v13089_v38 = vld [vmem:[#allocation148_spill] sm:$0xff]  ;;  %v10229_v52 = vpop.f32.mrb[162].mxu0 }
 0x347   :  { %v3651_v21 = vpack.c.bf16 %v10202_v59, %v10202_v59  ;;  %v2442_v7 = vmax.f32 %v2440_v56, %v2441_v28  ;;  %v3022_v19 = vmax.f32 %v3020_v30, %v3021_v1  ;;  %v2448_v31 = vmax.f32 %v2446_v37, %v2447_v14  ;;  %13090 = vst [vmem:[#allocation148_spill] sm:$0xff] %v10229_v52  ;;  %v13091_v30 = vld [vmem:[#allocation145_spill] sm:$0xff]  ;;  %v10235_v14 = vpop.f32.mrb[163].mxu0 }
 0x348   :  { %v3017_v9 = vrot.slane %v3016_v34, 1  ;;  %v3026_v60 = vmax.f32 %v1609_v49, %v3025_v43  ;;  %v2449_v29 = vrot.slane %v1513_v41, 4  ;;  %v10225_v10 = vmax.f32 %v3000_v5, 0.0  ;;  %v13092_v37 = vld [vmem:[#allocation209_spill] sm:$0xff]  ;;  %13093 = vst [vmem:[#allocation145_spill] sm:$0xff] %v10235_v14 }
 0x349   :  { %v3006_v63 = vmax.f32 %v3004_v20, %v3005_v26  ;;  %v3012_v6 = vmax.f32 %v3010_v48, %v3011_v62  ;;  %v1610_v18 = vadd.f32 %v10046_v0, %v13089_v38  ;;  %v1514_v28 = vadd.f32 %v10046_v0, %v13091_v30  ;;  %v13094_v43 = vld [vmem:[#allocation213_spill] sm:$0xff]  ;;  %v13095_v48 = vld [vmem:[#allocation214_spill] sm:$0xff] }
 0x34a   :  { %13088 = vst [vmem:[#allocation292_spill] sm:$0xff] %v10225_v10  ;;  %v3027_v59 = vrot.slane %v3026_v60, 2  ;;  %v2450_v56 = vmax.f32 %v1513_v41, %v2449_v29  ;;  %v1611_v1 = vadd.f32 %v10050_v4, %v13092_v37  ;;  %v3023_v49 = vrot.slane %v3022_v19, 1 }
 0x34b   :  { %v3031_v5 = vrot.slane %v1610_v18, 4  ;;  %v1515_v20 = vadd.f32 %v10050_v4, %v13094_v43  ;;  %v1612_v26 = vadd.f32 %v10046_v0, %v13095_v48  ;;  %v2455_v54 = vrot.slane %v1514_v28, 4 }
 0x34c   :  { %v3028_v62 = vmax.f32 %v3026_v60, %v3027_v59  ;;  %v2451_v38 = vrot.slane %v2450_v56, 2  ;;  %v3037_v41 = vrot.slane %v1611_v1, 4  ;;  %v3018_v29 = vmax.f32 %v3016_v34, %v3017_v9  ;;  %v10247_v59 = vpop.f32.mrb[164].mxu0 }
 0x34d   :  { %v3032_v52 = vmax.f32 %v1610_v18, %v3031_v5  ;;  %v2461_v30 = vrot.slane %v1515_v20, 4  ;;  %v3043_v61 = vrot.slane %v1612_v26, 4  ;;  %v3652_v37 = vpack.c.bf16 %v10225_v10, %v10225_v10  ;;  %v10249_v18 = vpop.f32.mrb[165].mxu0 }
 0x34e   :  { %v10243_v14 = vmax.f32 %v3006_v63, 0.0  ;;  %v10245_v39 = vmax.f32 %v3012_v6, 0.0  ;;  %v3029_v23 = vrot.slane %v3028_v62, 1  ;;  %v3024_v43 = vmax.f32 %v3022_v19, %v3023_v49  ;;  %v13100_v6 = vld [vmem:[#allocation217_spill] sm:$0xff]  ;;  %v10257_v19 = vpop.f32.mrb[166].mxu0 }
 0x34f   :  { %v2452_v44 = vmax.f32 %v2450_v56, %v2451_v38  ;;  %v2456_v27 = vmax.f32 %v1514_v28, %v2455_v54  ;;  %v3038_v48 = vmax.f32 %v1611_v1, %v3037_v41  ;;  %v4249_v60 = vunpack.c.l.b16 %v3651_v21  ;;  %13101 = vst [vmem:[#allocation217_spill] sm:$0xff] %v10257_v19  ;;  %v10265_v28 = vpop.f32.mrb[167].mxu0  ;;  %v7639_v49 = vld [vmem:[#allocation8 + $0xc] ss:$16 sps:$4 sm:$0xff]   ;;  %v7637_v41 = vld [vmem:[#allocation8 + $0x8] ss:$16 sps:$4 sm:$0xff]  }
 0x350   :  { %13096 = vst [vmem:[#allocation209_spill] sm:$0xff] %v10243_v14  ;;  %13097 = vst [vmem:[#allocation213_spill] sm:$0xff] %v10245_v39  ;;  %v3033_v58 = vrot.slane %v3032_v52, 2  ;;  %v2462_v34 = vmax.f32 %v1515_v20, %v2461_v30  ;;  %v3044_v9 = vmax.f32 %v1612_v26, %v3043_v61  ;;  %v10251_v5 = vmax.f32 %v2442_v7, 0.0  ;;  %4975 = vmatprep.subr.bf16.mxu1 %v7639_v49  ;;  %v13106_v19 = vld [vmem:[#allocation153_spill] sm:$0xff] }
 0x351   :  { %v10253_v10 = vmax.f32 %v2448_v31, 0.0  ;;  %v3030_v63 = vmax.f32 %v3028_v62, %v3029_v23  ;;  %v1516_v35 = vadd.f32 %v10046_v0, %v13100_v6  ;;  %v4250_v54 = vunpack.c.l.b16 %v3652_v37  ;;  %13103 = vst [vmem:[#allocation295_spill] sm:$0xff] %v10265_v28  ;;  %4976 = vmatpush1.bf16.msra.mxu1 %v7637_v41 }
 0x352   :  { %13098 = vst [vmem:[#allocation214_spill] sm:$0xff] %v10251_v5  ;;  %v3653_v56 = vpack.c.bf16 %v10243_v14, %v10243_v14  ;;  %v3654_v21 = vpack.c.bf16 %v10245_v39, %v10245_v39  ;;  %v10263_v61 = vmax.f32 %v3018_v29, 0.0  ;;  %v10267_v7 = vmax.f32 %v3024_v43, 0.0 }
 0x353   :  { %13099 = vst [vmem:[#allocation293_spill] sm:$0xff] %v10253_v10  ;;  %v2453_v31 = vrot.slane %v2452_v44, 1  ;;  %v2457_v23 = vrot.slane %v2456_v27, 2  ;;  %v3039_v1 = vrot.slane %v3038_v48, 2  ;;  %v4482_v20 = vsel %vm4279_vm0, %v4249_v60, %v10196_v46 }
 0x354   :  { %13102 = vst [vmem:[#allocation294_spill] sm:$0xff] %v10263_v61  ;;  %13104 = vst [vmem:[#allocation296_spill] sm:$0xff] %v10267_v7  ;;  %v3034_v26 = vmax.f32 %v3032_v52, %v3033_v58  ;;  %v2463_v62 = vrot.slane %v2462_v34, 2  ;;  %v3045_v38 = vrot.slane %v3044_v9, 2  ;;  %v3559_v30 = vpack.c.bf16 %v10251_v5, %v10251_v5 }
 0x355   :  { %v3560_v29 = vpack.c.bf16 %v10253_v10, %v10253_v10  ;;  %v10275_v37 = vmax.f32 %v3030_v63, 0.0  ;;  %v2467_v43 = vrot.slane %v1516_v35, 4  ;;  %v4489_v6 = vsel %vm4279_vm0, %v4250_v54, %v10213_v50  ;;  %v7642_v10 = vld [vmem:[#allocation8 + $0x2c] ss:$16 sps:$4 sm:$0xff]   ;;  %v7640_v54 = vld [vmem:[#allocation8 + $0x28] ss:$16 sps:$4 sm:$0xff]  }
 0x356   :  { %v4251_v14 = vunpack.c.l.b16 %v3653_v56  ;;  %v4252_v39 = vunpack.c.l.b16 %v3654_v21  ;;  %v3655_v58 = vpack.c.bf16 %v10263_v61, %v10263_v61  ;;  %v3656_v46 = vpack.c.bf16 %v10267_v7, %v10267_v7  ;;  %4977 = vmatprep.subr.bf16.mxu1 %v7642_v10  ;;  %v13117_v7 = vld [vmem:[#allocation201_spill] sm:$0xff] }
 0x357   :  { %13105 = vst [vmem:[#allocation297_spill] sm:$0xff] %v10275_v37  ;;  %v2454_v52 = vmax.f32 %v2452_v44, %v2453_v31  ;;  %v2458_v60 = vmax.f32 %v2456_v27, %v2457_v23  ;;  %v3040_v5 = vmax.f32 %v3038_v48, %v3039_v1  ;;  %v3035_v63 = vrot.slane %v3034_v26, 1  ;;  %v10298_v48 = vpop.f32.mrb[168].mxu0  ;;  %4978 = vmatpush1.bf16.msra.mxu1 %v7640_v54 }
 0x358   :  { %v10283_v28 = vmax.f32 %v2462_v34, %v2463_v62  ;;  %v10285_v49 = vmax.f32 %v3044_v9, %v3045_v38  ;;  %v1613_v50 = vadd.f32 %v10050_v4, %v13106_v19  ;;  %v10292_v56 = vsel %vm4281_vm1, %v10217_v57, %v10208_v22  ;;  %v10310_v22 = vpop.f32.mrb[169].mxu0 }
 0x359   :  { %v10294_v21 = vunpack.c.l.b16 %v3559_v30  ;;  %v3657_v27 = vpack.c.bf16 %v10275_v37, %v10275_v37  ;;  %v2468_v44 = vmax.f32 %v1516_v35, %v2467_v43  ;;  %v10300_v34 = vunpack.c.l.b16 %v3560_v29  ;;  %v10316_v1 = vpop.f32.mrb[170].mxu0 }
 0x35a   :  { %v10303_v9 = vsel %vm4281_vm1, %v4251_v14, %v4482_v20  ;;  %v10306_v19 = vsel %vm4281_vm1, %v4252_v39, %v4489_v6  ;;  %v10308_v31 = vunpack.c.l.b16 %v3655_v58  ;;  %v10312_v57 = vunpack.c.l.b16 %v3656_v46  ;;  %v10320_v38 = vpop.f32.mrb[171].mxu0  ;;  %v13113_v6 = vld [vmem:[#allocation189_spill] sm:$0xff]  ;;  %v13114_v58 = vld [vmem:[#allocation191_spill] sm:$0xff] }
 0x35b   :  { %13107 = vst [vmem:[#allocation153_spill] sm:$0xff] %v10303_v9  ;;  %v10314_v23 = vmax.f32 %v2454_v52, 0.0  ;;  %v2459_v35 = vrot.slane %v2458_v60, 1  ;;  %v3041_v10 = vrot.slane %v3040_v5, 1  ;;  %v3036_v62 = vmax.f32 %v3034_v26, %v3035_v63  ;;  %v13116_v63 = vld [vmem:[#allocation134_spill] sm:$0xff] }
 0x35c   :  { %13108 = vst [vmem:[#allocation298_spill] sm:$0xff] %v10308_v31  ;;  %13109 = vst [vmem:[#allocation299_spill] sm:$0xff] %v10312_v57  ;;  %v2465_v14 = vrot.slane %v10283_v28, 1  ;;  %v3047_v20 = vrot.slane %v10285_v49, 1  ;;  %v3049_v39 = vrot.slane %v1613_v50, 4  ;;  %v10322_v41 = vunpack.c.l.b16 %v3657_v27 }
 0x35d   :  { %13110 = vst [vmem:[#allocation300_spill] sm:$0xff] %v10314_v23  ;;  %v2469_v30 = vrot.slane %v2468_v44, 2  ;;  %v13112_v29 = vpack.c.bf16 %v9768_v53, %v9768_v53  ;;  %v4379_v46 = vsel %vm4283_vm2, %v13114_v58, %v13113_v6  ;;  %v13115_v26 = vpack.c.bf16 %v10108_v32, %v10108_v32  ;;  %v13118_v32 = vld [vmem:[#allocation215_spill] sm:$0xff] }
 0x35e   :  { %13111 = vst [vmem:[#allocation301_spill] sm:$0xff] %v10322_v41  ;;  %v4380_v54 = vsel %vm4285_vm3, %v13116_v63, %v4379_v46  ;;  %v4393_v27 = vsel %vm4283_vm2, %v10020_v11, %v9958_v25  ;;  %v1614_v37 = vadd.f32 %v10046_v0, %v9838_v40  ;;  %v2460_v61 = vmax.f32 %v2458_v60, %v2459_v35  ;;  %v13119_v60 = vld [vmem:[#allocation206_spill] sm:$0xff] }
 0x35f   :  { %v4134_v43 = vunpack.c.l.b16 %v13112_v29  ;;  %v4150_v52 = vunpack.c.l.b16 %v13115_v26  ;;  %v3561_v29 = vpack.c.bf16 %v10314_v23, %v10314_v23  ;;  %v4381_v6 = vsel %vm4287_vm4, %v13117_v7, %v4380_v54 }
 0x360   :  { %v4394_v58 = vsel %vm4285_vm3, %v10096_v17, %v4393_v27  ;;  %v3050_v26 = vmax.f32 %v1613_v50, %v3049_v39  ;;  %v4382_v46 = vsel %vm4289_vm5, %v13118_v32, %v4381_v6  ;;  %v3055_v11 = vrot.slane %v1614_v37, 4  ;;  %v13121_v39 = vld [vmem:[#allocation113_spill] sm:$0xff]  ;;  %v13122_v32 = vld [vmem:[#allocation188_spill] sm:$0xff] }
 0x361   :  { %v4395_v25 = vsel %vm4287_vm4, %v10128_v36, %v4394_v58  ;;  %v3042_v63 = vmax.f32 %v3040_v5, %v3041_v10  ;;  %v2470_v40 = vmax.f32 %v2468_v44, %v2469_v30  ;;  %v13120_v35 = vpack.c.bf16 %v13119_v60, %v13119_v60 }
 0x362   :  { %v4396_v23 = vsel %vm4289_vm5, %v10136_v45, %v4395_v25  ;;  %v4383_v54 = vsel %vm4291_vm6, %v4134_v43, %v4382_v46  ;;  %v3056_v50 = vmax.f32 %v1614_v37, %v3055_v11  ;;  %v4372_v27 = vsel %vm4283_vm2, %v13122_v32, %v13121_v39  ;;  %v13125_v45 = vld [vmem:[#allocation133_spill] sm:$0xff]  ;;  %v13128_v25 = vld [vmem:[#allocation211_spill] sm:$0xff] }
 0x363   :  { %v4133_v7 = vunpack.c.l.b16 %v13120_v35  ;;  %v4397_v17 = vsel %vm4291_vm6, %v4150_v52, %v4396_v23  ;;  %v13124_v5 = vpack.c.bf16 %v10100_v47, %v10100_v47  ;;  %v4373_v10 = vsel %vm4285_vm3, %v13125_v45, %v4372_v27  ;;  %v13126_v23 = vld [vmem:[#allocation199_spill] sm:$0xff] }
 0x364   :  { %v10360_v36 = vpack.c.b16 %v4397_v17, %v4383_v54  ;;  %v4386_v30 = vsel %vm4283_vm2, %v9980_v51, %v9948_v8  ;;  %v3051_v43 = vrot.slane %v3050_v26, 2  ;;  %v4374_v37 = vsel %vm4287_vm4, %v13126_v23, %v4373_v10  ;;  %v13145_v47 = vld [vmem:[#allocation239_spill] sm:$0xff] }
 0x365   :  { %v4149_v44 = vunpack.c.l.b16 %v13124_v5  ;;  %v4387_v52 = vsel %vm4285_vm3, %v10042_v2, %v4386_v30  ;;  %v1615_v6 = vadd.f32 %v10050_v4, %v9858_v3  ;;  %v10376_v58 = vmax.f32 %v3036_v62, 0.0  ;;  %v13132_v5 = vld [vmem:[#allocation103_spill] sm:$0xff] }
 0x366   :  { %13123 = vst [vmem:[#allocation189_spill] sm:$0xff] %v10360_v36  ;;  %4924 = vmatprep.mubr.bf16.mxu1 %v10360_v36  ;;  %v3057_v46 = vrot.slane %v3056_v50, 2  ;;  %v4375_v11 = vsel %vm4289_vm5, %v13128_v25, %v4374_v37  ;;  %v4388_v8 = vsel %vm4287_vm4, %v10114_v42, %v4387_v52  ;;  %v10383_v51 = vunpack.c.l.b16 %v3561_v29  ;;  %v13130_v29 = vld [vmem:[#allocation175_spill] sm:$0xff]  ;;  %v13137_v52 = vld [vmem:[#allocation228_spill] sm:$0xff] }
 0x367   :  { %13127 = vst [vmem:[#allocation191_spill] sm:$0xff] %v10376_v58  ;;  %v2466_v35 = vmax.f32 %v10283_v28, %v2465_v14  ;;  %v3048_v2 = vmax.f32 %v10285_v49, %v3047_v20  ;;  %v4389_v3 = vsel %vm4289_vm5, %v10134_v24, %v4388_v8  ;;  %v2471_v62 = vrot.slane %v2470_v40, 1  ;;  %v13131_v49 = vld [vmem:[#allocation225_spill] sm:$0xff]  ;;  %v13150_v36 = vld [vmem:[#allocation243_spill] sm:$0xff] }
 0x368   :  { %v4376_v54 = vsel %vm4291_vm6, %v4133_v7, %v4375_v11  ;;  %v4390_v17 = vsel %vm4291_vm6, %v4149_v44, %v4389_v3  ;;  %v1617_v39 = vadd.f32 %v10050_v4, %v9882_v33  ;;  %v3052_v32 = vmax.f32 %v3050_v26, %v3051_v43 }
 0x369   :  { %v10393_v27 = vpack.c.b16 %v4390_v17, %v4376_v54  ;;  %v3061_v42 = vrot.slane %v1615_v6, 4  ;;  %v1517_v28 = vadd.f32 %v10050_v4, %v13130_v29  ;;  %v3058_v14 = vmax.f32 %v3056_v50, %v3057_v46 }
 0x36a   :  { %v1616_v20 = vadd.f32 %v10046_v0, %v13131_v49  ;;  %v3073_v24 = vrot.slane %v1617_v39, 4  ;;  %v1618_v7 = vadd.f32 %v10046_v0, %v13132_v5  ;;  %v10401_v45 = vmax.f32 %v2460_v61, 0.0  ;;  %v7643_v49 = vld [vmem:[#allocation8 + $0x48] ss:$16 sps:$4 sm:$0xff]  }
 0x36b   :  { %13129 = vst [vmem:[#allocation134_spill] sm:$0xff] %v10393_v27  ;;  %v10403_v44 = vmax.f32 %v3042_v63, 0.0  ;;  %4925 = vmatmul.mubr.bf16.gmra.mrb[92].mxu1 %v10393_v27  ;;  %v2473_v33 = vrot.slane %v1517_v28, 4  ;;  %v1518_v26 = vadd.f32 %v10046_v0, %v9905_v55  ;;  %v3658_v50 = vpack.c.bf16 %v10376_v58, %v10376_v58 }
 0x36c   :  { %13133 = vst [vmem:[#allocation201_spill] sm:$0xff] %v10401_v45  ;;  %v10410_v10 = vmax.f32 %v2466_v35, 0.0  ;;  %v3074_v30 = vmax.f32 %v1617_v39, %v3073_v24  ;;  %v3079_v43 = vrot.slane %v1618_v7, 4  ;;  %v10412_v23 = vmax.f32 %v3048_v2, 0.0  ;;  %v7645_v24 = vld [vmem:[#allocation8 + $0x4c] ss:$16 sps:$4 sm:$0xff]  }
 0x36d   :  { %13134 = vst [vmem:[#allocation215_spill] sm:$0xff] %v10403_v44  ;;  %v2472_v37 = vmax.f32 %v2470_v40, %v2471_v62  ;;  %v2479_v61 = vrot.slane %v1518_v26, 4  ;;  %v1619_v63 = vadd.f32 %v10050_v4, %v13137_v52  ;;  %v3053_v46 = vrot.slane %v3052_v32, 1  ;;  %4979 = vmatprep.subr.bf16.mxu1 %v7645_v24 }
 0x36e   :  { %13135 = vst [vmem:[#allocation113_spill] sm:$0xff] %v10410_v10  ;;  %13136 = vst [vmem:[#allocation188_spill] sm:$0xff] %v10412_v23  ;;  %v3059_v25 = vrot.slane %v3058_v14, 1  ;;  %v3062_v11 = vmax.f32 %v1615_v6, %v3061_v42  ;;  %v3067_v8 = vrot.slane %v1616_v20, 4  ;;  %v3562_v55 = vpack.c.bf16 %v10401_v45, %v10401_v45  ;;  %4980 = vmatpush1.bf16.msra.mxu1 %v7643_v49 }
 0x36f   :  { %v3075_v3 = vrot.slane %v3074_v30, 2  ;;  %v2474_v54 = vmax.f32 %v1517_v28, %v2473_v33  ;;  %v3085_v35 = vrot.slane %v1619_v63, 4  ;;  %v10418_v17 = vunpack.c.l.b16 %v3658_v50 }
 0x370   :  { %v3659_v2 = vpack.c.bf16 %v10403_v44, %v10403_v44  ;;  %v3563_v40 = vpack.c.bf16 %v10410_v10, %v10410_v10  ;;  %v3080_v62 = vmax.f32 %v1618_v7, %v3079_v43  ;;  %v3660_v39 = vpack.c.bf16 %v10412_v23, %v10412_v23 }
 0x371   :  { %13138 = vst [vmem:[#allocation133_spill] sm:$0xff] %v10418_v17  ;;  %v10426_v6 = vmax.f32 %v2472_v37, 0.0  ;;  %v2480_v42 = vmax.f32 %v1518_v26, %v2479_v61  ;;  %v3086_v29 = vmax.f32 %v1619_v63, %v3085_v35  ;;  %v3054_v28 = vmax.f32 %v3052_v32, %v3053_v46  ;;  %v7646_v61 = vld [vmem:[#allocation8 + $0x68] ss:$16 sps:$4 sm:$0xff]   ;;  %v7648_v32 = vld [vmem:[#allocation8 + $0x6c] ss:$16 sps:$4 sm:$0xff]  }
 0x372   :  { %v3060_v5 = vmax.f32 %v3058_v14, %v3059_v25  ;;  %v3063_v33 = vrot.slane %v3062_v11, 2  ;;  %v3068_v50 = vmax.f32 %v1616_v20, %v3067_v8  ;;  %v3076_v52 = vmax.f32 %v3074_v30, %v3075_v3  ;;  %v10438_v46 = vpop.f32.mrb[172].mxu0  ;;  %4981 = vmatprep.subr.bf16.mxu1 %v7648_v32 }
 0x373   :  { %13139 = vst [vmem:[#allocation199_spill] sm:$0xff] %v10426_v6  ;;  %v2475_v58 = vrot.slane %v2474_v54, 2  ;;  %v3087_v44 = vrot.slane %v3086_v29, 2  ;;  %v1519_v10 = vadd.f32 %v10050_v4, %v9927_v16  ;;  %v10430_v7 = vunpack.c.l.b16 %v3562_v55  ;;  %4982 = vmatpush1.bf16.msra.mxu1 %v7646_v61  ;;  %v10468_v27 = vpop.f32.mrb[173].mxu0 }
 0x374   :  { %v10432_v43 = vunpack.c.l.b16 %v3659_v2  ;;  %v10434_v37 = vunpack.c.l.b16 %v3563_v40  ;;  %v3081_v26 = vrot.slane %v3080_v62, 2  ;;  %v3564_v14 = vpack.c.bf16 %v10426_v6, %v10426_v6  ;;  %v13144_v6 = vld [vmem:[#allocation237_spill] sm:$0xff] }
 0x375   :  { %v2481_v20 = vrot.slane %v2480_v42, 2  ;;  %v3088_v30 = vmax.f32 %v3086_v29, %v3087_v44  ;;  %v2485_v63 = vrot.slane %v1519_v10, 4  ;;  %v10440_v16 = vmax.f32 %v3054_v28, 0.0 }
 0x376   :  { %13140 = vst [vmem:[#allocation211_spill] sm:$0xff] %v10432_v43  ;;  %v3064_v25 = vmax.f32 %v3062_v11, %v3063_v33  ;;  %v3069_v8 = vrot.slane %v3068_v50, 2  ;;  %v1620_v55 = vadd.f32 %v10046_v0, %v9929_v15  ;;  %v10444_v3 = vmax.f32 %v3060_v5, 0.0 }
 0x377   :  { %13141 = vst [vmem:[#allocation175_spill] sm:$0xff] %v10440_v16  ;;  %v3077_v35 = vrot.slane %v3076_v52, 1  ;;  %v2476_v2 = vmax.f32 %v2474_v54, %v2475_v58  ;;  %v2486_v40 = vmax.f32 %v1519_v10, %v2485_v63  ;;  %v10446_v49 = vunpack.c.l.b16 %v3660_v39 }
 0x378   :  { %13142 = vst [vmem:[#allocation225_spill] sm:$0xff] %v10444_v3  ;;  %v3082_v24 = vmax.f32 %v3080_v62, %v3081_v26  ;;  %v3091_v44 = vrot.slane %v1620_v55, 4  ;;  %v1520_v29 = vadd.f32 %v10046_v0, %v9964_v12  ;;  %v10450_v28 = vunpack.c.l.b16 %v3564_v14 }
 0x379   :  { %13143 = vst [vmem:[#allocation103_spill] sm:$0xff] %v10446_v49  ;;  %v2482_v11 = vmax.f32 %v2480_v42, %v2481_v20  ;;  %v3089_v33 = vrot.slane %v3088_v30, 1  ;;  %v2487_v23 = vrot.slane %v2486_v40, 2  ;;  %v3065_v5 = vrot.slane %v3064_v25, 1  ;;  %v13170_v49 = vld [vmem:[#allocation263_spill] sm:$0xff] }
 0x37a   :  { %v3092_v32 = vmax.f32 %v1620_v55, %v3091_v44  ;;  %v2491_v58 = vrot.slane %v1520_v29, 4  ;;  %v3662_v10 = vpack.c.bf16 %v10444_v3, %v10444_v3  ;;  %v3070_v54 = vmax.f32 %v3068_v50, %v3069_v8  ;;  %v13146_v3 = vld [vmem:[#allocation240_spill] sm:$0xff] }
 0x37b   :  { %v3078_v62 = vmax.f32 %v3076_v52, %v3077_v35  ;;  %v2477_v39 = vrot.slane %v2476_v2, 1  ;;  %v3083_v26 = vrot.slane %v3082_v24, 1  ;;  %v1621_v42 = vadd.f32 %v10050_v4, %v9966_v13 }
 0x37c   :  { %v3093_v12 = vrot.slane %v3092_v32, 2  ;;  %v2492_v61 = vmax.f32 %v1520_v29, %v2491_v58  ;;  %v2483_v14 = vrot.slane %v2482_v11, 1  ;;  %v3090_v20 = vmax.f32 %v3088_v30, %v3089_v33 }
 0x37d   :  { %v2488_v63 = vmax.f32 %v2486_v40, %v2487_v23  ;;  %v1622_v15 = vadd.f32 %v10046_v0, %v13144_v6  ;;  %v3097_v45 = vrot.slane %v1621_v42, 4  ;;  %v1623_v50 = vadd.f32 %v10050_v4, %v13145_v47 }
 0x37e   :  { %v3094_v55 = vmax.f32 %v3092_v32, %v3093_v12  ;;  %v2493_v44 = vrot.slane %v2492_v61, 2  ;;  %v3071_v52 = vrot.slane %v3070_v54, 1  ;;  %v2478_v8 = vmax.f32 %v2476_v2, %v2477_v39 }
 0x37f   :  { %v3103_v35 = vrot.slane %v1622_v15, 4  ;;  %v1624_v29 = vadd.f32 %v10046_v0, %v13146_v3  ;;  %v3098_v60 = vmax.f32 %v1621_v42, %v3097_v45  ;;  %v3109_v30 = vrot.slane %v1623_v50, 4  ;;  %v10480_v42 = vpop.f32.mrb[84].mxu1 }
 0x380   :  { %v3095_v58 = vrot.slane %v3094_v55, 1  ;;  %v2494_v13 = vmax.f32 %v2492_v61, %v2493_v44  ;;  %v3066_v23 = vmax.f32 %v3064_v25, %v3065_v5  ;;  %v10464_v40 = vmax.f32 %v3078_v62, 0.0  ;;  %v10474_v61 = vpop.f32.mrb[174].mxu0  ;;  %v7649_v25 = vld [vmem:[#allocation8 + $0x88] ss:$16 sps:$4 sm:$0xff]   ;;  %13152 = vst [vmem:[#allocation243_spill] sm:$0xff] %v10480_v42 }
 0x381   :  { %v3104_v6 = vmax.f32 %v1622_v15, %v3103_v35  ;;  %v3115_v33 = vrot.slane %v1624_v29, 4  ;;  %v3084_v32 = vmax.f32 %v3082_v24, %v3083_v26  ;;  %v2484_v12 = vmax.f32 %v2482_v11, %v2483_v14  ;;  %v7651_v5 = vld [vmem:[#allocation8 + $0x8c] ss:$16 sps:$4 sm:$0xff]   ;;  %v10478_v26 = vpop.f32.mrb[175].mxu0 }
 0x382   :  { %13147 = vst [vmem:[#allocation228_spill] sm:$0xff] %v10464_v40  ;;  %v10466_v53 = vmax.f32 %v3090_v20, 0.0  ;;  %v2489_v47 = vrot.slane %v2488_v63, 1  ;;  %v10470_v2 = vunpack.c.l.b16 %v3662_v10  ;;  %v3099_v39 = vrot.slane %v3098_v60, 2  ;;  %v13153_v44 = vld [vmem:[#allocation247_spill] sm:$0xff]  ;;  %4983 = vmatprep.subr.bf16.mxu1 %v7651_v5  ;;  %v10494_v5 = vpop.f32.mrb[85].mxu1 }
 0x383   :  { %v3110_v3 = vmax.f32 %v1623_v50, %v3109_v30  ;;  %v1625_v45 = vadd.f32 %v10050_v4, %v13150_v36  ;;  %v3072_v15 = vmax.f32 %v3070_v54, %v3071_v52  ;;  %v10476_v62 = vmax.f32 %v2478_v8, 0.0  ;;  %v7654_v36 = vld [vmem:[#allocation8 + $0xac] ss:$16 sps:$4 sm:$0xff]   ;;  %4984 = vmatpush1.bf16.msra.mxu1 %v7649_v25  ;;  %v7652_v8 = vld [vmem:[#allocation8 + $0xa8] ss:$16 sps:$4 sm:$0xff]   ;;  %13157 = vst [vmem:[#allocation304_spill] sm:$0xff] %v10494_v5 }
 0x384   :  { %13148 = vst [vmem:[#allocation237_spill] sm:$0xff] %v10466_v53  ;;  %13149 = vst [vmem:[#allocation239_spill] sm:$0xff] %v10470_v2  ;;  %v3096_v24 = vmax.f32 %v3094_v55, %v3095_v58  ;;  %v2495_v11 = vrot.slane %v2494_v13, 1  ;;  %v3105_v10 = vrot.slane %v3104_v6, 2  ;;  %v3116_v14 = vmax.f32 %v1624_v29, %v3115_v33  ;;  %4985 = vmatprep.subr.bf16.mxu1 %v7654_v36  ;;  %v13162_v36 = vld [vmem:[#allocation249_spill] sm:$0xff] }
 0x385   :  { %13151 = vst [vmem:[#allocation240_spill] sm:$0xff] %v10476_v62  ;;  %v3121_v20 = vrot.slane %v1625_v45, 4  ;;  %v1521_v50 = vadd.f32 %v10050_v4, %v13153_v44  ;;  %v10484_v35 = vmax.f32 %v3066_v23, 0.0  ;;  %v3665_v54 = vpack.c.bf16 %v10464_v40, %v10464_v40  ;;  %v7657_v4 = vld [vmem:[#allocation8 + $0xcc] ss:$16 sps:$4 sm:$0xff]   ;;  %v10500_v40 = vpop.f32.mrb[86].mxu1 }
 0x386   :  { %v10488_v52 = vmax.f32 %v3084_v32, 0.0  ;;  %v10490_v55 = vmax.f32 %v2484_v12, 0.0  ;;  %v3667_v29 = vpack.c.bf16 %v10466_v53, %v10466_v53  ;;  %v2490_v58 = vmax.f32 %v2488_v63, %v2489_v47  ;;  %13159 = vst [vmem:[#allocation306_spill] sm:$0xff] %v10500_v40  ;;  %v13163_v40 = vld [vmem:[#allocation254_spill] sm:$0xff] }
 0x387   :  { %13154 = vst [vmem:[#allocation247_spill] sm:$0xff] %v10484_v35  ;;  %v3100_v30 = vmax.f32 %v3098_v60, %v3099_v39  ;;  %v3111_v33 = vrot.slane %v3110_v3, 2  ;;  %v10496_v23 = vmax.f32 %v3072_v15, 0.0  ;;  %v3565_v32 = vpack.c.bf16 %v10476_v62, %v10476_v62  ;;  %v10504_v60 = vpop.f32.mrb[87].mxu1  ;;  %4986 = vmatpush1.bf16.msra.mxu1 %v7652_v8 }
 0x388   :  { %13155 = vst [vmem:[#allocation302_spill] sm:$0xff] %v10488_v52  ;;  %13156 = vst [vmem:[#allocation303_spill] sm:$0xff] %v10490_v55  ;;  %v3122_v44 = vmax.f32 %v1625_v45, %v3121_v20  ;;  %v2497_v12 = vrot.slane %v1521_v50, 4  ;;  %v10502_v25 = vmax.f32 %v3096_v24, 0.0  ;;  %v2496_v42 = vmax.f32 %v2494_v13, %v2495_v11  ;;  %v7655_v20 = vld [vmem:[#allocation8 + $0xc8] ss:$16 sps:$4 sm:$0xff]   ;;  %4987 = vmatprep.subr.bf16.mxu1 %v7657_v4 }
 0x389   :  { %13158 = vst [vmem:[#allocation305_spill] sm:$0xff] %v10496_v23  ;;  %v3106_v53 = vmax.f32 %v3104_v6, %v3105_v10  ;;  %v3117_v63 = vrot.slane %v3116_v14, 2  ;;  %13161 = vst [vmem:[#allocation308_spill] sm:$0xff] %v10504_v60  ;;  %v4263_v47 = vunpack.c.l.b16 %v3665_v54  ;;  %v3666_v39 = vpack.c.bf16 %v10488_v52, %v10488_v52  ;;  %v7660_v11 = vld [vmem:[#allocation8 + $0xec] ss:$16 sps:$4 sm:$0xff]  }
 0x38a   :  { %13160 = vst [vmem:[#allocation307_spill] sm:$0xff] %v10502_v25  ;;  %v3566_v15 = vpack.c.bf16 %v10490_v55, %v10490_v55  ;;  %v1626_v45 = vadd.f32 %v10046_v0, %v13162_v36  ;;  %v4265_v62 = vunpack.c.l.b16 %v3667_v29  ;;  %v10512_v24 = vmax.f32 %v2490_v58, 0.0 }
 0x38b   :  { %v3101_v13 = vrot.slane %v3100_v30, 1  ;;  %v3112_v6 = vmax.f32 %v3110_v3, %v3111_v33  ;;  %v3123_v10 = vrot.slane %v3122_v44, 2  ;;  %v2498_v54 = vmax.f32 %v1521_v50, %v2497_v12  ;;  %4988 = vmatpush1.bf16.msra.mxu1 %v7655_v20  ;;  %v7658_v50 = vld [vmem:[#allocation8 + $0xe8] ss:$16 sps:$4 sm:$0xff]  }
 0x38c   :  { %v3127_v60 = vrot.slane %v1626_v45, 4  ;;  %v1522_v52 = vadd.f32 %v10046_v0, %v13163_v40  ;;  %v3668_v55 = vpack.c.bf16 %v10502_v25, %v10502_v25  ;;  %v10518_v5 = vmax.f32 %v2496_v42, 0.0  ;;  %4989 = vmatprep.subr.bf16.mxu1 %v7660_v11  ;;  %v7663_v42 = vld [vmem:[#allocation8 + $0x10c] ss:$16 sps:$4 sm:$0xff]  }
 0x38d   :  { %v3107_v8 = vrot.slane %v3106_v53, 1  ;;  %v3118_v36 = vmax.f32 %v3116_v14, %v3117_v63  ;;  %v10522_v58 = vunpack.c.l.b16 %v3565_v32  ;;  %v10524_v4 = vunpack.c.l.b16 %v3666_v39  ;;  %v7661_v14 = vld [vmem:[#allocation8 + $0x108] ss:$16 sps:$4 sm:$0xff]  }
 0x38e   :  { %v3128_v3 = vmax.f32 %v1626_v45, %v3127_v60  ;;  %v2503_v33 = vrot.slane %v1522_v52, 4  ;;  %v10526_v12 = vunpack.c.l.b16 %v3566_v15  ;;  %v3102_v0 = vmax.f32 %v3100_v30, %v3101_v13  ;;  %v10535_v30 = vld [vmem:[#allocation7] sm:$0xff]  ;;  %v13164_v13 = vld [vmem:[#allocation256_spill] sm:$0xff]  ;;  %v13167_v45 = vld [vmem:[#allocation259_spill] sm:$0xff] }
 0x38f   :  { %v3113_v40 = vrot.slane %v3112_v6, 1  ;;  %v10529_v25 = vsel %vm4279_vm0, %v4265_v62, %v4263_v47  ;;  %v3124_v32 = vmax.f32 %v3122_v44, %v3123_v10  ;;  %v2499_v63 = vrot.slane %v2498_v54, 2  ;;  %v13165_v62 = vld [vmem:[#allocation257_spill] sm:$0xff]  ;;  %4990 = vmatpush1.bf16.msra.mxu1 %v7658_v50  ;;  %v10543_v10 = vld [vmem:[#allocation7 + $0x8] sm:$0xff] }
 0x390   :  { %v4266_v60 = vunpack.c.l.b16 %v3668_v55  ;;  %v3108_v39 = vmax.f32 %v3106_v53, %v3107_v8  ;;  %v3119_v20 = vrot.slane %v3118_v36, 1  ;;  %v3129_v15 = vrot.slane %v3128_v3, 2  ;;  %v13168_v8 = vld [vmem:[#allocation260_spill] sm:$0xff]  ;;  %4991 = vmatprep.subr.bf16.mxu1 %v7663_v42 }
 0x391   :  { %v2504_v29 = vmax.f32 %v1522_v52, %v2503_v33  ;;  %v1627_v11 = vadd.f32 %v10535_v30, %v13164_v13  ;;  %v1523_v47 = vadd.f32 %v10535_v30, %v13165_v62  ;;  %v10541_v44 = vmax.f32 %v3102_v0, 0.0  ;;  %v7666_v33 = vld [vmem:[#allocation8 + $0x12c] ss:$16 sps:$4 sm:$0xff]  }
 0x392   :  { %v3114_v55 = vmax.f32 %v3112_v6, %v3113_v40  ;;  %v1628_v53 = vadd.f32 %v10543_v10, %v13167_v45  ;;  %v1524_v52 = vadd.f32 %v10543_v10, %v13168_v8  ;;  %v3125_v43 = vrot.slane %v3124_v32, 1  ;;  %v7664_v45 = vld [vmem:[#allocation8 + $0x128] ss:$16 sps:$4 sm:$0xff]  }
 0x393   :  { %13166 = vst [vmem:[#allocation249_spill] sm:$0xff] %v10541_v44  ;;  %v2500_v13 = vmax.f32 %v2498_v54, %v2499_v63  ;;  %v3133_v41 = vrot.slane %v1627_v11, 4  ;;  %v2509_v31 = vrot.slane %v1523_v47, 4  ;;  %v10549_v62 = vmax.f32 %v3108_v39, 0.0  ;;  %4992 = vmatpush1.bf16.msra.mxu1 %v7661_v14  ;;  %v7669_v63 = vld [vmem:[#allocation8 + $0x14c] ss:$16 sps:$4 sm:$0xff]  }
 0x394   :  { %v3120_v50 = vmax.f32 %v3118_v36, %v3119_v20  ;;  %v3139_v0 = vrot.slane %v1628_v53, 4  ;;  %v2515_v9 = vrot.slane %v1524_v52, 4  ;;  %v3130_v6 = vmax.f32 %v3128_v3, %v3129_v15  ;;  %4993 = vmatprep.subr.bf16.mxu1 %v7666_v33  ;;  %v13172_v14 = vld [vmem:[#allocation264_spill] sm:$0xff] }
 0x395   :  { %13169 = vst [vmem:[#allocation254_spill] sm:$0xff] %v10549_v62  ;;  %v2505_v40 = vrot.slane %v2504_v29, 2  ;;  %v3134_v35 = vmax.f32 %v1627_v11, %v3133_v41  ;;  %v2510_v2 = vmax.f32 %v1523_v47, %v2509_v31  ;;  %v3669_v8 = vpack.c.bf16 %v10541_v44, %v10541_v44 }
 0x396   :  { %v3140_v42 = vmax.f32 %v1628_v53, %v3139_v0  ;;  %v2516_v16 = vmax.f32 %v1524_v52, %v2515_v9  ;;  %v1629_v54 = vadd.f32 %v10535_v30, %v13170_v49  ;;  %v10555_v39 = vmax.f32 %v3114_v55, 0.0  ;;  %v7667_v52 = vld [vmem:[#allocation8 + $0x148] ss:$16 sps:$4 sm:$0xff]  }
 0x397   :  { %v3126_v36 = vmax.f32 %v3124_v32, %v3125_v43  ;;  %v2501_v20 = vrot.slane %v2500_v13, 1  ;;  %v2511_v3 = vrot.slane %v2510_v2, 2  ;;  %v1630_v11 = vadd.f32 %v10543_v10, %v13172_v14  ;;  %4994 = vmatpush1.bf16.msra.mxu1 %v7664_v45  ;;  %v7672_v43 = vld [vmem:[#allocation8 + $0x16c] ss:$16 sps:$4 sm:$0xff]  }
 0x398   :  { %13171 = vst [vmem:[#allocation256_spill] sm:$0xff] %v10555_v39  ;;  %v3141_v15 = vrot.slane %v3140_v42, 2  ;;  %v2517_v41 = vrot.slane %v2516_v16, 2  ;;  %v3145_v31 = vrot.slane %v1629_v54, 4  ;;  %v3131_v47 = vrot.slane %v3130_v6, 1  ;;  %4995 = vmatprep.subr.bf16.mxu1 %v7669_v63 }
 0x399   :  { %v2506_v44 = vmax.f32 %v2504_v29, %v2505_v40  ;;  %v3135_v53 = vrot.slane %v3134_v35, 2  ;;  %v2512_v9 = vmax.f32 %v2510_v2, %v2511_v3  ;;  %v3151_v55 = vrot.slane %v1630_v11, 4  ;;  %v7670_v63 = vld [vmem:[#allocation8 + $0x168] ss:$16 sps:$4 sm:$0xff]  }
 0x39a   :  { %v3142_v49 = vmax.f32 %v3140_v42, %v3141_v15  ;;  %v2518_v33 = vmax.f32 %v2516_v16, %v2517_v41  ;;  %v3146_v0 = vmax.f32 %v1629_v54, %v3145_v31  ;;  %v4503_v32 = vsel %vm4279_vm0, %v4266_v60, %v10524_v4 }
 0x39b   :  { %v3670_v17 = vpack.c.bf16 %v10549_v62, %v10549_v62  ;;  %v10563_v57 = vmax.f32 %v3120_v50, 0.0  ;;  %v2513_v14 = vrot.slane %v2512_v9, 1  ;;  %v2502_v29 = vmax.f32 %v2500_v13, %v2501_v20  ;;  %4996 = vmatpush1.bf16.msra.mxu1 %v7667_v52  ;;  %v7675_v50 = vld [vmem:[#allocation8 + $0x18c] ss:$16 sps:$4 sm:$0xff]   ;;  %v13175_v20 = vld [vmem:[#allocation266_spill] sm:$0xff] }
 0x39c   :  { %v2519_v40 = vrot.slane %v2518_v33, 1  ;;  %v3147_v2 = vrot.slane %v3146_v0, 2  ;;  %v3152_v45 = vmax.f32 %v1630_v11, %v3151_v55  ;;  %v4267_v3 = vunpack.c.l.b16 %v3669_v8  ;;  %4997 = vmatprep.subr.bf16.mxu1 %v7672_v43  ;;  %v13176_v8 = vld [vmem:[#allocation269_spill] sm:$0xff] }
 0x39d   :  { %13173 = vst [vmem:[#allocation257_spill] sm:$0xff] %v10563_v57  ;;  %v3132_v42 = vmax.f32 %v3130_v6, %v3131_v47  ;;  %v2507_v16 = vrot.slane %v2506_v44, 1  ;;  %v3136_v54 = vmax.f32 %v3134_v35, %v3135_v53  ;;  %v3671_v15 = vpack.c.bf16 %v10555_v39, %v10555_v39 }
 0x39e   :  { %v10567_v4 = vmax.f32 %v3126_v36, 0.0  ;;  %v2514_v60 = vmax.f32 %v2512_v9, %v2513_v14  ;;  %v3143_v41 = vrot.slane %v3142_v49, 1  ;;  %v2520_v31 = vmax.f32 %v2518_v33, %v2519_v40  ;;  %v7673_v33 = vld [vmem:[#allocation8 + $0x188] ss:$16 sps:$4 sm:$0xff]  }
 0x39f   :  { %v3148_v13 = vmax.f32 %v3146_v0, %v3147_v2  ;;  %v1631_v11 = vadd.f32 %v10535_v30, %v13175_v20  ;;  %v1632_v6 = vadd.f32 %v10543_v10, %v13176_v8  ;;  %v4268_v35 = vunpack.c.l.b16 %v3670_v17  ;;  %4998 = vmatpush1.bf16.msra.mxu1 %v7670_v63 }
 0x3a0   :  { %13174 = vst [vmem:[#allocation259_spill] sm:$0xff] %v10567_v4  ;;  %v3672_v47 = vpack.c.bf16 %v10563_v57, %v10563_v57  ;;  %v10575_v53 = vmax.f32 %v2502_v29, 0.0  ;;  %v3153_v36 = vrot.slane %v3152_v45, 2  ;;  %v10577_v52 = vmax.f32 %v3132_v42, 0.0  ;;  %4999 = vmatprep.subr.bf16.mxu1 %v7675_v50  ;;  %v7678_v29 = vld [vmem:[#allocation8 + $0x1ac] ss:$16 sps:$4 sm:$0xff]  }
 0x3a1   :  { %v2508_v9 = vmax.f32 %v2506_v44, %v2507_v16  ;;  %v3137_v55 = vrot.slane %v3136_v54, 1  ;;  %v3163_v43 = vrot.slane %v1632_v6, 4  ;;  %v10581_v0 = vsel %vm4281_vm1, %v4267_v3, %v10529_v25  ;;  %v7676_v50 = vld [vmem:[#allocation8 + $0x1a8] ss:$16 sps:$4 sm:$0xff]  }
 0x3a2   :  { %13177 = vst [vmem:[#allocation260_spill] sm:$0xff] %v10575_v53  ;;  %13178 = vst [vmem:[#allocation263_spill] sm:$0xff] %v10577_v52  ;;  %v3673_v17 = vpack.c.bf16 %v10567_v4, %v10567_v4  ;;  %v10585_v14 = vmax.f32 %v2514_v60, 0.0  ;;  %v3144_v40 = vmax.f32 %v3142_v49, %v3143_v41  ;;  %v10587_v2 = vunpack.c.l.b16 %v3671_v15  ;;  %v13190_v4 = vld [vmem:[#allocation278_spill] sm:$0xff] }
 0x3a3   :  { %13179 = vst [vmem:[#allocation264_spill] sm:$0xff] %v10581_v0  ;;  %v10589_v42 = vmax.f32 %v2520_v31, 0.0  ;;  %v3149_v44 = vrot.slane %v3148_v13, 1  ;;  %v3157_v16 = vrot.slane %v1631_v11, 4  ;;  %v10592_v63 = vsel %vm4281_vm1, %v4268_v35, %v4503_v32  ;;  %5000 = vmatpush1.bf16.msra.mxu1 %v7673_v33  ;;  %v13188_v35 = vld [vmem:[#allocation273_spill] sm:$0xff] }
 0x3a4   :  { %13180 = vst [vmem:[#allocation266_spill] sm:$0xff] %v10585_v14  ;;  %13181 = vst [vmem:[#allocation269_spill] sm:$0xff] %v10587_v2  ;;  %v10594_v20 = vunpack.c.l.b16 %v3672_v47  ;;  %v3569_v25 = vpack.c.bf16 %v10575_v53, %v10575_v53  ;;  %v3154_v3 = vmax.f32 %v3152_v45, %v3153_v36  ;;  %v3674_v49 = vpack.c.bf16 %v10577_v52, %v10577_v52  ;;  %v7681_v45 = vld [vmem:[#allocation8 + $0x1cc] ss:$16 sps:$4 sm:$0xff]  }
 0x3a5   :  { %13182 = vst [vmem:[#allocation309_spill] sm:$0xff] %v10589_v42  ;;  %13183 = vst [vmem:[#allocation310_spill] sm:$0xff] %v10592_v63  ;;  %v10600_v60 = vmax.f32 %v2508_v9, 0.0  ;;  %v3138_v15 = vmax.f32 %v3136_v54, %v3137_v55  ;;  %v3164_v41 = vmax.f32 %v1632_v6, %v3163_v43  ;;  %v10602_v31 = vunpack.c.l.b16 %v3673_v17  ;;  %5001 = vmatprep.subr.bf16.mxu1 %v7678_v29  ;;  %v13189_v6 = vld [vmem:[#allocation276_spill] sm:$0xff] }
 0x3a6   :  { %13184 = vst [vmem:[#allocation311_spill] sm:$0xff] %v10594_v20  ;;  %v3571_v32 = vpack.c.bf16 %v10585_v14, %v10585_v14  ;;  %v10606_v8 = vmax.f32 %v3144_v40, 0.0  ;;  %v1525_v47 = vadd.f32 %v10535_v30, %v13188_v35  ;;  %v3572_v36 = vpack.c.bf16 %v10589_v42, %v10589_v42 }
 0x3a7   :  { %13185 = vst [vmem:[#allocation312_spill] sm:$0xff] %v10600_v60  ;;  %13186 = vst [vmem:[#allocation313_spill] sm:$0xff] %v10602_v31  ;;  %v3150_v9 = vmax.f32 %v3148_v13, %v3149_v44  ;;  %v3158_v54 = vmax.f32 %v1631_v11, %v3157_v16  ;;  %v1526_v55 = vadd.f32 %v10543_v10, %v13189_v6  ;;  %v4167_v43 = vunpack.c.l.b16 %v3569_v25  ;;  %v7679_v13 = vld [vmem:[#allocation8 + $0x1c8] ss:$16 sps:$4 sm:$0xff]   ;;  %v7684_v6 = vld [vmem:[#allocation8 + $0x1ec] ss:$16 sps:$4 sm:$0xff]  }
 0x3a8   :  { %13187 = vst [vmem:[#allocation314_spill] sm:$0xff] %v10606_v8  ;;  %v3155_v33 = vrot.slane %v3154_v3, 1  ;;  %v2521_v17 = vrot.slane %v1525_v47, 4  ;;  %v1527_v40 = vadd.f32 %v10535_v30, %v13190_v4  ;;  %v10616_v39 = vunpack.c.l.b16 %v3674_v49  ;;  %5002 = vmatpush1.bf16.msra.mxu1 %v7676_v50 }
 0x3a9   :  { %v3570_v29 = vpack.c.bf16 %v10600_v60, %v10600_v60  ;;  %v10620_v35 = vmax.f32 %v3138_v15, 0.0  ;;  %v3165_v52 = vrot.slane %v3164_v41, 2  ;;  %v3676_v11 = vpack.c.bf16 %v10606_v8, %v10606_v8  ;;  %5003 = vmatprep.subr.bf16.mxu1 %v7681_v45  ;;  %v13194_v8 = vld [vmem:[#allocation280_spill] sm:$0xff]  ;;  %v7682_v45 = vld [vmem:[#allocation8 + $0x1e8] ss:$16 sps:$4 sm:$0xff]  }
 0x3aa   :  { %13191 = vst [vmem:[#allocation273_spill] sm:$0xff] %v10616_v39  ;;  %v2522_v44 = vmax.f32 %v1525_v47, %v2521_v17  ;;  %v2527_v16 = vrot.slane %v1526_v55, 4  ;;  %v2533_v25 = vrot.slane %v1527_v40, 4  ;;  %v4169_v57 = vunpack.c.l.b16 %v3571_v32 }
 0x3ab   :  { %13192 = vst [vmem:[#allocation276_spill] sm:$0xff] %v10620_v35  ;;  %v4170_v4 = vunpack.c.l.b16 %v3572_v36  ;;  %v10624_v49 = vmax.f32 %v3150_v9, 0.0  ;;  %v3159_v62 = vrot.slane %v3158_v54, 2  ;;  %v3156_v53 = vmax.f32 %v3154_v3, %v3155_v33 }
 0x3ac   :  { %v2523_v14 = vrot.slane %v2522_v44, 2  ;;  %v2528_v15 = vmax.f32 %v1526_v55, %v2527_v16  ;;  %v2534_v60 = vmax.f32 %v1527_v40, %v2533_v25  ;;  %v4168_v42 = vunpack.c.l.b16 %v3570_v29  ;;  %5004 = vmatpush1.bf16.msra.mxu1 %v7679_v13  ;;  %v13198_v16 = vld [vmem:[#allocation129_spill] sm:$0xff] }
 0x3ad   :  { %13193 = vst [vmem:[#allocation278_spill] sm:$0xff] %v10624_v49  ;;  %v3166_v31 = vmax.f32 %v3164_v41, %v3165_v52  ;;  %v1528_v47 = vadd.f32 %v10543_v10, %v13194_v8  ;;  %v10630_v17 = vunpack.c.l.b16 %v3676_v11  ;;  %5005 = vmatprep.subr.bf16.mxu1 %v7684_v6  ;;  %v10633_v3 = vsel %vm4279_vm0, %v4169_v57, %v4167_v43  ;;  %v13197_v11 = vld [vmem:[#allocation127_spill] sm:$0xff]  ;;  %v13199_v6 = vld [vmem:[#allocation128_spill] sm:$0xff] }
 0x3ae   :  { %v2524_v32 = vmax.f32 %v2522_v44, %v2523_v14  ;;  %v2529_v36 = vrot.slane %v2528_v15, 2  ;;  %v2535_v9 = vrot.slane %v2534_v60, 2  ;;  %v10636_v55 = vsel %vm4279_vm0, %v4170_v4, %v4168_v42 }
 0x3af   :  { %13195 = vst [vmem:[#allocation280_spill] sm:$0xff] %v10630_v17  ;;  %v3160_v41 = vmax.f32 %v3158_v54, %v3159_v62  ;;  %v10640_v33 = vmax.f32 %v3156_v53, 0.0  ;;  %v3167_v13 = vrot.slane %v3166_v31, 1  ;;  %v2539_v14 = vrot.slane %v1528_v47, 4 }
 0x3b0   :  { %v2525_v8 = vrot.slane %v2524_v32, 1  ;;  %v2530_v40 = vmax.f32 %v2528_v15, %v2529_v36  ;;  %v2536_v29 = vmax.f32 %v2534_v60, %v2535_v9  ;;  %v1529_v44 = vadd.f32 %v10535_v30, %v13197_v11  ;;  %5006 = vmatpush1.bf16.msra.mxu1 %v7682_v45  ;;  %v13200_v15 = vld [vmem:[#allocation281_spill] sm:$0xff] }
 0x3b1   :  { %13196 = vst [vmem:[#allocation315_spill] sm:$0xff] %v10640_v33  ;;  %v1530_v57 = vadd.f32 %v10543_v10, %v13198_v16  ;;  %v1531_v62 = vadd.f32 %v10535_v30, %v13199_v6  ;;  %v2540_v53 = vmax.f32 %v1528_v47, %v2539_v14  ;;  %v1532_v60 = vadd.f32 %v10543_v10, %v13200_v15 }
 0x3b2   :  { %v2526_v42 = vmax.f32 %v2524_v32, %v2525_v8  ;;  %v2531_v43 = vrot.slane %v2530_v40, 1  ;;  %v2537_v25 = vrot.slane %v2536_v29, 1  ;;  %v2545_v54 = vrot.slane %v1529_v44, 4 }
 0x3b3   :  { %v2551_v4 = vrot.slane %v1530_v57, 4  ;;  %v2557_v52 = vrot.slane %v1531_v62, 4  ;;  %v2541_v50 = vrot.slane %v2540_v53, 2  ;;  %v2563_v32 = vrot.slane %v1532_v60, 4 }
 0x3b4   :  { %v10650_v36 = vmax.f32 %v2526_v42, 0.0  ;;  %v2532_v9 = vmax.f32 %v2530_v40, %v2531_v43  ;;  %v2538_v11 = vmax.f32 %v2536_v29, %v2537_v25  ;;  %v2546_v16 = vmax.f32 %v1529_v44, %v2545_v54 }
 0x3b5   :  { %v2552_v45 = vmax.f32 %v1530_v57, %v2551_v4  ;;  %v3678_v8 = vpack.c.bf16 %v10640_v33, %v10640_v33  ;;  %v3161_v2 = vrot.slane %v3160_v41, 1  ;;  %v2558_v47 = vmax.f32 %v1531_v62, %v2557_v52  ;;  %v10664_v62 = vpop.f32.mrb[88].mxu1  ;;  %v13213_v33 = vld [vmem:[#allocation288_spill] sm:$0xff] }
 0x3b6   :  { %13201 = vst [vmem:[#allocation127_spill] sm:$0xff] %v10650_v36  ;;  %v10654_v6 = vmax.f32 %v2532_v9, 0.0  ;;  %v2542_v14 = vmax.f32 %v2540_v53, %v2541_v50  ;;  %v2547_v0 = vrot.slane %v2546_v16, 2  ;;  %v2564_v15 = vmax.f32 %v1532_v60, %v2563_v32  ;;  %13205 = vst [vmem:[#allocation316_spill] sm:$0xff] %v10664_v62 }
 0x3b7   :  { %v2553_v49 = vrot.slane %v2552_v45, 2  ;;  %v3168_v42 = vmax.f32 %v3166_v31, %v3167_v13  ;;  %v3573_v40 = vpack.c.bf16 %v10650_v36, %v10650_v36  ;;  %v10658_v29 = vmax.f32 %v2538_v11, 0.0  ;;  %v10666_v11 = vpop.f32.mrb[89].mxu1 }
 0x3b8   :  { %13202 = vst [vmem:[#allocation129_spill] sm:$0xff] %v10654_v6  ;;  %v2559_v44 = vrot.slane %v2558_v47, 2  ;;  %v2543_v57 = vrot.slane %v2542_v14, 1  ;;  %v2548_v43 = vmax.f32 %v2546_v16, %v2547_v0  ;;  %v2565_v54 = vrot.slane %v2564_v15, 2  ;;  %13206 = vst [vmem:[#allocation317_spill] sm:$0xff] %v10666_v11 }
 0x3b9   :  { %13203 = vst [vmem:[#allocation128_spill] sm:$0xff] %v10658_v29  ;;  %v2554_v25 = vmax.f32 %v2552_v45, %v2553_v49  ;;  %v10660_v4 = vunpack.c.l.b16 %v3678_v8  ;;  %v3162_v9 = vmax.f32 %v3160_v41, %v3161_v2  ;;  %v3574_v50 = vpack.c.bf16 %v10654_v6, %v10654_v6  ;;  %v13208_v49 = vld [vmem:[#allocation202_spill] sm:$0xff]  ;;  %v10674_v41 = vpop.f32.mrb[90].mxu1 }
 0x3ba   :  { %v2560_v52 = vmax.f32 %v2558_v47, %v2559_v44  ;;  %v2544_v31 = vmax.f32 %v2542_v14, %v2543_v57  ;;  %v2549_v13 = vrot.slane %v2548_v43, 1  ;;  %v2566_v60 = vmax.f32 %v2564_v15, %v2565_v54  ;;  %v13209_v45 = vld [vmem:[#allocation286_spill] sm:$0xff]  ;;  %13210 = vst [vmem:[#allocation202_spill] sm:$0xff] %v10674_v41  ;;  %v10680_v44 = vpop.f32.mrb[91].mxu1 }
 0x3bb   :  { %13204 = vst [vmem:[#allocation281_spill] sm:$0xff] %v10660_v4  ;;  %v2555_v53 = vrot.slane %v2554_v25, 1  ;;  %v10668_v32 = vmax.f32 %v3168_v42, 0.0  ;;  %v1533_v16 = vadd.f32 %v10535_v30, %v13208_v49  ;;  %v1534_v2 = vadd.f32 %v10543_v10, %v13209_v45  ;;  %13212 = vst [vmem:[#allocation319_spill] sm:$0xff] %v10680_v44 }
 0x3bc   :  { %v2561_v0 = vrot.slane %v2560_v52, 1  ;;  %v4171_v8 = vunpack.c.l.b16 %v3573_v40  ;;  %v3575_v47 = vpack.c.bf16 %v10658_v29, %v10658_v29  ;;  %v10678_v14 = vmax.f32 %v2544_v31, 0.0 }
 0x3bd   :  { %13207 = vst [vmem:[#allocation318_spill] sm:$0xff] %v10668_v32  ;;  %v2550_v15 = vmax.f32 %v2548_v43, %v2549_v13  ;;  %v4172_v42 = vunpack.c.l.b16 %v3574_v50  ;;  %v2569_v57 = vrot.slane %v1533_v16, 4  ;;  %v2575_v54 = vrot.slane %v1534_v2, 4  ;;  %v13219_v43 = vld [vmem:[#allocation136_spill] sm:$0xff] }
 0x3be   :  { %13211 = vst [vmem:[#allocation286_spill] sm:$0xff] %v10678_v14  ;;  %v1535_v49 = vadd.f32 %v10535_v30, %v13213_v33  ;;  %v10684_v36 = vmax.f32 %v3162_v9, 0.0  ;;  %v2556_v45 = vmax.f32 %v2554_v25, %v2555_v53  ;;  %v2562_v6 = vmax.f32 %v2560_v52, %v2561_v0 }
 0x3bf   :  { %v2567_v41 = vrot.slane %v2566_v60, 1  ;;  %v3576_v40 = vpack.c.bf16 %v10678_v14, %v10678_v14  ;;  %v2570_v29 = vmax.f32 %v1533_v16, %v2569_v57  ;;  %v2576_v31 = vmax.f32 %v1534_v2, %v2575_v54  ;;  %v13218_v57 = vld [vmem:[#allocation289_spill] sm:$0xff]  ;;  %v13221_v14 = vld [vmem:[#allocation148_spill] sm:$0xff] }
 0x3c0   :  { %13214 = vst [vmem:[#allocation288_spill] sm:$0xff] %v10684_v36  ;;  %v2581_v11 = vrot.slane %v1535_v49, 4  ;;  %v10692_v50 = vsel %vm4281_vm1, %v4171_v8, %v10633_v3  ;;  %v10694_v13 = vunpack.c.l.b16 %v3575_v47  ;;  %v10696_v33 = vmax.f32 %v2550_v15, 0.0 }
 0x3c1   :  { %v10700_v25 = vsel %vm4281_vm1, %v4172_v42, %v10636_v55  ;;  %v2571_v9 = vrot.slane %v2570_v29, 2  ;;  %v2577_v52 = vrot.slane %v2576_v31, 2  ;;  %v10702_v0 = vmax.f32 %v2556_v45, 0.0 }
 0x3c2   :  { %13215 = vst [vmem:[#allocation320_spill] sm:$0xff] %v10696_v33  ;;  %v2582_v53 = vmax.f32 %v1535_v49, %v2581_v11  ;;  %v10704_v16 = vmax.f32 %v2562_v6, 0.0  ;;  %v2568_v2 = vmax.f32 %v2566_v60, %v2567_v41  ;;  %v1536_v3 = vadd.f32 %v10543_v10, %v13218_v57  ;;  %v13220_v49 = vld [vmem:[#allocation291_spill] sm:$0xff] }
 0x3c3   :  { %13216 = vst [vmem:[#allocation321_spill] sm:$0xff] %v10702_v0  ;;  %v10708_v8 = vunpack.c.l.b16 %v3576_v40  ;;  %v2572_v47 = vmax.f32 %v2570_v29, %v2571_v9  ;;  %v2578_v15 = vmax.f32 %v2576_v31, %v2577_v52  ;;  %v3577_v55 = vpack.c.bf16 %v10696_v33, %v10696_v33  ;;  %v13222_v9 = vld [vmem:[#allocation145_spill] sm:$0xff] }
 0x3c4   :  { %13217 = vst [vmem:[#allocation322_spill] sm:$0xff] %v10704_v16  ;;  %v2583_v54 = vrot.slane %v2582_v53, 2  ;;  %v2587_v42 = vrot.slane %v1536_v3, 4  ;;  %v1537_v11 = vadd.f32 %v10535_v30, %v13219_v43  ;;  %v1538_v6 = vadd.f32 %v10543_v10, %v13220_v49 }
 0x3c5   :  { %v2573_v45 = vrot.slane %v2572_v47, 1  ;;  %v2579_v60 = vrot.slane %v2578_v15, 1  ;;  %v1539_v40 = vadd.f32 %v10535_v30, %v13221_v14  ;;  %v1540_v52 = vadd.f32 %v10543_v10, %v13222_v9 }
 0x3c6   :  { %v2584_v41 = vmax.f32 %v2582_v53, %v2583_v54  ;;  %v2588_v57 = vmax.f32 %v1536_v3, %v2587_v42  ;;  %v2593_v29 = vrot.slane %v1537_v11, 4  ;;  %v2599_v31 = vrot.slane %v1538_v6, 4 }
 0x3c7   :  { %v3578_v33 = vpack.c.bf16 %v10702_v0, %v10702_v0  ;;  %v2574_v44 = vmax.f32 %v2572_v47, %v2573_v45  ;;  %v2580_v43 = vmax.f32 %v2578_v15, %v2579_v60  ;;  %v2605_v62 = vrot.slane %v1539_v40, 4 }
 0x3c8   :  { %v2589_v4 = vrot.slane %v2588_v57, 2  ;;  %v2594_v49 = vmax.f32 %v1537_v11, %v2593_v29  ;;  %v2600_v36 = vmax.f32 %v1538_v6, %v2599_v31  ;;  %v2611_v17 = vrot.slane %v1540_v52, 4 }
 0x3c9   :  { %v3579_v53 = vpack.c.bf16 %v10704_v16, %v10704_v16  ;;  %v10724_v14 = vmax.f32 %v2568_v2, 0.0  ;;  %v2585_v3 = vrot.slane %v2584_v41, 1  ;;  %v2606_v54 = vmax.f32 %v1539_v40, %v2605_v62 }
 0x3ca   :  { %v2590_v42 = vmax.f32 %v2588_v57, %v2589_v4  ;;  %v2595_v35 = vrot.slane %v2594_v49, 2  ;;  %v2601_v9 = vrot.slane %v2600_v36, 2  ;;  %v2612_v39 = vmax.f32 %v1540_v52, %v2611_v17 }
 0x3cb   :  { %13223 = vst [vmem:[#allocation289_spill] sm:$0xff] %v10724_v14  ;;  %v10726_v20 = vunpack.c.l.b16 %v3577_v55  ;;  %v10728_v47 = vunpack.c.l.b16 %v3578_v33  ;;  %v10730_v15 = vmax.f32 %v2574_v44, 0.0  ;;  %v2607_v11 = vrot.slane %v2606_v54, 2 }
 0x3cc   :  { %v10732_v6 = vmax.f32 %v2580_v43, 0.0  ;;  %v2596_v45 = vmax.f32 %v2594_v49, %v2595_v35  ;;  %v2602_v60 = vmax.f32 %v2600_v36, %v2601_v9  ;;  %v2613_v29 = vrot.slane %v2612_v39, 2  ;;  %v13226_v36 = vld [vmem:[#allocation217_spill] sm:$0xff] }
 0x3cd   :  { %13224 = vst [vmem:[#allocation136_spill] sm:$0xff] %v10730_v15  ;;  %v10734_v2 = vunpack.c.l.b16 %v3579_v53  ;;  %v3580_v4 = vpack.c.bf16 %v10724_v14, %v10724_v14  ;;  %v2586_v62 = vmax.f32 %v2584_v41, %v2585_v3  ;;  %v2608_v40 = vmax.f32 %v2606_v54, %v2607_v11 }
 0x3ce   :  { %13225 = vst [vmem:[#allocation291_spill] sm:$0xff] %v10732_v6  ;;  %v2591_v17 = vrot.slane %v2590_v42, 1  ;;  %v2597_v55 = vrot.slane %v2596_v45, 1  ;;  %v2603_v57 = vrot.slane %v2602_v60, 1  ;;  %v2614_v33 = vmax.f32 %v2612_v39, %v2613_v29 }
 0x3cf   :  { %v2609_v31 = vrot.slane %v2608_v40, 1  ;;  %v1541_v44 = vadd.f32 %v10535_v30, %v10247_v59  ;;  %v1542_v35 = vadd.f32 %v10543_v10, %v10249_v18  ;;  %v1543_v52 = vadd.f32 %v10535_v30, %v13226_v36 }
 0x3d0   :  { %v3581_v43 = vpack.c.bf16 %v10730_v15, %v10730_v15  ;;  %v3582_v41 = vpack.c.bf16 %v10732_v6, %v10732_v6  ;;  %v2598_v49 = vmax.f32 %v2596_v45, %v2597_v55  ;;  %v2615_v53 = vrot.slane %v2614_v33, 1 }
 0x3d1   :  { %v2610_v3 = vmax.f32 %v2608_v40, %v2609_v31  ;;  %v2617_v39 = vrot.slane %v1541_v44, 4  ;;  %v2623_v54 = vrot.slane %v1542_v35, 4  ;;  %v2629_v9 = vrot.slane %v1543_v52, 4  ;;  %v13228_v40 = vld [vmem:[#allocation295_spill] sm:$0xff] }
 0x3d2   :  { %v10748_v11 = vunpack.c.l.b16 %v3580_v4  ;;  %v10750_v59 = vmax.f32 %v2586_v62, 0.0  ;;  %v2592_v18 = vmax.f32 %v2590_v42, %v2591_v17  ;;  %v2616_v29 = vmax.f32 %v2614_v33, %v2615_v53 }
 0x3d3   :  { %v2604_v16 = vmax.f32 %v2602_v60, %v2603_v57  ;;  %v2618_v36 = vmax.f32 %v1541_v44, %v2617_v39  ;;  %v2624_v14 = vmax.f32 %v1542_v35, %v2623_v54  ;;  %v2630_v0 = vmax.f32 %v1543_v52, %v2629_v9 }
 0x3d4   :  { %v10752_v15 = vunpack.c.l.b16 %v3581_v43  ;;  %v10754_v63 = vunpack.c.l.b16 %v3582_v41  ;;  %v10756_v45 = vmax.f32 %v2598_v49, 0.0  ;;  %v1544_v55 = vadd.f32 %v10543_v10, %v13228_v40 }
 0x3d5   :  { %v10760_v31 = vmax.f32 %v2610_v3, 0.0  ;;  %v2619_v4 = vrot.slane %v2618_v36, 2  ;;  %v2625_v62 = vrot.slane %v2624_v14, 2  ;;  %v2631_v6 = vrot.slane %v2630_v0, 2 }
 0x3d6   :  { %13227 = vst [vmem:[#allocation148_spill] sm:$0xff] %v10756_v45  ;;  %v10764_v60 = vmax.f32 %v2592_v18, 0.0  ;;  %v10766_v17 = vmax.f32 %v2616_v29, 0.0  ;;  %v2635_v57 = vrot.slane %v1544_v55, 4  ;;  %v10768_v33 = vmax.f32 %v2604_v16, 0.0 }
 0x3d7   :  { %13229 = vst [vmem:[#allocation145_spill] sm:$0xff] %v10760_v31  ;;  %v2620_v44 = vmax.f32 %v2618_v36, %v2619_v4  ;;  %v2626_v35 = vmax.f32 %v2624_v14, %v2625_v62  ;;  %v2632_v52 = vmax.f32 %v2630_v0, %v2631_v6  ;;  %v3585_v43 = vpack.c.bf16 %v10756_v45, %v10756_v45 }
 0x3d8   :  { %13230 = vst [vmem:[#allocation217_spill] sm:$0xff] %v10766_v17  ;;  %13231 = vst [vmem:[#allocation295_spill] sm:$0xff] %v10768_v33  ;;  %v2636_v41 = vmax.f32 %v1544_v55, %v2635_v57  ;;  %v1545_v49 = vadd.f32 %v10535_v30, %v10298_v48  ;;  %v1546_v53 = vadd.f32 %v10543_v10, %v10310_v22 }
 0x3d9   :  { %v3587_v3 = vpack.c.bf16 %v10760_v31, %v10760_v31  ;;  %v2621_v39 = vrot.slane %v2620_v44, 1  ;;  %v2627_v54 = vrot.slane %v2626_v35, 1  ;;  %v2633_v16 = vrot.slane %v2632_v52, 1 }
 0x3da   :  { %v3588_v14 = vpack.c.bf16 %v10766_v17, %v10766_v17  ;;  %v2637_v0 = vrot.slane %v2636_v41, 2  ;;  %v2641_v6 = vrot.slane %v1545_v49, 4  ;;  %v2647_v9 = vrot.slane %v1546_v53, 4 }
 0x3db   :  { %v2622_v18 = vmax.f32 %v2620_v44, %v2621_v39  ;;  %v2628_v29 = vmax.f32 %v2626_v35, %v2627_v54  ;;  %v2634_v36 = vmax.f32 %v2632_v52, %v2633_v16  ;;  %v1547_v48 = vadd.f32 %v10535_v30, %v10316_v1 }
 0x3dc   :  { %v2638_v40 = vmax.f32 %v2636_v41, %v2637_v0  ;;  %v2642_v22 = vmax.f32 %v1545_v49, %v2641_v6  ;;  %v2648_v55 = vmax.f32 %v1546_v53, %v2647_v9  ;;  %v1548_v4 = vadd.f32 %v10543_v10, %v10320_v38 }
 0x3dd   :  { %v3586_v62 = vpack.c.bf16 %v10768_v33, %v10768_v33  ;;  %v10786_v57 = vmax.f32 %v2622_v18, 0.0  ;;  %v10788_v42 = vmax.f32 %v2628_v29, 0.0  ;;  %v2653_v31 = vrot.slane %v1547_v48, 4 }
 0x3de   :  { %v2639_v44 = vrot.slane %v2638_v40, 1  ;;  %v2643_v35 = vrot.slane %v2642_v22, 2  ;;  %v2649_v52 = vrot.slane %v2648_v55, 2  ;;  %v2659_v39 = vrot.slane %v1548_v4, 4 }
 0x3df   :  { %13232 = vst [vmem:[#allocation323_spill] sm:$0xff] %v10786_v57  ;;  %v4185_v54 = vunpack.c.l.b16 %v3587_v3  ;;  %v4186_v1 = vunpack.c.l.b16 %v3588_v14  ;;  %v10790_v41 = vmax.f32 %v2634_v36, 0.0  ;;  %v2654_v49 = vmax.f32 %v1547_v48, %v2653_v31 }
 0x3e0   :  { %v3589_v38 = vpack.c.bf16 %v10786_v57, %v10786_v57  ;;  %v2644_v53 = vmax.f32 %v2642_v22, %v2643_v35  ;;  %v2650_v16 = vmax.f32 %v2648_v55, %v2649_v52  ;;  %v2660_v0 = vmax.f32 %v1548_v4, %v2659_v39  ;;  %v13372_v57 = vld [vmem:[#allocation43_spill] sm:$0xff] }
 0x3e1   :  { %13233 = vst [vmem:[#allocation324_spill] sm:$0xff] %v10790_v41  ;;  %v4183_v6 = vunpack.c.l.b16 %v3585_v43  ;;  %v3590_v9 = vpack.c.bf16 %v10788_v42, %v10788_v42  ;;  %v2640_v18 = vmax.f32 %v2638_v40, %v2639_v44  ;;  %v2655_v29 = vrot.slane %v2654_v49, 2 }
 0x3e2   :  { %v4184_v45 = vunpack.c.l.b16 %v3586_v62  ;;  %v2645_v33 = vrot.slane %v2644_v53, 1  ;;  %v2651_v17 = vrot.slane %v2650_v16, 1  ;;  %v2661_v3 = vrot.slane %v2660_v0, 2 }
 0x3e3   :  { %v3584_v14 = vpack.c.bf16 %v10764_v60, %v10764_v60  ;;  %v4426_v31 = vsel %vm4279_vm0, %v4185_v54, %v4183_v6  ;;  %v3591_v36 = vpack.c.bf16 %v10790_v41, %v10790_v41  ;;  %v2656_v48 = vmax.f32 %v2654_v49, %v2655_v29  ;;  %v13366_v41 = vld [vmem:[#allocation35_spill] sm:$0xff] }
 0x3e4   :  { %v4433_v43 = vsel %vm4279_vm0, %v4186_v1, %v4184_v45  ;;  %v4187_v22 = vunpack.c.l.b16 %v3589_v38  ;;  %v2646_v55 = vmax.f32 %v2644_v53, %v2645_v33  ;;  %v2662_v4 = vmax.f32 %v2660_v0, %v2661_v3 }
 0x3e5   :  { %v4188_v40 = vunpack.c.l.b16 %v3590_v9  ;;  %v10802_v44 = vmax.f32 %v2640_v18, 0.0  ;;  %v2652_v62 = vmax.f32 %v2650_v16, %v2651_v17  ;;  %v2657_v35 = vrot.slane %v2656_v48, 1 }
 0x3e6   :  { %v10804_v52 = vmax.f32 %v2646_v55, 0.0  ;;  %v2663_v39 = vrot.slane %v2662_v4, 1  ;;  %v4407_v54 = vsel %vm4283_vm2, %v10300_v34, %v10292_v56  ;;  %v4421_v49 = vsel %vm4283_vm2, %v10708_v8, %v10700_v25 }
 0x3e7   :  { %13234 = vst [vmem:[#allocation325_spill] sm:$0xff] %v10802_v44  ;;  %v10812_v45 = vunpack.c.l.b16 %v3591_v36  ;;  %v2658_v33 = vmax.f32 %v2656_v48, %v2657_v35  ;;  %v4408_v1 = vsel %vm4285_vm3, %v10430_v7, %v4407_v54  ;;  %v4422_v17 = vsel %vm4285_vm3, %v10728_v47, %v4421_v49 }
 0x3e8   :  { %13235 = vst [vmem:[#allocation326_spill] sm:$0xff] %v10804_v52  ;;  %v2664_v38 = vmax.f32 %v2662_v4, %v2663_v39  ;;  %v13236_v53 = vpack.c.bf16 %v10518_v5, %v10518_v5  ;;  %v4182_v0 = vunpack.c.l.b16 %v3584_v14  ;;  %v4409_v56 = vsel %vm4287_vm4, %v10450_v28, %v4408_v1  ;;  %v13242_v14 = vld [vmem:[#allocation203_spill] sm:$0xff] }
 0x3e9   :  { %v3592_v34 = vpack.c.bf16 %v10802_v44, %v10802_v44  ;;  %v10825_v25 = vmax.f32 %v2652_v62, 0.0  ;;  %v4410_v7 = vsel %vm4289_vm5, %v10526_v12, %v4409_v56  ;;  %v13238_v8 = vpack.c.bf16 %v10512_v24, %v10512_v24 }
 0x3ea   :  { %v4166_v16 = vunpack.c.l.b16 %v13236_v53  ;;  %v3593_v6 = vpack.c.bf16 %v10804_v52, %v10804_v52  ;;  %v10834_v9 = vmax.f32 %v2658_v33, 0.0  ;;  %v10836_v18 = vmax.f32 %v2664_v38, 0.0  ;;  %v13364_v52 = vld [vmem:[#allocation23_spill] sm:$0xff] }
 0x3eb   :  { %13237 = vst [vmem:[#allocation327_spill] sm:$0xff] %v10825_v25  ;;  %v4165_v47 = vunpack.c.l.b16 %v13238_v8  ;;  %v4423_v28 = vsel %vm4287_vm4, %v10748_v11, %v4422_v17  ;;  %v13241_v12 = vpack.c.bf16 %v10750_v59, %v10750_v59  ;;  %v4400_v36 = vsel %vm4283_vm2, %v10294_v21, %v13242_v14 }
 0x3ec   :  { %13239 = vst [vmem:[#allocation328_spill] sm:$0xff] %v10834_v9  ;;  %13240 = vst [vmem:[#allocation329_spill] sm:$0xff] %v10836_v18  ;;  %v4424_v29 = vsel %vm4289_vm5, %v10754_v63, %v4423_v28  ;;  %v4414_v48 = vsel %vm4283_vm2, %v10694_v13, %v10692_v50  ;;  %v4411_v55 = vsel %vm4291_vm6, %v4166_v16, %v4410_v7  ;;  %v4190_v17 = vunpack.c.l.b16 %v3592_v34 }
 0x3ed   :  { %v4181_v3 = vunpack.c.l.b16 %v13241_v12  ;;  %v4425_v4 = vsel %vm4291_vm6, %v4182_v0, %v4424_v29  ;;  %v4401_v11 = vsel %vm4285_vm3, %v10383_v51, %v4400_v36  ;;  %v4415_v63 = vsel %vm4285_vm3, %v10726_v20, %v4414_v48  ;;  %v13246_v12 = vld [vmem:[#allocation184_spill] sm:$0xff] }
 0x3ee   :  { %v3594_v62 = vpack.c.bf16 %v10825_v25, %v10825_v25  ;;  %v10859_v35 = vpack.c.b16 %v4425_v4, %v4411_v55  ;;  %v4402_v21 = vsel %vm4287_vm4, %v10434_v37, %v4401_v11  ;;  %v4416_v50 = vsel %vm4287_vm4, %v10734_v2, %v4415_v63  ;;  %v13247_v48 = vld [vmem:[#allocation116_spill] sm:$0xff] }
 0x3ef   :  { %v3596_v13 = vpack.c.bf16 %v10836_v18, %v10836_v18  ;;  %v4403_v51 = vsel %vm4289_vm5, %v10522_v58, %v4402_v21  ;;  %v4417_v20 = vsel %vm4289_vm5, %v10752_v15, %v4416_v50  ;;  %v1549_v39 = vadd.f32 %v10535_v30, %v10438_v46  ;;  %v7712_v18 = vld [vmem:[#allocation10 + $0x90] ss:$8 sps:$4 sm:$0xff]  }
 0x3f0   :  { %4934 = vmatprep.mubr.bf16.mxu1 %v10859_v35  ;;  %v4404_v54 = vsel %vm4291_vm6, %v4165_v47, %v4403_v51  ;;  %v4418_v37 = vsel %vm4291_vm6, %v4181_v3, %v4417_v20  ;;  %v1550_v2 = vadd.f32 %v10543_v10, %v10468_v27  ;;  %v1551_v49 = vadd.f32 %v10535_v30, %v10474_v61  ;;  %v13249_v51 = vld [vmem:[#allocation132_spill] sm:$0xff] }
 0x3f1   :  { %v3595_v58 = vpack.c.bf16 %v10834_v9, %v10834_v9  ;;  %v10882_v33 = vpack.c.b16 %v4418_v37, %v4404_v54  ;;  %v2665_v15 = vrot.slane %v1549_v39, 4  ;;  %v1552_v46 = vadd.f32 %v10543_v10, %v10478_v26  ;;  %v13243_v26 = vld [vmem:[#allocation135_spill] sm:$0xff] }
 0x3f2   :  { %v4427_v1 = vsel %vm4281_vm1, %v4187_v22, %v4426_v31  ;;  %v2671_v38 = vrot.slane %v1550_v2, 4  ;;  %v2677_v53 = vrot.slane %v1551_v49, 4  ;;  %v4434_v16 = vsel %vm4281_vm1, %v4188_v40, %v4433_v43  ;;  %v13245_v40 = vld [vmem:[#allocation178_spill] sm:$0xff] }
 0x3f3   :  { %v4192_v27 = vunpack.c.l.b16 %v3594_v62  ;;  %4935 = vmatmul.mubr.bf16.gmra.mrb[96].mxu1 %v10882_v33  ;;  %v2666_v61 = vmax.f32 %v1549_v39, %v2665_v15  ;;  %v2683_v30 = vrot.slane %v1552_v46, 4  ;;  %v4191_v0 = vunpack.c.l.b16 %v3593_v6  ;;  %v13248_v62 = vld [vmem:[#allocation194_spill] sm:$0xff]  ;;  %v13250_v39 = vld [vmem:[#allocation196_spill] sm:$0xff] }
 0x3f4   :  { %v4194_v56 = vunpack.c.l.b16 %v3596_v13  ;;  %v2672_v7 = vmax.f32 %v1550_v2, %v2671_v38  ;;  %v2678_v8 = vmax.f32 %v1551_v49, %v2677_v53  ;;  %v4193_v47 = vunpack.c.l.b16 %v3595_v58  ;;  %v13252_v53 = vld [vmem:[#allocation104_spill] sm:$0xff] }
 0x3f5   :  { %v2667_v28 = vrot.slane %v2666_v61, 2  ;;  %v2684_v29 = vmax.f32 %v1552_v46, %v2683_v30  ;;  %v13244_v10 = vpack.c.bf16 %v13243_v26, %v13243_v26  ;;  %v4435_v43 = vsel %vm4283_vm2, %v4190_v17, %v4434_v16  ;;  %v13253_v16 = vld [vmem:[#allocation179_spill] sm:$0xff] }
 0x3f6   :  { %v2673_v22 = vrot.slane %v2672_v7, 2  ;;  %v2679_v34 = vrot.slane %v2678_v8, 2  ;;  %v4449_v3 = vsel %vm4283_vm2, %v13246_v12, %v13245_v40  ;;  %v4436_v36 = vsel %vm4285_vm3, %v4192_v27, %v4435_v43  ;;  %v13261_v43 = vld [vmem:[#allocation195_spill] sm:$0xff]  ;;  %v13262_v40 = vld [vmem:[#allocation261_spill] sm:$0xff] }
 0x3f7   :  { %v4214_v31 = vunpack.c.l.b16 %v13244_v10  ;;  %v2668_v14 = vmax.f32 %v2666_v61, %v2667_v28  ;;  %v2685_v6 = vrot.slane %v2684_v29, 2  ;;  %v4450_v55 = vsel %vm4285_vm3, %v13247_v48, %v4449_v3  ;;  %v13256_v10 = vld [vmem:[#allocation193_spill] sm:$0xff]  ;;  %v13265_v48 = vld [vmem:[#allocation210_spill] sm:$0xff] }
 0x3f8   :  { %v2674_v4 = vmax.f32 %v2672_v7, %v2673_v22  ;;  %v2680_v11 = vmax.f32 %v2678_v8, %v2679_v34  ;;  %v4437_v63 = vsel %vm4287_vm4, %v4194_v56, %v4436_v36  ;;  %v4451_v21 = vsel %vm4287_vm4, %v13248_v62, %v4450_v55  ;;  %v13254_v7 = vld [vmem:[#allocation187_spill] sm:$0xff]  ;;  %v13266_v55 = vld [vmem:[#allocation212_spill] sm:$0xff] }
 0x3f9   :  { %v2669_v50 = vrot.slane %v2668_v14, 1  ;;  %v2686_v13 = vmax.f32 %v2684_v29, %v2685_v6  ;;  %v4452_v20 = vsel %vm4289_vm5, %v13249_v51, %v4451_v21  ;;  %v13251_v54 = vpack.c.bf16 %v13250_v39, %v13250_v39  ;;  %v13267_v21 = vld [vmem:[#allocation218_spill] sm:$0xff]  ;;  %v13269_v51 = vld [vmem:[#allocation235_spill] sm:$0xff] }
 0x3fa   :  { %v2675_v2 = vrot.slane %v2674_v4, 1  ;;  %v2681_v49 = vrot.slane %v2680_v11, 1  ;;  %v4453_v58 = vsel %vm4291_vm6, %v4214_v31, %v4452_v20  ;;  %v4428_v15 = vsel %vm4283_vm2, %v10812_v45, %v4427_v1  ;;  %v13257_v1 = vld [vmem:[#allocation223_spill] sm:$0xff] }
 0x3fb   :  { %v4213_v37 = vunpack.c.l.b16 %v13251_v54  ;;  %v2670_v46 = vmax.f32 %v2668_v14, %v2669_v50  ;;  %v2687_v17 = vrot.slane %v2686_v13, 1  ;;  %v4429_v38 = vsel %vm4285_vm3, %v4191_v0, %v4428_v15  ;;  %v13271_v15 = vld [vmem:[#allocation248_spill] sm:$0xff] }
 0x3fc   :  { %v4442_v27 = vsel %vm4283_vm2, %v13253_v16, %v13252_v53  ;;  %v2676_v61 = vmax.f32 %v2674_v4, %v2675_v2  ;;  %v2682_v30 = vmax.f32 %v2680_v11, %v2681_v49  ;;  %v4430_v56 = vsel %vm4287_vm4, %v4193_v47, %v4429_v38  ;;  %v13270_v2 = vld [vmem:[#allocation221_spill] sm:$0xff] }
 0x3fd   :  { %v4443_v8 = vsel %vm4285_vm3, %v13254_v7, %v4442_v27  ;;  %v10917_v28 = vmax.f32 %v2670_v46, 0.0  ;;  %v2688_v29 = vmax.f32 %v2686_v13, %v2687_v17  ;;  %v13258_v0 = vpack.c.bf16 %v13257_v1, %v13257_v1  ;;  %v13268_v13 = vld [vmem:[#allocation233_spill] sm:$0xff]  ;;  %v13273_v27 = vld [vmem:[#allocation252_spill] sm:$0xff]  ;;  %v13358_v1 = vld [vmem:[#allocation38_spill] sm:$0xff] }
 0x3fe   :  { %v4444_v45 = vsel %vm4287_vm4, %v13256_v10, %v4443_v8  ;;  %v10924_v22 = vmax.f32 %v2676_v61, 0.0  ;;  %v10926_v34 = vmax.f32 %v2682_v30, 0.0  ;;  %v13263_v12 = vpack.c.bf16 %v13262_v40, %v13262_v40  ;;  %v13272_v53 = vld [vmem:[#allocation161_spill] sm:$0xff] }
 0x3ff   :  { %13255 = vst [vmem:[#allocation203_spill] sm:$0xff] %v10917_v28  ;;  %v4230_v31 = vunpack.c.l.b16 %v13258_v0  ;;  %v4445_v47 = vsel %vm4289_vm5, %v13261_v43, %v4444_v45  ;;  %v3597_v14 = vpack.c.bf16 %v10917_v28, %v10917_v28  ;;  %v10935_v6 = vmax.f32 %v2688_v29, 0.0  ;;  %v13274_v29 = vld [vmem:[#allocation255_spill] sm:$0xff] }
 0x400   :  { %13259 = vst [vmem:[#allocation178_spill] sm:$0xff] %v10924_v22  ;;  %13260 = vst [vmem:[#allocation184_spill] sm:$0xff] %v10926_v34  ;;  %v4246_v3 = vunpack.c.l.b16 %v13263_v12  ;;  %v4446_v36 = vsel %vm4291_vm6, %v4213_v37, %v4445_v47  ;;  %v4463_v4 = vsel %vm4283_vm2, %v13266_v55, %v13265_v48  ;;  %v3598_v11 = vpack.c.bf16 %v10924_v22, %v10924_v22  ;;  %v13275_v47 = vld [vmem:[#allocation219_spill] sm:$0xff] }
 0x401   :  { %13264 = vst [vmem:[#allocation116_spill] sm:$0xff] %v10935_v6  ;;  %v3599_v62 = vpack.c.bf16 %v10926_v34, %v10926_v34  ;;  %v4464_v50 = vsel %vm4285_vm3, %v13267_v21, %v4463_v4  ;;  %v4477_v20 = vsel %vm4283_vm2, %v13269_v51, %v13268_v13  ;;  %v4195_v54 = vunpack.c.l.b16 %v3597_v14  ;;  %v13280_v21 = vld [vmem:[#allocation207_spill] sm:$0xff]  ;;  %v13282_v13 = vld [vmem:[#allocation234_spill] sm:$0xff] }
 0x402   :  { %v3600_v37 = vpack.c.bf16 %v10935_v6, %v10935_v6  ;;  %v4465_v49 = vsel %vm4287_vm4, %v13270_v2, %v4464_v50  ;;  %v4478_v46 = vsel %vm4285_vm3, %v13271_v15, %v4477_v20  ;;  %v4196_v17 = vunpack.c.l.b16 %v3598_v11  ;;  %v13281_v50 = vld [vmem:[#allocation231_spill] sm:$0xff]  ;;  %v13285_v2 = vld [vmem:[#allocation236_spill] sm:$0xff] }
 0x403   :  { %v4197_v38 = vunpack.c.l.b16 %v3599_v62  ;;  %v4466_v16 = vsel %vm4289_vm5, %v13272_v53, %v4465_v49  ;;  %v4479_v61 = vsel %vm4287_vm4, %v13273_v27, %v4478_v46  ;;  %v4431_v7 = vsel %vm4289_vm5, %v4195_v54, %v4430_v56  ;;  %v13284_v54 = vld [vmem:[#allocation216_spill] sm:$0xff]  ;;  %v13287_v46 = vld [vmem:[#allocation299_spill] sm:$0xff] }
 0x404   :  { %v4198_v30 = vunpack.c.l.b16 %v3600_v37  ;;  %v4467_v8 = vsel %vm4291_vm6, %v4230_v31, %v4466_v16  ;;  %v4480_v10 = vsel %vm4289_vm5, %v13274_v29, %v4479_v61  ;;  %v4438_v45 = vsel %vm4289_vm5, %v4196_v17, %v4437_v63  ;;  %v13277_v31 = vld [vmem:[#allocation250_spill] sm:$0xff]  ;;  %v13279_v63 = vld [vmem:[#allocation208_spill] sm:$0xff]  ;;  %v13289_v16 = vld [vmem:[#allocation251_spill] sm:$0xff] }
 0x405   :  { %v4432_v0 = vsel %vm4291_vm6, %v4197_v38, %v4431_v7  ;;  %v4481_v43 = vsel %vm4291_vm6, %v4246_v3, %v4480_v10  ;;  %v13276_v12 = vpack.c.bf16 %v13275_v47, %v13275_v47  ;;  %v13278_v4 = vpack.c.bf16 %v13277_v31, %v13277_v31  ;;  %v13288_v38 = vld [vmem:[#allocation220_spill] sm:$0xff]  ;;  %v13290_v61 = vld [vmem:[#allocation133_spill] sm:$0xff]  ;;  %v13291_v7 = vld [vmem:[#allocation310_spill] sm:$0xff] }
 0x406   :  { %v4439_v48 = vsel %vm4291_vm6, %v4198_v30, %v4438_v45  ;;  %v10971_v55 = vpack.c.b16 %v4446_v36, %v4432_v0  ;;  %v10973_v56 = vpack.c.b16 %v4481_v43, %v4467_v8  ;;  %v4456_v3 = vsel %vm4283_vm2, %v13280_v21, %v13279_v63  ;;  %v13292_v8 = vld [vmem:[#allocation311_spill] sm:$0xff]  ;;  %v13293_v10 = vld [vmem:[#allocation222_spill] sm:$0xff]  ;;  %v13294_v45 = vld [vmem:[#allocation253_spill] sm:$0xff] }
 0x407   :  { %v4229_v14 = vunpack.c.l.b16 %v13276_v12  ;;  %v4245_v11 = vunpack.c.l.b16 %v13278_v4  ;;  %v10978_v62 = vpack.c.b16 %v4453_v58, %v4439_v48  ;;  %v4470_v51 = vsel %vm4283_vm2, %v13282_v13, %v13281_v50  ;;  %v13295_v43 = vld [vmem:[#allocation103_spill] sm:$0xff]  ;;  %v13296_v48 = vld [vmem:[#allocation273_spill] sm:$0xff]  ;;  %v13299_v50 = vld [vmem:[#allocation276_spill] sm:$0xff] }
 0x408   :  { %v13283_v36 = vpack.c.bf16 %v10496_v23, %v10496_v23  ;;  %v4457_v37 = vsel %vm4285_vm3, %v13284_v54, %v4456_v3  ;;  %v4471_v49 = vsel %vm4285_vm3, %v13285_v2, %v4470_v51  ;;  %v13286_v58 = vpack.c.bf16 %v10668_v32, %v10668_v32  ;;  %v13297_v63 = vld [vmem:[#allocation175_spill] sm:$0xff]  ;;  %v13350_v32 = vld [vmem:[#allocation26_spill] sm:$0xff] }
 0x409   :  { %v4491_v17 = vsel %vm4283_vm2, %v13287_v46, %v10306_v19  ;;  %4944 = vmatprep.mubr.bf16.mxu1 %v10978_v62  ;;  %v4458_v53 = vsel %vm4287_vm4, %v13288_v38, %v4457_v37  ;;  %v4472_v27 = vsel %vm4287_vm4, %v13289_v16, %v4471_v49  ;;  %v4505_v29 = vsel %vm4283_vm2, %v13292_v8, %v13291_v7  ;;  %v13302_v37 = vld [vmem:[#allocation280_spill] sm:$0xff]  ;;  %v13303_v49 = vld [vmem:[#allocation247_spill] sm:$0xff]  ;;  %v13304_v46 = vld [vmem:[#allocation278_spill] sm:$0xff] }
 0x40a   :  { %v4262_v20 = vunpack.c.l.b16 %v13283_v36  ;;  %v4278_v15 = vunpack.c.l.b16 %v13286_v58  ;;  %v4492_v30 = vsel %vm4285_vm3, %v13290_v61, %v4491_v17  ;;  %4945 = vmatmul.mubr.bf16.gmra.mrb[100].mxu1 %v10971_v55  ;;  %v4459_v19 = vsel %vm4289_vm5, %v13293_v10, %v4458_v53  ;;  %v13301_v36 = vld [vmem:[#allocation239_spill] sm:$0xff]  ;;  %v13306_v53 = vld [vmem:[#allocation288_spill] sm:$0xff]  ;;  %v13308_v8 = vld [vmem:[#allocation153_spill] sm:$0xff] }
 0x40b   :  { %v4473_v0 = vsel %vm4289_vm5, %v13294_v45, %v4472_v27  ;;  %v4493_v12 = vsel %vm4287_vm4, %v13295_v43, %v4492_v30  ;;  %v4506_v4 = vsel %vm4285_vm3, %v13296_v48, %v4505_v29  ;;  %v13298_v21 = vpack.c.bf16 %v13297_v63, %v13297_v63  ;;  %4954 = vmatprep.mubr.bf16.mxu1 %v10973_v56  ;;  %v13307_v27 = vld [vmem:[#allocation281_spill] sm:$0xff]  ;;  %v13309_v29 = vld [vmem:[#allocation298_spill] sm:$0xff]  ;;  %v13310_v45 = vld [vmem:[#allocation264_spill] sm:$0xff] }
 0x40c   :  { %v13300_v13 = vpack.c.bf16 %v13299_v50, %v13299_v50  ;;  %v4494_v54 = vsel %vm4289_vm5, %v13301_v36, %v4493_v12  ;;  %v4507_v2 = vsel %vm4287_vm4, %v13302_v37, %v4506_v4  ;;  %v3663_v58 = vpack.c.bf16 %v13303_v49, %v13303_v49  ;;  %v13311_v43 = vld [vmem:[#allocation269_spill] sm:$0xff] }
 0x40d   :  { %v4259_v3 = vunpack.c.l.b16 %v13298_v21  ;;  %v13305_v17 = vpack.c.bf16 %v13304_v46, %v13304_v46  ;;  %v3679_v16 = vpack.c.bf16 %v13306_v53, %v13306_v53  ;;  %v4508_v61 = vsel %vm4289_vm5, %v13307_v27, %v4507_v2  ;;  %v13312_v21 = vld [vmem:[#allocation301_spill] sm:$0xff] }
 0x40e   :  { %v4273_v51 = vunpack.c.l.b16 %v13300_v13  ;;  %v4460_v30 = vsel %vm4291_vm6, %v4229_v14, %v4459_v19  ;;  %v4474_v7 = vsel %vm4291_vm6, %v4245_v11, %v4473_v0  ;;  %v4484_v10 = vsel %vm4283_vm2, %v13309_v29, %v13308_v8  ;;  %v13313_v36 = vld [vmem:[#allocation313_spill] sm:$0xff]  ;;  %v13314_v19 = vld [vmem:[#allocation211_spill] sm:$0xff]  ;;  %v13315_v29 = vld [vmem:[#allocation54_spill] sm:$0xff] }
 0x40f   :  { %v4275_v38 = vunpack.c.l.b16 %v13305_v17  ;;  %v4498_v12 = vsel %vm4283_vm2, %v13311_v43, %v13310_v45  ;;  %v4495_v48 = vsel %vm4291_vm6, %v4262_v20, %v4494_v54  ;;  %v4509_v4 = vsel %vm4291_vm6, %v4278_v15, %v4508_v61  ;;  %v11075_v43 = vld [vmem:[%s12317_s4] sm:$0xf]  ;;  %v13347_v50 = vld [vmem:[#allocation33_spill] sm:$0xff] }
 0x410   :  { %v4485_v13 = vsel %vm4285_vm3, %v13312_v21, %v4484_v10  ;;  %v4499_v14 = vsel %vm4285_vm3, %v13313_v36, %v4498_v12  ;;  %v4522_v37 = vpack.c.b16 %v4474_v7, %v4460_v30  ;;  %v4525_v2 = vpack.c.b16 %v4509_v4, %v4495_v48  ;;  %v13320_v30 = vld [vmem:[#allocation82_spill] sm:$0xff]  ;;  %v13321_v7 = vld [vmem:[#allocation189_spill] sm:$0xff]  ;;  %v13324_v36 = vld [vmem:[#allocation271_spill] sm:$0xff] }
 0x411   :  { %v4486_v11 = vsel %vm4287_vm4, %v13314_v19, %v4485_v13  ;;  %v4500_v0 = vsel %vm4287_vm4, %v4273_v51, %v4499_v14  ;;  %v4261_v17 = vunpack.c.l.b16 %v3663_v58  ;;  %v4277_v27 = vunpack.c.l.b16 %v3679_v16  ;;  %v13316_v51 = vld [vmem:[#allocation55_spill] sm:$0xff]  ;;  %v13317_v58 = vld [vmem:[#allocation62_spill] sm:$0xff] }
 0x412   :  { %4955 = vmatmul.mubr.bf16.gmra.mrb[104].mxu1 %v4522_v37  ;;  %v4487_v20 = vsel %vm4289_vm5, %v4259_v3, %v4486_v11  ;;  %v4501_v15 = vsel %vm4289_vm5, %v4275_v38, %v4500_v0  ;;  %v13318_v16 = vld [vmem:[#allocation71_spill] sm:$0xff]  ;;  %v13319_v3 = vld [vmem:[#allocation198_spill] sm:$0xff]  ;;  %v3747_v38 = vlaneseq }
 0x413   :  { %4964 = vmatprep.mubr.bf16.mxu1 %v4525_v2  ;;  %v4488_v54 = vsel %vm4291_vm6, %v4261_v17, %v4487_v20  ;;  %v4502_v61 = vsel %vm4291_vm6, %v4277_v27, %v4501_v15  ;;  %v13323_v12 = vld [vmem:[#allocation134_spill] sm:$0xff]  ;;  %v13326_v27 = vld [vmem:[#allocation277_spill] sm:$0xff] }
 0x414   :  { %v11059_v8 = vpack.c.b16 %v4502_v61, %v4488_v54  ;;  %v11069_v10 = vshrl.u32 %v3747_v38, 7  ;;  %v7687_v15 = vld [vmem:[#allocation10 + $0x4] ss:$8 sps:$4 sm:$0xff]  }
 0x415   :  { %v13327_v54 = vld [vmem:[#allocation16_spill] sm:$0xff]  ;;  %7100 = vmatprep.subr.bf16.mxu1 %v7687_v15 }
 0x416   :  { %13322 = vst [vmem:[#allocation194_spill] sm:$0xff] %v11069_v10  ;;  %v12583_v45 = vsub.s32 0, %v11069_v10  ;;  %v12582_v11 = vsub.s32 1, %v11069_v10  ;;  %v13336_v15 = vld [vmem:[#allocation308_spill] sm:$0xff] }
 0x418   :  { %v11082_v48 = vrot.slane %v11075_v43, %v12583_v45  ;;  %v11103_v17 = vrot.slane %v11075_v43, %v12582_v11 }
 0x41a   :  { %4965 = vmatmul.mubr.bf16.gmra.mrb[108].mxu1 %v11059_v8  ;;  %v4897_v14 = vadd.f32 %v13324_v36, %v11082_v48  ;;  %v4901_v20 = vadd.f32 %v13326_v27, %v11082_v48  ;;  %v13335_v27 = vld [vmem:[#allocation306_spill] sm:$0xff] }
 0x41b   :  { %5007 = vmatprep.mubr.bf16.mxu1 %v13315_v29  ;;  %v13328_v29 = vld [vmem:[#allocation274_spill] sm:$0xff] }
 0x422   :  { %5008 = vmatmul.mubr.bf16.vlgmr.msra.gmra.mrb[112].mxu1 %v13316_v51  ;;  %v4899_v51 = vadd.f32 %v13328_v29, %v11103_v17 }
 0x423   :  { %5017 = vmatprep.mubr.bf16.mxu1 %v13317_v58  ;;  %v11113_v58 = vmax.f32 %v4901_v20, 0.0  ;;  %v4911_v20 = vadd.f32 %v13335_v27, %v11082_v48  ;;  %v13341_v27 = vld [vmem:[#allocation22_spill] sm:$0xff] }
 0x424   :  { %v11121_v36 = vmax.f32 %v4899_v51, 0.0 }
 0x425   :  { %13329 = vst [vmem:[#allocation104_spill] sm:$0xff] %v11113_v58  ;;  %v5360_v53 = vrot.slane %v11113_v58, 2  ;;  %v11150_v46 = vmax.f32 %v4911_v20, 0.0  ;;  %v5368_v40 = vrot.slane %v11113_v58, 6  ;;  %v5370_v34 = vrot.slane %v11113_v58, 7 }
 0x426   :  { %13333 = vst [vmem:[#allocation179_spill] sm:$0xff] %v11121_v36 }
 0x427   :  { %13345 = vst [vmem:[#allocation210_spill] sm:$0xff] %v11150_v46 }
 0x42a   :  { %5018 = vmatmul.mubr.bf16.gmra.mrb[116].mxu1 %v13318_v16  ;;  %v13330_v16 = vld [vmem:[#allocation279_spill] sm:$0xff] }
 0x42b   :  { %5027 = vmatprep.mubr.bf16.mxu1 %v13319_v3  ;;  %v13331_v3 = vld [vmem:[#allocation243_spill] sm:$0xff] }
 0x42c   :  { %v4907_v38 = vadd.f32 %v13331_v3, %v11082_v48 }
 0x432   :  { %5028 = vmatmul.mubr.bf16.gmra.mrb[120].mxu1 %v13320_v30 }
 0x433   :  { %5037 = vmatprep.mubr.bf16.mxu1 %v13321_v7 }
 0x43a   :  { %5038 = vmatmul.mubr.bf16.gmra.mrb[124].mxu1 %v13323_v12 }
 0x43b   :  { %5047 = vmatprep.mubr.bf16.mxu1 %v10859_v35  ;;  %v11096_v35 = vmax.f32 %v4897_v14, 0.0  ;;  %v13334_v14 = vld [vmem:[#allocation304_spill] sm:$0xff] }
 0x43d   :  { %13325 = vst [vmem:[#allocation132_spill] sm:$0xff] %v11096_v35  ;;  %v5344_v0 = vrot.slane %v11096_v35, 1  ;;  %v5348_v7 = vrot.slane %v11096_v35, 3  ;;  %v5350_v51 = vrot.slane %v11096_v35, 4 }
 0x43e   :  { %v11084_v4 = vpop.f32.mrb[92].mxu1 }
 0x43f   :  { %v11086_v21 = vpop.f32.mrb[93].mxu1  ;;  %v5826_v61 = vsub.f32 %v13327_v54, %v5344_v0  ;;  %v4909_v0 = vadd.f32 %v13334_v14, %v11103_v17  ;;  %v4913_v54 = vadd.f32 %v13336_v15, %v11103_v17  ;;  %v5352_v14 = vrot.slane %v11096_v35, 5 }
 0x440   :  { %v11088_v13 = vpop.f32.mrb[94].mxu1  ;;  %v5830_v15 = vsub.f32 %v13341_v27, %v5348_v7  ;;  %v13349_v27 = vld [vmem:[#allocation24_spill] sm:$0xff] }
 0x441   :  { %v11092_v19 = vpop.f32.mrb[95].mxu1  ;;  %v6336_v12 = vrot.slane %v5826_v61, 7  ;;  %v11134_v61 = vmax.f32 %v4907_v38, 0.0  ;;  %v5354_v38 = vrot.slane %v11096_v35, 6  ;;  %v5834_v20 = vsub.f32 %v13350_v32, %v5352_v14  ;;  %v13353_v14 = vld [vmem:[#allocation19_spill] sm:$0xff] }
 0x442   :  { %5048 = vmatmul.mubr.bf16.gmra.mrb[128].mxu1 %v10882_v33  ;;  %v5346_v33 = vrot.slane %v11096_v35, 2  ;;  %v6340_v23 = vrot.slane %v5830_v15, 5 }
 0x443   :  { %5057 = vmatprep.mubr.bf16.mxu1 %v10978_v62  ;;  %v7685_v62 = vld [vmem:[#allocation10] ss:$8 sps:$4 sm:$0xff]   ;;  %13339 = vst [vmem:[#allocation193_spill] sm:$0xff] %v11134_v61 }
 0x444   :  { %7101 = vmatpush1.bf16.msra.mxu1 %v7685_v62  ;;  %v13337_v62 = vld [vmem:[#allocation17_spill] sm:$0xff] }
 0x445   :  { %v5824_v29 = vsub.f32 %v13337_v62, %v11096_v35  ;;  %v13342_v62 = vld [vmem:[#allocation317_spill] sm:$0xff] }
 0x446   :  { %v4919_v11 = vadd.f32 %v13342_v62, %v11103_v17  ;;  %v5832_v62 = vsub.f32 %v13349_v27, %v5350_v51  ;;  %v13352_v51 = vld [vmem:[#allocation36_spill] sm:$0xff] }
 0x44a   :  { %5058 = vmatmul.mubr.bf16.gmra.mrb[132].mxu1 %v10971_v55  ;;  %v4903_v55 = vadd.f32 %v13330_v16, %v11103_v17 }
 0x44b   :  { %5067 = vmatprep.mubr.bf16.mxu1 %v10973_v56  ;;  %v13332_v56 = vld [vmem:[#allocation20_spill] sm:$0xff] }
 0x44c   :  { %v5828_v30 = vsub.f32 %v13332_v56, %v5346_v33  ;;  %v5358_v33 = vrot.slane %v11113_v58, 1  ;;  %v11132_v16 = vmax.f32 %v4903_v55, 0.0  ;;  %v13343_v55 = vld [vmem:[#allocation202_spill] sm:$0xff] }
 0x44d   :  { %v4921_v45 = vadd.f32 %v13343_v55, %v11082_v48  ;;  %v5345_v55 = vrot.slane %v11121_v36, 1 }
 0x44e   :  { %13338 = vst [vmem:[#allocation187_spill] sm:$0xff] %v11132_v16  ;;  %v6338_v3 = vrot.slane %v5828_v30, 6  ;;  %v11148_v30 = vmax.f32 %v4909_v0, 0.0  ;;  %v5842_v7 = vsub.f32 %v13347_v50, %v5358_v33  ;;  %v5356_v0 = vrot.slane %v11096_v35, 7  ;;  %v13351_v50 = vld [vmem:[#allocation28_spill] sm:$0xff] }
 0x44f   :  { %v11166_v31 = vmax.f32 %v4921_v45, 0.0  ;;  %v11170_v33 = vsub.f32 %v13351_v50, %v5354_v38  ;;  %v5359_v27 = vrot.slane %v11132_v16, 1  ;;  %v5362_v45 = vrot.slane %v11113_v58, 3 }
 0x450   :  { %13344 = vst [vmem:[#allocation195_spill] sm:$0xff] %v11148_v30  ;;  %v5827_v15 = vsub.f32 %v13353_v14, %v5345_v55  ;;  %v6344_v38 = vrot.slane %v5834_v20, 3  ;;  %v5366_v50 = vrot.slane %v11113_v58, 5  ;;  %v13356_v14 = vld [vmem:[#allocation21_spill] sm:$0xff] }
 0x451   :  { %v5846_v39 = vsub.f32 %v13358_v1, %v5362_v45  ;;  %v13362_v45 = vld [vmem:[#allocation37_spill] sm:$0xff] }
 0x452   :  { %5068 = vmatmul.mubr.bf16.gmra.mrb[136].mxu1 %v4522_v37  ;;  %v13340_v37 = vld [vmem:[#allocation316_spill] sm:$0xff] }
 0x453   :  { %5077 = vmatprep.mubr.bf16.mxu1 %v4525_v2  ;;  %v4917_v56 = vadd.f32 %v13340_v37, %v11082_v48  ;;  %v6337_v2 = vsel %vm4279_vm0, %v6336_v12, %v5824_v29  ;;  %v11152_v37 = vmax.f32 %v4913_v54, 0.0  ;;  %v13348_v12 = vld [vmem:[#allocation319_spill] sm:$0xff]  ;;  %v11164_v54 = vmax.f32 %v4919_v11, 0.0 }
 0x454   :  { %v4923_v29 = vadd.f32 %v13348_v12, %v11103_v17  ;;  %v6339_v49 = vsel %vm4281_vm1, %v6338_v3, %v6337_v2  ;;  %v5844_v3 = vsub.f32 %v13352_v51, %v5360_v53  ;;  %v5347_v12 = vrot.slane %v11121_v36, 2 }
 0x455   :  { %13346 = vst [vmem:[#allocation212_spill] sm:$0xff] %v11152_v37  ;;  %v11160_v63 = vmax.f32 %v4917_v56, 0.0  ;;  %v6341_v2 = vsel %vm4283_vm2, %v6340_v23, %v6339_v49  ;;  %v6364_v56 = vrot.slane %v5842_v7, 7  ;;  %v6342_v11 = vrot.slane %v5832_v62, 4  ;;  %v13355_v23 = vld [vmem:[#allocation32_spill] sm:$0xff] }
 0x456   :  { %v11176_v32 = vmax.f32 %v4923_v29, 0.0  ;;  %v5364_v53 = vrot.slane %v11113_v58, 4  ;;  %v5840_v49 = vsub.f32 %v13355_v23, %v11113_v58  ;;  %v6366_v29 = vrot.slane %v5844_v3, 6 }
 0x457   :  { %v6343_v7 = vsel %vm4285_vm3, %v6342_v11, %v6341_v2  ;;  %v5361_v62 = vrot.slane %v11132_v16, 2  ;;  %v6346_v51 = vrot.slane %v11170_v33, 2  ;;  %v5349_v23 = vrot.slane %v11121_v36, 3  ;;  %v13359_v33 = vld [vmem:[#allocation40_spill] sm:$0xff] }
 0x458   :  { %v6365_v55 = vsel %vm4279_vm0, %v6364_v56, %v5840_v49  ;;  %v6350_v2 = vrot.slane %v5827_v15, 7  ;;  %v6345_v11 = vsel %vm4287_vm4, %v6344_v38, %v6343_v7  ;;  %v5848_v28 = vsub.f32 %v13359_v33, %v5364_v53  ;;  %v7688_v56 = vld [vmem:[#allocation10 + $0x10] ss:$8 sps:$4 sm:$0xff]   ;;  %v7690_v49 = vld [vmem:[#allocation10 + $0x14] ss:$8 sps:$4 sm:$0xff]   ;;  %v13363_v53 = vld [vmem:[#allocation44_spill] sm:$0xff] }
 0x459   :  { %v5845_v35 = vsub.f32 %v13362_v45, %v5361_v62  ;;  %v7693_v15 = vld [vmem:[#allocation10 + $0x24] ss:$8 sps:$4 sm:$0xff]   ;;  %v5351_v38 = vrot.slane %v11121_v36, 4  ;;  %v5363_v7 = vrot.slane %v11132_v16, 3  ;;  %7102 = vmatprep.subr.bf16.mxu1 %v7690_v49  ;;  %v5852_v33 = vsub.f32 %v13363_v53, %v5368_v40 }
 0x45a   :  { %5078 = vmatmul.mubr.bf16.gmra.mrb[140].mxu1 %v11059_v8  ;;  %v13354_v8 = vld [vmem:[#allocation30_spill] sm:$0xff]  ;;  %v6368_v9 = vrot.slane %v5846_v39, 5  ;;  %v6370_v62 = vrot.slane %v5848_v28, 4  ;;  %v5353_v45 = vrot.slane %v11121_v36, 5  ;;  %v5355_v39 = vrot.slane %v11121_v36, 6 }
 0x45b   :  { %v11181_v47 = vsub.f32 %v13354_v8, %v5356_v0  ;;  %v5829_v0 = vsub.f32 %v13356_v14, %v5347_v12  ;;  %v13357_v8 = vld [vmem:[#allocation34_spill] sm:$0xff]  ;;  %7103 = vmatpush1.bf16.msra.mxu1 %v7688_v56  ;;  %v6380_v40 = vrot.slane %v5845_v35, 6  ;;  %v13368_v56 = vld [vmem:[#allocation39_spill] sm:$0xff]  ;;  %v5369_v35 = vrot.slane %v11132_v16, 6 }
 0x45c   :  { %v5843_v20 = vsub.f32 %v13357_v8, %v5359_v27  ;;  %v13360_v12 = vld [vmem:[#allocation42_spill] sm:$0xff]  ;;  %v6367_v27 = vsel %vm4281_vm1, %v6366_v29, %v6365_v55  ;;  %v7691_v55 = vld [vmem:[#allocation10 + $0x20] ss:$8 sps:$4 sm:$0xff]   ;;  %7104 = vmatprep.subr.bf16.mxu1 %v7693_v15  ;;  %v5847_v49 = vsub.f32 %v13368_v56, %v5363_v7 }
 0x45d   :  { %v5850_v14 = vsub.f32 %v13360_v12, %v5366_v50  ;;  %v13361_v8 = vld [vmem:[#allocation18_spill] sm:$0xff]  ;;  %v6352_v3 = vrot.slane %v5829_v0, 6  ;;  %v5831_v50 = vsub.f32 %v13364_v52, %v5349_v23  ;;  %v5841_v0 = vsub.f32 %v13366_v41, %v11132_v16  ;;  %v13367_v23 = vld [vmem:[#allocation25_spill] sm:$0xff] }
 0x45e   :  { %v5825_v1 = vsub.f32 %v13361_v8, %v11121_v36  ;;  %v6378_v58 = vrot.slane %v5843_v20, 7  ;;  %v13365_v12 = vld [vmem:[#allocation46_spill] sm:$0xff]  ;;  %v6369_v20 = vsel %vm4283_vm2, %v6368_v9, %v6367_v27  ;;  %v5365_v52 = vrot.slane %v11132_v16, 4 }
 0x45f   :  { %v11211_v8 = vsub.f32 %v13365_v12, %v5370_v34  ;;  %v6372_v53 = vrot.slane %v5850_v14, 3  ;;  %v5367_v41 = vrot.slane %v11132_v16, 5  ;;  %v6354_v15 = vrot.slane %v5831_v50, 5  ;;  %7105 = vmatpush1.bf16.msra.mxu1 %v7691_v55  ;;  %v7694_v7 = vld [vmem:[#allocation10 + $0x30] ss:$8 sps:$4 sm:$0xff]   ;;  %v13371_v55 = vld [vmem:[#allocation29_spill] sm:$0xff] }
 0x460   :  { %v6351_v29 = vsel %vm4279_vm0, %v6350_v2, %v5825_v1  ;;  %v5833_v2 = vsub.f32 %v13367_v23, %v5351_v38  ;;  %v6379_v28 = vsel %vm4279_vm0, %v6378_v58, %v5841_v0  ;;  %v6347_v1 = vsel %vm4289_vm5, %v6346_v51, %v6345_v11  ;;  %v7696_v12 = vld [vmem:[#allocation10 + $0x34] ss:$8 sps:$4 sm:$0xff]   ;;  %v13370_v58 = vld [vmem:[#allocation41_spill] sm:$0xff] }
 0x461   :  { %v6353_v34 = vsel %vm4281_vm1, %v6352_v3, %v6351_v29  ;;  %v6371_v9 = vsel %vm4285_vm3, %v6370_v62, %v6369_v20  ;;  %v5357_v27 = vrot.slane %v11121_v36, 7  ;;  %v5373_v38 = vrot.slane %v11148_v30, 1  ;;  %v13369_v3 = vld [vmem:[#allocation27_spill] sm:$0xff]  ;;  %v7699_v14 = vld [vmem:[#allocation10 + $0x44] ss:$8 sps:$4 sm:$0xff]   ;;  %7106 = vmatprep.subr.bf16.mxu1 %v7696_v12 }
 0x462   :  { %v5835_v29 = vsub.f32 %v13369_v3, %v5353_v45  ;;  %v5849_v0 = vsub.f32 %v13370_v58, %v5365_v52  ;;  %v6355_v51 = vsel %vm4283_vm2, %v6354_v15, %v6353_v34  ;;  %v6381_v11 = vsel %vm4281_vm1, %v6380_v40, %v6379_v28  ;;  %v7697_v52 = vld [vmem:[#allocation10 + $0x40] ss:$8 sps:$4 sm:$0xff]   ;;  %v13373_v15 = vld [vmem:[#allocation51_spill] sm:$0xff] }
 0x463   :  { %v5371_v50 = vrot.slane %v11132_v16, 7  ;;  %v5837_v62 = vsub.f32 %v13371_v55, %v5355_v39  ;;  %v6356_v20 = vrot.slane %v5833_v2, 4  ;;  %v6382_v23 = vrot.slane %v5847_v49, 5  ;;  %7107 = vmatpush1.bf16.msra.mxu1 %v7694_v7  ;;  %v13374_v2 = vld [vmem:[#allocation31_spill] sm:$0xff]  ;;  %v13375_v12 = vld [vmem:[#allocation45_spill] sm:$0xff] }
 0x464   :  { %v6373_v56 = vsel %vm4287_vm4, %v6372_v53, %v6371_v9  ;;  %v6374_v36 = vrot.slane %v5852_v33, 2  ;;  %v5851_v26 = vsub.f32 %v13372_v57, %v5367_v41  ;;  %v5375_v45 = vrot.slane %v11148_v30, 2  ;;  %7108 = vmatprep.subr.bf16.mxu1 %v7699_v14  ;;  %v13376_v7 = vld [vmem:[#allocation49_spill] sm:$0xff] }
 0x465   :  { %v6357_v34 = vsel %vm4285_vm3, %v6356_v20, %v6355_v51  ;;  %v6383_v40 = vsel %vm4283_vm2, %v6382_v23, %v6381_v11  ;;  %v5387_v28 = vrot.slane %v11152_v37, 1  ;;  %v5859_v39 = vsub.f32 %v13373_v15, %v5373_v38  ;;  %v13377_v14 = vld [vmem:[#allocation53_spill] sm:$0xff]  ;;  %v7702_v20 = vld [vmem:[#allocation10 + $0x54] ss:$8 sps:$4 sm:$0xff]  }
 0x466   :  { %v5839_v49 = vsub.f32 %v13374_v2, %v5357_v27  ;;  %v5853_v53 = vsub.f32 %v13375_v12, %v5369_v35  ;;  %v6358_v33 = vrot.slane %v5835_v29, 3  ;;  %v6384_v9 = vrot.slane %v5849_v0, 4  ;;  %v13378_v0 = vld [vmem:[#allocation74_spill] sm:$0xff] }
 0x467   :  { %v6375_v57 = vsel %vm4289_vm5, %v6374_v36, %v6373_v56  ;;  %v6376_v41 = vrot.slane %v11211_v8, 1  ;;  %v11247_v3 = vsub.f32 %v13376_v7, %v5371_v50  ;;  %v6360_v58 = vrot.slane %v5837_v62, 2  ;;  %7109 = vmatpush1.bf16.msra.mxu1 %v7697_v52  ;;  %v7700_v8 = vld [vmem:[#allocation10 + $0x50] ss:$8 sps:$4 sm:$0xff]  }
 0x468   :  { %v6359_v51 = vsel %vm4287_vm4, %v6358_v33, %v6357_v34  ;;  %v6385_v11 = vsel %vm4285_vm3, %v6384_v9, %v6383_v40  ;;  %v5389_v38 = vrot.slane %v11152_v37, 2  ;;  %v5861_v27 = vsub.f32 %v13377_v14, %v5375_v45  ;;  %v7705_v45 = vld [vmem:[#allocation10 + $0x64] ss:$8 sps:$4 sm:$0xff]   ;;  %7110 = vmatprep.subr.bf16.mxu1 %v7702_v20 }
 0x469   :  { %v6386_v35 = vrot.slane %v5851_v26, 3  ;;  %v5377_v29 = vrot.slane %v11148_v30, 3  ;;  %v5875_v36 = vsub.f32 %v13378_v0, %v5387_v28  ;;  %v6406_v55 = vrot.slane %v5859_v39, 7  ;;  %v13382_v28 = vld [vmem:[#allocation48_spill] sm:$0xff]  ;;  %v13383_v39 = vld [vmem:[#allocation79_spill] sm:$0xff]  ;;  %v13384_v33 = vld [vmem:[#allocation57_spill] sm:$0xff] }
 0x46a   :  { %v13379_v50 = vrot.slane %v11181_v47, 1  ;;  %v11261_v23 = vsel %vm4291_vm6, %v6376_v41, %v6375_v57  ;;  %v6362_v56 = vrot.slane %v5839_v49, 1  ;;  %v6388_v34 = vrot.slane %v5853_v53, 2  ;;  %v7703_v49 = vld [vmem:[#allocation10 + $0x60] ss:$8 sps:$4 sm:$0xff]   ;;  %v13387_v0 = vld [vmem:[#allocation59_spill] sm:$0xff] }
 0x46b   :  { %13381 = vst [vmem:[#allocation233_spill] sm:$0xff] %v11261_v23  ;;  %v6361_v26 = vsel %vm4289_vm5, %v6360_v58, %v6359_v51  ;;  %v6387_v52 = vsel %vm4287_vm4, %v6386_v35, %v6385_v11  ;;  %v6390_v40 = vrot.slane %v11247_v3, 1  ;;  %v5857_v15 = vsub.f32 %v13382_v28, %v11148_v30  ;;  %7111 = vmatpush1.bf16.msra.mxu1 %v7700_v8  ;;  %v13386_v14 = vld [vmem:[#allocation69_spill] sm:$0xff]  ;;  %v13422_v23 = vld [vmem:[#allocation75_spill] sm:$0xff] }
 0x46c   :  { %v11258_v62 = vsel %vm4291_vm6, %v13379_v50, %v6347_v1  ;;  %v5379_v47 = vrot.slane %v11148_v30, 4  ;;  %v5381_v1 = vrot.slane %v11148_v30, 5  ;;  %v5877_v2 = vsub.f32 %v13383_v39, %v5389_v38  ;;  %7112 = vmatprep.subr.bf16.mxu1 %v7705_v45  ;;  %v13388_v20 = vld [vmem:[#allocation85_spill] sm:$0xff] }
 0x46d   :  { %13380 = vst [vmem:[#allocation218_spill] sm:$0xff] %v11258_v62  ;;  %v6408_v12 = vrot.slane %v5861_v27, 6  ;;  %v5391_v53 = vrot.slane %v11152_v37, 3  ;;  %v5863_v9 = vsub.f32 %v13384_v33, %v5377_v29  ;;  %v6407_v57 = vsel %vm4279_vm0, %v6406_v55, %v5857_v15  ;;  %v13390_v15 = vld [vmem:[#allocation66_spill] sm:$0xff]  ;;  %v13423_v62 = vld [vmem:[#allocation80_spill] sm:$0xff] }
 0x46e   :  { %v6434_v41 = vrot.slane %v5875_v36, 7  ;;  %v11275_v7 = vsel %vm4291_vm6, %v6362_v56, %v6361_v26  ;;  %v6389_v3 = vsel %vm4289_vm5, %v6388_v34, %v6387_v52  ;;  %v5383_v58 = vrot.slane %v11148_v30, 6  ;;  %v13389_v52 = vld [vmem:[#allocation61_spill] sm:$0xff] }
 0x46f   :  { %13385 = vst [vmem:[#allocation235_spill] sm:$0xff] %v11275_v7  ;;  %v5385_v51 = vrot.slane %v11148_v30, 7  ;;  %v5393_v11 = vrot.slane %v11152_v37, 4  ;;  %v5395_v38 = vrot.slane %v11152_v37, 5  ;;  %v5873_v27 = vsub.f32 %v13386_v14, %v11152_v37  ;;  %7113 = vmatpush1.bf16.msra.mxu1 %v7703_v49 }
 0x470   :  { %v5372_v35 = vrot.slane %v11134_v61, 1  ;;  %v5397_v29 = vrot.slane %v11152_v37, 6  ;;  %v5865_v36 = vsub.f32 %v13387_v0, %v5379_v47  ;;  %v6409_v55 = vsel %vm4281_vm1, %v6408_v12, %v6407_v57  ;;  %v13391_v47 = vld [vmem:[#allocation72_spill] sm:$0xff]  ;;  %v13392_v12 = vld [vmem:[#allocation90_spill] sm:$0xff] }
 0x471   :  { %v6436_v8 = vrot.slane %v5877_v2, 6  ;;  %v5879_v50 = vsub.f32 %v13388_v20, %v5391_v53  ;;  %v6410_v56 = vrot.slane %v5863_v9, 5  ;;  %v6435_v34 = vsel %vm4279_vm0, %v6434_v41, %v5873_v27  ;;  %v13393_v53 = vld [vmem:[#allocation50_spill] sm:$0xff] }
 0x472   :  { %v5386_v45 = vrot.slane %v11150_v46, 1  ;;  %v5399_v26 = vrot.slane %v11152_v37, 7  ;;  %v5867_v28 = vsub.f32 %v13389_v52, %v5381_v1  ;;  %v5869_v39 = vsub.f32 %v13390_v15, %v5383_v58  ;;  %v13394_v57 = vld [vmem:[#allocation98_spill] sm:$0xff] }
 0x473   :  { %v5374_v33 = vrot.slane %v11134_v61, 2  ;;  %v5871_v14 = vsub.f32 %v13391_v47, %v5385_v51  ;;  %v5881_v2 = vsub.f32 %v13392_v12, %v5393_v11  ;;  %v6411_v49 = vsel %vm4283_vm2, %v6410_v56, %v6409_v55  ;;  %v13396_v58 = vld [vmem:[#allocation114_spill] sm:$0xff]  ;;  %v13398_v11 = vld [vmem:[#allocation119_spill] sm:$0xff] }
 0x474   :  { %v5858_v9 = vsub.f32 %v13393_v53, %v5372_v35  ;;  %v5883_v41 = vsub.f32 %v13394_v57, %v5395_v38  ;;  %v6412_v27 = vrot.slane %v5865_v36, 4  ;;  %v6437_v0 = vsel %vm4281_vm1, %v6436_v8, %v6435_v34  ;;  %v13397_v51 = vld [vmem:[#allocation70_spill] sm:$0xff]  ;;  %v13399_v38 = vld [vmem:[#allocation52_spill] sm:$0xff] }
 0x475   :  { %v5388_v20 = vrot.slane %v11150_v46, 2  ;;  %v11303_v1 = vsel %vm4291_vm6, %v6390_v40, %v6389_v3  ;;  %v5885_v52 = vsub.f32 %v13396_v58, %v5397_v29  ;;  %v6438_v15 = vrot.slane %v5879_v50, 5  ;;  %v13400_v50 = vld [vmem:[#allocation78_spill] sm:$0xff] }
 0x476   :  { %13395 = vst [vmem:[#allocation221_spill] sm:$0xff] %v11303_v1  ;;  %v5874_v47 = vsub.f32 %v13397_v51, %v5386_v45  ;;  %v11308_v12 = vsub.f32 %v13398_v11, %v5399_v26  ;;  %v6413_v35 = vsel %vm4285_vm3, %v6412_v27, %v6411_v49  ;;  %v6414_v55 = vrot.slane %v5867_v28, 3  ;;  %v13401_v49 = vld [vmem:[#allocation47_spill] sm:$0xff] }
 0x477   :  { %v5860_v36 = vsub.f32 %v13399_v38, %v5374_v33  ;;  %v6416_v56 = vrot.slane %v5869_v39, 2  ;;  %v6439_v8 = vsel %vm4283_vm2, %v6438_v15, %v6437_v0  ;;  %v5376_v34 = vrot.slane %v11134_v61, 3  ;;  %v13404_v38 = vld [vmem:[#allocation84_spill] sm:$0xff] }
 0x478   :  { %v6392_v40 = vrot.slane %v5858_v9, 7  ;;  %v6418_v3 = vrot.slane %v5871_v14, 1  ;;  %v6440_v53 = vrot.slane %v5881_v2, 4  ;;  %v6442_v29 = vrot.slane %v5883_v41, 3  ;;  %v13402_v2 = vld [vmem:[#allocation56_spill] sm:$0xff]  ;;  %v13403_v41 = vld [vmem:[#allocation67_spill] sm:$0xff] }
 0x479   :  { %v5876_v57 = vsub.f32 %v13400_v50, %v5388_v20  ;;  %v6415_v45 = vsel %vm4287_vm4, %v6414_v55, %v6413_v35  ;;  %v5390_v26 = vrot.slane %v11150_v46, 3  ;;  %v5856_v28 = vsub.f32 %v13401_v49, %v11134_v61  ;;  %v7708_v14 = vld [vmem:[#allocation10 + $0x74] ss:$8 sps:$4 sm:$0xff]  }
 0x47a   :  { %v6420_v27 = vrot.slane %v5874_v47, 7  ;;  %v6441_v39 = vsel %vm4285_vm3, %v6440_v53, %v6439_v8  ;;  %v6444_v33 = vrot.slane %v5885_v52, 2  ;;  %v5378_v0 = vrot.slane %v11134_v61, 4  ;;  %v13405_v53 = vld [vmem:[#allocation58_spill] sm:$0xff]  ;;  %7114 = vmatprep.subr.bf16.mxu1 %v7708_v14  ;;  %v13428_v14 = vld [vmem:[#allocation137_spill] sm:$0xff] }
 0x47b   :  { %v6394_v58 = vrot.slane %v5860_v36, 6  ;;  %v5862_v9 = vsub.f32 %v13402_v2, %v5376_v34  ;;  %v5872_v20 = vsub.f32 %v13403_v41, %v11150_v46  ;;  %v6393_v15 = vsel %vm4279_vm0, %v6392_v40, %v5856_v28  ;;  %v13407_v28 = vld [vmem:[#allocation88_spill] sm:$0xff] }
 0x47c   :  { %v6417_v51 = vsel %vm4289_vm5, %v6416_v56, %v6415_v45  ;;  %v5380_v11 = vrot.slane %v11134_v61, 5  ;;  %v5392_v47 = vrot.slane %v11150_v46, 4  ;;  %v6422_v35 = vrot.slane %v5876_v57, 6 }
 0x47d   :  { %v6443_v52 = vsel %vm4287_vm4, %v6442_v29, %v6441_v39  ;;  %v5382_v55 = vrot.slane %v11134_v61, 6  ;;  %v5878_v36 = vsub.f32 %v13404_v38, %v5390_v26  ;;  %v6421_v8 = vsel %vm4279_vm0, %v6420_v27, %v5872_v20 }
 0x47e   :  { %v4927_v34 = vadd.f32 %v11084_v4, %v11082_v48  ;;  %v5384_v40 = vrot.slane %v11134_v61, 7  ;;  %v5864_v56 = vsub.f32 %v13405_v53, %v5378_v0  ;;  %v6395_v50 = vsel %vm4281_vm1, %v6394_v58, %v6393_v15  ;;  %v13408_v58 = vld [vmem:[#allocation60_spill] sm:$0xff]  ;;  %v13420_v61 = vld [vmem:[#allocation122_spill] sm:$0xff] }
 0x47f   :  { %v11339_v45 = vsel %vm4291_vm6, %v6418_v3, %v6417_v51  ;;  %v5394_v29 = vrot.slane %v11150_v46, 5  ;;  %v5396_v57 = vrot.slane %v11150_v46, 6  ;;  %v6396_v49 = vrot.slane %v5862_v9, 5  ;;  %v13409_v9 = vld [vmem:[#allocation64_spill] sm:$0xff] }
 0x480   :  { %13406 = vst [vmem:[#allocation248_spill] sm:$0xff] %v11339_v45  ;;  %v4929_v26 = vadd.f32 %v11086_v21, %v11103_v17  ;;  %v4933_v4 = vadd.f32 %v11092_v19, %v11103_v17  ;;  %v5880_v27 = vsub.f32 %v13407_v28, %v5392_v47  ;;  %v6423_v39 = vsel %vm4281_vm1, %v6422_v35, %v6421_v8  ;;  %v13410_v21 = vld [vmem:[#allocation68_spill] sm:$0xff]  ;;  %v13411_v35 = vld [vmem:[#allocation97_spill] sm:$0xff] }
 0x481   :  { %v5398_v0 = vrot.slane %v11150_v46, 7  ;;  %v5866_v3 = vsub.f32 %v13408_v58, %v5380_v11  ;;  %v6397_v2 = vsel %vm4283_vm2, %v6396_v49, %v6395_v50  ;;  %v6424_v41 = vrot.slane %v5878_v36, 5  ;;  %v13412_v8 = vld [vmem:[#allocation109_spill] sm:$0xff]  ;;  %v7706_v49 = vld [vmem:[#allocation10 + $0x70] ss:$8 sps:$4 sm:$0xff]   ;;  %v13421_v45 = vld [vmem:[#allocation124_spill] sm:$0xff] }
 0x482   :  { %v11353_v20 = vsel %vm4289_vm5, %v6444_v33, %v6443_v52  ;;  %v11356_v15 = vsub.f32 %v13409_v9, %v5382_v55  ;;  %v11359_v51 = vsub.f32 %v13410_v21, %v5384_v40  ;;  %v6398_v19 = vrot.slane %v5864_v56, 4  ;;  %v7711_v46 = vld [vmem:[#allocation10 + $0x84] ss:$8 sps:$4 sm:$0xff]   ;;  %7115 = vmatpush1.bf16.msra.mxu1 %v7706_v49  ;;  %v13429_v49 = vld [vmem:[#allocation139_spill] sm:$0xff] }
 0x483   :  { %v11361_v47 = vmax.f32 %v4927_v34, 0.0  ;;  %v5882_v38 = vsub.f32 %v13411_v35, %v5394_v29  ;;  %v11365_v53 = vsub.f32 %v13412_v8, %v5396_v57  ;;  %v6425_v11 = vsel %vm4283_vm2, %v6424_v41, %v6423_v39  ;;  %v13414_v34 = vld [vmem:[#allocation117_spill] sm:$0xff]  ;;  %7116 = vmatprep.subr.bf16.mxu1 %v7711_v46 }
 0x484   :  { %v11368_v36 = vmax.f32 %v4929_v26, 0.0  ;;  %v11372_v33 = vadd.f32 %v11088_v13, %v11082_v48  ;;  %v6399_v52 = vsel %vm4285_vm3, %v6398_v19, %v6397_v2  ;;  %v6426_v55 = vrot.slane %v5880_v27, 4  ;;  %v13415_v19 = vld [vmem:[#allocation107_spill] sm:$0xff] }
 0x485   :  { %v11375_v40 = vmax.f32 %v4933_v4, 0.0  ;;  %v11378_v56 = vsub.f32 %v13414_v34, %v5398_v0  ;;  %v6400_v50 = vrot.slane %v5866_v3, 3  ;;  %v5401_v29 = vrot.slane %v11164_v54, 1  ;;  %v13417_v4 = vld [vmem:[#allocation106_spill] sm:$0xff] }
 0x486   :  { %v6427_v26 = vsel %vm4285_vm3, %v6426_v55, %v6425_v11  ;;  %v5415_v13 = vrot.slane %v11176_v32, 1  ;;  %v6428_v27 = vrot.slane %v5882_v38, 3  ;;  %v5403_v39 = vrot.slane %v11164_v54, 2  ;;  %v13418_v38 = vld [vmem:[#allocation125_spill] sm:$0xff] }
 0x487   :  { %13413 = vst [vmem:[#allocation161_spill] sm:$0xff] %v11375_v40  ;;  %v11386_v28 = vsel %vm4287_vm4, %v6400_v50, %v6399_v52  ;;  %v5405_v0 = vrot.slane %v11164_v54, 3  ;;  %v5407_v58 = vrot.slane %v11164_v54, 4  ;;  %v5400_v3 = vrot.slane %v11160_v63, 1  ;;  %v13416_v52 = vld [vmem:[#allocation126_spill] sm:$0xff] }
 0x488   :  { %v5414_v2 = vrot.slane %v11166_v31, 1  ;;  %v11395_v41 = vsel %vm4287_vm4, %v6428_v27, %v6427_v26  ;;  %v5409_v9 = vrot.slane %v11164_v54, 5  ;;  %v5411_v21 = vrot.slane %v11164_v54, 6 }
 0x489   :  { %v5891_v35 = vsub.f32 %v13415_v19, %v5401_v29  ;;  %v5417_v8 = vrot.slane %v11176_v32, 2  ;;  %v5419_v11 = vrot.slane %v11176_v32, 3  ;;  %v5907_v55 = vsub.f32 %v13416_v52, %v5415_v13  ;;  %v13419_v13 = vld [vmem:[#allocation112_spill] sm:$0xff]  ;;  %v13424_v19 = vld [vmem:[#allocation138_spill] sm:$0xff] }
 0x48a   :  { %v5421_v34 = vrot.slane %v11176_v32, 4  ;;  %v5423_v50 = vrot.slane %v11176_v32, 5  ;;  %v5402_v26 = vrot.slane %v11160_v63, 2  ;;  %v5416_v27 = vrot.slane %v11166_v31, 2 }
 0x48b   :  { %v5425_v29 = vrot.slane %v11176_v32, 6  ;;  %v5890_v57 = vsub.f32 %v13417_v4, %v5400_v3  ;;  %v5906_v37 = vsub.f32 %v13418_v38, %v5414_v2  ;;  %v5889_v52 = vsub.f32 %v13419_v13, %v11164_v54  ;;  %v7709_v2 = vld [vmem:[#allocation10 + $0x80] ss:$8 sps:$4 sm:$0xff]   ;;  %v13425_v38 = vld [vmem:[#allocation94_spill] sm:$0xff] }
 0x48c   :  { %v5893_v30 = vsub.f32 %v13420_v61, %v5403_v39  ;;  %v5895_v16 = vsub.f32 %v13421_v45, %v5405_v0  ;;  %v6462_v1 = vrot.slane %v5891_v35, 7  ;;  %v11417_v7 = vsub.f32 %v13422_v23, %v5407_v58  ;;  %v13426_v61 = vld [vmem:[#allocation99_spill] sm:$0xff]  ;;  %v13427_v45 = vld [vmem:[#allocation121_spill] sm:$0xff]  ;;  %7117 = vmatpush1.bf16.msra.mxu1 %v7709_v2  ;;  %v13436_v2 = vld [vmem:[#allocation120_spill] sm:$0xff] }
 0x48d   :  { %v11420_v6 = vsub.f32 %v13423_v62, %v5409_v9  ;;  %v5909_v4 = vsub.f32 %v13424_v19, %v5417_v8  ;;  %v6490_v3 = vrot.slane %v5907_v55, 7  ;;  %v11424_v22 = vsub.f32 %v13425_v38, %v5411_v21  ;;  %v7714_v23 = vld [vmem:[#allocation10 + $0x94] ss:$8 sps:$4 sm:$0xff]  }
 0x48e   :  { %v5905_v39 = vsub.f32 %v13426_v61, %v11176_v32  ;;  %v5892_v0 = vsub.f32 %v13427_v45, %v5402_v26  ;;  %v5908_v35 = vsub.f32 %v13428_v14, %v5416_v27  ;;  %v5404_v62 = vrot.slane %v11160_v63, 3  ;;  %v13430_v19 = vld [vmem:[#allocation118_spill] sm:$0xff]  ;;  %v13431_v27 = vld [vmem:[#allocation111_spill] sm:$0xff]  ;;  %v13432_v45 = vld [vmem:[#allocation96_spill] sm:$0xff]  ;;  %7118 = vmatprep.subr.bf16.mxu1 %v7714_v23 }
 0x48f   :  { %v5418_v58 = vrot.slane %v11166_v31, 3  ;;  %v6448_v9 = vrot.slane %v5890_v57, 7  ;;  %v6476_v8 = vrot.slane %v5906_v37, 7  ;;  %v5911_v55 = vsub.f32 %v13429_v49, %v5419_v11 }
 0x490   :  { %v5913_v21 = vsub.f32 %v13430_v19, %v5421_v34  ;;  %v6463_v13 = vsel %vm4279_vm0, %v6462_v1, %v5889_v52  ;;  %v6464_v38 = vrot.slane %v5893_v30, 6  ;;  %v6491_v61 = vsel %vm4279_vm0, %v6490_v3, %v5905_v39  ;;  %v7717_v1 = vld [vmem:[#allocation10 + $0xa4] ss:$8 sps:$4 sm:$0xff]   ;;  %v13433_v30 = vld [vmem:[#allocation123_spill] sm:$0xff]  ;;  %v13435_v19 = vld [vmem:[#allocation146_spill] sm:$0xff]  ;;  %7119 = vmatpush1.bf16.msra.mxu1 %v7712_v18 }
 0x491   :  { %v6492_v26 = vrot.slane %v5909_v4, 6  ;;  %v5888_v46 = vsub.f32 %v13431_v27, %v11160_v63  ;;  %v5904_v14 = vsub.f32 %v13432_v45, %v11166_v31  ;;  %v5406_v37 = vrot.slane %v11160_v63, 4  ;;  %v13434_v3 = vld [vmem:[#allocation115_spill] sm:$0xff]  ;;  %7120 = vmatprep.subr.bf16.mxu1 %v7717_v1 }
 0x492   :  { %v5420_v57 = vrot.slane %v11166_v31, 4  ;;  %v6450_v11 = vrot.slane %v5892_v0, 6  ;;  %v6478_v34 = vrot.slane %v5908_v35, 6  ;;  %v5894_v52 = vsub.f32 %v13433_v30, %v5404_v62 }
 0x493   :  { %v5910_v4 = vsub.f32 %v13434_v3, %v5418_v58  ;;  %v6449_v39 = vsel %vm4279_vm0, %v6448_v9, %v5888_v46  ;;  %v6477_v49 = vsel %vm4279_vm0, %v6476_v8, %v5904_v14  ;;  %v5915_v27 = vsub.f32 %v13435_v19, %v5423_v50  ;;  %v7715_v58 = vld [vmem:[#allocation10 + $0xa0] ss:$8 sps:$4 sm:$0xff]   ;;  %v13438_v8 = vld [vmem:[#allocation63_spill] sm:$0xff] }
 0x494   :  { %v11448_v45 = vsub.f32 %v13436_v2, %v5425_v29  ;;  %v6466_v25 = vrot.slane %v5895_v16, 5  ;;  %v6494_v44 = vrot.slane %v5911_v55, 5  ;;  %v6465_v0 = vsel %vm4281_vm1, %v6464_v38, %v6463_v13  ;;  %v13437_v9 = vld [vmem:[#allocation73_spill] sm:$0xff]  ;;  %v7720_v16 = vld [vmem:[#allocation10 + $0xb4] ss:$8 sps:$4 sm:$0xff]   ;;  %7121 = vmatpush1.bf16.msra.mxu1 %v7715_v58 }
 0x495   :  { %v6493_v35 = vsel %vm4281_vm1, %v6492_v26, %v6491_v61  ;;  %v5408_v23 = vrot.slane %v11160_v63, 5  ;;  %v5422_v62 = vrot.slane %v11166_v31, 5  ;;  %v5896_v46 = vsub.f32 %v13437_v9, %v5406_v37  ;;  %7122 = vmatprep.subr.bf16.mxu1 %v7720_v16 }
 0x496   :  { %v5912_v14 = vsub.f32 %v13438_v8, %v5420_v57  ;;  %v6451_v50 = vsel %vm4281_vm1, %v6450_v11, %v6449_v39  ;;  %v6479_v29 = vsel %vm4281_vm1, %v6478_v34, %v6477_v49  ;;  %v6468_v55 = vrot.slane %v11417_v7, 4  ;;  %v13439_v57 = vld [vmem:[#allocation76_spill] sm:$0xff]  ;;  %v7718_v7 = vld [vmem:[#allocation10 + $0xb0] ss:$8 sps:$4 sm:$0xff]  }
 0x497   :  { %v6496_v13 = vrot.slane %v5913_v21, 4  ;;  %v6452_v38 = vrot.slane %v5894_v52, 5  ;;  %v6480_v61 = vrot.slane %v5910_v4, 5  ;;  %v6467_v26 = vsel %vm4283_vm2, %v6466_v25, %v6465_v0  ;;  %v13440_v11 = vld [vmem:[#allocation140_spill] sm:$0xff] }
 0x498   :  { %v6495_v18 = vsel %vm4283_vm2, %v6494_v44, %v6493_v35  ;;  %v5410_v30 = vrot.slane %v11160_v63, 6  ;;  %v5424_v37 = vrot.slane %v11166_v31, 6  ;;  %v5898_v3 = vsub.f32 %v13439_v57, %v5408_v23  ;;  %v7723_v44 = vld [vmem:[#allocation10 + $0xc4] ss:$8 sps:$4 sm:$0xff]   ;;  %7123 = vmatpush1.bf16.msra.mxu1 %v7718_v7 }
 0x499   :  { %v5914_v39 = vsub.f32 %v13440_v11, %v5422_v62  ;;  %v6453_v34 = vsel %vm4283_vm2, %v6452_v38, %v6451_v50  ;;  %v6481_v1 = vsel %vm4283_vm2, %v6480_v61, %v6479_v29  ;;  %v6470_v21 = vrot.slane %v11420_v6, 3  ;;  %v13441_v35 = vld [vmem:[#allocation92_spill] sm:$0xff]  ;;  %v13442_v62 = vld [vmem:[#allocation65_spill] sm:$0xff]  ;;  %7124 = vmatprep.subr.bf16.mxu1 %v7723_v44 }
 0x49a   :  { %v6498_v52 = vrot.slane %v5915_v27, 3  ;;  %v6454_v25 = vrot.slane %v5896_v46, 4  ;;  %v6482_v4 = vrot.slane %v5912_v14, 4  ;;  %v6469_v49 = vsel %vm4285_vm3, %v6468_v55, %v6467_v26  ;;  %v13444_v46 = vld [vmem:[#allocation131_spill] sm:$0xff]  ;;  %v13446_v50 = vld [vmem:[#allocation157_spill] sm:$0xff] }
 0x49b   :  { %v6497_v19 = vsel %vm4285_vm3, %v6496_v13, %v6495_v18  ;;  %v5412_v2 = vrot.slane %v11160_v63, 7  ;;  %v5426_v0 = vrot.slane %v11166_v31, 7  ;;  %v5900_v23 = vsub.f32 %v13441_v35, %v5410_v30  ;;  %v7721_v13 = vld [vmem:[#allocation10 + $0xc0] ss:$8 sps:$4 sm:$0xff]   ;;  %v7726_v30 = vld [vmem:[#allocation10 + $0xd4] ss:$8 sps:$4 sm:$0xff]  }
 0x49c   :  { %v5916_v58 = vsub.f32 %v13442_v62, %v5424_v37  ;;  %v6455_v9 = vsel %vm4285_vm3, %v6454_v25, %v6453_v34  ;;  %v6483_v6 = vsel %vm4285_vm3, %v6482_v4, %v6481_v1  ;;  %v13443_v27 = vrot.slane %v11164_v54, 7  ;;  %v13447_v37 = vld [vmem:[#allocation95_spill] sm:$0xff]  ;;  %v13448_v11 = vld [vmem:[#allocation81_spill] sm:$0xff]  ;;  %7125 = vmatpush1.bf16.msra.mxu1 %v7721_v13 }
 0x49d   :  { %v13445_v14 = vrot.slane %v11176_v32, 7  ;;  %v6456_v16 = vrot.slane %v5898_v3, 3  ;;  %v6484_v55 = vrot.slane %v5914_v39, 3  ;;  %v6471_v38 = vsel %vm4287_vm4, %v6470_v21, %v6469_v49  ;;  %7126 = vmatprep.subr.bf16.mxu1 %v7726_v30  ;;  %v7729_v35 = vld [vmem:[#allocation10 + $0xe4] ss:$8 sps:$4 sm:$0xff]  }
 0x49e   :  { %v5903_v8 = vsub.f32 %v13444_v46, %v13443_v27  ;;  %v6472_v61 = vrot.slane %v11424_v22, 2  ;;  %v6499_v26 = vsel %vm4287_vm4, %v6498_v52, %v6497_v19  ;;  %v6500_v18 = vrot.slane %v11448_v45, 2  ;;  %v7724_v19 = vld [vmem:[#allocation10 + $0xd0] ss:$8 sps:$4 sm:$0xff]  }
 0x49f   :  { %v5919_v29 = vsub.f32 %v13446_v50, %v13445_v14  ;;  %v5902_v57 = vsub.f32 %v13447_v37, %v5412_v2  ;;  %v5918_v34 = vsub.f32 %v13448_v11, %v5426_v0  ;;  %v6457_v1 = vsel %vm4287_vm4, %v6456_v16, %v6455_v9 }
 0x4a0   :  { %v6485_v3 = vsel %vm4287_vm4, %v6484_v55, %v6483_v6  ;;  %v13449_v39 = vrot.slane %v11356_v15, 2  ;;  %v6432_v22 = vrot.slane %v11378_v56, 1  ;;  %v6458_v21 = vrot.slane %v5900_v23, 2  ;;  %7127 = vmatpush1.bf16.msra.mxu1 %v7724_v19 }
 0x4a1   :  { %v6486_v52 = vrot.slane %v5916_v58, 2  ;;  %v3757_v45 = vsub.s32 2, %v11069_v10  ;;  %v13450_v25 = vrot.slane %v11365_v53, 2  ;;  %v6473_v44 = vsel %vm4289_vm5, %v6472_v61, %v6471_v38  ;;  %7128 = vmatprep.subr.bf16.mxu1 %v7729_v35  ;;  %v13459_v35 = vld [vmem:[#allocation183_spill] sm:$0xff] }
 0x4a2   :  { %v6403_v7 = vsel %vm4289_vm5, %v13449_v39, %v11386_v28  ;;  %v6501_v49 = vsel %vm4289_vm5, %v6500_v18, %v6499_v26  ;;  %v6474_v15 = vrot.slane %v5903_v8, 1  ;;  %v6502_v2 = vrot.slane %v5919_v29, 1  ;;  %v7727_v8 = vld [vmem:[#allocation10 + $0xe0] ss:$8 sps:$4 sm:$0xff]  }
 0x4a3   :  { %v6431_v4 = vsel %vm4289_vm5, %v13450_v25, %v11395_v41  ;;  %v6459_v28 = vsel %vm4289_vm5, %v6458_v21, %v6457_v1  ;;  %v6487_v56 = vsel %vm4289_vm5, %v6486_v52, %v6485_v3  ;;  %v11505_v0 = vmax.f32 %v11372_v33, 0.0  ;;  %v13454_v3 = vld [vmem:[#allocation173_spill] sm:$0xff] }
 0x4a4   :  { %v13451_v53 = vrot.slane %v11308_v12, 1  ;;  %v6460_v23 = vrot.slane %v5902_v57, 1  ;;  %v6488_v62 = vrot.slane %v5918_v34, 1  ;;  %v13452_v58 = vrot.slane %v11359_v51, 1  ;;  %v13453_v34 = vld [vmem:[#allocation154_spill] sm:$0xff]  ;;  %7129 = vmatpush1.bf16.msra.mxu1 %v7727_v8  ;;  %v13455_v52 = vld [vmem:[#allocation93_spill] sm:$0xff] }
 0x4a5   :  { %v11519_v6 = vsel %vm4291_vm6, %v6432_v22, %v6431_v4  ;;  %v11522_v33 = vsel %vm4291_vm6, %v6474_v15, %v6473_v44  ;;  %v11525_v27 = vsel %vm4291_vm6, %v6502_v2, %v6501_v49  ;;  %v11528_v12 = vrot.slane %v11075_v43, %v3757_v45  ;;  %v7732_v43 = vld [vmem:[#allocation10 + $0xf4] ss:$8 sps:$4 sm:$0xff]   ;;  %v13457_v15 = vld [vmem:[#allocation165_spill] sm:$0xff]  ;;  %v13462_v8 = vld [vmem:[#allocation144_spill] sm:$0xff] }
 0x4a6   :  { %v11511_v41 = vsel %vm4291_vm6, %v13451_v53, %v11353_v20  ;;  %v11516_v9 = vsel %vm4291_vm6, %v13452_v58, %v6403_v7  ;;  %v11531_v20 = vsel %vm4291_vm6, %v6460_v23, %v6459_v28  ;;  %v11534_v51 = vsel %vm4291_vm6, %v6488_v62, %v6487_v56  ;;  %v7730_v7 = vld [vmem:[#allocation10 + $0xf0] ss:$8 sps:$4 sm:$0xff]   ;;  %7130 = vmatprep.subr.bf16.mxu1 %v7732_v43  ;;  %v13458_v28 = vld [vmem:[#allocation108_spill] sm:$0xff]  ;;  %v13461_v58 = vld [vmem:[#allocation89_spill] sm:$0xff] }
 0x4a7   :  { %v5429_v46 = vrot.slane %v11368_v36, 1  ;;  %v5443_v14 = vrot.slane %v11375_v40, 1  ;;  %v5428_v50 = vrot.slane %v11361_v47, 1  ;;  %v5430_v29 = vrot.slane %v11361_v47, 2  ;;  %v13456_v49 = vld [vmem:[#allocation163_spill] sm:$0xff]  ;;  %v13460_v23 = vld [vmem:[#allocation152_spill] sm:$0xff] }
 0x4a8   :  { %v5432_v16 = vrot.slane %v11361_v47, 3  ;;  %v5431_v55 = vrot.slane %v11368_v36, 2  ;;  %v5433_v13 = vrot.slane %v11368_v36, 3  ;;  %v5434_v38 = vrot.slane %v11361_v47, 4  ;;  %v13463_v43 = vld [vmem:[#allocation83_spill] sm:$0xff]  ;;  %7131 = vmatpush1.bf16.msra.mxu1 %v7730_v7 }
 0x4a9   :  { %v5442_v61 = vrot.slane %v11505_v0, 1  ;;  %v5435_v26 = vrot.slane %v11368_v36, 4  ;;  %v5437_v18 = vrot.slane %v11368_v36, 5  ;;  %v5439_v30 = vrot.slane %v11368_v36, 6 }
 0x4aa   :  { %v5441_v37 = vrot.slane %v11368_v36, 7  ;;  %v5445_v57 = vrot.slane %v11375_v40, 2  ;;  %v5447_v11 = vrot.slane %v11375_v40, 3  ;;  %v5921_v1 = vsub.f32 %v13453_v34, %v11368_v36 }
 0x4ab   :  { %v5923_v39 = vsub.f32 %v13454_v3, %v5429_v46  ;;  %v5449_v22 = vrot.slane %v11375_v40, 4  ;;  %v5451_v21 = vrot.slane %v11375_v40, 5  ;;  %v5939_v45 = vsub.f32 %v13455_v52, %v5443_v14  ;;  %v13464_v3 = vld [vmem:[#allocation227_spill] sm:$0xff] }
 0x4ac   :  { %v5444_v25 = vrot.slane %v11505_v0, 2  ;;  %v5453_v4 = vrot.slane %v11375_v40, 6  ;;  %v5455_v44 = vrot.slane %v11375_v40, 7  ;;  %v5922_v19 = vsub.f32 %v13456_v49, %v5428_v50 }
 0x4ad   :  { %v5938_v2 = vsub.f32 %v13457_v15, %v5442_v61  ;;  %v5925_v56 = vsub.f32 %v13458_v28, %v5431_v55  ;;  %v5927_v53 = vsub.f32 %v13459_v35, %v5433_v13  ;;  %v5929_v62 = vsub.f32 %v13460_v23, %v5435_v26  ;;  %v13465_v61 = vld [vmem:[#allocation167_spill] sm:$0xff]  ;;  %v13466_v13 = vld [vmem:[#allocation177_spill] sm:$0xff]  ;;  %v13467_v26 = vld [vmem:[#allocation102_spill] sm:$0xff] }
 0x4ae   :  { %v11566_v46 = vsub.f32 %v13461_v58, %v5437_v18  ;;  %v11569_v14 = vsub.f32 %v13462_v8, %v5439_v30  ;;  %v11572_v34 = vsub.f32 %v13463_v43, %v5441_v37  ;;  %v5941_v52 = vsub.f32 %v13464_v3, %v5445_v57  ;;  %v13468_v18 = vld [vmem:[#allocation238_spill] sm:$0xff]  ;;  %v13470_v43 = vld [vmem:[#allocation265_spill] sm:$0xff] }
 0x4af   :  { %v6518_v50 = vrot.slane %v5923_v39, 7  ;;  %v5937_v55 = vsub.f32 %v13465_v61, %v11375_v40  ;;  %v6546_v49 = vrot.slane %v5939_v45, 7  ;;  %v5924_v15 = vsub.f32 %v13466_v13, %v5430_v29  ;;  %v13469_v37 = vld [vmem:[#allocation258_spill] sm:$0xff]  ;;  %v13471_v39 = vld [vmem:[#allocation268_spill] sm:$0xff] }
 0x4b0   :  { %v5940_v28 = vsub.f32 %v13467_v26, %v5444_v25  ;;  %v5943_v35 = vsub.f32 %v13468_v18, %v5447_v11  ;;  %v5446_v30 = vrot.slane %v11505_v0, 3  ;;  %v6504_v23 = vrot.slane %v5922_v19, 7  ;;  %v13472_v29 = vld [vmem:[#allocation86_spill] sm:$0xff]  ;;  %v13473_v11 = vld [vmem:[#allocation159_spill] sm:$0xff]  ;;  %v13498_v40 = vld [vmem:[#allocation312_spill] sm:$0xff] }
 0x4b1   :  { %v6532_v58 = vrot.slane %v5938_v2, 7  ;;  %v5945_v8 = vsub.f32 %v13469_v37, %v5449_v22  ;;  %v5947_v57 = vsub.f32 %v13470_v43, %v5451_v21  ;;  %v11584_v7 = vsub.f32 %v13471_v39, %v5453_v4  ;;  %v13474_v21 = vld [vmem:[#allocation181_spill] sm:$0xff]  ;;  %v13475_v4 = vld [vmem:[#allocation232_spill] sm:$0xff] }
 0x4b2   :  { %v6520_v3 = vrot.slane %v5925_v56, 6  ;;  %v6519_v45 = vsel %vm4279_vm0, %v6518_v50, %v5921_v1  ;;  %v6548_v61 = vrot.slane %v5941_v52, 6  ;;  %v5920_v25 = vsub.f32 %v13472_v29, %v11361_v47  ;;  %v13476_v52 = vld [vmem:[#allocation272_spill] sm:$0xff] }
 0x4b3   :  { %v5936_v13 = vsub.f32 %v13473_v11, %v11505_v0  ;;  %v6547_v19 = vsel %vm4279_vm0, %v6546_v49, %v5937_v55  ;;  %v5448_v2 = vrot.slane %v11505_v0, 4  ;;  %v6506_v22 = vrot.slane %v5924_v15, 6  ;;  %v13478_v11 = vld [vmem:[#allocation246_spill] sm:$0xff] }
 0x4b4   :  { %v6534_v26 = vrot.slane %v5940_v28, 6  ;;  %v5926_v18 = vsub.f32 %v13474_v21, %v5432_v16  ;;  %v5942_v37 = vsub.f32 %v13475_v4, %v5446_v30  ;;  %v6505_v56 = vsel %vm4279_vm0, %v6504_v23, %v5920_v25  ;;  %v13477_v28 = vld [vmem:[#allocation197_spill] sm:$0xff] }
 0x4b5   :  { %v6533_v1 = vsel %vm4279_vm0, %v6532_v58, %v5936_v13  ;;  %v11598_v50 = vsub.f32 %v13476_v52, %v5455_v44  ;;  %v6521_v43 = vsel %vm4281_vm1, %v6520_v3, %v6519_v45  ;;  %v6522_v39 = vrot.slane %v5927_v53, 5 }
 0x4b6   :  { %v6524_v29 = vrot.slane %v5929_v62, 4  ;;  %v6549_v55 = vsel %vm4281_vm1, %v6548_v61, %v6547_v19  ;;  %v6550_v49 = vrot.slane %v5943_v35, 5  ;;  %v5436_v15 = vrot.slane %v11361_v47, 5 }
 0x4b7   :  { %v5450_v16 = vrot.slane %v11505_v0, 5  ;;  %v5928_v30 = vsub.f32 %v13477_v28, %v5434_v38  ;;  %v5944_v23 = vsub.f32 %v13478_v11, %v5448_v2  ;;  %v6507_v58 = vsel %vm4281_vm1, %v6506_v22, %v6505_v56  ;;  %v13479_v38 = vld [vmem:[#allocation162_spill] sm:$0xff] }
 0x4b8   :  { %v6535_v44 = vsel %vm4281_vm1, %v6534_v26, %v6533_v1  ;;  %v6523_v25 = vsel %vm4283_vm2, %v6522_v39, %v6521_v43  ;;  %v6526_v53 = vrot.slane %v11566_v46, 3  ;;  %v6508_v62 = vrot.slane %v5926_v18, 5  ;;  %v13480_v2 = vld [vmem:[#allocation262_spill] sm:$0xff] }
 0x4b9   :  { %v6536_v3 = vrot.slane %v5942_v37, 5  ;;  %v6551_v35 = vsel %vm4283_vm2, %v6550_v49, %v6549_v55  ;;  %v6552_v45 = vrot.slane %v5945_v8, 4  ;;  %v5438_v61 = vrot.slane %v11361_v47, 6  ;;  %v13481_v43 = vld [vmem:[#allocation142_spill] sm:$0xff]  ;;  %v13482_v55 = vld [vmem:[#allocation267_spill] sm:$0xff] }
 0x4ba   :  { %v5452_v13 = vrot.slane %v11505_v0, 6  ;;  %v5930_v19 = vsub.f32 %v13479_v38, %v5436_v15  ;;  %v5946_v21 = vsub.f32 %v13480_v2, %v5450_v16  ;;  %v6509_v22 = vsel %vm4283_vm2, %v6508_v62, %v6507_v58 }
 0x4bb   :  { %v6537_v26 = vsel %vm4283_vm2, %v6536_v3, %v6535_v44  ;;  %v6525_v4 = vsel %vm4285_vm3, %v6524_v29, %v6523_v25  ;;  %v5440_v46 = vrot.slane %v11361_v47, 7  ;;  %v6510_v18 = vrot.slane %v5928_v30, 4  ;;  %v13483_v44 = vld [vmem:[#allocation206_spill] sm:$0xff] }
 0x4bc   :  { %v6538_v37 = vrot.slane %v5944_v23, 4  ;;  %v6528_v8 = vrot.slane %v11569_v14, 2  ;;  %v6553_v56 = vsel %vm4285_vm3, %v6552_v45, %v6551_v35  ;;  %v6554_v1 = vrot.slane %v5947_v57, 3  ;;  %v13484_v35 = vld [vmem:[#allocation270_spill] sm:$0xff] }
 0x4bd   :  { %v5454_v52 = vrot.slane %v11505_v0, 7  ;;  %v5932_v39 = vsub.f32 %v13481_v43, %v5438_v61  ;;  %v5948_v49 = vsub.f32 %v13482_v55, %v5452_v13  ;;  %v6511_v15 = vsel %vm4285_vm3, %v6510_v18, %v6509_v22  ;;  %v7871_v22 = vld [vmem:[%s12317_s4] sm:$0xf] }
 0x4be   :  { %v6539_v16 = vsel %vm4285_vm3, %v6538_v37, %v6537_v26  ;;  %v3761_v29 = vsub.s32 3, %v11069_v10  ;;  %v6527_v28 = vsel %vm4287_vm4, %v6526_v53, %v6525_v4  ;;  %v6512_v30 = vrot.slane %v5930_v19, 3 }
 0x4bf   :  { %v6540_v11 = vrot.slane %v5946_v21, 3  ;;  %v6530_v23 = vrot.slane %v11572_v34, 1  ;;  %v6555_v57 = vsel %vm4287_vm4, %v6554_v1, %v6553_v56  ;;  %v6556_v58 = vrot.slane %v11584_v7, 2 }
 0x4c0   :  { %v5934_v25 = vsub.f32 %v13483_v44, %v5440_v46  ;;  %v5950_v45 = vsub.f32 %v13484_v35, %v5454_v52  ;;  %v6513_v61 = vsel %vm4287_vm4, %v6512_v30, %v6511_v15  ;;  %v6529_v34 = vsel %vm4289_vm5, %v6528_v8, %v6527_v28 }
 0x4c1   :  { %v6541_v53 = vsel %vm4287_vm4, %v6540_v11, %v6539_v16  ;;  %v6514_v19 = vrot.slane %v5932_v39, 2  ;;  %v6542_v2 = vrot.slane %v5948_v49, 2  ;;  %v11642_v26 = vrot.slane %v7871_v22, %v3761_v29  ;;  %v13492_v22 = vld [vmem:[#allocation201_spill] sm:$0xff] }
 0x4c2   :  { %v6557_v4 = vsel %vm4289_vm5, %v6556_v58, %v6555_v57  ;;  %v6558_v46 = vrot.slane %v11598_v50, 1  ;;  %v11654_v52 = vsel %vm4291_vm6, %v6530_v23, %v6529_v34  ;;  %v6516_v43 = vrot.slane %v5934_v25, 1 }
 0x4c3   :  { %v6515_v8 = vsel %vm4289_vm5, %v6514_v19, %v6513_v61  ;;  %v6543_v56 = vsel %vm4289_vm5, %v6542_v2, %v6541_v53  ;;  %v6544_v39 = vrot.slane %v5950_v45, 1  ;;  %v13488_v45 = vld [vmem:[#allocation200_spill] sm:$0xff]  ;;  %v13489_v53 = vld [vmem:[#allocation287_spill] sm:$0xff]  ;;  %v13490_v19 = vld [vmem:[#allocation282_spill] sm:$0xff] }
 0x4c4   :  { %v11659_v49 = vsel %vm4291_vm6, %v6558_v46, %v6557_v4  ;;  %v11666_v29 = vsel %vm4291_vm6, %v6516_v43, %v6515_v8  ;;  %v13493_v46 = vld [vmem:[#allocation199_spill] sm:$0xff]  ;;  %v13494_v8 = vld [vmem:[#allocation309_spill] sm:$0xff] }
 0x4c5   :  { %v11669_v28 = vsel %vm4291_vm6, %v6544_v39, %v6543_v56  ;;  %v13495_v43 = vld [vmem:[#allocation129_spill] sm:$0xff] }
 0x4c6   :  { %v4936_v14 = vpop.f32.mrb[96].mxu1 }
 0x4c7   :  { %v4937_v62 = vadd.f32 %v4936_v14, %v11082_v48  ;;  %v4938_v3 = vpop.f32.mrb[97].mxu1 }
 0x4c8   :  { %v4939_v13 = vadd.f32 %v4938_v3, %v11103_v17  ;;  %v4940_v38 = vpop.f32.mrb[98].mxu1 }
 0x4c9   :  { %v4941_v7 = vadd.f32 %v4940_v38, %v11082_v48  ;;  %v4942_v21 = vpop.f32.mrb[99].mxu1  ;;  %v11651_v1 = vmax.f32 %v4937_v62, 0.0 }
 0x4ca   :  { %v11646_v18 = vmax.f32 %v4939_v13, 0.0  ;;  %v4943_v37 = vadd.f32 %v4942_v21, %v11103_v17 }
 0x4cb   :  { %13486 = vst [vmem:[#allocation255_spill] sm:$0xff] %v11651_v1  ;;  %v11663_v16 = vmax.f32 %v4941_v7, 0.0  ;;  %v13491_v7 = vld [vmem:[#allocation293_spill] sm:$0xff] }
 0x4cc   :  { %13485 = vst [vmem:[#allocation252_spill] sm:$0xff] %v11646_v18  ;;  %v11656_v55 = vmax.f32 %v4943_v37, 0.0  ;;  %v5457_v50 = vrot.slane %v11646_v18, 1  ;;  %v5459_v15 = vrot.slane %v11646_v18, 2  ;;  %v5461_v30 = vrot.slane %v11646_v18, 3 }
 0x4cd   :  { %v5463_v11 = vrot.slane %v11646_v18, 4  ;;  %v5465_v14 = vrot.slane %v11646_v18, 5  ;;  %v5467_v58 = vrot.slane %v11646_v18, 6  ;;  %v5469_v44 = vrot.slane %v11646_v18, 7 }
 0x4ce   :  { %13487 = vst [vmem:[#allocation208_spill] sm:$0xff] %v11656_v55  ;;  %v5471_v23 = vrot.slane %v11656_v55, 1  ;;  %v5473_v57 = vrot.slane %v11656_v55, 2  ;;  %v5475_v25 = vrot.slane %v11656_v55, 3  ;;  %v5477_v3 = vrot.slane %v11656_v55, 4 }
 0x4cf   :  { %v5479_v35 = vrot.slane %v11656_v55, 5  ;;  %v5955_v61 = vsub.f32 %v13488_v45, %v5457_v50  ;;  %v5957_v13 = vsub.f32 %v13489_v53, %v5459_v15  ;;  %v5481_v38 = vrot.slane %v11656_v55, 6  ;;  %v13496_v50 = vld [vmem:[#allocation303_spill] sm:$0xff]  ;;  %v13497_v53 = vld [vmem:[#allocation286_spill] sm:$0xff] }
 0x4d0   :  { %v5483_v34 = vrot.slane %v11656_v55, 7  ;;  %v5953_v2 = vsub.f32 %v13490_v19, %v11646_v18  ;;  %v5959_v21 = vsub.f32 %v13491_v7, %v5461_v30  ;;  %v5961_v4 = vsub.f32 %v13492_v22, %v5463_v11  ;;  %v13499_v18 = vld [vmem:[#allocation321_spill] sm:$0xff] }
 0x4d1   :  { %v5963_v37 = vsub.f32 %v13493_v46, %v5465_v14  ;;  %v5971_v56 = vsub.f32 %v13494_v8, %v5471_v23  ;;  %v5973_v39 = vsub.f32 %v13495_v43, %v5473_v57  ;;  %v5965_v45 = vsub.f32 %v13496_v50, %v5467_v58  ;;  %v13500_v7 = vld [vmem:[#allocation289_spill] sm:$0xff]  ;;  %v13501_v14 = vld [vmem:[#allocation291_spill] sm:$0xff] }
 0x4d2   :  { %v5967_v15 = vsub.f32 %v10518_v5, %v5469_v44  ;;  %v5975_v62 = vsub.f32 %v13497_v53, %v5475_v25  ;;  %v6574_v10 = vrot.slane %v5955_v61, 7  ;;  %v5969_v19 = vsub.f32 %v13498_v40, %v11656_v55 }
 0x4d3   :  { %v5977_v30 = vsub.f32 %v13499_v18, %v5477_v3  ;;  %v5979_v11 = vsub.f32 %v13500_v7, %v5479_v35  ;;  %v6576_v22 = vrot.slane %v5957_v13, 6  ;;  %v5981_v46 = vsub.f32 %v13501_v14, %v5481_v38 }
 0x4d4   :  { %v6575_v23 = vsel %vm4279_vm0, %v6574_v10, %v5953_v2  ;;  %v6578_v57 = vrot.slane %v5959_v21, 5  ;;  %v6602_v8 = vrot.slane %v5971_v56, 7  ;;  %v5983_v58 = vsub.f32 %v10764_v60, %v5483_v34 }
 0x4d5   :  { %v6577_v5 = vsel %vm4281_vm1, %v6576_v22, %v6575_v23  ;;  %v6580_v44 = vrot.slane %v5961_v4, 4  ;;  %v6604_v25 = vrot.slane %v5973_v39, 6  ;;  %v6582_v40 = vrot.slane %v5963_v37, 3 }
 0x4d6   :  { %v6579_v61 = vsel %vm4283_vm2, %v6578_v57, %v6577_v5  ;;  %v6603_v18 = vsel %vm4279_vm0, %v6602_v8, %v5969_v19  ;;  %v6606_v3 = vrot.slane %v5975_v62, 5  ;;  %v6584_v13 = vrot.slane %v5965_v45, 2 }
 0x4d7   :  { %v6581_v35 = vsel %vm4285_vm3, %v6580_v44, %v6579_v61  ;;  %v6605_v38 = vsel %vm4281_vm1, %v6604_v25, %v6603_v18  ;;  %v6608_v10 = vrot.slane %v5977_v30, 4  ;;  %v6610_v34 = vrot.slane %v5979_v11, 3 }
 0x4d8   :  { %v6583_v2 = vsel %vm4287_vm4, %v6582_v40, %v6581_v35  ;;  %v6607_v60 = vsel %vm4283_vm2, %v6606_v3, %v6605_v38  ;;  %v5458_v21 = vrot.slane %v11651_v1, 2  ;;  %v6612_v56 = vrot.slane %v5981_v46, 2  ;;  %v13505_v3 = vld [vmem:[#allocation130_spill] sm:$0xff] }
 0x4d9   :  { %v6585_v4 = vsel %vm4289_vm5, %v6584_v13, %v6583_v2  ;;  %v6609_v37 = vsel %vm4285_vm3, %v6608_v10, %v6607_v60  ;;  %v5460_v62 = vrot.slane %v11651_v1, 3  ;;  %v6586_v43 = vrot.slane %v5967_v15, 1  ;;  %v13506_v13 = vld [vmem:[#allocation284_spill] sm:$0xff]  ;;  %v13507_v60 = vld [vmem:[#allocation275_spill] sm:$0xff] }
 0x4da   :  { %v6611_v39 = vsel %vm4287_vm4, %v6610_v34, %v6609_v37  ;;  %v6614_v50 = vrot.slane %v5983_v58, 1  ;;  %v5462_v45 = vrot.slane %v11651_v1, 4  ;;  %v5464_v30 = vrot.slane %v11651_v1, 5 }
 0x4db   :  { %v6613_v19 = vsel %vm4289_vm5, %v6612_v56, %v6611_v39  ;;  %v5466_v7 = vrot.slane %v11651_v1, 6  ;;  %v5468_v11 = vrot.slane %v11651_v1, 7  ;;  %v11722_v46 = vsel %vm4291_vm6, %v6586_v43, %v6585_v4  ;;  %v13508_v4 = vld [vmem:[#allocation214_spill] sm:$0xff]  ;;  %v13509_v43 = vld [vmem:[#allocation300_spill] sm:$0xff] }
 0x4dc   :  { %13502 = vst [vmem:[#allocation207_spill] sm:$0xff] %v11722_v46  ;;  %v5470_v15 = vrot.slane %v11663_v16, 1  ;;  %v5472_v23 = vrot.slane %v11663_v16, 2  ;;  %v5474_v58 = vrot.slane %v11663_v16, 3  ;;  %v5476_v5 = vrot.slane %v11663_v16, 4 }
 0x4dd   :  { %v4946_v53 = vpop.f32.mrb[100].mxu1  ;;  %v5478_v44 = vrot.slane %v11663_v16, 5  ;;  %v11731_v61 = vsel %vm4291_vm6, %v6614_v50, %v6613_v19  ;;  %v5480_v40 = vrot.slane %v11663_v16, 6  ;;  %v13504_v18 = vrot.slane %v11651_v1, 1  ;;  %v13510_v50 = vld [vmem:[#allocation113_spill] sm:$0xff]  ;;  %v13511_v19 = vld [vmem:[#allocation266_spill] sm:$0xff] }
 0x4de   :  { %v4947_v22 = vadd.f32 %v4946_v53, %v11082_v48  ;;  %v4948_v14 = vpop.f32.mrb[101].mxu1  ;;  %13503 = vst [vmem:[#allocation231_spill] sm:$0xff] %v11731_v61  ;;  %v5956_v38 = vsub.f32 %v13506_v13, %v5458_v21  ;;  %v5482_v2 = vrot.slane %v11663_v16, 7  ;;  %v5952_v34 = vsub.f32 %v13507_v60, %v11651_v1  ;;  %v13514_v13 = vld [vmem:[#allocation127_spill] sm:$0xff]  ;;  %v13515_v61 = vld [vmem:[#allocation128_spill] sm:$0xff] }
 0x4df   :  { %v4949_v57 = vadd.f32 %v4948_v14, %v11103_v17  ;;  %v4950_v8 = vpop.f32.mrb[102].mxu1  ;;  %v5954_v35 = vsub.f32 %v13505_v3, %v13504_v18  ;;  %v5958_v37 = vsub.f32 %v13508_v4, %v5460_v62  ;;  %v5960_v39 = vsub.f32 %v13509_v43, %v5462_v45  ;;  %v13516_v45 = vld [vmem:[#allocation260_spill] sm:$0xff] }
 0x4e0   :  { %v4952_v25 = vpop.f32.mrb[103].mxu1  ;;  %v11738_v10 = vmax.f32 %v4947_v22, 0.0  ;;  %v4951_v56 = vadd.f32 %v4950_v8, %v11082_v48  ;;  %v5962_v53 = vsub.f32 %v13510_v50, %v5464_v30  ;;  %v5970_v14 = vsub.f32 %v13511_v19, %v5470_v15  ;;  %v13513_v22 = vld [vmem:[#allocation240_spill] sm:$0xff] }
 0x4e1   :  { %v11748_v18 = vmax.f32 %v4949_v57, 0.0  ;;  %v4953_v21 = vadd.f32 %v4952_v25, %v11103_v17  ;;  %v5964_v3 = vsub.f32 %v13513_v22, %v5466_v7  ;;  %v5972_v55 = vsub.f32 %v13514_v13, %v5472_v23  ;;  %v13517_v43 = vld [vmem:[#allocation320_spill] sm:$0xff]  ;;  %v13518_v57 = vld [vmem:[#allocation322_spill] sm:$0xff] }
 0x4e2   :  { %v5966_v60 = vsub.f32 %v10512_v24, %v5468_v11  ;;  %v5974_v62 = vsub.f32 %v13515_v61, %v5474_v58  ;;  %v6560_v4 = vrot.slane %v5954_v35, 7  ;;  %v6562_v8 = vrot.slane %v5956_v38, 6  ;;  %v13519_v19 = vld [vmem:[#allocation136_spill] sm:$0xff] }
 0x4e3   :  { %13512 = vst [vmem:[#allocation234_spill] sm:$0xff] %v11748_v18  ;;  %v5968_v30 = vsub.f32 %v13516_v45, %v11663_v16  ;;  %v5976_v15 = vsub.f32 %v13517_v43, %v5476_v5  ;;  %v5978_v50 = vsub.f32 %v13518_v57, %v5478_v44  ;;  %v5980_v25 = vsub.f32 %v13519_v19, %v5480_v40 }
 0x4e4   :  { %v6561_v7 = vsel %vm4279_vm0, %v6560_v4, %v5952_v34  ;;  %v6564_v23 = vrot.slane %v5958_v37, 5  ;;  %v6566_v22 = vrot.slane %v5960_v39, 4  ;;  %v6588_v24 = vrot.slane %v5970_v14, 7 }
 0x4e5   :  { %v4956_v1 = vpop.f32.mrb[104].mxu1  ;;  %v6563_v58 = vsel %vm4281_vm1, %v6562_v8, %v6561_v7  ;;  %v6568_v61 = vrot.slane %v5962_v53, 3  ;;  %v6570_v35 = vrot.slane %v5964_v3, 2  ;;  %v6590_v38 = vrot.slane %v5972_v55, 6 }
 0x4e6   :  { %v4958_v46 = vpop.f32.mrb[105].mxu1  ;;  %v4957_v13 = vadd.f32 %v4956_v1, %v11082_v48  ;;  %v6565_v5 = vsel %vm4283_vm2, %v6564_v23, %v6563_v58  ;;  %v6589_v44 = vsel %vm4279_vm0, %v6588_v24, %v5968_v30  ;;  %v6592_v40 = vrot.slane %v5974_v62, 5 }
 0x4e7   :  { %v4960_v11 = vpop.f32.mrb[106].mxu1  ;;  %v4959_v43 = vadd.f32 %v4958_v46, %v11103_v17  ;;  %v6567_v37 = vsel %vm4285_vm3, %v6566_v22, %v6565_v5  ;;  %v6591_v39 = vsel %vm4281_vm1, %v6590_v38, %v6589_v44  ;;  %v6594_v14 = vrot.slane %v5976_v15, 4 }
 0x4e8   :  { %v4962_v45 = vpop.f32.mrb[107].mxu1  ;;  %v4961_v34 = vadd.f32 %v4960_v11, %v11082_v48  ;;  %v6569_v55 = vsel %vm4287_vm4, %v6568_v61, %v6567_v37  ;;  %v6593_v1 = vsel %vm4283_vm2, %v6592_v40, %v6591_v39  ;;  %v11772_v3 = vmax.f32 %v4951_v56, 0.0 }
 0x4e9   :  { %v4963_v53 = vadd.f32 %v4962_v45, %v11103_v17  ;;  %v5982_v4 = vsub.f32 %v10750_v59, %v5482_v2  ;;  %v6571_v62 = vsel %vm4289_vm5, %v6570_v35, %v6569_v55  ;;  %v6596_v46 = vrot.slane %v5978_v50, 3 }
 0x4ea   :  { %v11776_v8 = vmax.f32 %v4953_v21, 0.0  ;;  %v6572_v30 = vrot.slane %v5966_v60, 1  ;;  %v6595_v57 = vsel %vm4285_vm3, %v6594_v14, %v6593_v1  ;;  %v6598_v19 = vrot.slane %v5980_v25, 2 }
 0x4eb   :  { %v11779_v7 = vmax.f32 %v4957_v13, 0.0  ;;  %v11781_v23 = vmax.f32 %v4959_v43, 0.0  ;;  %v11783_v22 = vmax.f32 %v4961_v34, 0.0  ;;  %v6597_v56 = vsel %vm4287_vm4, %v6596_v46, %v6595_v57 }
 0x4ec   :  { %v11786_v24 = vmax.f32 %v4963_v53, 0.0  ;;  %v11790_v21 = vsel %vm4291_vm6, %v6572_v30, %v6571_v62  ;;  %v6599_v60 = vsel %vm4289_vm5, %v6598_v19, %v6597_v56  ;;  %v6600_v11 = vrot.slane %v5982_v4, 1  ;;  %v13527_v4 = vld [vmem:[#allocation217_spill] sm:$0xff]  ;;  %v13528_v19 = vld [vmem:[#allocation295_spill] sm:$0xff] }
 0x4ed   :  { %13520 = vst [vmem:[#allocation216_spill] sm:$0xff] %v11779_v7  ;;  %13521 = vst [vmem:[#allocation236_spill] sm:$0xff] %v11781_v23  ;;  %v4966_v15 = vpop.f32.mrb[108].mxu1  ;;  %v5485_v58 = vrot.slane %v11748_v18, 1  ;;  %v5487_v61 = vrot.slane %v11748_v18, 2  ;;  %v5489_v38 = vrot.slane %v11748_v18, 3 }
 0x4ee   :  { %13522 = vst [vmem:[#allocation299_spill] sm:$0xff] %v11783_v22  ;;  %13523 = vst [vmem:[#allocation220_spill] sm:$0xff] %v11786_v24  ;;  %v4967_v59 = vadd.f32 %v4966_v15, %v11082_v48  ;;  %v4968_v2 = vpop.f32.mrb[109].mxu1  ;;  %v5491_v13 = vrot.slane %v11748_v18, 4  ;;  %v5493_v45 = vrot.slane %v11748_v18, 5  ;;  %v5495_v5 = vrot.slane %v11748_v18, 6 }
 0x4ef   :  { %v4969_v50 = vadd.f32 %v4968_v2, %v11103_v17  ;;  %v4970_v25 = vpop.f32.mrb[110].mxu1  ;;  %v11805_v40 = vsel %vm4291_vm6, %v6600_v11, %v6599_v60  ;;  %v5497_v43 = vrot.slane %v11748_v18, 7  ;;  %v5499_v34 = vrot.slane %v11776_v8, 1  ;;  %v13529_v15 = vld [vmem:[#allocation325_spill] sm:$0xff]  ;;  %v13530_v2 = vld [vmem:[#allocation327_spill] sm:$0xff]  ;;  %v13532_v11 = vld [vmem:[#allocation178_spill] sm:$0xff] }
 0x4f0   :  { %v11796_v35 = vpop.f32.mrb[111].mxu1  ;;  %v11802_v44 = vmax.f32 %v4967_v59, 0.0  ;;  %v11812_v39 = vadd.f32 %v4970_v25, %v11082_v48  ;;  %v5501_v53 = vrot.slane %v11776_v8, 2  ;;  %v5503_v55 = vrot.slane %v11776_v8, 3  ;;  %v13535_v7 = vld [vmem:[#allocation172_spill] sm:$0xff]  ;;  %v13536_v24 = vld [vmem:[#allocation174_spill] sm:$0xff] }
 0x4f1   :  { %v11809_v37 = vmax.f32 %v4969_v50, 0.0  ;;  %v5505_v1 = vrot.slane %v11776_v8, 4  ;;  %v5507_v14 = vrot.slane %v11776_v8, 5  ;;  %v5987_v62 = vsub.f32 %v13527_v4, %v5485_v58  ;;  %v13531_v50 = vld [vmem:[#allocation329_spill] sm:$0xff]  ;;  %v13534_v4 = vld [vmem:[#allocation171_spill] sm:$0xff] }
 0x4f2   :  { %13524 = vst [vmem:[#allocation251_spill] sm:$0xff] %v11802_v44  ;;  %13526 = vst [vmem:[#allocation310_spill] sm:$0xff] %v11812_v39  ;;  %v5989_v46 = vsub.f32 %v10788_v42, %v5487_v61  ;;  %v5509_v30 = vrot.slane %v11776_v8, 6  ;;  %v5511_v57 = vrot.slane %v11776_v8, 7  ;;  %v5985_v48 = vsub.f32 %v13528_v19, %v11748_v18  ;;  %v13539_v39 = vld [vmem:[#allocation186_spill] sm:$0xff] }
 0x4f3   :  { %13525 = vst [vmem:[#allocation133_spill] sm:$0xff] %v11809_v37  ;;  %v5991_v56 = vsub.f32 %v13529_v15, %v5489_v38  ;;  %v5993_v60 = vsub.f32 %v13530_v2, %v5491_v13  ;;  %v5995_v25 = vsub.f32 %v13531_v50, %v5493_v45  ;;  %v5997_v44 = vsub.f32 %v13532_v11, %v5495_v5  ;;  %v13533_v37 = vld [vmem:[#allocation116_spill] sm:$0xff]  ;;  %v13537_v2 = vld [vmem:[#allocation105_spill] sm:$0xff] }
 0x4f4   :  { %v11829_v58 = vsub.f32 %v13533_v37, %v5497_v43  ;;  %v6001_v22 = vsub.f32 %v13534_v4, %v11776_v8  ;;  %v6003_v19 = vsub.f32 %v13535_v7, %v5499_v34  ;;  %v6005_v38 = vsub.f32 %v13536_v24, %v5501_v53 }
 0x4f5   :  { %v5009_v59 = vpop.f32.mrb[112].mxu1  ;;  %v6007_v45 = vsub.f32 %v13537_v2, %v5503_v55  ;;  %v6630_v50 = vrot.slane %v5987_v62, 7  ;;  %v6632_v5 = vrot.slane %v5989_v46, 6  ;;  %v6011_v18 = vsub.f32 %v13539_v39, %v5507_v14 }
 0x4f6   :  { %v5010_v42 = vadd.f32 %v5009_v59, %v11528_v12  ;;  %v5011_v61 = vpop.f32.mrb[113].mxu1  ;;  %v13538_v59 = vld [vmem:[#allocation182_spill] sm:$0xff]  ;;  %v6634_v34 = vrot.slane %v5991_v56, 5  ;;  %v6636_v62 = vrot.slane %v5993_v60, 4  ;;  %v6658_v39 = vrot.slane %v6003_v19, 7 }
 0x4f7   :  { %v5012_v15 = vadd.f32 %v5011_v61, %v11642_v26  ;;  %v5013_v13 = vpop.f32.mrb[114].mxu1  ;;  %v6009_v23 = vsub.f32 %v13538_v59, %v5505_v1  ;;  %v6631_v24 = vsel %vm4279_vm0, %v6630_v50, %v5985_v48  ;;  %v6638_v61 = vrot.slane %v5995_v25, 3 }
 0x4f8   :  { %v7408_v11 = vmul.f32 -1.442695, %v5010_v42  ;;  %v5014_v43 = vadd.f32 %v5013_v13, %v11528_v12  ;;  %v5015_v37 = vpop.f32.mrb[115].mxu1  ;;  %v6633_v55 = vsel %vm4281_vm1, %v6632_v5, %v6631_v24  ;;  %v6660_v14 = vrot.slane %v6005_v38, 6  ;;  %v13540_v13 = vld [vmem:[#allocation192_spill] sm:$0xff]  ;;  %v13541_v5 = vld [vmem:[#allocation135_spill] sm:$0xff] }
 0x4f9   :  { %v7409_v4 = vmul.f32 -1.442695, %v5012_v15  ;;  %v5016_v7 = vadd.f32 %v5015_v37, %v11642_v26  ;;  %v6635_v42 = vsel %vm4283_vm2, %v6634_v34, %v6633_v55  ;;  %v6013_v48 = vsub.f32 %v13540_v13, %v5509_v30 }
 0x4fa   :  { %7733 = vpow2.f32 %v7408_v11  ;;  %v7410_v53 = vmul.f32 -1.442695, %v5014_v43  ;;  %v6637_v1 = vsel %vm4285_vm3, %v6636_v62, %v6635_v42  ;;  %v6640_v2 = vrot.slane %v5997_v44, 2 }
 0x4fb   :  { %7735 = vpow2.f32 %v7409_v4  ;;  %v7411_v46 = vmul.f32 -1.442695, %v5016_v7  ;;  %v6639_v56 = vsel %vm4287_vm4, %v6638_v61, %v6637_v1  ;;  %v6015_v11 = vsub.f32 %v13541_v5, %v5511_v57 }
 0x4fc   :  { %7737 = vpow2.f32 %v7410_v53  ;;  %v6659_v43 = vsel %vm4279_vm0, %v6658_v39, %v6001_v22  ;;  %v6662_v25 = vrot.slane %v6007_v45, 5  ;;  %v6641_v19 = vsel %vm4289_vm5, %v6640_v2, %v6639_v56 }
 0x4fd   :  { %7739 = vpow2.f32 %v7411_v46  ;;  %v5019_v15 = vpop.f32.mrb[116].mxu1  ;;  %v6661_v38 = vsel %vm4281_vm1, %v6660_v14, %v6659_v43  ;;  %v6664_v4 = vrot.slane %v6009_v23, 4  ;;  %v6666_v34 = vrot.slane %v6011_v18, 3 }
 0x4fe   :  { %v5020_v50 = vadd.f32 %v5019_v15, %v11528_v12  ;;  %v5021_v60 = vpop.f32.mrb[117].mxu1  ;;  %v6663_v24 = vsel %vm4283_vm2, %v6662_v25, %v6661_v38  ;;  %v6668_v45 = vrot.slane %v6013_v48, 2  ;;  %v6642_v62 = vrot.slane %v11829_v58, 1 }
 0x4ff   :  { %v5022_v37 = vadd.f32 %v5021_v60, %v11642_v26  ;;  %v5023_v59 = vpop.f32.mrb[118].mxu1  ;;  %v6665_v22 = vsel %vm4285_vm3, %v6664_v4, %v6663_v24  ;;  %v11862_v23 = vadd.f32 %v11796_v35, %v11103_v17  ;;  %v6670_v39 = vrot.slane %v6015_v11, 1 }
 0x500   :  { %v7412_v30 = vmul.f32 -1.442695, %v5020_v50  ;;  %v5024_v7 = vadd.f32 %v5023_v59, %v11528_v12  ;;  %v5025_v44 = vpop.f32.mrb[119].mxu1  ;;  %v6667_v46 = vsel %vm4287_vm4, %v6666_v34, %v6665_v22  ;;  %v11866_v1 = vsel %vm4291_vm6, %v6642_v62, %v6641_v19 }
 0x501   :  { %v7413_v53 = vmul.f32 -1.442695, %v5022_v37  ;;  %v5026_v57 = vadd.f32 %v5025_v44, %v11642_v26  ;;  %v6669_v18 = vsel %vm4289_vm5, %v6668_v45, %v6667_v46  ;;  %v5484_v14 = vrot.slane %v11738_v10, 1 }
 0x502   :  { %7741 = vpow2.f32 %v7412_v30  ;;  %v7414_v55 = vmul.f32 -1.442695, %v5024_v7  ;;  %v5486_v48 = vrot.slane %v11738_v10, 2  ;;  %v5488_v17 = vrot.slane %v11738_v10, 3 }
 0x503   :  { %7743 = vpow2.f32 %v7413_v53  ;;  %v7415_v42 = vmul.f32 -1.442695, %v5026_v57  ;;  %v11873_v60 = vsel %vm4291_vm6, %v6670_v39, %v6669_v18  ;;  %v5490_v5 = vrot.slane %v11738_v10, 4 }
 0x504   :  { %v7734_v61 = vpop.eup %7733  ;;  %7745 = vpow2.f32 %v7414_v55  ;;  %v5492_v59 = vrot.slane %v11738_v10, 5  ;;  %v5494_v24 = vrot.slane %v11738_v10, 6  ;;  %v5496_v53 = vrot.slane %v11738_v10, 7 }
 0x505   :  { %v7736_v15 = vpop.eup %7735  ;;  %v5216_v58 = vadd.f32 1.0, %v7734_v61  ;;  %7747 = vpow2.f32 %v7415_v42  ;;  %v5029_v13 = vpop.f32.mrb[120].mxu1  ;;  %v5498_v57 = vrot.slane %v11772_v3, 1  ;;  %v13550_v42 = vld [vmem:[#allocation233_spill] sm:$0xff] }
 0x506   :  { %v7738_v35 = vpop.eup %7737  ;;  %v5217_v56 = vadd.f32 1.0, %v7736_v15  ;;  %v5030_v2 = vadd.f32 %v5029_v13, %v11528_v12  ;;  %v5031_v50 = vpop.f32.mrb[121].mxu1  ;;  %v13542_v13 = vld [vmem:[#allocation148_spill] sm:$0xff] }
 0x507   :  { %v7740_v11 = vpop.eup %7739  ;;  %7749 = vrcp.f32 %v5216_v58  ;;  %v5218_v43 = vadd.f32 1.0, %v7738_v35  ;;  %v5032_v25 = vadd.f32 %v5031_v50, %v11642_v26  ;;  %v5033_v37 = vpop.f32.mrb[122].mxu1  ;;  %v13557_v35 = vld [vmem:[#allocation187_spill] sm:$0xff] }
 0x508   :  { %7751 = vrcp.f32 %v5217_v56  ;;  %v5219_v19 = vadd.f32 1.0, %v7740_v11  ;;  %v7416_v38 = vmul.f32 -1.442695, %v5030_v2  ;;  %v5034_v4 = vadd.f32 %v5033_v37, %v11528_v12  ;;  %v5035_v30 = vpop.f32.mrb[123].mxu1 }
 0x509   :  { %7753 = vrcp.f32 %v5218_v43  ;;  %v7417_v7 = vmul.f32 -1.442695, %v5032_v25  ;;  %v5036_v44 = vadd.f32 %v5035_v30, %v11642_v26  ;;  %v13543_v43 = vld [vmem:[#allocation145_spill] sm:$0xff]  ;;  %v13544_v30 = vld [vmem:[#allocation323_spill] sm:$0xff] }
 0x50a   :  { %7755 = vrcp.f32 %v5219_v19  ;;  %v7418_v34 = vmul.f32 -1.442695, %v5034_v4  ;;  %v11893_v25 = vsub.f32 %v13543_v43, %v5484_v14  ;;  %v13545_v43 = vld [vmem:[#allocation324_spill] sm:$0xff] }
 0x50b   :  { %7757 = vpow2.f32 %v7416_v38  ;;  %v7419_v22 = vmul.f32 -1.442695, %v5036_v44 }
 0x50c   :  { %v7742_v62 = vpop.eup %7741  ;;  %7759 = vpow2.f32 %v7417_v7  ;;  %v11897_v7 = vsub.f32 %v13544_v30, %v5486_v48  ;;  %v13547_v30 = vld [vmem:[#allocation326_spill] sm:$0xff] }
 0x50d   :  { %v7744_v61 = vpop.eup %7743  ;;  %v5220_v39 = vadd.f32 1.0, %v7742_v62  ;;  %7761 = vpow2.f32 %v7418_v34  ;;  %v5039_v15 = vpop.f32.mrb[124].mxu1 }
 0x50e   :  { %v7746_v56 = vpop.eup %7745  ;;  %v5221_v2 = vadd.f32 1.0, %v7744_v61  ;;  %7763 = vpow2.f32 %v7419_v22  ;;  %v5040_v50 = vadd.f32 %v5039_v15, %v11528_v12  ;;  %v5041_v11 = vpop.f32.mrb[125].mxu1 }
 0x50f   :  { %v7748_v37 = vpop.eup %7747  ;;  %7765 = vrcp.f32 %v5220_v39  ;;  %v5222_v19 = vadd.f32 1.0, %v7746_v56  ;;  %v5042_v38 = vadd.f32 %v5041_v11, %v11642_v26  ;;  %v5043_v4 = vpop.f32.mrb[126].mxu1  ;;  %v11902_v39 = vsub.f32 %v13545_v43, %v5488_v17  ;;  %v13546_v11 = vld [vmem:[#allocation218_spill] sm:$0xff]  ;;  %v13551_v43 = vld [vmem:[#allocation132_spill] sm:$0xff] }
 0x510   :  { %7767 = vrcp.f32 %v5221_v2  ;;  %v5223_v44 = vadd.f32 1.0, %v7748_v37  ;;  %v7420_v34 = vmul.f32 -1.442695, %v5040_v50  ;;  %v5044_v22 = vadd.f32 %v5043_v4, %v11528_v12  ;;  %v5045_v62 = vpop.f32.mrb[127].mxu1  ;;  %v13548_v4 = vld [vmem:[#allocation235_spill] sm:$0xff] }
 0x511   :  { %v7750_v61 = vpop.eup %7749  ;;  %7769 = vrcp.f32 %v5222_v19  ;;  %v7421_v15 = vmul.f32 -1.442695, %v5042_v38  ;;  %v5046_v14 = vadd.f32 %v5045_v62, %v11642_v26  ;;  %v11906_v2 = vsub.f32 %v13547_v30, %v5490_v5  ;;  %v13549_v19 = vld [vmem:[#allocation328_spill] sm:$0xff] }
 0x512   :  { %v7752_v56 = vpop.eup %7751  ;;  %v6816_v58 = vmul.f32 %v7750_v61, %v13546_v11  ;;  %7771 = vrcp.f32 %v5223_v44  ;;  %v7422_v48 = vmul.f32 -1.442695, %v5044_v22  ;;  %v11910_v38 = vsub.f32 %v13549_v19, %v5492_v59  ;;  %v13552_v61 = vld [vmem:[#allocation203_spill] sm:$0xff]  ;;  %v13553_v11 = vld [vmem:[#allocation221_spill] sm:$0xff] }
 0x513   :  { %v7754_v50 = vpop.eup %7753  ;;  %7773 = vpow2.f32 %v7420_v34  ;;  %v7423_v37 = vmul.f32 -1.442695, %v5046_v14  ;;  %v6817_v18 = vmul.f32 %v7752_v56, %v13548_v4  ;;  %v11915_v44 = vsub.f32 %v13552_v61, %v5494_v24  ;;  %v13554_v14 = vld [vmem:[#allocation179_spill] sm:$0xff]  ;;  %v13555_v56 = vld [vmem:[#allocation184_spill] sm:$0xff] }
 0x514   :  { %v7756_v62 = vpop.eup %7755  ;;  %v6818_v17 = vmul.f32 %v7754_v50, %v13550_v42  ;;  %7775 = vpow2.f32 %v7421_v15  ;;  %v6848_v46 = vadd.f32 %v6816_v58, %v13551_v43  ;;  %v11920_v4 = vsub.f32 %v13555_v56, %v5496_v53  ;;  %v13556_v58 = vld [vmem:[#allocation104_spill] sm:$0xff] }
 0x515   :  { %v7758_v22 = vpop.eup %7757  ;;  %7777 = vpow2.f32 %v7422_v48  ;;  %v5049_v5 = vpop.f32.mrb[128].mxu1  ;;  %v6819_v34 = vmul.f32 %v7756_v62, %v13553_v11  ;;  %v6849_v30 = vadd.f32 %v6817_v18, %v13554_v14  ;;  %v13558_v18 = vld [vmem:[#allocation160_spill] sm:$0xff] }
 0x516   :  { %v7760_v59 = vpop.eup %7759  ;;  %v5224_v19 = vadd.f32 1.0, %v7758_v22  ;;  %7779 = vpow2.f32 %v7423_v37  ;;  %v5050_v42 = vadd.f32 %v5049_v5, %v11528_v12  ;;  %v5051_v15 = vpop.f32.mrb[129].mxu1  ;;  %v6850_v50 = vadd.f32 %v6818_v17, %v13556_v58 }
 0x517   :  { %v7762_v24 = vpop.eup %7761  ;;  %v5225_v43 = vadd.f32 1.0, %v7760_v59  ;;  %v5052_v48 = vadd.f32 %v5051_v15, %v11642_v26  ;;  %v5053_v61 = vpop.f32.mrb[130].mxu1  ;;  %v6851_v62 = vadd.f32 %v6819_v34, %v13557_v35 }
 0x518   :  { %v7764_v53 = vpop.eup %7763  ;;  %7781 = vrcp.f32 %v5224_v19  ;;  %v5226_v14 = vadd.f32 1.0, %v7762_v24  ;;  %v7424_v22 = vmul.f32 -1.442695, %v5050_v42  ;;  %v5054_v37 = vadd.f32 %v5053_v61, %v11528_v12  ;;  %v5055_v5 = vpop.f32.mrb[131].mxu1  ;;  %v13559_v19 = vld [vmem:[#allocation248_spill] sm:$0xff] }
 0x519   :  { %v7766_v56 = vpop.eup %7765  ;;  %7783 = vrcp.f32 %v5225_v43  ;;  %v5227_v17 = vadd.f32 1.0, %v7764_v53  ;;  %v7425_v58 = vmul.f32 -1.442695, %v5052_v48  ;;  %v5056_v59 = vadd.f32 %v5055_v5, %v11642_v26  ;;  %v13560_v48 = vld [vmem:[#allocation100_spill] sm:$0xff]  ;;  %v13564_v5 = vld [vmem:[#allocation193_spill] sm:$0xff] }
 0x51a   :  { %v7768_v15 = vpop.eup %7767  ;;  %7785 = vrcp.f32 %v5226_v14  ;;  %v7426_v55 = vmul.f32 -1.442695, %v5054_v37  ;;  %v6881_v35 = vpack.c.bf16 %v6851_v62, %v6849_v30  ;;  %v6880_v34 = vpack.c.bf16 %v6850_v50, %v6848_v46  ;;  %v13562_v46 = vld [vmem:[#allocation101_spill] sm:$0xff] }
 0x51b   :  { %v7770_v45 = vpop.eup %7769  ;;  %7787 = vrcp.f32 %v5227_v17  ;;  %v7427_v11 = vmul.f32 -1.442695, %v5056_v59  ;;  %v6821_v24 = vmul.f32 %v7768_v15, %v13559_v19  ;;  %v6820_v42 = vmul.f32 %v7766_v56, %v11516_v9  ;;  %v13565_v59 = vld [vmem:[#allocation210_spill] sm:$0xff] }
 0x51c   :  { %v7772_v61 = vpop.eup %7771  ;;  %7789 = vpow2.f32 %v7424_v22  ;;  %7132 = vmatprep.mubr.bf16.mxu1 %v6881_v35  ;;  %v6822_v43 = vmul.f32 %v7770_v45, %v11519_v6  ;;  %v11936_v53 = vsub.f32 %v13560_v48, %v5498_v57  ;;  %v13561_v30 = vrot.slane %v11772_v3, 2  ;;  %v13563_v22 = vld [vmem:[#allocation195_spill] sm:$0xff]  ;;  %v13566_v48 = vld [vmem:[#allocation212_spill] sm:$0xff] }
 0x51d   :  { %v7774_v62 = vpop.eup %7773  ;;  %7791 = vpow2.f32 %v7425_v58  ;;  %7133 = vmatmul.mubr.bf16.vlgmr.msra.gmra.mrb[144].mxu1 %v6880_v34  ;;  %v5059_v14 = vpop.f32.mrb[132].mxu1  ;;  %v6823_v9 = vmul.f32 %v7772_v61, %v11511_v41  ;;  %v6853_v37 = vadd.f32 %v6821_v24, %v13563_v22  ;;  %v6852_v6 = vadd.f32 %v6820_v42, %v13564_v5 }
 0x51e   :  { %v11941_v50 = vsub.f32 %v13562_v46, %v13561_v30  ;;  %v7776_v45 = vpop.eup %7775  ;;  %v5228_v56 = vadd.f32 1.0, %v7774_v62  ;;  %7793 = vpow2.f32 %v7426_v55  ;;  %v5060_v57 = vadd.f32 %v5059_v14, %v11528_v12  ;;  %v5061_v17 = vpop.f32.mrb[133].mxu1 }
 0x51f   :  { %v6854_v15 = vadd.f32 %v6822_v43, %v13565_v59  ;;  %v7778_v35 = vpop.eup %7777  ;;  %v5229_v19 = vadd.f32 1.0, %v7776_v45  ;;  %7795 = vpow2.f32 %v7427_v11  ;;  %v5062_v58 = vadd.f32 %v5061_v17, %v11642_v26  ;;  %v5063_v34 = vpop.f32.mrb[134].mxu1  ;;  %v13568_v17 = vld [vmem:[#allocation176_spill] sm:$0xff] }
 0x520   :  { %v6855_v41 = vadd.f32 %v6823_v9, %v13566_v48  ;;  %v7780_v61 = vpop.eup %7779  ;;  %7797 = vrcp.f32 %v5228_v56  ;;  %v5230_v24 = vadd.f32 1.0, %v7778_v35  ;;  %v7428_v42 = vmul.f32 -1.442695, %v5060_v57  ;;  %v5065_v55 = vpop.f32.mrb[135].mxu1 }
 0x521   :  { %v5064_v30 = vadd.f32 %v5063_v34, %v11528_v12  ;;  %7799 = vrcp.f32 %v5229_v19  ;;  %v5231_v46 = vadd.f32 1.0, %v7780_v61  ;;  %v7429_v62 = vmul.f32 -1.442695, %v5062_v58 }
 0x522   :  { %v5066_v43 = vadd.f32 %v5065_v55, %v11642_v26  ;;  %v7782_v14 = vpop.eup %7781  ;;  %7801 = vrcp.f32 %v5230_v24  ;;  %v6883_v22 = vpack.c.bf16 %v6855_v41, %v6853_v37  ;;  %v6882_v5 = vpack.c.bf16 %v6854_v15, %v6852_v6 }
 0x523   :  { %v7430_v11 = vmul.f32 -1.442695, %v5064_v30  ;;  %v7784_v45 = vpop.eup %7783  ;;  %7803 = vrcp.f32 %v5231_v46  ;;  %v6824_v56 = vmul.f32 %v7782_v14, %v11531_v20  ;;  %v13567_v57 = vrot.slane %v11772_v3, 3 }
 0x524   :  { %v7431_v9 = vmul.f32 -1.442695, %v5066_v43  ;;  %v7786_v35 = vpop.eup %7785  ;;  %7805 = vpow2.f32 %v7428_v42  ;;  %7142 = vmatprep.mubr.bf16.mxu1 %v6883_v22  ;;  %v6825_v19 = vmul.f32 %v7784_v45, %v11522_v33  ;;  %v6616_v58 = vrot.slane %v11893_v25, 7 }
 0x525   :  { %v11956_v59 = vsub.f32 %v13568_v17, %v13567_v57  ;;  %v6618_v37 = vrot.slane %v11897_v7, 6  ;;  %v7788_v6 = vpop.eup %7787  ;;  %7807 = vpow2.f32 %v7429_v62  ;;  %7143 = vmatmul.mubr.bf16.gmra.mrb[148].mxu1 %v6882_v5  ;;  %v5069_v15 = vpop.f32.mrb[136].mxu1  ;;  %v6826_v20 = vmul.f32 %v7786_v35, %v11534_v51 }
 0x526   :  { %v6856_v34 = vadd.f32 %v6824_v56, %v11160_v63  ;;  %v6620_v48 = vrot.slane %v11902_v39, 5  ;;  %v7790_v41 = vpop.eup %7789  ;;  %7809 = vpow2.f32 %v7430_v11  ;;  %v5070_v61 = vadd.f32 %v5069_v15, %v11528_v12  ;;  %v5071_v24 = vpop.f32.mrb[137].mxu1 }
 0x527   :  { %v6827_v33 = vmul.f32 %v7788_v6, %v11525_v27  ;;  %v6857_v25 = vadd.f32 %v6825_v19, %v11164_v54  ;;  %v7792_v7 = vpop.eup %7791  ;;  %v5232_v42 = vadd.f32 1.0, %v7790_v41  ;;  %7811 = vpow2.f32 %v7431_v9  ;;  %v5073_v55 = vpop.f32.mrb[138].mxu1 }
 0x528   :  { %v5072_v30 = vadd.f32 %v5071_v24, %v11642_v26  ;;  %v6858_v51 = vadd.f32 %v6826_v20, %v11166_v31  ;;  %v7794_v63 = vpop.eup %7793  ;;  %v5233_v46 = vadd.f32 1.0, %v7792_v7  ;;  %v5074_v62 = vadd.f32 %v5073_v55, %v11528_v12  ;;  %v5075_v43 = vpop.f32.mrb[139].mxu1 }
 0x529   :  { %v6859_v14 = vadd.f32 %v6827_v33, %v11176_v32  ;;  %v13569_v27 = vsub.f32 %v13542_v13, %v11738_v10  ;;  %v7796_v11 = vpop.eup %7795  ;;  %7813 = vrcp.f32 %v5232_v42  ;;  %v5234_v22 = vadd.f32 1.0, %v7794_v63 }
 0x52a   :  { %v7432_v5 = vmul.f32 -1.442695, %v5070_v61  ;;  %v5076_v45 = vadd.f32 %v5075_v43, %v11642_v26  ;;  %v7798_v9 = vpop.eup %7797  ;;  %7815 = vrcp.f32 %v5233_v46  ;;  %v5235_v31 = vadd.f32 1.0, %v7796_v11 }
 0x52b   :  { %v6617_v54 = vsel %vm4279_vm0, %v6616_v58, %v13569_v27  ;;  %v7433_v56 = vmul.f32 -1.442695, %v5072_v30  ;;  %v6885_v57 = vpack.c.bf16 %v6859_v14, %v6857_v25  ;;  %v7800_v17 = vpop.eup %7799  ;;  %7817 = vrcp.f32 %v5234_v22 }
 0x52c   :  { %v7434_v35 = vmul.f32 -1.442695, %v5074_v62  ;;  %v6884_v32 = vpack.c.bf16 %v6858_v51, %v6856_v34  ;;  %v6828_v19 = vmul.f32 %v7798_v9, %v11666_v29  ;;  %v7802_v13 = vpop.eup %7801  ;;  %7819 = vrcp.f32 %v5235_v31 }
 0x52d   :  { %v7435_v58 = vmul.f32 -1.442695, %v5076_v45  ;;  %7152 = vmatprep.mubr.bf16.mxu1 %v6885_v57  ;;  %v6829_v6 = vmul.f32 %v7800_v17, %v11654_v52  ;;  %v6619_v15 = vsel %vm4281_vm1, %v6618_v37, %v6617_v54  ;;  %v7804_v20 = vpop.eup %7803  ;;  %7821 = vpow2.f32 %v7432_v5  ;;  %v5079_v41 = vpop.f32.mrb[140].mxu1 }
 0x52e   :  { %7153 = vmatmul.mubr.bf16.gmra.mrb[152].mxu1 %v6884_v32  ;;  %v6830_v61 = vmul.f32 %v7802_v13, %v11669_v28  ;;  %v6860_v24 = vadd.f32 %v6828_v19, %v11361_v47  ;;  %v6622_v34 = vrot.slane %v11906_v2, 4  ;;  %v7806_v33 = vpop.eup %7805  ;;  %7823 = vpow2.f32 %v7433_v56  ;;  %v5081_v25 = vpop.f32.mrb[141].mxu1  ;;  %v13571_v56 = vld [vmem:[#allocation207_spill] sm:$0xff] }
 0x52f   :  { %v5080_v29 = vadd.f32 %v5079_v41, %v11528_v12  ;;  %v6831_v7 = vmul.f32 %v7804_v20, %v11659_v49  ;;  %v6861_v52 = vadd.f32 %v6829_v6, %v11368_v36  ;;  %v7808_v37 = vpop.eup %7807  ;;  %v5236_v42 = vadd.f32 1.0, %v7806_v33  ;;  %v5083_v55 = vpop.f32.mrb[142].mxu1  ;;  %v13572_v19 = vld [vmem:[#allocation255_spill] sm:$0xff] }
 0x530   :  { %7825 = vpow2.f32 %v7434_v35  ;;  %v5082_v30 = vadd.f32 %v5081_v25, %v11642_v26  ;;  %v6862_v28 = vadd.f32 %v6830_v61, %v11505_v0  ;;  %v7810_v47 = vpop.eup %7809  ;;  %v5237_v51 = vadd.f32 1.0, %v7808_v37  ;;  %v5085_v63 = vpop.f32.mrb[143].mxu1  ;;  %v13570_v0 = vld [vmem:[#allocation161_spill] sm:$0xff]  ;;  %v13576_v61 = vld [vmem:[#allocation110_spill] sm:$0xff]  ;;  %v13579_v37 = vld [vmem:[#allocation208_spill] sm:$0xff] }
 0x531   :  { %7827 = vpow2.f32 %v7435_v58  ;;  %v5084_v2 = vadd.f32 %v5083_v55, %v11528_v12  ;;  %v6621_v49 = vsel %vm4283_vm2, %v6620_v48, %v6619_v15  ;;  %v7812_v46 = vpop.eup %7811  ;;  %v5238_v36 = vadd.f32 1.0, %v7810_v47  ;;  %v13574_v15 = vld [vmem:[#allocation252_spill] sm:$0xff] }
 0x532   :  { %7829 = vrcp.f32 %v5236_v42  ;;  %v7436_v62 = vmul.f32 -1.442695, %v5080_v29  ;;  %v5086_v43 = vadd.f32 %v5085_v63, %v11642_v26  ;;  %v5239_v14 = vadd.f32 1.0, %v7812_v46  ;;  %v13578_v29 = vld [vmem:[#allocation185_spill] sm:$0xff]  ;;  %v13583_v46 = vld [vmem:[#allocation196_spill] sm:$0xff] }
 0x533   :  { %7831 = vrcp.f32 %v5237_v51  ;;  %v7437_v27 = vmul.f32 -1.442695, %v5082_v30  ;;  %v6863_v54 = vadd.f32 %v6831_v7, %v13570_v0  ;;  %v7814_v11 = vpop.eup %7813  ;;  %v7438_v22 = vmul.f32 -1.442695, %v5084_v2  ;;  %v13581_v2 = vld [vmem:[#allocation190_spill] sm:$0xff] }
 0x534   :  { %7833 = vrcp.f32 %v5238_v36  ;;  %v6886_v12 = vpack.c.bf16 %v6862_v28, %v6860_v24  ;;  %v6623_v5 = vsel %vm4285_vm3, %v6622_v34, %v6621_v49  ;;  %v7816_v39 = vpop.eup %7815  ;;  %v6832_v45 = vmul.f32 %v7814_v11, %v11790_v21  ;;  %v13573_v21 = vld [vmem:[#allocation231_spill] sm:$0xff] }
 0x535   :  { %7835 = vrcp.f32 %v5239_v14  ;;  %v6887_v48 = vpack.c.bf16 %v6863_v54, %v6861_v52  ;;  %v6624_v9 = vrot.slane %v11910_v38, 3  ;;  %v7818_v31 = vpop.eup %7817  ;;  %v7439_v26 = vmul.f32 -1.442695, %v5086_v43 }
 0x536   :  { %7837 = vpow2.f32 %v7436_v62  ;;  %v6833_v57 = vmul.f32 %v7816_v39, %v13571_v56  ;;  %v6626_v17 = vrot.slane %v11915_v44, 2  ;;  %v7820_v35 = vpop.eup %7819  ;;  %v6834_v32 = vmul.f32 %v7818_v31, %v11805_v40 }
 0x537   :  { %7839 = vpow2.f32 %v7437_v27  ;;  %7162 = vmatprep.mubr.bf16.mxu1 %v6887_v48  ;;  %v6864_v13 = vadd.f32 %v6832_v45, %v13572_v19  ;;  %v6625_v58 = vsel %vm4287_vm4, %v6624_v9, %v6623_v5  ;;  %v7822_v6 = vpop.eup %7821  ;;  %v6835_v38 = vmul.f32 %v7820_v35, %v13573_v21 }
 0x538   :  { %7841 = vpow2.f32 %v7438_v22  ;;  %7163 = vmatmul.mubr.bf16.gmra.mrb[156].mxu1 %v6886_v12  ;;  %v6865_v20 = vadd.f32 %v6833_v57, %v13574_v15  ;;  %v13575_v41 = vrot.slane %v11772_v3, 4  ;;  %v7824_v24 = vpop.eup %7823  ;;  %v5240_v34 = vadd.f32 1.0, %v7822_v6  ;;  %v13585_v57 = vld [vmem:[#allocation234_spill] sm:$0xff] }
 0x539   :  { %v6866_v33 = vadd.f32 %v6834_v32, %v11663_v16  ;;  %v13577_v40 = vrot.slane %v11772_v3, 5  ;;  %v6627_v7 = vsel %vm4289_vm5, %v6626_v17, %v6625_v58  ;;  %v6867_v42 = vadd.f32 %v6835_v38, %v13579_v37 }
 0x53a   :  { %v6008_v44 = vsub.f32 %v13576_v61, %v13575_v41  ;;  %v7826_v52 = vpop.eup %7825  ;;  %v6628_v30 = vrot.slane %v11920_v4, 1  ;;  %v6644_v55 = vrot.slane %v11936_v53, 7  ;;  %v6646_v28 = vrot.slane %v11941_v50, 6 }
 0x53b   :  { %v6010_v25 = vsub.f32 %v13578_v29, %v13577_v40  ;;  %v7828_v47 = vpop.eup %7827  ;;  %7843 = vpow2.f32 %v7439_v26  ;;  %v6888_v51 = vpack.c.bf16 %v6866_v33, %v6864_v13  ;;  %v13580_v16 = vrot.slane %v11772_v3, 6 }
 0x53c   :  { %v13582_v49 = vrot.slane %v11772_v3, 7  ;;  %v7830_v62 = vpop.eup %7829  ;;  %v6889_v43 = vpack.c.bf16 %v6867_v42, %v6865_v20  ;;  %v6629_v14 = vsel %vm4291_vm6, %v6628_v30, %v6627_v7  ;;  %v13584_v4 = vsub.f32 %v13558_v18, %v11772_v3  ;;  %v13588_v7 = vld [vmem:[#allocation220_spill] sm:$0xff] }
 0x53d   :  { %v6012_v63 = vsub.f32 %v13581_v2, %v13580_v16  ;;  %v6648_v50 = vrot.slane %v11956_v59, 5  ;;  %v7832_v27 = vpop.eup %7831  ;;  %7845 = vrcp.f32 %v5240_v34  ;;  %v5241_v0 = vadd.f32 1.0, %v7824_v24  ;;  %v13587_v24 = vld [vmem:[#allocation236_spill] sm:$0xff]  ;;  %v13589_v16 = vld [vmem:[#allocation151_spill] sm:$0xff] }
 0x53e   :  { %v6014_v36 = vsub.f32 %v13583_v46, %v13582_v49  ;;  %v6645_v53 = vsel %vm4279_vm0, %v6644_v55, %v13584_v4  ;;  %v6650_v11 = vrot.slane %v6008_v44, 4  ;;  %v7834_v22 = vpop.eup %7833  ;;  %v5242_v12 = vadd.f32 1.0, %v7826_v52  ;;  %7172 = vmatprep.mubr.bf16.mxu1 %v6889_v43  ;;  %v13591_v43 = vld [vmem:[#allocation149_spill] sm:$0xff]  ;;  %v13592_v4 = vld [vmem:[#allocation143_spill] sm:$0xff] }
 0x53f   :  { %v6647_v54 = vsel %vm4281_vm1, %v6646_v28, %v6645_v53  ;;  %v6837_v5 = vmul.f32 %v7832_v27, %v11866_v1  ;;  %v6652_v48 = vrot.slane %v6010_v25, 3  ;;  %v7836_v45 = vpop.eup %7835  ;;  %v5243_v18 = vadd.f32 1.0, %v7828_v47 }
 0x540   :  { %v6649_v39 = vsel %vm4283_vm2, %v6648_v50, %v6647_v54  ;;  %v6654_v31 = vrot.slane %v6012_v63, 2  ;;  %v6836_v59 = vmul.f32 %v7830_v62, %v6629_v14  ;;  %v7838_v26 = vpop.eup %7837  ;;  %7173 = vmatmul.mubr.bf16.gmra.mrb[160].mxu1 %v6888_v51  ;;  %v6839_v56 = vmul.f32 %v7836_v45, %v11873_v60  ;;  %v13586_v60 = vld [vmem:[#allocation310_spill] sm:$0xff]  ;;  %v13590_v63 = vld [vmem:[#allocation205_spill] sm:$0xff] }
 0x541   :  { %v6651_v9 = vsel %vm4285_vm3, %v6650_v11, %v6649_v39  ;;  %v6869_v17 = vadd.f32 %v6837_v5, %v13585_v57  ;;  %v6656_v32 = vrot.slane %v6014_v36, 1  ;;  %v7840_v19 = vpop.eup %7839  ;;  %7847 = vrcp.f32 %v5241_v0  ;;  %v13593_v50 = vld [vmem:[#allocation77_spill] sm:$0xff]  ;;  %v13595_v11 = vld [vmem:[#allocation170_spill] sm:$0xff]  ;;  %v13596_v5 = vld [vmem:[#allocation155_spill] sm:$0xff] }
 0x542   :  { %v6653_v35 = vsel %vm4287_vm4, %v6652_v48, %v6651_v9  ;;  %v5244_v1 = vadd.f32 1.0, %v7838_v26  ;;  %v6868_v58 = vadd.f32 %v6836_v59, %v11738_v10  ;;  %v7842_v6 = vpop.eup %7841  ;;  %7849 = vrcp.f32 %v5242_v12  ;;  %v13594_v0 = vld [vmem:[#allocation169_spill] sm:$0xff]  ;;  %v13597_v48 = vld [vmem:[#allocation158_spill] sm:$0xff] }
 0x543   :  { %v6655_v13 = vsel %vm4289_vm5, %v6654_v31, %v6653_v35  ;;  %v5245_v21 = vadd.f32 1.0, %v7840_v19  ;;  %v6871_v38 = vadd.f32 %v6839_v56, %v11776_v8  ;;  %v12039_v20 = vmax.f32 %v13586_v60, 0.0  ;;  %v13599_v31 = vld [vmem:[#allocation229_spill] sm:$0xff]  ;;  %v13600_v56 = vld [vmem:[#allocation168_spill] sm:$0xff] }
 0x544   :  { %v6657_v15 = vsel %vm4291_vm6, %v6656_v32, %v6655_v13  ;;  %v12042_v41 = vmax.f32 %v11862_v23, 0.0  ;;  %7851 = vrcp.f32 %v5243_v18  ;;  %v5513_v34 = vrot.slane %v13587_v24, 1  ;;  %v13598_v18 = vld [vmem:[#allocation223_spill] sm:$0xff]  ;;  %v13602_v13 = vld [vmem:[#allocation242_spill] sm:$0xff] }
 0x545   :  { %v6838_v61 = vmul.f32 %v7834_v22, %v6657_v15  ;;  %v6891_v44 = vpack.c.bf16 %v6871_v38, %v6869_v17  ;;  %v5515_v10 = vrot.slane %v13587_v24, 2  ;;  %v5517_v33 = vrot.slane %v13587_v24, 3  ;;  %v7844_v40 = vpop.eup %7843  ;;  %v13601_v17 = vld [vmem:[#allocation180_spill] sm:$0xff]  ;;  %v13604_v38 = vld [vmem:[#allocation261_spill] sm:$0xff] }
 0x546   :  { %7853 = vrcp.f32 %v5244_v1  ;;  %v12047_v8 = vadd.f32 1.0, %v7842_v6  ;;  %v5519_v25 = vrot.slane %v13587_v24, 4  ;;  %v5521_v23 = vrot.slane %v13587_v24, 5  ;;  %v13603_v6 = vld [vmem:[#allocation245_spill] sm:$0xff] }
 0x547   :  { %v6870_v29 = vadd.f32 %v6838_v61, %v11772_v3  ;;  %7855 = vrcp.f32 %v5245_v21  ;;  %7182 = vmatprep.mubr.bf16.mxu1 %v6891_v44  ;;  %v5527_v52 = vrot.slane %v13588_v7, 1  ;;  %v5529_v37 = vrot.slane %v13588_v7, 2  ;;  %v12054_v42 = vpop.eup %7845 }
 0x548   :  { %v5523_v55 = vrot.slane %v13587_v24, 6  ;;  %v5525_v28 = vrot.slane %v13587_v24, 7  ;;  %v5531_v47 = vrot.slane %v13588_v7, 3  ;;  %v12059_v3 = vadd.f32 1.0, %v7844_v40 }
 0x549   :  { %v6890_v30 = vpack.c.bf16 %v6870_v29, %v6868_v58  ;;  %v5533_v51 = vrot.slane %v13588_v7, 4  ;;  %v6019_v2 = vsub.f32 %v13589_v16, %v5513_v34  ;;  %v6021_v49 = vsub.f32 %v13590_v63, %v5515_v10 }
 0x54a   :  { %v5535_v46 = vrot.slane %v13588_v7, 5  ;;  %v5537_v36 = vrot.slane %v13588_v7, 6  ;;  %v5539_v62 = vrot.slane %v13588_v7, 7  ;;  %v6017_v14 = vsub.f32 %v13591_v43, %v13587_v24 }
 0x54b   :  { %7183 = vmatmul.mubr.bf16.gmra.mrb[164].mxu1 %v6890_v30  ;;  %v6023_v53 = vsub.f32 %v13592_v4, %v5517_v33  ;;  %v6025_v27 = vsub.f32 %v13593_v50, %v5519_v25  ;;  %v6035_v54 = vsub.f32 %v13594_v0, %v5527_v52  ;;  %v6037_v22 = vsub.f32 %v13595_v11, %v5529_v37  ;;  %v7848_v12 = vpop.eup %7847 }
 0x54c   :  { %v6027_v39 = vsub.f32 %v13596_v5, %v5521_v23  ;;  %v6029_v45 = vsub.f32 %v13597_v48, %v5523_v55  ;;  %v6031_v9 = vsub.f32 %v13598_v18, %v5525_v28  ;;  %v6039_v59 = vsub.f32 %v13599_v31, %v5531_v47  ;;  %v12077_v26 = vpop.eup %7849 }
 0x54d   :  { %v6033_v57 = vsub.f32 %v13600_v56, %v13588_v7  ;;  %v6041_v35 = vsub.f32 %v13601_v17, %v5533_v51  ;;  %v6686_v32 = vrot.slane %v6019_v2, 7  ;;  %v6688_v19 = vrot.slane %v6021_v49, 6  ;;  %v13607_v17 = vld [vmem:[#allocation91_spill] sm:$0xff] }
 0x54e   :  { %v7852_v1 = vpop.eup %7851  ;;  %v6043_v58 = vsub.f32 %v13602_v13, %v5535_v46  ;;  %v6045_v21 = vsub.f32 %v13603_v6, %v5537_v36  ;;  %v6047_v15 = vsub.f32 %v13604_v38, %v5539_v62  ;;  %v6714_v60 = vrot.slane %v6035_v54, 7  ;;  %v13609_v6 = vld [vmem:[#allocation150_spill] sm:$0xff] }
 0x54f   :  { %v6687_v61 = vsel %vm4279_vm0, %v6686_v32, %v6017_v14  ;;  %v6690_v44 = vrot.slane %v6023_v53, 5  ;;  %v6692_v34 = vrot.slane %v6025_v27, 4  ;;  %v6716_v10 = vrot.slane %v6037_v22, 6  ;;  %v13605_v14 = vld [vmem:[#allocation216_spill] sm:$0xff] }
 0x550   :  { %v12086_v33 = vpop.eup %7853  ;;  %v6689_v40 = vsel %vm4281_vm1, %v6688_v19, %v6687_v61  ;;  %v6694_v29 = vrot.slane %v6027_v39, 3  ;;  %v6715_v25 = vsel %vm4279_vm0, %v6714_v60, %v6033_v57  ;;  %v6718_v23 = vrot.slane %v6039_v59, 5  ;;  %v13606_v39 = vld [vmem:[#allocation299_spill] sm:$0xff] }
 0x551   :  { %v12090_v52 = vpop.eup %7855  ;;  %v6691_v37 = vsel %vm4283_vm2, %v6690_v44, %v6689_v40  ;;  %v6696_v30 = vrot.slane %v6029_v45, 2  ;;  %v6717_v55 = vsel %vm4281_vm1, %v6716_v10, %v6715_v25  ;;  %v6720_v28 = vrot.slane %v6041_v35, 4  ;;  %v13612_v44 = vld [vmem:[#allocation147_spill] sm:$0xff]  ;;  %v13614_v40 = vld [vmem:[#allocation224_spill] sm:$0xff] }
 0x552   :  { %v6693_v47 = vsel %vm4285_vm3, %v6692_v34, %v6691_v37  ;;  %v6698_v51 = vrot.slane %v6031_v9, 1  ;;  %v6719_v16 = vsel %vm4283_vm2, %v6718_v23, %v6717_v55  ;;  %v6722_v2 = vrot.slane %v6043_v58, 3  ;;  %v13613_v10 = vld [vmem:[#allocation87_spill] sm:$0xff]  ;;  %v13615_v25 = vld [vmem:[#allocation156_spill] sm:$0xff]  ;;  %v13617_v55 = vld [vmem:[#allocation226_spill] sm:$0xff] }
 0x553   :  { %v6695_v63 = vsel %vm4287_vm4, %v6694_v29, %v6693_v47  ;;  %v6721_v49 = vsel %vm4285_vm3, %v6720_v28, %v6719_v16  ;;  %v6724_v46 = vrot.slane %v6045_v21, 2  ;;  %v6726_v36 = vrot.slane %v6047_v15, 1  ;;  %v13611_v15 = vld [vmem:[#allocation166_spill] sm:$0xff]  ;;  %v13616_v37 = vld [vmem:[#allocation219_spill] sm:$0xff] }
 0x554   :  { %v6697_v62 = vsel %vm4289_vm5, %v6696_v30, %v6695_v63  ;;  %v6723_v43 = vsel %vm4287_vm4, %v6722_v2, %v6721_v49  ;;  %v5512_v4 = vrot.slane %v13605_v14, 1  ;;  %v5514_v53 = vrot.slane %v13605_v14, 2  ;;  %v13619_v2 = vld [vmem:[#allocation230_spill] sm:$0xff]  ;;  %v13620_v49 = vld [vmem:[#allocation241_spill] sm:$0xff] }
 0x555   :  { %v6699_v50 = vsel %vm4291_vm6, %v6698_v51, %v6697_v62  ;;  %v6725_v27 = vsel %vm4289_vm5, %v6724_v46, %v6723_v43  ;;  %v5516_v0 = vrot.slane %v13605_v14, 3  ;;  %v5518_v54 = vrot.slane %v13605_v14, 4  ;;  %v13618_v51 = vld [vmem:[#allocation164_spill] sm:$0xff] }
 0x556   :  { %v6727_v11 = vsel %vm4291_vm6, %v6726_v36, %v6725_v27  ;;  %v6841_v22 = vmul.f32 %v7848_v12, %v6699_v50  ;;  %v5520_v5 = vrot.slane %v13605_v14, 5  ;;  %v5526_v48 = vrot.slane %v13606_v39, 1  ;;  %v13621_v62 = vld [vmem:[#allocation244_spill] sm:$0xff]  ;;  %v13622_v27 = vld [vmem:[#allocation250_spill] sm:$0xff] }
 0x557   :  { %v6843_v45 = vmul.f32 %v7852_v1, %v6727_v11  ;;  %v5522_v18 = vrot.slane %v13605_v14, 6  ;;  %v5524_v9 = vrot.slane %v13605_v14, 7  ;;  %v5528_v31 = vrot.slane %v13606_v39, 2  ;;  %v13608_v1 = vld [vmem:[#allocation204_spill] sm:$0xff] }
 0x558   :  { %v6873_v59 = vadd.f32 %v6841_v22, %v13587_v24  ;;  %v5530_v56 = vrot.slane %v13606_v39, 3  ;;  %v5532_v57 = vrot.slane %v13606_v39, 4  ;;  %v6018_v35 = vsub.f32 %v13607_v17, %v5512_v4  ;;  %v13610_v24 = vld [vmem:[#allocation141_spill] sm:$0xff] }
 0x559   :  { %v6875_v12 = vadd.f32 %v6843_v45, %v13588_v7  ;;  %v5534_v32 = vrot.slane %v13606_v39, 5  ;;  %v5536_v19 = vrot.slane %v13606_v39, 6  ;;  %v6020_v13 = vsub.f32 %v13608_v1, %v5514_v53 }
 0x55a   :  { %v5538_v58 = vrot.slane %v13606_v39, 7  ;;  %v6016_v21 = vsub.f32 %v13609_v6, %v13605_v14  ;;  %v6022_v38 = vsub.f32 %v13610_v24, %v5516_v0  ;;  %v6034_v60 = vsub.f32 %v13611_v15, %v5526_v48 }
 0x55b   :  { %v6893_v61 = vpack.c.bf16 %v6875_v12, %v6873_v59  ;;  %v6024_v34 = vsub.f32 %v13612_v44, %v5518_v54  ;;  %v6026_v7 = vsub.f32 %v13613_v10, %v5520_v5  ;;  %v6036_v29 = vsub.f32 %v13614_v40, %v5528_v31 }
 0x55c   :  { %v6028_v23 = vsub.f32 %v13615_v25, %v5522_v18  ;;  %v6030_v30 = vsub.f32 %v13616_v37, %v5524_v9  ;;  %v6038_v28 = vsub.f32 %v13617_v55, %v5530_v56  ;;  %v6672_v47 = vrot.slane %v6018_v35, 7  ;;  %v13624_v37 = vld [vmem:[#allocation292_spill] sm:$0xff]  ;;  %v13625_v55 = vld [vmem:[#allocation213_spill] sm:$0xff] }
 0x55d   :  { %7192 = vmatprep.mubr.bf16.mxu1 %v6893_v61  ;;  %v6032_v16 = vsub.f32 %v13618_v51, %v13606_v39  ;;  %v6040_v63 = vsub.f32 %v13619_v2, %v5532_v57  ;;  %v6042_v46 = vsub.f32 %v13620_v49, %v5534_v32  ;;  %v6674_v36 = vrot.slane %v6020_v13, 6  ;;  %v13626_v2 = vld [vmem:[#allocation296_spill] sm:$0xff]  ;;  %v13627_v49 = vld [vmem:[#allocation307_spill] sm:$0xff] }
 0x55e   :  { %v6044_v43 = vsub.f32 %v13621_v62, %v5536_v19  ;;  %v6673_v4 = vsel %vm4279_vm0, %v6672_v47, %v6016_v21  ;;  %v6676_v53 = vrot.slane %v6022_v38, 5  ;;  %v6700_v50 = vrot.slane %v6034_v60, 7  ;;  %v13623_v21 = vld [vmem:[#allocation133_spill] sm:$0xff] }
 0x55f   :  { %v6046_v0 = vsub.f32 %v13622_v27, %v5538_v58  ;;  %v6675_v54 = vsel %vm4281_vm1, %v6674_v36, %v6673_v4  ;;  %v6678_v11 = vrot.slane %v6024_v34, 4  ;;  %v6702_v22 = vrot.slane %v6036_v29, 6  ;;  %v13628_v36 = vld [vmem:[#allocation254_spill] sm:$0xff]  ;;  %v13629_v4 = vld [vmem:[#allocation285_spill] sm:$0xff]  ;;  %v13631_v27 = vld [vmem:[#allocation188_spill] sm:$0xff] }
 0x560   :  { %v6677_v5 = vsel %vm4283_vm2, %v6676_v53, %v6675_v54  ;;  %v6680_v48 = vrot.slane %v6026_v7, 3  ;;  %v6701_v45 = vsel %vm4279_vm0, %v6700_v50, %v6032_v16  ;;  %v6704_v18 = vrot.slane %v6038_v28, 5  ;;  %v13630_v50 = vld [vmem:[#allocation191_spill] sm:$0xff]  ;;  %v13632_v54 = vld [vmem:[#allocation225_spill] sm:$0xff] }
 0x561   :  { %v6679_v9 = vsel %vm4285_vm3, %v6678_v11, %v6677_v5  ;;  %v6682_v31 = vrot.slane %v6028_v23, 2  ;;  %v6703_v59 = vsel %vm4281_vm1, %v6702_v22, %v6701_v45  ;;  %v6706_v56 = vrot.slane %v6040_v63, 4  ;;  %v13633_v22 = vld [vmem:[#allocation257_spill] sm:$0xff] }
 0x562   :  { %v6681_v57 = vsel %vm4287_vm4, %v6680_v48, %v6679_v9  ;;  %v6684_v17 = vrot.slane %v6030_v30, 1  ;;  %v6705_v35 = vsel %vm4283_vm2, %v6704_v18, %v6703_v59  ;;  %v6708_v12 = vrot.slane %v6042_v46, 3  ;;  %v13634_v18 = vld [vmem:[#allocation305_spill] sm:$0xff] }
 0x563   :  { %v6683_v32 = vsel %vm4289_vm5, %v6682_v31, %v6681_v57  ;;  %v6707_v19 = vsel %vm4285_vm3, %v6706_v56, %v6705_v35  ;;  %v6710_v1 = vrot.slane %v6044_v43, 2  ;;  %v6712_v13 = vrot.slane %v6046_v0, 1  ;;  %v13635_v31 = vld [vmem:[#allocation302_spill] sm:$0xff]  ;;  %v13636_v56 = vld [vmem:[#allocation263_spill] sm:$0xff] }
 0x564   :  { %v6685_v58 = vsel %vm4291_vm6, %v6684_v17, %v6683_v32  ;;  %v6709_v6 = vsel %vm4287_vm4, %v6708_v12, %v6707_v19  ;;  %v5541_v24 = vrot.slane %v13623_v21, 1  ;;  %v5543_v38 = vrot.slane %v13623_v21, 2  ;;  %v13637_v17 = vld [vmem:[#allocation314_spill] sm:$0xff] }
 0x565   :  { %7857 = vrcp.f32 %v12059_v3  ;;  %v6711_v15 = vsel %vm4289_vm5, %v6710_v1, %v6709_v6  ;;  %v6840_v60 = vmul.f32 %v12054_v42, %v6685_v58  ;;  %v5545_v61 = vrot.slane %v13623_v21, 3  ;;  %v13638_v58 = vld [vmem:[#allocation315_spill] sm:$0xff] }
 0x566   :  { %v6713_v44 = vsel %vm4291_vm6, %v6712_v13, %v6711_v15  ;;  %v5547_v34 = vrot.slane %v13623_v21, 4  ;;  %v5555_v10 = vrot.slane %v12042_v41, 1  ;;  %v5557_v7 = vrot.slane %v12042_v41, 2 }
 0x567   :  { %v6842_v40 = vmul.f32 %v12077_v26, %v6713_v44  ;;  %v6872_v29 = vadd.f32 %v6840_v60, %v13605_v14  ;;  %v5549_v3 = vrot.slane %v13623_v21, 5  ;;  %v5551_v25 = vrot.slane %v13623_v21, 6 }
 0x568   :  { %v5553_v42 = vrot.slane %v13623_v21, 7  ;;  %v5559_v23 = vrot.slane %v12042_v41, 3  ;;  %v6051_v30 = vsub.f32 %v13624_v37, %v5541_v24  ;;  %v6053_v28 = vsub.f32 %v13625_v55, %v5543_v38  ;;  %v13639_v24 = vld [vmem:[#allocation318_spill] sm:$0xff] }
 0x569   :  { %v6874_v47 = vadd.f32 %v6842_v40, %v13606_v39  ;;  %v5561_v51 = vrot.slane %v12042_v41, 4  ;;  %v5563_v26 = vrot.slane %v12042_v41, 5  ;;  %v5565_v14 = vrot.slane %v12042_v41, 6 }
 0x56a   :  { %v5567_v16 = vrot.slane %v12042_v41, 7  ;;  %v6055_v63 = vsub.f32 %v13626_v2, %v5545_v61  ;;  %v6067_v46 = vsub.f32 %v13627_v49, %v5555_v10  ;;  %v6069_v62 = vsub.f32 %v13628_v36, %v5557_v7 }
 0x56b   :  { %v6892_v43 = vpack.c.bf16 %v6874_v47, %v6872_v29  ;;  %v6049_v53 = vsub.f32 %v13629_v4, %v13623_v21  ;;  %v6057_v39 = vsub.f32 %v13630_v50, %v5547_v34  ;;  %v6059_v0 = vsub.f32 %v13631_v27, %v5549_v3 }
 0x56c   :  { %v6061_v11 = vsub.f32 %v13632_v54, %v5551_v25  ;;  %v6071_v5 = vsub.f32 %v13633_v22, %v5559_v23  ;;  %v6742_v48 = vrot.slane %v6051_v30, 7  ;;  %v6744_v45 = vrot.slane %v6053_v28, 6 }
 0x56d   :  { %7193 = vmatmul.mubr.bf16.gmra.mrb[168].mxu1 %v6892_v43  ;;  %v6063_v9 = vsub.f32 %v13634_v18, %v5553_v42  ;;  %v6065_v59 = vsub.f32 %v13635_v31, %v12042_v41  ;;  %v6073_v57 = vsub.f32 %v13636_v56, %v5561_v51  ;;  %v6075_v35 = vsub.f32 %v13637_v17, %v5563_v26 }
 0x56e   :  { %v6743_v12 = vsel %vm4279_vm0, %v6742_v48, %v6049_v53  ;;  %v6746_v32 = vrot.slane %v6055_v63, 5  ;;  %v6770_v19 = vrot.slane %v6067_v46, 7  ;;  %v6772_v1 = vrot.slane %v6069_v62, 6 }
 0x56f   :  { %v7858_v13 = vpop.eup %7857  ;;  %v6077_v6 = vsub.f32 %v13638_v58, %v5565_v14  ;;  %v6079_v38 = vsub.f32 %v13639_v24, %v5567_v16  ;;  %v6745_v15 = vsel %vm4281_vm1, %v6744_v45, %v6743_v12  ;;  %v6748_v60 = vrot.slane %v6057_v39, 4  ;;  %v13640_v14 = vld [vmem:[#allocation251_spill] sm:$0xff]  ;;  %v13650_v24 = vld [vmem:[#allocation256_spill] sm:$0xff] }
 0x570   :  { %v6747_v61 = vsel %vm4283_vm2, %v6746_v32, %v6745_v15  ;;  %v6750_v44 = vrot.slane %v6059_v0, 3  ;;  %v6771_v34 = vsel %vm4279_vm0, %v6770_v19, %v6065_v59  ;;  %v6774_v10 = vrot.slane %v6071_v5, 5  ;;  %v13641_v0 = vld [vmem:[#allocation290_spill] sm:$0xff]  ;;  %v13644_v59 = vld [vmem:[#allocation237_spill] sm:$0xff]  ;;  %v13646_v12 = vld [vmem:[#allocation283_spill] sm:$0xff] }
 0x571   :  { %v6749_v7 = vsel %vm4285_vm3, %v6748_v60, %v6747_v61  ;;  %v6752_v40 = vrot.slane %v6061_v11, 2  ;;  %v6773_v29 = vsel %vm4281_vm1, %v6772_v1, %v6771_v34  ;;  %v6776_v3 = vrot.slane %v6073_v57, 4  ;;  %v13642_v11 = vld [vmem:[#allocation209_spill] sm:$0xff]  ;;  %v13648_v1 = vld [vmem:[#allocation215_spill] sm:$0xff]  ;;  %v13652_v34 = vld [vmem:[#allocation228_spill] sm:$0xff] }
 0x572   :  { %v6751_v25 = vsel %vm4287_vm4, %v6750_v44, %v6749_v7  ;;  %v6754_v42 = vrot.slane %v6063_v9, 1  ;;  %v6775_v23 = vsel %vm4283_vm2, %v6774_v10, %v6773_v29  ;;  %v6778_v37 = vrot.slane %v6075_v35, 3  ;;  %v13643_v9 = vld [vmem:[#allocation294_spill] sm:$0xff]  ;;  %v13645_v57 = vld [vmem:[#allocation249_spill] sm:$0xff]  ;;  %v13649_v58 = vld [vmem:[#allocation175_spill] sm:$0xff] }
 0x573   :  { %v6753_v30 = vsel %vm4289_vm5, %v6752_v40, %v6751_v25  ;;  %v6777_v55 = vsel %vm4285_vm3, %v6776_v3, %v6775_v23  ;;  %v6780_v28 = vrot.slane %v6077_v6, 2  ;;  %v6782_v47 = vrot.slane %v6079_v38, 1  ;;  %v13647_v19 = vld [vmem:[#allocation297_spill] sm:$0xff]  ;;  %v13651_v61 = vld [vmem:[#allocation247_spill] sm:$0xff]  ;;  %v13654_v29 = vld [vmem:[#allocation276_spill] sm:$0xff] }
 0x574   :  { %v6755_v51 = vsel %vm4291_vm6, %v6754_v42, %v6753_v30  ;;  %v6779_v26 = vsel %vm4287_vm4, %v6778_v37, %v6777_v55  ;;  %v5540_v16 = vrot.slane %v13640_v14, 1  ;;  %v5542_v2 = vrot.slane %v13640_v14, 2  ;;  %v13653_v7 = vld [vmem:[#allocation259_spill] sm:$0xff]  ;;  %v13655_v55 = vld [vmem:[#allocation278_spill] sm:$0xff] }
 0x575   :  { %7859 = vrcp.f32 %v12047_v8  ;;  %v6781_v63 = vsel %vm4289_vm5, %v6780_v28, %v6779_v26  ;;  %v6845_v49 = vmul.f32 %v12090_v52, %v6755_v51  ;;  %v5544_v46 = vrot.slane %v13640_v14, 3 }
 0x576   :  { %v6783_v36 = vsel %vm4291_vm6, %v6782_v47, %v6781_v63  ;;  %v5546_v62 = vrot.slane %v13640_v14, 4  ;;  %v5554_v43 = vrot.slane %v12039_v20, 1  ;;  %v5556_v4 = vrot.slane %v12039_v20, 2  ;;  %v13656_v47 = vld [vmem:[#allocation288_spill] sm:$0xff] }
 0x577   :  { %v6847_v53 = vmul.f32 %v7858_v13, %v6783_v36  ;;  %v6877_v50 = vadd.f32 %v6845_v49, %v13623_v21  ;;  %v5548_v39 = vrot.slane %v13640_v14, 5  ;;  %v5550_v8 = vrot.slane %v13640_v14, 6 }
 0x578   :  { %v5552_v27 = vrot.slane %v13640_v14, 7  ;;  %v5558_v52 = vrot.slane %v12039_v20, 3  ;;  %v6050_v54 = vsub.f32 %v13641_v0, %v5540_v16  ;;  %v6052_v22 = vsub.f32 %v13642_v11, %v5542_v2 }
 0x579   :  { %v6879_v5 = vadd.f32 %v6847_v53, %v12042_v41  ;;  %v5560_v48 = vrot.slane %v12039_v20, 4  ;;  %v5562_v45 = vrot.slane %v12039_v20, 5  ;;  %v5564_v21 = vrot.slane %v12039_v20, 6 }
 0x57a   :  { %v5566_v18 = vrot.slane %v12039_v20, 7  ;;  %v6054_v31 = vsub.f32 %v13643_v9, %v5544_v46  ;;  %v6066_v56 = vsub.f32 %v13644_v59, %v5554_v43  ;;  %v6068_v17 = vsub.f32 %v13645_v57, %v5556_v4  ;;  %v6928_v59 = vld [vmem:[%s12319_s6] sm:$0x3]  ;;  %s8024_s6 = smov [#allocation11]  }
 0x57b   :  { %v6895_v35 = vpack.c.bf16 %v6879_v5, %v6877_v50  ;;  %v6048_v32 = vsub.f32 %v13646_v12, %v13640_v14  ;;  %v6056_v41 = vsub.f32 %v13647_v19, %v5546_v62  ;;  %v6058_v13 = vsub.f32 %v13648_v1, %v5548_v39  ;;  %s7250_s23 = sshll.u32 %s8024_s6, 4  ;;  %s7251_s23 = int_to_ptr.vmem [resolvable:$true] %s7250_s23 }
 0x57c   :  { %v6060_v6 = vsub.f32 %v13649_v58, %v5550_v8  ;;  %v6070_v38 = vsub.f32 %v13650_v24, %v5558_v52  ;;  %v6728_v15 = vrot.slane %v6050_v54, 7  ;;  %v6730_v60 = vrot.slane %v6052_v22, 6  ;;  %s7982_s24 = scalar_lea.vmem %s7251_s23, 4096  ;;  %p7987_p13 = scmp.lt.s32.totalorder %s7251_s23, %s7251_s23 }
 0x57d   :  { %7202 = vmatprep.mubr.bf16.mxu1 %v6895_v35  ;;  %v6062_v44 = vsub.f32 %v13651_v61, %v5552_v27  ;;  %v6064_v10 = vsub.f32 %v13652_v34, %v12039_v20  ;;  %v6072_v40 = vsub.f32 %v13653_v7, %v5560_v48  ;;  %v6074_v3 = vsub.f32 %v13654_v29, %v5562_v45  ;;  %p7983_p12 = scmp.ne.s32.totalorder %s7251_s23, %s7982_s24  ;;  %p7988_p0 = scmp.lt.s32.totalorder %s7982_s24, %s7982_s24 }
 0x57e   :  { %v6729_v25 = vsel %vm4279_vm0, %v6728_v15, %v6048_v32  ;;  %v6732_v42 = vrot.slane %v6054_v31, 5  ;;  %v6756_v23 = vrot.slane %v6066_v56, 7  ;;  %v6758_v37 = vrot.slane %v6068_v17, 6  ;;  %v13657_v56 = vld [vmem:[#allocation194_spill] sm:$0xff] }
 0x57f   :  { %v7860_v30 = vpop.eup %7859  ;;  %v6076_v28 = vsub.f32 %v13655_v55, %v5564_v21  ;;  %v6078_v51 = vsub.f32 %v13656_v47, %v5566_v18  ;;  %v6731_v26 = vsel %vm4281_vm1, %v6730_v60, %v6729_v25  ;;  %v6734_v16 = vrot.slane %v6056_v41, 4  ;;  %p7989_p1 = por %p7988_p0, %p7987_p13 }
 0x580   :  { %v6733_v2 = vsel %vm4283_vm2, %v6732_v42, %v6731_v26  ;;  %v6736_v63 = vrot.slane %v6058_v13, 3  ;;  %v6757_v49 = vsel %vm4279_vm0, %v6756_v23, %v6064_v10  ;;  %v6760_v46 = vrot.slane %v6070_v38, 5 }
 0x581   :  { %v6735_v36 = vsel %vm4285_vm3, %v6734_v16, %v6733_v2  ;;  %v6738_v62 = vrot.slane %v6060_v6, 2  ;;  %v6759_v43 = vsel %vm4281_vm1, %v6758_v37, %v6757_v49  ;;  %v6762_v4 = vrot.slane %v6072_v40, 4  ;;  %p7990_p2 = pnand %p7989_p1, %p7983_p12 }
 0x582   :  { %v6737_v53 = vsel %vm4287_vm4, %v6736_v63, %v6735_v36  ;;  %v6740_v50 = vrot.slane %v6062_v44, 1  ;;  %v6761_v39 = vsel %vm4283_vm2, %v6760_v46, %v6759_v43  ;;  %v6764_v8 = vrot.slane %v6074_v3, 3 }
 0x583   :  { %v6739_v27 = vsel %vm4289_vm5, %v6738_v62, %v6737_v53  ;;  %v6763_v52 = vsel %vm4285_vm3, %v6762_v4, %v6761_v39  ;;  %v6766_v0 = vrot.slane %v6076_v28, 2  ;;  %v6768_v22 = vrot.slane %v6078_v51, 1 }
 0x584   :  { %v6741_v54 = vsel %vm4291_vm6, %v6740_v50, %v6739_v27  ;;  %v6765_v11 = vsel %vm4287_vm4, %v6764_v8, %v6763_v52  ;;  %v13658_v57 = vsub.s32 0, %v13657_v56  ;;  %v13659_v35 = vsub.s32 1, %v13657_v56 }
 0x585   :  { %v6767_v5 = vsel %vm4289_vm5, %v6766_v0, %v6765_v11  ;;  %v6844_v48 = vmul.f32 %v12086_v33, %v6741_v54 }
 0x586   :  { %v6769_v45 = vsel %vm4291_vm6, %v6768_v22, %v6767_v5  ;;  %v12260_v17 = vrot.slane %v6928_v59, %v13658_v57  ;;  %v12264_v33 = vrot.slane %v6928_v59, %v13659_v35 }
 0x587   :  { %v6846_v21 = vmul.f32 %v7860_v30, %v6769_v45  ;;  %v6876_v18 = vadd.f32 %v6844_v48, %v13640_v14 }
 0x589   :  { %v6878_v9 = vadd.f32 %v6846_v21, %v12039_v20 }
 0x58b   :  { %v6894_v31 = vpack.c.bf16 %v6878_v9, %v6876_v18 }
 0x58d   :  { %7203 = vmatmul.mubr.bf16.gmra.mrb[172].mxu1 %v6894_v31 }
 0x5f0   :  { %v7134_v12 = vpop.f32.mrb[144].mxu1 }
 0x5f1   :  { %v7135_v32 = vadd.f32 %v7134_v12, %v12260_v17  ;;  %v7136_v14 = vpop.f32.mrb[145].mxu1 }
 0x5f2   :  { %v7137_v20 = vadd.f32 %v7136_v14, %v12264_v33  ;;  %v7138_v19 = vpop.f32.mrb[146].mxu1 }
 0x5f3   :  { %7213 = vst [vmem:[#allocation11] sm:$0xff] %v7135_v32  ;;  %v7139_v41 = vadd.f32 %v7138_v19, %v12260_v17  ;;  %v7140_v1 = vpop.f32.mrb[147].mxu1 }
 0x5f4   :  { %7214 = vst [vmem:[#allocation11 + $0x8] sm:$0xff] %v7137_v20  ;;  %v7141_v13 = vadd.f32 %v7140_v1, %v12264_v33 }
 0x5f5   :  { %7215 = vst [vmem:[#allocation11 + $0x10] sm:$0xff] %v7139_v41 }
 0x5f6   :  { %7216 = vst [vmem:[#allocation11 + $0x18] sm:$0xff] %v7141_v13 }
 0x5f8   :  { %v7144_v58 = vpop.f32.mrb[148].mxu1 }
 0x5f9   :  { %v7145_v6 = vadd.f32 %v7144_v58, %v12260_v17  ;;  %v7146_v24 = vpop.f32.mrb[149].mxu1 }
 0x5fa   :  { %v7147_v38 = vadd.f32 %v7146_v24, %v12264_v33  ;;  %v7148_v15 = vpop.f32.mrb[150].mxu1 }
 0x5fb   :  { %7217 = vst [vmem:[#allocation11 + $0x20] sm:$0xff] %v7145_v6  ;;  %v7149_v60 = vadd.f32 %v7148_v15, %v12260_v17  ;;  %v7150_v61 = vpop.f32.mrb[151].mxu1 }
 0x5fc   :  { %7218 = vst [vmem:[#allocation11 + $0x28] sm:$0xff] %v7147_v38  ;;  %v7151_v44 = vadd.f32 %v7150_v61, %v12264_v33 }
 0x5fd   :  { %7219 = vst [vmem:[#allocation11 + $0x30] sm:$0xff] %v7149_v60 }
 0x5fe   :  { %7220 = vst [vmem:[#allocation11 + $0x38] sm:$0xff] %v7151_v44 }
 0x601   :  { %v7154_v34 = vpop.f32.mrb[152].mxu1 }
 0x602   :  { %v7155_v10 = vadd.f32 %v7154_v34, %v12260_v17  ;;  %v7156_v7 = vpop.f32.mrb[153].mxu1 }
 0x603   :  { %v7157_v40 = vadd.f32 %v7156_v7, %v12264_v33  ;;  %v7158_v29 = vpop.f32.mrb[154].mxu1 }
 0x604   :  { %7221 = vst [vmem:[#allocation11 + $0x40] sm:$0xff] %v7155_v10  ;;  %v7159_v3 = vadd.f32 %v7158_v29, %v12260_v17  ;;  %v7160_v25 = vpop.f32.mrb[155].mxu1 }
 0x605   :  { %7222 = vst [vmem:[#allocation11 + $0x48] sm:$0xff] %v7157_v40  ;;  %v7161_v42 = vadd.f32 %v7160_v25, %v12264_v33 }
 0x606   :  { %7223 = vst [vmem:[#allocation11 + $0x50] sm:$0xff] %v7159_v3 }
 0x607   :  { %7224 = vst [vmem:[#allocation11 + $0x58] sm:$0xff] %v7161_v42 }
 0x60b   :  { %v7164_v23 = vpop.f32.mrb[156].mxu1 }
 0x60c   :  { %v7165_v37 = vadd.f32 %v7164_v23, %v12260_v17  ;;  %v7166_v30 = vpop.f32.mrb[157].mxu1 }
 0x60d   :  { %v7167_v55 = vadd.f32 %v7166_v30, %v12264_v33  ;;  %v7168_v28 = vpop.f32.mrb[158].mxu1 }
 0x60e   :  { %7225 = vst [vmem:[#allocation11 + $0x60] sm:$0xff] %v7165_v37  ;;  %v7169_v47 = vadd.f32 %v7168_v28, %v12260_v17  ;;  %v7170_v51 = vpop.f32.mrb[159].mxu1 }
 0x60f   :  { %7226 = vst [vmem:[#allocation11 + $0x68] sm:$0xff] %v7167_v55  ;;  %v7171_v26 = vadd.f32 %v7170_v51, %v12264_v33 }
 0x610   :  { %7227 = vst [vmem:[#allocation11 + $0x70] sm:$0xff] %v7169_v47 }
 0x611   :  { %7228 = vst [vmem:[#allocation11 + $0x78] sm:$0xff] %v7171_v26 }
 0x613   :  { %v7174_v16 = vpop.f32.mrb[160].mxu1 }
 0x614   :  { %v7175_v2 = vadd.f32 %v7174_v16, %v12260_v17  ;;  %v7176_v63 = vpop.f32.mrb[161].mxu1 }
 0x615   :  { %v7177_v49 = vadd.f32 %v7176_v63, %v12264_v33  ;;  %v7178_v46 = vpop.f32.mrb[162].mxu1 }
 0x616   :  { %7229 = vst [vmem:[#allocation11 + $0x80] sm:$0xff] %v7175_v2  ;;  %v7179_v36 = vadd.f32 %v7178_v46, %v12260_v17  ;;  %v7180_v62 = vpop.f32.mrb[163].mxu1 }
 0x617   :  { %7230 = vst [vmem:[#allocation11 + $0x88] sm:$0xff] %v7177_v49  ;;  %v7181_v43 = vadd.f32 %v7180_v62, %v12264_v33 }
 0x618   :  { %7231 = vst [vmem:[#allocation11 + $0x90] sm:$0xff] %v7179_v36 }
 0x619   :  { %7232 = vst [vmem:[#allocation11 + $0x98] sm:$0xff] %v7181_v43 }
 0x61e   :  { %v7184_v4 = vpop.f32.mrb[164].mxu1 }
 0x61f   :  { %v7185_v53 = vadd.f32 %v7184_v4, %v12260_v17  ;;  %v7186_v50 = vpop.f32.mrb[165].mxu1 }
 0x620   :  { %v7187_v39 = vadd.f32 %v7186_v50, %v12264_v33  ;;  %v7188_v8 = vpop.f32.mrb[166].mxu1 }
 0x621   :  { %7233 = vst [vmem:[#allocation11 + $0xa0] sm:$0xff] %v7185_v53  ;;  %v7189_v27 = vadd.f32 %v7188_v8, %v12260_v17  ;;  %v7190_v52 = vpop.f32.mrb[167].mxu1 }
 0x622   :  { %7234 = vst [vmem:[#allocation11 + $0xa8] sm:$0xff] %v7187_v39  ;;  %v7191_v0 = vadd.f32 %v7190_v52, %v12264_v33 }
 0x623   :  { %7235 = vst [vmem:[#allocation11 + $0xb0] sm:$0xff] %v7189_v27 }
 0x624   :  { %7236 = vst [vmem:[#allocation11 + $0xb8] sm:$0xff] %v7191_v0 }
 0x640   :  { %v7194_v54 = vpop.f32.mrb[168].mxu1 }
 0x641   :  { %v7195_v11 = vadd.f32 %v7194_v54, %v12260_v17  ;;  %v7196_v22 = vpop.f32.mrb[169].mxu1 }
 0x642   :  { %v7197_v5 = vadd.f32 %v7196_v22, %v12264_v33  ;;  %v7198_v48 = vpop.f32.mrb[170].mxu1 }
 0x643   :  { %7237 = vst [vmem:[#allocation11 + $0xc0] sm:$0xff] %v7195_v11  ;;  %v7199_v45 = vadd.f32 %v7198_v48, %v12260_v17  ;;  %v7200_v21 = vpop.f32.mrb[171].mxu1 }
 0x644   :  { %7238 = vst [vmem:[#allocation11 + $0xc8] sm:$0xff] %v7197_v5  ;;  %v7201_v18 = vadd.f32 %v7200_v21, %v12264_v33 }
 0x645   :  { %7239 = vst [vmem:[#allocation11 + $0xd0] sm:$0xff] %v7199_v45 }
 0x646   :  { %7240 = vst [vmem:[#allocation11 + $0xd8] sm:$0xff] %v7201_v18 }
 0x660   :  { %v7204_v9 = vpop.f32.mrb[172].mxu1 }
 0x661   :  { %v7205_v31 = vadd.f32 %v7204_v9, %v12260_v17  ;;  %v7206_v59 = vpop.f32.mrb[173].mxu1 }
 0x662   :  { %v7207_v56 = vadd.f32 %v7206_v59, %v12264_v33  ;;  %v7208_v57 = vpop.f32.mrb[174].mxu1 }
 0x663   :  { %7241 = vst [vmem:[#allocation11 + $0xe0] sm:$0xff] %v7205_v31  ;;  %v7209_v35 = vadd.f32 %v7208_v57, %v12260_v17  ;;  %v7210_v12 = vpop.f32.mrb[175].mxu1 }
 0x664   :  { %7242 = vst [vmem:[#allocation11 + $0xe8] sm:$0xff] %v7207_v56  ;;  %v7211_v32 = vadd.f32 %v7210_v12, %v12264_v33 }
 0x665   :  { %7243 = vst [vmem:[#allocation11 + $0xf0] sm:$0xff] %v7209_v35 }
 0x666   :  { %7244 = vst [vmem:[#allocation11 + $0xf8] sm:$0xff] %v7211_v32 }
 0x667   :  { %7993 = shalt.err (!%p7990_p2)
}
 0x668   :  { %s7994_s28 = scalar_lea.hbm %s12320_s7, 4096 }
 0x669   :  { %p7995_p3 = scmp.ne.s32.totalorder %s12320_s7, %s7994_s28  ;;  %p7998_p4 = scmp.lt.u32.totalorder %s7994_s28, %s12320_s7 }
 0x66b   :  { %p8000_p5 = pnand %p7998_p4, %p7995_p3 }
 0x66d   :  { %8003 = shalt.err (!%p8000_p5)
}
 0x66e   :  { %7256 = dma.vmem_to_hbm [thread:$0]  %s7251_s23, 4096, %s12320_s7, [#allocation4], %s8016_s1, %s8016_s1, %s8017_s25  }
 0x66f   :  { %8010 = dma.done.wait [#allocation4], 4096  }
 0x670   :  { %8011 = vsyncadd [#allocation4], 4294963200 }
 0x671   :  { %7260 = vsyncpa [#allocation3], 1 }
 0x672   :  { %7261 = vsyncpa [#allocation6], 1 }
 0x673   :  { %7262 = vsyncpa [#allocation9], 1 }
 0x674   :  { %7263 = vsyncpa [#allocation4], 1 }

</bundles_post_ra>
